<compile_context>
chip_gen: v7x
topology: tpu7x:2x2x1
jax: 0.10.0
libtpu: 0.0.40
codegen_flags: <defaults>
</compile_context>

<pallas_src>
import functools

import jax
import jax.numpy as jnp
import numpy as np
from jax.experimental import pallas as pl
from jax.experimental.pallas import tpu as pltpu


# ---------------------------------------------------------------------------
# In-kernel exact GELU (erf via Abramowitz–Stegun 7.1.26, |err| <= 1.5e-7).
# The rational term's divide runs on the EUP via approx reciprocal.
# ---------------------------------------------------------------------------
def _gelu_exact(x):
    z = x * 0.7071067811865476          # x / sqrt(2)
    az = jnp.abs(z)
    t = pl.reciprocal(1.0 + 0.3275911 * az, approx=True)
    poly = t * (0.254829592 + t * (-0.284496736 + t * (1.421413741 +
           t * (-1.453152027 + t * 1.061405429))))
    erf_abs = 1.0 - poly * jnp.exp(-az * az)
    erf = jnp.where(z >= 0.0, erf_abs, -erf_abs)
    return 0.5 * x * (1.0 + erf)


# ---------------------------------------------------------------------------
# Fused GD kernel builder (cached per shape).
# ---------------------------------------------------------------------------
@functools.lru_cache(maxsize=None)
def _build_gd_call(B, H, W, C, E):
    HW = H * W

    def kernel(x_ref, p_ref, y_ref, m_ref, w1p_ref, w1y_ref, b1_ref,
               dw1_ref, dw2_ref, w2_ref, b2_ref, r_ref, v_ref):
        x = x_ref[0]                     # (C, HW)  f32
        phi0 = p_ref[0]                  # (C, HW)  f32
        y = y_ref[0]                     # (1, HW)  f32

        # Border-validity masks (precomputed in the wrapper), each (1, HW).
        m_cl = m_ref[0:1, :]             # col >= 1     (left  neighbour valid)
        m_cr = m_ref[1:2, :]             # col <= W-2   (right neighbour valid)
        m_rt = m_ref[2:3, :]             # row >= 1     (upper neighbour valid)
        m_rb = m_ref[3:4, :]             # row <= H-2   (lower neighbour valid)

        # ---- 1x1 conv (C+1 -> E): cat([y, Phi]) @ W1 split algebraically.
        #      Channel-major on the MXU: (E,C)@(C,HW) -> (E,HW), N = HW lanes.
        h = jnp.dot(w1p_ref[...], phi0, preferred_element_type=jnp.float32)
        h = h + w1y_ref[...] * y + b1_ref[...]

        def shift(t, off):
            # value at flattened pixel p+off (wrap-around gets masked later).
            return pltpu.roll(t, shift=(-off) % HW, axis=1)

        def dwconv3x3(t, dwr):
            # Depthwise 3x3, stride 1, pad 1, no bias.  Spatial shifts are
            # lane rotations (XLU) + border masks; no padded scratch, no
            # sublane-misaligned slab copies.  dwr[k], k = ki*3+kj -> (E, 1).
            c_m1 = shift(t, -1) * m_cl                 # (i, j-1)
            c_p1 = shift(t, +1) * m_cr                 # (i, j+1)
            # row i   (ki=1): accumulator initialized with the first tap.
            acc = dwr[3] * c_m1 + dwr[4] * t + dwr[5] * c_p1
            # row i-1 (ki=0): one row-mask multiply for the whole group.
            up = (dwr[0] * shift(c_m1, -W) + dwr[1] * shift(t, -W)
                  + dwr[2] * shift(c_p1, -W))
            # row i+1 (ki=2)
            dn = (dwr[6] * shift(c_m1, +W) + dwr[7] * shift(t, +W)
                  + dwr[8] * shift(c_p1, +W))
            return acc + m_rt * up + m_rb * dn

        g = _gelu_exact(dwconv3x3(h, dw1_ref))
        a2 = dwconv3x3(g, dw2_ref)

        # ---- 1x1 conv (E -> C) + bias:  (C,E)@(E,HW) -> (C,HW).
        phi_res = jnp.dot(w2_ref[...], a2, preferred_element_type=jnp.float32)
        phi_res = phi_res + b2_ref[...]

        # ---- GD arithmetic:  phi = phi_res + Phi ; AX = sum_c(x*phi)*2/C ;
        #      res = AX - y ; v = x - r * (res * phi)
        phi = phi_res + phi0
        ax = jnp.sum(x * phi, axis=0, keepdims=True) * (2.0 / C)   # (1, HW)
        res = ax - y
        r = r_ref[0]                     # scalar from SMEM
        v_ref[0] = x - r * (res * phi)

    return pl.pallas_call(
        kernel,
        grid=(B,),
        in_specs=[
            pl.BlockSpec((1, C, HW), lambda b: (b, 0, 0)),     # x
            pl.BlockSpec((1, C, HW), lambda b: (b, 0, 0)),     # Phi
            pl.BlockSpec((1, 1, HW), lambda b: (b, 0, 0)),     # y
            pl.BlockSpec((4, HW), lambda b: (0, 0)),           # border masks
            pl.BlockSpec((E, C), lambda b: (0, 0)),            # w1_phi^T
            pl.BlockSpec((E, 1), lambda b: (0, 0)),            # w1_y^T
            pl.BlockSpec((E, 1), lambda b: (0, 0)),            # b1^T
            pl.BlockSpec((9, E, 1), lambda b: (0, 0, 0)),      # dw1 taps
            pl.BlockSpec((9, E, 1), lambda b: (0, 0, 0)),      # dw2 taps
            pl.BlockSpec((C, E), lambda b: (0, 0)),            # w2^T
            pl.BlockSpec((C, 1), lambda b: (0, 0)),            # b2^T
            pl.BlockSpec(memory_space=pltpu.MemorySpace.SMEM), # r (scalar)
        ],
        out_specs=pl.BlockSpec((1, C, HW), lambda b: (b, 0, 0)),
        out_shape=jax.ShapeDtypeStruct((B, C, HW), jnp.float32),
        compiler_params=pltpu.CompilerParams(
            dimension_semantics=("parallel",)),
    )


# ---------------------------------------------------------------------------
# Public forward (NCHW in / NCHW out, like the PyTorch module).
# ---------------------------------------------------------------------------
def gd_forward(params, x_nchw, phi_nchw, y):
    """GD.forward.  x, Phi: (B, C, H, W) f32;  y: (B, H, W) f32  ->  v (B,C,H,W)."""
    B, C, H, W = x_nchw.shape
    E = params["dw1"].shape[-1]
    HW = H * W
    f32 = jnp.float32

    x = x_nchw.reshape(B, C, HW).astype(f32)            # free reshapes (NCHW)
    phi_in = phi_nchw.reshape(B, C, HW).astype(f32)
    y3 = y.reshape(B, 1, HW).astype(f32)

    col = jnp.arange(HW, dtype=jnp.int32) % W
    row = jnp.arange(HW, dtype=jnp.int32) // W
    masks = jnp.stack([col >= 1, col <= W - 2,
                       row >= 1, row <= H - 2]).astype(f32)     # (4, HW)

    w1p_t = params["w1_phi"].T.astype(f32)               # (E, C)
    w1y_t = params["w1_y"].T.astype(f32)                 # (E, 1)
    b1_t = params["b1"].T.astype(f32)                    # (E, 1)
    dw1 = params["dw1"].reshape(9, E)[:, :, None].astype(f32)   # (9, E, 1)
    dw2 = params["dw2"].reshape(9, E)[:, :, None].astype(f32)   # (9, E, 1)
    w2_t = params["w2"].T.astype(f32)                    # (C, E)
    b2_t = params["b2"].T.astype(f32)                    # (C, 1)
    r = params["r"].astype(f32)                          # (1,)

    call = _build_gd_call(B, H, W, C, E)
    v = call(x, phi_in, y3, masks, w1p_t, w1y_t, b1_t, dw1, dw2, w2_t, b2_t, r)
    return v.reshape(B, C, H, W)


# ---------------------------------------------------------------------------
# Pure-JAX (f32) reference for validation.
# ---------------------------------------------------------------------------
def gd_forward_ref(params, x_nchw, phi_nchw, y):
    x = jnp.transpose(x_nchw, (0, 2, 3, 1))
    phi_in = jnp.transpose(phi_nchw, (0, 2, 3, 1))
    B, H, W, C = x.shape
    cat = jnp.concatenate([y[..., None], phi_in], axis=-1)          # (B,H,W,C+1)
    w1 = jnp.concatenate([params["w1_y"], params["w1_phi"]], axis=0)
    h = jnp.einsum("bhwk,ke->bhwe", cat, w1) + params["b1"]

    def dwconv(t, w):
        tp = jnp.pad(t, ((0, 0), (1, 1), (1, 1), (0, 0)))
        out = jnp.zeros_like(t)
        for ki in range(3):
            for kj in range(3):
                out = out + tp[:, ki:ki + H, kj:kj + W, :] * w[ki, kj]
        return out

    h = dwconv(h, params["dw1"])
    h = jax.nn.gelu(h, approximate=False)
    h = dwconv(h, params["dw2"])
    phi_res = jnp.einsum("bhwe,ec->bhwc", h, params["w2"]) + params["b2"]
    phi = phi_res + phi_in
    ax = jnp.sum(x * phi, axis=-1, keepdims=True) * (2.0 / C)
    res = ax - y[..., None]
    v = x - params["r"][0] * (res * phi)
    return jnp.transpose(v, (0, 3, 1, 2))


# ---------------------------------------------------------------------------
# Deterministic synthetic parameters (PyTorch weight layouts re-expressed:
# 1x1 Conv2d (Cout,Cin,1,1) -> (Cin,Cout); depthwise (C,1,3,3) -> (3,3,C)).
# ---------------------------------------------------------------------------
def init_gd_params(key, dim, embedding_dim=32):
    ks = jax.random.split(key, 8)
    nrm = lambda k, shape, std: std * jax.random.normal(k, shape, jnp.float32)
    w1 = nrm(ks[0], (dim + 1, embedding_dim), 0.1)       # row 0 multiplies y
    return {
        "w1_y": w1[0:1, :],                              # (1, E)
        "w1_phi": w1[1:, :],                             # (dim, E)
        "b1": nrm(ks[1], (1, embedding_dim), 0.02),
        "dw1": nrm(ks[2], (3, 3, embedding_dim), 0.1),
        "dw2": nrm(ks[3], (3, 3, embedding_dim), 0.1),
        "w2": nrm(ks[4], (embedding_dim, dim), 0.1),
        "b2": nrm(ks[5], (1, dim), 0.02),
        "r": jnp.array([0.5], jnp.float32),              # nn.Parameter([0.5])
    }


# ---------------------------------------------------------------------------
if __name__ == "__main__":
    B, dim, H, W = 2, 8, 32, 32      # GD(dim=8); Phi embedding_dim fixed at 32

    key = jax.random.PRNGKey(0)
    kp, kx, kphi, ky = jax.random.split(key, 4)
    params = init_gd_params(kp, dim)

    x = jax.random.normal(kx, (B, dim, H, W), jnp.float32)
    Phi_t = jax.random.normal(kphi, (B, dim, H, W), jnp.float32)
    y = jax.random.normal(ky, (B, H, W), jnp.float32)

    v = gd_forward(params, x, Phi_t, y)
    jax.block_until_ready(v)

    assert v.shape == (B, dim, H, W)

    v_ref = gd_forward_ref(params, x, Phi_t, y)
    np.testing.assert_allclose(np.asarray(v), np.asarray(v_ref),
                               rtol=5e-3, atol=5e-3)

    print("KERNEL_OK")
</pallas_src>

<mosaic_0001>
module attributes {stable_mosaic.version = 11 : i64} {
  func.func @kernel(%arg0: i32, %arg1: memref<1x8x1024xf32, #tpu.memory_space<vmem>>, %arg2: memref<1x8x1024xf32, #tpu.memory_space<vmem>>, %arg3: memref<1x1x1024xf32, #tpu.memory_space<vmem>>, %arg4: memref<4x1024xf32, #tpu.memory_space<vmem>>, %arg5: memref<32x8xf32, #tpu.memory_space<vmem>>, %arg6: memref<32x1xf32, #tpu.memory_space<vmem>>, %arg7: memref<32x1xf32, #tpu.memory_space<vmem>>, %arg8: memref<9x32x1xf32, #tpu.memory_space<vmem>>, %arg9: memref<9x32x1xf32, #tpu.memory_space<vmem>>, %arg10: memref<8x32xf32, #tpu.memory_space<vmem>>, %arg11: memref<8x1xf32, #tpu.memory_space<vmem>>, %arg12: memref<1xf32, #tpu.memory_space<smem>>, %arg13: memref<1x8x1024xf32, #tpu.memory_space<vmem>>) attributes {dimension_semantics = [#tpu.dimension_semantics<parallel>], iteration_bounds = array<i64: 2>, scalar_prefetch = 0 : i64, scratch_operands = 0 : i64, tpu.core_type = #tpu.core_type<tc>, window_params = [{transform_indices = @transform_0, window_bounds = array<i64: 1, 8, 1024>}, {transform_indices = @transform_1, window_bounds = array<i64: 1, 8, 1024>}, {transform_indices = @transform_2, window_bounds = array<i64: 1, 1, 1024>}, {pipeline_mode = #tpu.pipeline_mode<synchronous>, transform_indices = @transform_3, window_bounds = array<i64: 4, 1024>}, {pipeline_mode = #tpu.pipeline_mode<synchronous>, transform_indices = @transform_4, window_bounds = array<i64: 32, 8>}, {pipeline_mode = #tpu.pipeline_mode<synchronous>, transform_indices = @transform_5, window_bounds = array<i64: 32, 1>}, {pipeline_mode = #tpu.pipeline_mode<synchronous>, transform_indices = @transform_6, window_bounds = array<i64: 32, 1>}, {pipeline_mode = #tpu.pipeline_mode<synchronous>, transform_indices = @transform_7, window_bounds = array<i64: 9, 32, 1>}, {pipeline_mode = #tpu.pipeline_mode<synchronous>, transform_indices = @transform_8, window_bounds = array<i64: 9, 32, 1>}, {pipeline_mode = #tpu.pipeline_mode<synchronous>, transform_indices = @transform_9, window_bounds = array<i64: 8, 32>}, {pipeline_mode = #tpu.pipeline_mode<synchronous>, transform_indices = @transform_10, window_bounds = array<i64: 8, 1>}, {transform_indices = @transform_11, window_bounds = array<i64: 1>}, {transform_indices = @transform_12, window_bounds = array<i64: 1, 8, 1024>}]} {
    %c0 = arith.constant 0 : index
    %c0_0 = arith.constant 0 : index
    %c0_1 = arith.constant 0 : index
    %0 = vector.load %arg1[%c0, %c0_0, %c0_1] : memref<1x8x1024xf32, #tpu.memory_space<vmem>>, vector<1x8x1024xf32>
    %1 = vector.shape_cast %0 : vector<1x8x1024xf32> to vector<8x1024xf32>
    %c0_2 = arith.constant 0 : index
    %c0_3 = arith.constant 0 : index
    %c0_4 = arith.constant 0 : index
    %2 = vector.load %arg2[%c0_2, %c0_3, %c0_4] : memref<1x8x1024xf32, #tpu.memory_space<vmem>>, vector<1x8x1024xf32>
    %3 = vector.shape_cast %2 : vector<1x8x1024xf32> to vector<8x1024xf32>
    %c0_5 = arith.constant 0 : index
    %c0_6 = arith.constant 0 : index
    %c0_7 = arith.constant 0 : index
    %4 = vector.load %arg3[%c0_5, %c0_6, %c0_7] : memref<1x1x1024xf32, #tpu.memory_space<vmem>>, vector<1x1x1024xf32>
    %5 = vector.shape_cast %4 : vector<1x1x1024xf32> to vector<1x1024xf32>
    %c0_8 = arith.constant 0 : index
    %c0_9 = arith.constant 0 : index
    %6 = vector.load %arg4[%c0_8, %c0_9] : memref<4x1024xf32, #tpu.memory_space<vmem>>, vector<1x1024xf32>
    %c1 = arith.constant 1 : index
    %c0_10 = arith.constant 0 : index
    %7 = vector.load %arg4[%c1, %c0_10] : memref<4x1024xf32, #tpu.memory_space<vmem>>, vector<1x1024xf32>
    %c2 = arith.constant 2 : index
    %c0_11 = arith.constant 0 : index
    %8 = vector.load %arg4[%c2, %c0_11] : memref<4x1024xf32, #tpu.memory_space<vmem>>, vector<1x1024xf32>
    %c3 = arith.constant 3 : index
    %c0_12 = arith.constant 0 : index
    %9 = vector.load %arg4[%c3, %c0_12] : memref<4x1024xf32, #tpu.memory_space<vmem>>, vector<1x1024xf32>
    %c0_13 = arith.constant 0 : index
    %c0_14 = arith.constant 0 : index
    %10 = vector.load %arg5[%c0_13, %c0_14] : memref<32x8xf32, #tpu.memory_space<vmem>>, vector<32x8xf32>
    %cst = arith.constant dense<0.000000e+00> : vector<32x1024xf32>
    %11 = tpu.matmul %10, %3, %cst {dimension_numbers = #tpu.dot_dimension_numbers<[1], [0], [0], [1], [0, 0, 1, 1], [], []>} : vector<32x8xf32>, vector<8x1024xf32>, vector<32x1024xf32> -> vector<32x1024xf32>
    %c0_15 = arith.constant 0 : index
    %c0_16 = arith.constant 0 : index
    %12 = vector.load %arg6[%c0_15, %c0_16] : memref<32x1xf32, #tpu.memory_space<vmem>>, vector<32x1xf32>
    %13 = vector.broadcast %12 : vector<32x1xf32> to vector<32x1024xf32>
    %14 = vector.broadcast %5 : vector<1x1024xf32> to vector<32x1024xf32>
    %15 = arith.mulf %13, %14 : vector<32x1024xf32>
    %16 = arith.addf %11, %15 : vector<32x1024xf32>
    %c0_17 = arith.constant 0 : index
    %c0_18 = arith.constant 0 : index
    %17 = vector.load %arg7[%c0_17, %c0_18] : memref<32x1xf32, #tpu.memory_space<vmem>>, vector<32x1xf32>
    %18 = vector.broadcast %17 : vector<32x1xf32> to vector<32x1024xf32>
    %19 = arith.addf %16, %18 : vector<32x1024xf32>
    %c1_i32 = arith.constant 1 : i32
    %20 = tpu.dynamic_rotate %19 by %c1_i32 dim 1 : vector<32x1024xf32>, i32 -> vector<32x1024xf32>
    %21 = vector.broadcast %6 : vector<1x1024xf32> to vector<32x1024xf32>
    %22 = arith.mulf %20, %21 : vector<32x1024xf32>
    %c1023_i32 = arith.constant 1023 : i32
    %23 = tpu.dynamic_rotate %19 by %c1023_i32 dim 1 : vector<32x1024xf32>, i32 -> vector<32x1024xf32>
    %24 = vector.broadcast %7 : vector<1x1024xf32> to vector<32x1024xf32>
    %25 = arith.mulf %23, %24 : vector<32x1024xf32>
    %c3_19 = arith.constant 3 : index
    %c0_20 = arith.constant 0 : index
    %c0_21 = arith.constant 0 : index
    %26 = vector.load %arg8[%c3_19, %c0_20, %c0_21] : memref<9x32x1xf32, #tpu.memory_space<vmem>>, vector<1x32x1xf32>
    %27 = vector.shape_cast %26 : vector<1x32x1xf32> to vector<32x1xf32>
    %28 = vector.broadcast %27 : vector<32x1xf32> to vector<32x1024xf32>
    %29 = arith.mulf %28, %22 : vector<32x1024xf32>
    %c4 = arith.constant 4 : index
    %c0_22 = arith.constant 0 : index
    %c0_23 = arith.constant 0 : index
    %30 = vector.load %arg8[%c4, %c0_22, %c0_23] : memref<9x32x1xf32, #tpu.memory_space<vmem>>, vector<1x32x1xf32>
    %31 = vector.shape_cast %30 : vector<1x32x1xf32> to vector<32x1xf32>
    %32 = vector.broadcast %31 : vector<32x1xf32> to vector<32x1024xf32>
    %33 = arith.mulf %32, %19 : vector<32x1024xf32>
    %34 = arith.addf %29, %33 : vector<32x1024xf32>
    %c5 = arith.constant 5 : index
    %c0_24 = arith.constant 0 : index
    %c0_25 = arith.constant 0 : index
    %35 = vector.load %arg8[%c5, %c0_24, %c0_25] : memref<9x32x1xf32, #tpu.memory_space<vmem>>, vector<1x32x1xf32>
    %36 = vector.shape_cast %35 : vector<1x32x1xf32> to vector<32x1xf32>
    %37 = vector.broadcast %36 : vector<32x1xf32> to vector<32x1024xf32>
    %38 = arith.mulf %37, %25 : vector<32x1024xf32>
    %39 = arith.addf %34, %38 : vector<32x1024xf32>
    %c0_26 = arith.constant 0 : index
    %c0_27 = arith.constant 0 : index
    %c0_28 = arith.constant 0 : index
    %40 = vector.load %arg8[%c0_26, %c0_27, %c0_28] : memref<9x32x1xf32, #tpu.memory_space<vmem>>, vector<1x32x1xf32>
    %41 = vector.shape_cast %40 : vector<1x32x1xf32> to vector<32x1xf32>
    %c32_i32 = arith.constant 32 : i32
    %42 = tpu.dynamic_rotate %22 by %c32_i32 dim 1 : vector<32x1024xf32>, i32 -> vector<32x1024xf32>
    %43 = vector.broadcast %41 : vector<32x1xf32> to vector<32x1024xf32>
    %44 = arith.mulf %43, %42 : vector<32x1024xf32>
    %c1_29 = arith.constant 1 : index
    %c0_30 = arith.constant 0 : index
    %c0_31 = arith.constant 0 : index
    %45 = vector.load %arg8[%c1_29, %c0_30, %c0_31] : memref<9x32x1xf32, #tpu.memory_space<vmem>>, vector<1x32x1xf32>
    %46 = vector.shape_cast %45 : vector<1x32x1xf32> to vector<32x1xf32>
    %c32_i32_32 = arith.constant 32 : i32
    %47 = tpu.dynamic_rotate %19 by %c32_i32_32 dim 1 : vector<32x1024xf32>, i32 -> vector<32x1024xf32>
    %48 = vector.broadcast %46 : vector<32x1xf32> to vector<32x1024xf32>
    %49 = arith.mulf %48, %47 : vector<32x1024xf32>
    %50 = arith.addf %44, %49 : vector<32x1024xf32>
    %c2_33 = arith.constant 2 : index
    %c0_34 = arith.constant 0 : index
    %c0_35 = arith.constant 0 : index
    %51 = vector.load %arg8[%c2_33, %c0_34, %c0_35] : memref<9x32x1xf32, #tpu.memory_space<vmem>>, vector<1x32x1xf32>
    %52 = vector.shape_cast %51 : vector<1x32x1xf32> to vector<32x1xf32>
    %c32_i32_36 = arith.constant 32 : i32
    %53 = tpu.dynamic_rotate %25 by %c32_i32_36 dim 1 : vector<32x1024xf32>, i32 -> vector<32x1024xf32>
    %54 = vector.broadcast %52 : vector<32x1xf32> to vector<32x1024xf32>
    %55 = arith.mulf %54, %53 : vector<32x1024xf32>
    %56 = arith.addf %50, %55 : vector<32x1024xf32>
    %c6 = arith.constant 6 : index
    %c0_37 = arith.constant 0 : index
    %c0_38 = arith.constant 0 : index
    %57 = vector.load %arg8[%c6, %c0_37, %c0_38] : memref<9x32x1xf32, #tpu.memory_space<vmem>>, vector<1x32x1xf32>
    %58 = vector.shape_cast %57 : vector<1x32x1xf32> to vector<32x1xf32>
    %c992_i32 = arith.constant 992 : i32
    %59 = tpu.dynamic_rotate %22 by %c992_i32 dim 1 : vector<32x1024xf32>, i32 -> vector<32x1024xf32>
    %60 = vector.broadcast %58 : vector<32x1xf32> to vector<32x1024xf32>
    %61 = arith.mulf %60, %59 : vector<32x1024xf32>
    %c7 = arith.constant 7 : index
    %c0_39 = arith.constant 0 : index
    %c0_40 = arith.constant 0 : index
    %62 = vector.load %arg8[%c7, %c0_39, %c0_40] : memref<9x32x1xf32, #tpu.memory_space<vmem>>, vector<1x32x1xf32>
    %63 = vector.shape_cast %62 : vector<1x32x1xf32> to vector<32x1xf32>
    %c992_i32_41 = arith.constant 992 : i32
    %64 = tpu.dynamic_rotate %19 by %c992_i32_41 dim 1 : vector<32x1024xf32>, i32 -> vector<32x1024xf32>
    %65 = vector.broadcast %63 : vector<32x1xf32> to vector<32x1024xf32>
    %66 = arith.mulf %65, %64 : vector<32x1024xf32>
    %67 = arith.addf %61, %66 : vector<32x1024xf32>
    %c8 = arith.constant 8 : index
    %c0_42 = arith.constant 0 : index
    %c0_43 = arith.constant 0 : index
    %68 = vector.load %arg8[%c8, %c0_42, %c0_43] : memref<9x32x1xf32, #tpu.memory_space<vmem>>, vector<1x32x1xf32>
    %69 = vector.shape_cast %68 : vector<1x32x1xf32> to vector<32x1xf32>
    %c992_i32_44 = arith.constant 992 : i32
    %70 = tpu.dynamic_rotate %25 by %c992_i32_44 dim 1 : vector<32x1024xf32>, i32 -> vector<32x1024xf32>
    %71 = vector.broadcast %69 : vector<32x1xf32> to vector<32x1024xf32>
    %72 = arith.mulf %71, %70 : vector<32x1024xf32>
    %73 = arith.addf %67, %72 : vector<32x1024xf32>
    %74 = vector.broadcast %8 : vector<1x1024xf32> to vector<32x1024xf32>
    %75 = arith.mulf %74, %56 : vector<32x1024xf32>
    %76 = arith.addf %39, %75 : vector<32x1024xf32>
    %77 = vector.broadcast %9 : vector<1x1024xf32> to vector<32x1024xf32>
    %78 = arith.mulf %77, %73 : vector<32x1024xf32>
    %79 = arith.addf %76, %78 : vector<32x1024xf32>
    %cst_45 = arith.constant 0.707106769 : f32
    %80 = vector.broadcast %cst_45 : f32 to vector<32x1024xf32>
    %81 = arith.mulf %79, %80 : vector<32x1024xf32>
    %82 = math.absf %81 : vector<32x1024xf32>
    %cst_46 = arith.constant 0.327591091 : f32
    %83 = vector.broadcast %cst_46 : f32 to vector<32x1024xf32>
    %84 = arith.mulf %83, %82 : vector<32x1024xf32>
    %cst_47 = arith.constant 1.000000e+00 : f32
    %85 = vector.broadcast %cst_47 : f32 to vector<32x1024xf32>
    %86 = arith.addf %85, %84 : vector<32x1024xf32>
    %87 = tpu.reciprocal %86 {approx = true} : vector<32x1024xf32> -> vector<32x1024xf32>
    %cst_48 = arith.constant 1.06140542 : f32
    %88 = vector.broadcast %cst_48 : f32 to vector<32x1024xf32>
    %89 = arith.mulf %87, %88 : vector<32x1024xf32>
    %cst_49 = arith.constant -1.45315206 : f32
    %90 = vector.broadcast %cst_49 : f32 to vector<32x1024xf32>
    %91 = arith.addf %90, %89 : vector<32x1024xf32>
    %92 = arith.mulf %87, %91 : vector<32x1024xf32>
    %cst_50 = arith.constant 1.42141378 : f32
    %93 = vector.broadcast %cst_50 : f32 to vector<32x1024xf32>
    %94 = arith.addf %93, %92 : vector<32x1024xf32>
    %95 = arith.mulf %87, %94 : vector<32x1024xf32>
    %cst_51 = arith.constant -0.284496725 : f32
    %96 = vector.broadcast %cst_51 : f32 to vector<32x1024xf32>
    %97 = arith.addf %96, %95 : vector<32x1024xf32>
    %98 = arith.mulf %87, %97 : vector<32x1024xf32>
    %cst_52 = arith.constant 0.254829586 : f32
    %99 = vector.broadcast %cst_52 : f32 to vector<32x1024xf32>
    %100 = arith.addf %99, %98 : vector<32x1024xf32>
    %101 = arith.mulf %87, %100 : vector<32x1024xf32>
    %cst_53 = arith.constant 0.000000e+00 : f32
    %102 = vector.broadcast %cst_53 : f32 to vector<32x1024xf32>
    %103 = arith.subf %102, %82 : vector<32x1024xf32>
    %104 = arith.mulf %103, %82 : vector<32x1024xf32>
    %105 = math.exp %104 : vector<32x1024xf32>
    %106 = arith.mulf %101, %105 : vector<32x1024xf32>
    %cst_54 = arith.constant 1.000000e+00 : f32
    %107 = vector.broadcast %cst_54 : f32 to vector<32x1024xf32>
    %108 = arith.subf %107, %106 : vector<32x1024xf32>
    %cst_55 = arith.constant 0.000000e+00 : f32
    %109 = vector.broadcast %cst_55 : f32 to vector<32x1024xf32>
    %110 = arith.cmpf oge, %81, %109 : vector<32x1024xf32>
    %cst_56 = arith.constant 0.000000e+00 : f32
    %111 = vector.broadcast %cst_56 : f32 to vector<32x1024xf32>
    %112 = arith.subf %111, %108 : vector<32x1024xf32>
    %113 = arith.select %110, %108, %112 : vector<32x1024xi1>, vector<32x1024xf32>
    %cst_57 = arith.constant 5.000000e-01 : f32
    %114 = vector.broadcast %cst_57 : f32 to vector<32x1024xf32>
    %115 = arith.mulf %114, %79 : vector<32x1024xf32>
    %cst_58 = arith.constant 1.000000e+00 : f32
    %116 = vector.broadcast %cst_58 : f32 to vector<32x1024xf32>
    %117 = arith.addf %116, %113 : vector<32x1024xf32>
    %118 = arith.mulf %115, %117 : vector<32x1024xf32>
    %c1_i32_59 = arith.constant 1 : i32
    %119 = tpu.dynamic_rotate %118 by %c1_i32_59 dim 1 : vector<32x1024xf32>, i32 -> vector<32x1024xf32>
    %120 = vector.broadcast %6 : vector<1x1024xf32> to vector<32x1024xf32>
    %121 = arith.mulf %119, %120 : vector<32x1024xf32>
    %c1023_i32_60 = arith.constant 1023 : i32
    %122 = tpu.dynamic_rotate %118 by %c1023_i32_60 dim 1 : vector<32x1024xf32>, i32 -> vector<32x1024xf32>
    %123 = vector.broadcast %7 : vector<1x1024xf32> to vector<32x1024xf32>
    %124 = arith.mulf %122, %123 : vector<32x1024xf32>
    %c3_61 = arith.constant 3 : index
    %c0_62 = arith.constant 0 : index
    %c0_63 = arith.constant 0 : index
    %125 = vector.load %arg9[%c3_61, %c0_62, %c0_63] : memref<9x32x1xf32, #tpu.memory_space<vmem>>, vector<1x32x1xf32>
    %126 = vector.shape_cast %125 : vector<1x32x1xf32> to vector<32x1xf32>
    %127 = vector.broadcast %126 : vector<32x1xf32> to vector<32x1024xf32>
    %128 = arith.mulf %127, %121 : vector<32x1024xf32>
    %c4_64 = arith.constant 4 : index
    %c0_65 = arith.constant 0 : index
    %c0_66 = arith.constant 0 : index
    %129 = vector.load %arg9[%c4_64, %c0_65, %c0_66] : memref<9x32x1xf32, #tpu.memory_space<vmem>>, vector<1x32x1xf32>
    %130 = vector.shape_cast %129 : vector<1x32x1xf32> to vector<32x1xf32>
    %131 = vector.broadcast %130 : vector<32x1xf32> to vector<32x1024xf32>
    %132 = arith.mulf %131, %118 : vector<32x1024xf32>
    %133 = arith.addf %128, %132 : vector<32x1024xf32>
    %c5_67 = arith.constant 5 : index
    %c0_68 = arith.constant 0 : index
    %c0_69 = arith.constant 0 : index
    %134 = vector.load %arg9[%c5_67, %c0_68, %c0_69] : memref<9x32x1xf32, #tpu.memory_space<vmem>>, vector<1x32x1xf32>
    %135 = vector.shape_cast %134 : vector<1x32x1xf32> to vector<32x1xf32>
    %136 = vector.broadcast %135 : vector<32x1xf32> to vector<32x1024xf32>
    %137 = arith.mulf %136, %124 : vector<32x1024xf32>
    %138 = arith.addf %133, %137 : vector<32x1024xf32>
    %c0_70 = arith.constant 0 : index
    %c0_71 = arith.constant 0 : index
    %c0_72 = arith.constant 0 : index
    %139 = vector.load %arg9[%c0_70, %c0_71, %c0_72] : memref<9x32x1xf32, #tpu.memory_space<vmem>>, vector<1x32x1xf32>
    %140 = vector.shape_cast %139 : vector<1x32x1xf32> to vector<32x1xf32>
    %c32_i32_73 = arith.constant 32 : i32
    %141 = tpu.dynamic_rotate %121 by %c32_i32_73 dim 1 : vector<32x1024xf32>, i32 -> vector<32x1024xf32>
    %142 = vector.broadcast %140 : vector<32x1xf32> to vector<32x1024xf32>
    %143 = arith.mulf %142, %141 : vector<32x1024xf32>
    %c1_74 = arith.constant 1 : index
    %c0_75 = arith.constant 0 : index
    %c0_76 = arith.constant 0 : index
    %144 = vector.load %arg9[%c1_74, %c0_75, %c0_76] : memref<9x32x1xf32, #tpu.memory_space<vmem>>, vector<1x32x1xf32>
    %145 = vector.shape_cast %144 : vector<1x32x1xf32> to vector<32x1xf32>
    %c32_i32_77 = arith.constant 32 : i32
    %146 = tpu.dynamic_rotate %118 by %c32_i32_77 dim 1 : vector<32x1024xf32>, i32 -> vector<32x1024xf32>
    %147 = vector.broadcast %145 : vector<32x1xf32> to vector<32x1024xf32>
    %148 = arith.mulf %147, %146 : vector<32x1024xf32>
    %149 = arith.addf %143, %148 : vector<32x1024xf32>
    %c2_78 = arith.constant 2 : index
    %c0_79 = arith.constant 0 : index
    %c0_80 = arith.constant 0 : index
    %150 = vector.load %arg9[%c2_78, %c0_79, %c0_80] : memref<9x32x1xf32, #tpu.memory_space<vmem>>, vector<1x32x1xf32>
    %151 = vector.shape_cast %150 : vector<1x32x1xf32> to vector<32x1xf32>
    %c32_i32_81 = arith.constant 32 : i32
    %152 = tpu.dynamic_rotate %124 by %c32_i32_81 dim 1 : vector<32x1024xf32>, i32 -> vector<32x1024xf32>
    %153 = vector.broadcast %151 : vector<32x1xf32> to vector<32x1024xf32>
    %154 = arith.mulf %153, %152 : vector<32x1024xf32>
    %155 = arith.addf %149, %154 : vector<32x1024xf32>
    %c6_82 = arith.constant 6 : index
    %c0_83 = arith.constant 0 : index
    %c0_84 = arith.constant 0 : index
    %156 = vector.load %arg9[%c6_82, %c0_83, %c0_84] : memref<9x32x1xf32, #tpu.memory_space<vmem>>, vector<1x32x1xf32>
    %157 = vector.shape_cast %156 : vector<1x32x1xf32> to vector<32x1xf32>
    %c992_i32_85 = arith.constant 992 : i32
    %158 = tpu.dynamic_rotate %121 by %c992_i32_85 dim 1 : vector<32x1024xf32>, i32 -> vector<32x1024xf32>
    %159 = vector.broadcast %157 : vector<32x1xf32> to vector<32x1024xf32>
    %160 = arith.mulf %159, %158 : vector<32x1024xf32>
    %c7_86 = arith.constant 7 : index
    %c0_87 = arith.constant 0 : index
    %c0_88 = arith.constant 0 : index
    %161 = vector.load %arg9[%c7_86, %c0_87, %c0_88] : memref<9x32x1xf32, #tpu.memory_space<vmem>>, vector<1x32x1xf32>
    %162 = vector.shape_cast %161 : vector<1x32x1xf32> to vector<32x1xf32>
    %c992_i32_89 = arith.constant 992 : i32
    %163 = tpu.dynamic_rotate %118 by %c992_i32_89 dim 1 : vector<32x1024xf32>, i32 -> vector<32x1024xf32>
    %164 = vector.broadcast %162 : vector<32x1xf32> to vector<32x1024xf32>
    %165 = arith.mulf %164, %163 : vector<32x1024xf32>
    %166 = arith.addf %160, %165 : vector<32x1024xf32>
    %c8_90 = arith.constant 8 : index
    %c0_91 = arith.constant 0 : index
    %c0_92 = arith.constant 0 : index
    %167 = vector.load %arg9[%c8_90, %c0_91, %c0_92] : memref<9x32x1xf32, #tpu.memory_space<vmem>>, vector<1x32x1xf32>
    %168 = vector.shape_cast %167 : vector<1x32x1xf32> to vector<32x1xf32>
    %c992_i32_93 = arith.constant 992 : i32
    %169 = tpu.dynamic_rotate %124 by %c992_i32_93 dim 1 : vector<32x1024xf32>, i32 -> vector<32x1024xf32>
    %170 = vector.broadcast %168 : vector<32x1xf32> to vector<32x1024xf32>
    %171 = arith.mulf %170, %169 : vector<32x1024xf32>
    %172 = arith.addf %166, %171 : vector<32x1024xf32>
    %173 = vector.broadcast %8 : vector<1x1024xf32> to vector<32x1024xf32>
    %174 = arith.mulf %173, %155 : vector<32x1024xf32>
    %175 = arith.addf %138, %174 : vector<32x1024xf32>
    %176 = vector.broadcast %9 : vector<1x1024xf32> to vector<32x1024xf32>
    %177 = arith.mulf %176, %172 : vector<32x1024xf32>
    %178 = arith.addf %175, %177 : vector<32x1024xf32>
    %c0_94 = arith.constant 0 : index
    %c0_95 = arith.constant 0 : index
    %179 = vector.load %arg10[%c0_94, %c0_95] : memref<8x32xf32, #tpu.memory_space<vmem>>, vector<8x32xf32>
    %cst_96 = arith.constant dense<0.000000e+00> : vector<8x1024xf32>
    %180 = tpu.matmul %179, %178, %cst_96 {dimension_numbers = #tpu.dot_dimension_numbers<[1], [0], [0], [1], [0, 0, 1, 1], [], []>} : vector<8x32xf32>, vector<32x1024xf32>, vector<8x1024xf32> -> vector<8x1024xf32>
    %c0_97 = arith.constant 0 : index
    %c0_98 = arith.constant 0 : index
    %181 = vector.load %arg11[%c0_97, %c0_98] : memref<8x1xf32, #tpu.memory_space<vmem>>, vector<8x1xf32>
    %182 = vector.broadcast %181 : vector<8x1xf32> to vector<8x1024xf32>
    %183 = arith.addf %180, %182 : vector<8x1024xf32>
    %184 = arith.addf %183, %3 : vector<8x1024xf32>
    %185 = arith.mulf %1, %184 : vector<8x1024xf32>
    %cst_99 = arith.constant dense<0.000000e+00> : vector<1024xf32>
    %186 = vector.multi_reduction <add>, %185, %cst_99 [0] : vector<8x1024xf32> to vector<1024xf32>
    %187 = vector.shape_cast %186 : vector<1024xf32> to vector<1x1024xf32>
    %cst_100 = arith.constant 2.500000e-01 : f32
    %188 = vector.broadcast %cst_100 : f32 to vector<1x1024xf32>
    %189 = arith.mulf %187, %188 : vector<1x1024xf32>
    %190 = arith.subf %189, %5 : vector<1x1024xf32>
    %c0_101 = arith.constant 0 : index
    %191 = memref.load %arg12[%c0_101] : memref<1xf32, #tpu.memory_space<smem>>
    %192 = vector.broadcast %190 : vector<1x1024xf32> to vector<8x1024xf32>
    %193 = arith.mulf %192, %184 : vector<8x1024xf32>
    %194 = vector.broadcast %191 : f32 to vector<8x1024xf32>
    %195 = arith.mulf %194, %193 : vector<8x1024xf32>
    %196 = arith.subf %1, %195 : vector<8x1024xf32>
    %c0_102 = arith.constant 0 : index
    %c0_103 = arith.constant 0 : index
    %c0_104 = arith.constant 0 : index
    %197 = vector.load %arg13[%c0_102, %c0_103, %c0_104] : memref<1x8x1024xf32, #tpu.memory_space<vmem>>, vector<1x8x1024xf32>
    %198 = vector.shape_cast %197 : vector<1x8x1024xf32> to vector<8x1024xf32>
    %199 = vector.shape_cast %196 : vector<8x1024xf32> to vector<1x8x1024xf32>
    tpu.vector_store %arg13[%c0_102, %c0_103, %c0_104], %199 {strides = array<i32>} : memref<1x8x1024xf32, #tpu.memory_space<vmem>>, vector<1x8x1024xf32>,
    return
  }
  func.func @transform_0(%arg0: i32) -> (i32, i32, i32) {
    %c0_i32 = arith.constant 0 : i32
    %c0_i32_0 = arith.constant 0 : i32
    %c0_i32_1 = arith.constant 0 : i32
    return %arg0, %c0_i32, %c0_i32_0 : i32, i32, i32
  }
  func.func @transform_1(%arg0: i32) -> (i32, i32, i32) {
    %c0_i32 = arith.constant 0 : i32
    %c0_i32_0 = arith.constant 0 : i32
    %c0_i32_1 = arith.constant 0 : i32
    return %arg0, %c0_i32, %c0_i32_0 : i32, i32, i32
  }
  func.func @transform_2(%arg0: i32) -> (i32, i32, i32) {
    %c0_i32 = arith.constant 0 : i32
    %c0_i32_0 = arith.constant 0 : i32
    %c0_i32_1 = arith.constant 0 : i32
    return %arg0, %c0_i32, %c0_i32_0 : i32, i32, i32
  }
  func.func @transform_3(%arg0: i32) -> (i32, i32) {
    %c0_i32 = arith.constant 0 : i32
    %c0_i32_0 = arith.constant 0 : i32
    %c0_i32_1 = arith.constant 0 : i32
    return %c0_i32, %c0_i32_0 : i32, i32
  }
  func.func @transform_4(%arg0: i32) -> (i32, i32) {
    %c0_i32 = arith.constant 0 : i32
    %c0_i32_0 = arith.constant 0 : i32
    %c0_i32_1 = arith.constant 0 : i32
    return %c0_i32, %c0_i32_0 : i32, i32
  }
  func.func @transform_5(%arg0: i32) -> (i32, i32) {
    %c0_i32 = arith.constant 0 : i32
    %c0_i32_0 = arith.constant 0 : i32
    %c0_i32_1 = arith.constant 0 : i32
    return %c0_i32, %c0_i32_0 : i32, i32
  }
  func.func @transform_6(%arg0: i32) -> (i32, i32) {
    %c0_i32 = arith.constant 0 : i32
    %c0_i32_0 = arith.constant 0 : i32
    %c0_i32_1 = arith.constant 0 : i32
    return %c0_i32, %c0_i32_0 : i32, i32
  }
  func.func @transform_7(%arg0: i32) -> (i32, i32, i32) {
    %c0_i32 = arith.constant 0 : i32
    %c0_i32_0 = arith.constant 0 : i32
    %c0_i32_1 = arith.constant 0 : i32
    %c0_i32_2 = arith.constant 0 : i32
    return %c0_i32, %c0_i32_0, %c0_i32_1 : i32, i32, i32
  }
  func.func @transform_8(%arg0: i32) -> (i32, i32, i32) {
    %c0_i32 = arith.constant 0 : i32
    %c0_i32_0 = arith.constant 0 : i32
    %c0_i32_1 = arith.constant 0 : i32
    %c0_i32_2 = arith.constant 0 : i32
    return %c0_i32, %c0_i32_0, %c0_i32_1 : i32, i32, i32
  }
  func.func @transform_9(%arg0: i32) -> (i32, i32) {
    %c0_i32 = arith.constant 0 : i32
    %c0_i32_0 = arith.constant 0 : i32
    %c0_i32_1 = arith.constant 0 : i32
    return %c0_i32, %c0_i32_0 : i32, i32
  }
  func.func @transform_10(%arg0: i32) -> (i32, i32) {
    %c0_i32 = arith.constant 0 : i32
    %c0_i32_0 = arith.constant 0 : i32
    %c0_i32_1 = arith.constant 0 : i32
    return %c0_i32, %c0_i32_0 : i32, i32
  }
  func.func @transform_11(%arg0: i32) -> i32 {
    %c0_i32 = arith.constant 0 : i32
    %c0_i32_0 = arith.constant 0 : i32
    return %c0_i32 : i32
  }
  func.func @transform_12(%arg0: i32) -> (i32, i32, i32) {
    %c0_i32 = arith.constant 0 : i32
    %c0_i32_0 = arith.constant 0 : i32
    %c0_i32_1 = arith.constant 0 : i32
    return %arg0, %c0_i32, %c0_i32_0 : i32, i32, i32
  }
}

</mosaic_0001>

<bundles_post_ra>
// kernel: tpu_custom_call.1
= control target key start
LH: loop header
LB: loop body
LE: loop exit
PB: predicated region body
PF: predicated region fallthrough
CT: control target
= control target key end

     0   :  { %s14402_s0 = inlined_call_operand.vmem [shape: f32[2,8,1024], index: 0, kind: input, shape index: {}]   ;;  %s14403_s1 = inlined_call_operand.vmem [shape: f32[2,8,1024], index: 1, kind: input, shape index: {}]   ;;  %s14404_s2 = inlined_call_operand.vmem [shape: f32[2,1,1024], index: 2, kind: input, shape index: {}]   ;;  %s14405_s3 = inlined_call_operand.vmem [shape: f32[4,1024], index: 3, kind: input, shape index: {}]   ;;  %s14406_s4 = inlined_call_operand.vmem [shape: f32[32,8], index: 4, kind: input, shape index: {}]   ;;  %s14407_s5 = inlined_call_operand.vmem [shape: f32[32,1], index: 5, kind: input, shape index: {}]   ;;  %s14408_s6 = inlined_call_operand.vmem [shape: f32[32,1], index: 6, kind: input, shape index: {}]   ;;  %s14409_s7 = inlined_call_operand.vmem [shape: f32[9,32,1], index: 7, kind: input, shape index: {}]   ;;  %s14410_s8 = inlined_call_operand.vmem [shape: f32[9,32,1], index: 8, kind: input, shape index: {}]   ;;  %s14411_s9 = inlined_call_operand.vmem [shape: f32[8,32], index: 9, kind: input, shape index: {}]   ;;  %s14412_s10 = inlined_call_operand.vmem [shape: f32[8,1], index: 10, kind: input, shape index: {}]   ;;  %s14413_s11 = inlined_call_operand.<no memory space> [shape: f32[1], index: 11, kind: input, shape index: {}]   ;;  %s14414_s12 = inlined_call_operand.hbm [shape: f32[2,8,1024], index: 12, kind: output, shape index: {}]  }
   0x1   :  { %15235 = sst [smem:[#allocation246_spill]] %s14403_s1 }
   0x2   :  { %15236 = sst [smem:[#allocation247_spill]] %s14406_s4 }
   0x3   :  { %17 = sst [smem:[#allocation2]] %s14413_s11 }
   0x4   :  { %18 = vsyncpa [#allocation4], 0 }
   0x5   :  { %20 = vsyncpa [#allocation4 + $0x1], 0  ;;  %s6329_s23 = smov 0   ;;  %s6331_s24 = smov 0  }
   0x6   :  { %s6333_s25 = smov 0   ;;  %s6335_s26 = smov 0  }
   0x7 LB: > { %s6350_s11 = sadd.s32 4294967295, %s6252_s26   ;;  %s5869_s27 = sadd.s32 4294967294, %s6252_s26   ;;  %s6252_s26 = sphi %s6335_s26, %s16976_s26   ;;  %s6248_s25 = sphi %s6333_s25, %s16975_s25   ;;  %s6244_s24 = sphi %s6331_s24, %s16974_s24   ;;  %s6240_s23 = sphi %s6329_s23, %s16973_s23  }
   0x8   : > { %s6354_s28 = sadd.s32 1, %s6252_s26   ;;  %s300_s29 = sadd.s32 1, %s6248_s25 }
   0x9   : > { %s297_s30 = ssub.s32 %s6252_s26, %s6354_s28  ;;  %p310_p0 = scmp.ne.s32.totalorder %s6248_s25, %s6244_s24 }
   0xa   : > { %p298_p1 = scmp.eq.s32.totalorder %s297_s30, 0  ;;  %p311_p2 = scmp.eq.s32.totalorder %s6350_s11, 1 }
   0xb   : > { %p316_p3 = scmp.ne.s32.totalorder %s6244_s24, %s6240_s23  ;;  %p317_p4 = scmp.eq.s32.totalorder %s5869_s27, 1 }
   0xc   : > { %s6365_s13 = scalar_select %p298_p1, %s6248_s25, %s300_s29  }
   0xd   : > { %p6367_p5 = por %p311_p2, %p310_p0  ;;  %p6371_p6 = por %p317_p4, %p316_p3 }
   0xe   : > { %p5872_p7 = scmp.ge.s32.totalorder %s6252_s26, 1  ;;  %p385_p8 = scmp.lt.s32.totalorder %s6252_s26, 3 }
  0x10   : > { %p386_p9 = pnand %p5872_p7, %p385_p8 }
  0x12   : > { %389 = sbr.rel (%p386_p9) target bundleno = 2161 (0x871), region = 68 }
  0x19   : > { %p436_p10 = scmp.lt.s32.totalorder %s6350_s11, 1  ;;  %v14416_v0 = vmov 0.0   ;;  %v480_v1 = vld [vmem:[%s14407_s5 + $0x10] sm:$0xff]  ;;  %v478_v2 = vld [vmem:[%s14407_s5] sm:$0xff]  ;;  %v6255_v3 = vmov 0   ;;  %s15239_s1 = sld [smem:[#allocation246_spill]]  ;;  %v14418_v42 = vlaneseq }
  0x1a   : > { %652 = vmatprep.mubr.f32.mxu0 %v14416_v0  ;;  %741 = vmatprep.mubr.f32.mxu1 %v14416_v0  ;;  %s15240_s4 = sld [smem:[#allocation247_spill]]  ;;  %vm575_vm0 = vcmask 64512   ;;  %v481_v14 = vld [vmem:[%s14407_s5 + $0x18] sm:$0xff]  ;;  %v479_v15 = vld [vmem:[%s14407_s5 + $0x8] sm:$0xff]  ;;  %v944_v18 = vld [vmem:[%s14408_s6] sm:$0xff]  ;;  %s6257_s30 = smov 127  }
  0x1b   : > { %s6387_s20 = scalar_select %p436_p10, %s6350_s11, 1  ;;  %6052 = vset.pattern.permute.xlu1 %v6255_v3  ;;  %6051 = vset.pattern.permute.xlu0 %v6255_v3  ;;  %v945_v17 = vld [vmem:[%s14408_s6 + $0x8] sm:$0xff]  ;;  %v947_v20 = vld [vmem:[%s14408_s6 + $0x18] sm:$0xff]  ;;  %v946_v21 = vld [vmem:[%s14408_s6 + $0x10] sm:$0xff]  ;;  %v6529_v43 = vshrl.u32 %v14418_v42, 7 }
  0x1c   : > { %494 = vperm.xlu1 %6052, %v480_v1   ;;  %484 = vperm.xlu0 %6051, %v478_v2   ;;  %v5899_v22 = vld [vmem:[%s14409_s7 + $0x68] sm:$0xff]  ;;  %v5898_v23 = vld [vmem:[%s14409_s7 + $0x60] sm:$0xff]  ;;  %v5901_v24 = vld [vmem:[%s14409_s7 + $0x78] sm:$0xff]  ;;  %s6258_s16 = smov 32   ;;  %s6259_s27 = smov 96  }
  0x1d   : > { %s14415_s21 = sshll.u32 %s6387_s20, 6  ;;  %v5900_v25 = vld [vmem:[%s14409_s7 + $0x70] sm:$0xff]  ;;  %v5903_v26 = vld [vmem:[%s14409_s7 + $0x88] sm:$0xff]  ;;  %v5902_v27 = vld [vmem:[%s14409_s7 + $0x80] sm:$0xff]  ;;  %s5878_s22 = sshll.u32 %s6387_s20, 3  ;;  %v6535_v44 = vsub.s32 0, %v6529_v43 }
  0x1e   : > { %v5905_v28 = vld [vmem:[%s14409_s7 + $0x98] sm:$0xff]  ;;  %v5904_v29 = vld [vmem:[%s14409_s7 + $0x90] sm:$0xff]  ;;  %v5907_v30 = vld [vmem:[%s14409_s7 + $0xa8] sm:$0xff]  ;;  %v6542_v47 = vsub.s32 2, %v6529_v43  ;;  %s16963_s17 = sshll.u32 %s6387_s20, 6  ;;  %s5705_s20 = sld [smem:[#allocation2]] }
  0x1f   : > { %s6395_s29 = scalar_lea.vmem %s15239_s1, %s14415_s21  ;;  %v5906_v31 = vld [vmem:[%s14409_s7 + $0xa0] sm:$0xff]  ;;  %v5909_v32 = vld [vmem:[%s14409_s7 + $0xb8] sm:$0xff]  ;;  %v5908_v33 = vld [vmem:[%s14409_s7 + $0xb0] sm:$0xff]  ;;  %s449_s1 = scalar_lea.vmem %s14404_s2, %s5878_s22  ;;  %15241 = vst [vmem:[#allocation6_spill] sm:$0xff] %v6535_v44 }
  0x20   : > { %v474_v4 = vld [vmem:[%s15240_s4] sm:$0xff]  ;;  %v459_v5 = vld [vmem:[%s6395_s29 + $0x8] sm:$0xff]  ;;  %v461_v6 = vld [vmem:[%s6395_s29 + $0x18] sm:$0xff]  ;;  %499 = vperm.xlu1 %6052, %v481_v14   ;;  %489 = vperm.xlu0 %6051, %v479_v15   ;;  %15242 = vst [vmem:[#allocation7_spill] sm:$0xff] %v6542_v47  ;;  %v6594_v15 = vsub.s32 1, %v6529_v43  ;;  %s14262_s22 = scalar_lea.vmem %s14402_s0, %s16963_s17  ;;  %s433_s21 = sand.u32 1, %s6244_s24  }
  0x21   : > { %v458_v7 = vld [vmem:[%s6395_s29] sm:$0xff]  ;;  %588 = vmatprep.subr.mxu0 %v459_v5  ;;  %677 = vmatprep.subr.mxu1 %v461_v6  ;;  %v460_v8 = vld [vmem:[%s6395_s29 + $0x10] sm:$0xff]  ;;  %v463_v9 = vld [vmem:[%s6395_s29 + $0x28] sm:$0xff]  ;;  %s6260_s19 = smov [#allocation3]  }
  0x22   : > { %589 = vmatpush1.msra.mxu0 %v458_v7  ;;  %678 = vmatpush1.msra.mxu1 %v460_v8  ;;  %v465_v10 = vld [vmem:[%s6395_s29 + $0x38] sm:$0xff]  ;;  %v462_v11 = vld [vmem:[%s6395_s29 + $0x20] sm:$0xff]  ;;  %v464_v12 = vld [vmem:[%s6395_s29 + $0x30] sm:$0xff]  ;;  %15246 = vst [vmem:[#allocation11_spill] sm:$0xff] %v6594_v15 }
  0x23   : > { %5882 = vmatmul.mubr.msk.f32.vlgmr.msra.gmra.mrb[0].mxu0 %vm575_vm0, %v474_v4  ;;  %5886 = vmatmul.mubr.msk.f32.vlgmr.msra.gmra.mrb[0].mxu1 %vm575_vm0, %v474_v4  ;;  %v475_v13 = vld [vmem:[%s15240_s4 + $0x8] sm:$0xff]  ;;  %v476_v16 = vld [vmem:[%s15240_s4 + $0x10] sm:$0xff]  ;;  %v477_v19 = vld [vmem:[%s15240_s4 + $0x18] sm:$0xff]  ;;  %s6256_s4 = smov 1  }
  0x24   : > { %658 = vmatprep.mubr.f32.mxu0 %v14416_v0  ;;  %747 = vmatprep.mubr.f32.mxu1 %v14416_v0  ;;  %v1578_v34 = vld [vmem:[%s14409_s7 + $0x8] sm:$0xff]  ;;  %v1577_v35 = vld [vmem:[%s14409_s7] sm:$0xff]  ;;  %v1580_v36 = vld [vmem:[%s14409_s7 + $0x18] sm:$0xff] }
  0x25   : > { %766 = vmatprep.subr.mxu0 %v463_v9  ;;  %855 = vmatprep.subr.mxu1 %v465_v10  ;;  %v1579_v37 = vld [vmem:[%s14409_s7 + $0x10] sm:$0xff]  ;;  %v5911_v38 = vld [vmem:[%s14409_s7 + $0x28] sm:$0xff]  ;;  %v5910_v39 = vld [vmem:[%s14409_s7 + $0x20] sm:$0xff] }
  0x26   : > { %767 = vmatpush1.msra.mxu0 %v462_v11  ;;  %856 = vmatpush1.msra.mxu1 %v464_v12  ;;  %v5913_v40 = vld [vmem:[%s14409_s7 + $0x38] sm:$0xff]  ;;  %v5912_v41 = vld [vmem:[%s14409_s7 + $0x30] sm:$0xff]  ;;  %v6537_v45 = vld [vmem:[%s449_s1] sm:$0xff] }
  0x27   : > { %5883 = vmatmul.mubr.msk.f32.gmra.mrb[2].mxu0 %vm575_vm0, %v475_v13  ;;  %5887 = vmatmul.mubr.msk.f32.gmra.mrb[2].mxu1 %vm575_vm0, %v475_v13  ;;  %v6548_v49 = vrot.slane %v6537_v45, %v6535_v44  ;;  %v6552_v50 = vrot.slane %v6537_v45, %v6542_v47 }
  0x28   : > { %664 = vmatprep.mubr.f32.mxu0 %v14416_v0  ;;  %753 = vmatprep.mubr.f32.mxu1 %v14416_v0 }
  0x29   : > { %955 = vperm.xlu1 %6052, %v945_v17   ;;  %950 = vperm.xlu0 %6051, %v944_v18   ;;  %15243 = vst [vmem:[#allocation8_spill] sm:$0xff] %v6548_v49  ;;  %15244 = vst [vmem:[#allocation9_spill] sm:$0xff] %v6552_v50 }
  0x2b   : > { %5884 = vmatmul.mubr.msk.f32.gmra.mrb[4].mxu0 %vm575_vm0, %v476_v16  ;;  %5888 = vmatmul.mubr.msk.f32.gmra.mrb[4].mxu1 %vm575_vm0, %v476_v16 }
  0x2c   : > { %670 = vmatprep.mubr.f32.mxu0 %v14416_v0  ;;  %759 = vmatprep.mubr.f32.mxu1 %v14416_v0 }
  0x2d   : > { %965 = vperm.xlu1 %6052, %v947_v20   ;;  %960 = vperm.xlu0 %6051, %v946_v21   ;;  %v6613_v21 = vrot.slane %v6537_v45, %v6594_v15 }
  0x2f   : > { %5885 = vmatmul.mubr.msk.f32.gmra.mrb[6].mxu0 %vm575_vm0, %v477_v19  ;;  %5889 = vmatmul.mubr.msk.f32.gmra.mrb[6].mxu1 %vm575_vm0, %v477_v19  ;;  %15248 = vst [vmem:[#allocation13_spill] sm:$0xff] %v6613_v21 }
  0x30   : > { %830 = vmatprep.mubr.f32.mxu0 %v14416_v0  ;;  %919 = vmatprep.mubr.f32.mxu1 %v14416_v0 }
  0x31   : > { %1354 = vperm.xlu1 %6052, %v5899_v22   ;;  %1349 = vperm.xlu0 %6051, %v5898_v23   ;;  %v6616_v22 = vsub.s32 3, %v6529_v43 }
  0x33   : > { %5890 = vmatmul.mubr.msk.f32.vlgmr.msra.gmra.mrb[8].mxu0 %vm575_vm0, %v474_v4  ;;  %5894 = vmatmul.mubr.msk.f32.vlgmr.msra.gmra.mrb[8].mxu1 %vm575_vm0, %v474_v4  ;;  %15249 = vst [vmem:[#allocation14_spill] sm:$0xff] %v6616_v22 }
  0x34   : > { %836 = vmatprep.mubr.f32.mxu0 %v14416_v0  ;;  %925 = vmatprep.mubr.f32.mxu1 %v14416_v0 }
  0x35   : > { %1364 = vperm.xlu1 %6052, %v5901_v24   ;;  %1359 = vperm.xlu0 %6051, %v5900_v25  }
  0x37   : > { %5891 = vmatmul.mubr.msk.f32.gmra.mrb[10].mxu0 %vm575_vm0, %v475_v13  ;;  %5895 = vmatmul.mubr.msk.f32.gmra.mrb[10].mxu1 %vm575_vm0, %v475_v13 }
  0x38   : > { %842 = vmatprep.mubr.f32.mxu0 %v14416_v0  ;;  %931 = vmatprep.mubr.f32.mxu1 %v14416_v0 }
  0x39   : > { %1411 = vperm.xlu1 %6052, %v5903_v26   ;;  %1406 = vperm.xlu0 %6051, %v5902_v27  }
  0x3b   : > { %5892 = vmatmul.mubr.msk.f32.gmra.mrb[12].mxu0 %vm575_vm0, %v476_v16  ;;  %5896 = vmatmul.mubr.msk.f32.gmra.mrb[12].mxu1 %vm575_vm0, %v476_v16 }
  0x3c   : > { %848 = vmatprep.mubr.f32.mxu0 %v14416_v0  ;;  %937 = vmatprep.mubr.f32.mxu1 %v14416_v0 }
  0x3d   : > { %1421 = vperm.xlu1 %6052, %v5905_v28   ;;  %1416 = vperm.xlu0 %6051, %v5904_v29   ;;  %v6634_v28 = vrot.slane %v6537_v45, %v6616_v22 }
  0x3f   : > { %5893 = vmatmul.mubr.msk.f32.gmra.mrb[14].mxu0 %vm575_vm0, %v477_v19  ;;  %5897 = vmatmul.mubr.msk.f32.gmra.mrb[14].mxu1 %vm575_vm0, %v477_v19  ;;  %15250 = vst [vmem:[#allocation15_spill] sm:$0xff] %v6634_v28 }
  0x40   : > { %5476 = vmatprep.mubr.f32.mxu1 %v14416_v0  ;;  %5405 = vmatprep.mubr.f32.mxu0 %v14416_v0 }
  0x41   : > { %1500 = vperm.xlu1 %6052, %v5907_v30   ;;  %1495 = vperm.xlu0 %6051, %v5906_v31  }
  0x45   : > { %1510 = vperm.xlu1 %6052, %v5909_v32   ;;  %1505 = vperm.xlu0 %6051, %v5908_v33  }
  0x49   : > { %1685 = vperm.xlu1 %6052, %v1578_v34   ;;  %1680 = vperm.xlu0 %6051, %v1577_v35  }
  0x4d   : > { %1695 = vperm.xlu1 %6052, %v1580_v36   ;;  %1690 = vperm.xlu0 %6051, %v1579_v37  }
  0x51   : > { %1838 = vperm.xlu1 %6052, %v5911_v38   ;;  %1833 = vperm.xlu0 %6051, %v5910_v39  }
  0x55   : > { %1848 = vperm.xlu1 %6052, %v5913_v40   ;;  %1843 = vperm.xlu0 %6051, %v5912_v41  }
  0x9b   : > { %v6539_v46 = vpop.permute.xlu0 %484  ;;  %v6544_v48 = vpop.permute.xlu1 %494 }
  0x9c   : > { %v543_v52 = vmul.f32 %v6548_v49, %v6539_v46  ;;  %v545_v54 = vmul.f32 %v6552_v50, %v6539_v46  ;;  %v544_v27 = vmul.f32 %v6613_v21, %v6539_v46  ;;  %v546_v34 = vmul.f32 %v6634_v28, %v6539_v46 }
  0x9f   : > { %v6554_v51 = vpop.permute.xlu0 %489  ;;  %v6558_v53 = vpop.permute.xlu1 %499 }
  0xa0   : > { %v551_v63 = vmul.f32 %v6548_v49, %v6554_v51  ;;  %v553_v4 = vmul.f32 %v6552_v50, %v6554_v51  ;;  %v552_v37 = vmul.f32 %v6613_v21, %v6554_v51 }
  0xa8   : > { %v6562_v60 = vpop.permute.xlu0 %950  ;;  %v6573_v7 = vpop.permute.xlu1 %955 }
  0xf6   : > { %v654_v55 = vpop.f32.mrb[0].mxu0  ;;  %v743_v56 = vpop.f32.mrb[0].mxu1 }
  0xf7   : > { %v655_v57 = vadd.f32 %v654_v55, %v543_v52  ;;  %v656_v58 = vpop.f32.mrb[1].mxu0  ;;  %v745_v59 = vpop.f32.mrb[1].mxu1  ;;  %v744_v62 = vadd.f32 %v743_v56, %v545_v54  ;;  %v554_v56 = vmul.f32 %v6634_v28, %v6554_v51 }
  0xf8   : > { %v657_v33 = vadd.f32 %v656_v58, %v544_v27  ;;  %v746_v41 = vadd.f32 %v745_v59, %v546_v34  ;;  %v6730_v34 = vpop.permute.xlu1 %965 }
  0xf9   : > { %v6565_v61 = vadd.f32 %v6562_v60, %v655_v57  ;;  %v6576_v8 = vadd.f32 %v6562_v60, %v744_v62 }
  0xfa   : > { %v660_v1 = vpop.f32.mrb[2].mxu0  ;;  %v749_v2 = vpop.f32.mrb[2].mxu1  ;;  %v6665_v40 = vadd.f32 %v6562_v60, %v657_v33  ;;  %v6682_v59 = vadd.f32 %v6562_v60, %v746_v41  ;;  %v569_v33 = vmul.f32 %v6552_v50, %v6558_v53 }
  0xfb   : > { %v661_v3 = vadd.f32 %v660_v1, %v551_v63  ;;  %v662_v5 = vpop.f32.mrb[3].mxu0  ;;  %v751_v6 = vpop.f32.mrb[3].mxu1  ;;  %1000 = vrot.lane.b32.xlu0 %v6565_v61, %s6256_s4  ;;  %15245 = vst [vmem:[#allocation10_spill] sm:$0xff] %v6576_v8  ;;  %v750_v10 = vadd.f32 %v749_v2, %v553_v4  ;;  %v559_v2 = vmul.f32 %v6548_v49, %v6544_v48 }
  0xfc   : > { %15251 = vst [vmem:[#allocation16_spill] sm:$0xff] %v6665_v40  ;;  %v663_v52 = vadd.f32 %v662_v5, %v552_v37  ;;  %15252 = vst [vmem:[#allocation17_spill] sm:$0xff] %v6682_v59  ;;  %v752_v63 = vadd.f32 %v751_v6, %v554_v56  ;;  %v561_v4 = vmul.f32 %v6552_v50, %v6544_v48  ;;  %v6717_v6 = vpop.permute.xlu0 %960  ;;  %v6752_v56 = vpop.permute.xlu1 %1354 }
  0xfd   : > { %v6579_v9 = vadd.f32 %v6573_v7, %v661_v3  ;;  %v6597_v16 = vadd.f32 %v6573_v7, %v750_v10  ;;  %v567_v5 = vmul.f32 %v6548_v49, %v6558_v53  ;;  %15259 = vst [vmem:[#allocation24_spill] sm:$0xff] %v6752_v56 }
  0xfe   : > { %v6581_v11 = vpop.f32.mrb[4].mxu0  ;;  %v6583_v12 = vpop.f32.mrb[4].mxu1  ;;  %v6685_v62 = vadd.f32 %v6573_v7, %v663_v52  ;;  %v6692_v1 = vadd.f32 %v6573_v7, %v752_v63  ;;  %v560_v63 = vmul.f32 %v6613_v21, %v6544_v48 }
  0xff   : > { %v6585_v13 = vpop.f32.mrb[5].mxu0  ;;  %v6587_v14 = vpop.f32.mrb[5].mxu1  ;;  %1002 = vrot.lane.b32.xlu1 %v6579_v9, %s6256_s4  ;;  %1016 = vrot.lane.b32.xlu0 %v6576_v8, %s6256_s4  ;;  %15247 = vst [vmem:[#allocation12_spill] sm:$0xff] %v6597_v16  ;;  %v667_v3 = vadd.f32 %v6581_v11, %v559_v2  ;;  %v756_v27 = vadd.f32 %v6583_v12, %v561_v4 }
 0x100   : > { %15253 = vst [vmem:[#allocation18_spill] sm:$0xff] %v6685_v62  ;;  %15254 = vst [vmem:[#allocation19_spill] sm:$0xff] %v6692_v1  ;;  %v6746_v52 = vpop.permute.xlu0 %1349  ;;  %v6766_v2 = vpop.permute.xlu1 %1364 }
 0x101   : > { %v6720_v10 = vadd.f32 %v6717_v6, %v667_v3  ;;  %v6733_v37 = vadd.f32 %v6717_v6, %v756_v27  ;;  %15258 = vst [vmem:[#allocation23_spill] sm:$0xff] %v6746_v52  ;;  %15261 = vst [vmem:[#allocation26_spill] sm:$0xff] %v6766_v2  ;;  %v669_v3 = vadd.f32 %v6585_v13, %v560_v63 }
 0x102   : > { %v6599_v17 = vpop.f32.mrb[6].mxu0  ;;  %v6601_v18 = vpop.f32.mrb[6].mxu1  ;;  %v568_v27 = vmul.f32 %v6613_v21, %v6558_v53  ;;  %v570_v63 = vmul.f32 %v6634_v28, %v6558_v53 }
 0x103   : > { %v6603_v19 = vpop.f32.mrb[7].mxu0  ;;  %v6605_v20 = vpop.f32.mrb[7].mxu1  ;;  %1018 = vrot.lane.b32.xlu1 %v6597_v16, %s6256_s4  ;;  %1172 = vrot.lane.b32.xlu0 %v6565_v61, %s6257_s30  ;;  %v673_v11 = vadd.f32 %v6599_v17, %v567_v5  ;;  %15255 = vst [vmem:[#allocation20_spill] sm:$0xff] %v6733_v37  ;;  %v762_v12 = vadd.f32 %v6601_v18, %v569_v33 }
 0x104   : > { %v6758_v18 = vpop.permute.xlu0 %1359  ;;  %v562_v5 = vmul.f32 %v6634_v28, %v6544_v48  ;;  %v675_v13 = vadd.f32 %v6603_v19, %v568_v27  ;;  %v764_v19 = vadd.f32 %v6605_v20, %v570_v63  ;;  %v6826_v63 = vsub.s32 6, %v6529_v43 }
 0x105   : > { %v6736_v41 = vadd.f32 %v6730_v34, %v673_v11  ;;  %v6744_v17 = vadd.f32 %v6730_v34, %v762_v12  ;;  %15260 = vst [vmem:[#allocation25_spill] sm:$0xff] %v6758_v18  ;;  %v6780_v11 = vadd.f32 %v6717_v6, %v669_v3  ;;  %v6784_v12 = vpop.permute.xlu1 %1411 }
 0x106   : > { %v6618_v23 = vpop.f32.mrb[8].mxu0  ;;  %v6620_v24 = vpop.f32.mrb[8].mxu1  ;;  %v758_v33 = vadd.f32 %v6587_v14, %v562_v5  ;;  %15264 = vst [vmem:[#allocation29_spill] sm:$0xff] %v6784_v12  ;;  %v6798_v14 = vadd.f32 %v6730_v34, %v675_v13  ;;  %v6808_v27 = vadd.f32 %v6730_v34, %v764_v19  ;;  %15274 = vst [vmem:[#allocation39_spill] sm:$0xff] %v6826_v63 }
 0x107   : > { %v6622_v25 = vpop.f32.mrb[9].mxu0  ;;  %v6624_v26 = vpop.f32.mrb[9].mxu1  ;;  %1174 = vrot.lane.b32.xlu1 %v6579_v9, %s6257_s30  ;;  %1188 = vrot.lane.b32.xlu0 %v6576_v8, %s6257_s30  ;;  %15256 = vst [vmem:[#allocation21_spill] sm:$0xff] %v6736_v41  ;;  %15257 = vst [vmem:[#allocation22_spill] sm:$0xff] %v6744_v17  ;;  %v6838_v49 = vrot.slane %v6537_v45, %v6826_v63 }
 0x108   : > { %v6769_v4 = vpop.permute.xlu0 %1406  ;;  %15263 = vst [vmem:[#allocation28_spill] sm:$0xff] %v6780_v11  ;;  %v6795_v3 = vadd.f32 %v6717_v6, %v758_v33  ;;  %15267 = vst [vmem:[#allocation32_spill] sm:$0xff] %v6798_v14  ;;  %v6813_v33 = vsub.s32 4, %v6529_v43 }
 0x109   : > { %15262 = vst [vmem:[#allocation27_spill] sm:$0xff] %v6769_v4  ;;  %v6805_v5 = vpop.permute.xlu1 %1421  ;;  %15269 = vst [vmem:[#allocation34_spill] sm:$0xff] %v6808_v27 }
 0x10a   : > { %v6636_v29 = vpop.f32.mrb[10].mxu0  ;;  %v6638_v30 = vpop.f32.mrb[10].mxu1  ;;  %15266 = vst [vmem:[#allocation31_spill] sm:$0xff] %v6795_v3  ;;  %15268 = vst [vmem:[#allocation33_spill] sm:$0xff] %v6805_v5  ;;  %v6823_v13 = vrot.slane %v6537_v45, %v6813_v33 }
 0x10b   : > { %v6640_v31 = vpop.f32.mrb[11].mxu0  ;;  %v6642_v32 = vpop.f32.mrb[11].mxu1  ;;  %1190 = vrot.lane.b32.xlu1 %v6597_v16, %s6257_s30  ;;  %1735 = vrot.lane.b32.xlu0 %v6565_v61, %s6258_s16  ;;  %15271 = vst [vmem:[#allocation36_spill] sm:$0xff] %v6813_v33  ;;  %15276 = vst [vmem:[#allocation41_spill] sm:$0xff] %v6838_v49 }
 0x10c   : > { %v6792_v0 = vpop.permute.xlu0 %1416  ;;  %15273 = vst [vmem:[#allocation38_spill] sm:$0xff] %v6823_v13  ;;  %v547_v21 = vmul.f32 %v6823_v13, %v6539_v46  ;;  %v555_v18 = vmul.f32 %v6823_v13, %v6554_v51 }
 0x10d   : > { %15265 = vst [vmem:[#allocation30_spill] sm:$0xff] %v6792_v0  ;;  %v6819_v20 = vpop.permute.xlu1 %1500 }
 0x10e   : > { %v6650_v35 = vpop.f32.mrb[12].mxu0  ;;  %v6652_v36 = vpop.f32.mrb[12].mxu1  ;;  %15272 = vst [vmem:[#allocation37_spill] sm:$0xff] %v6819_v20  ;;  %v833_v50 = vadd.f32 %v6618_v23, %v547_v21  ;;  %v839_v21 = vadd.f32 %v6636_v29, %v555_v18 }
 0x10f   : > { %v6656_v38 = vpop.f32.mrb[13].mxu0  ;;  %v6658_v39 = vpop.f32.mrb[13].mxu1  ;;  %1737 = vrot.lane.b32.xlu1 %v6579_v9, %s6258_s16  ;;  %1751 = vrot.lane.b32.xlu0 %v6576_v8, %s6258_s16 }
 0x110   : > { %v6810_v42 = vpop.permute.xlu0 %1495  ;;  %v6858_v20 = vadd.f32 %v6562_v60, %v833_v50 }
 0x111   : > { %15270 = vst [vmem:[#allocation35_spill] sm:$0xff] %v6810_v42  ;;  %v6844_v28 = vpop.permute.xlu1 %1510 }
 0x112   : > { %v6667_v54 = vpop.f32.mrb[14].mxu0  ;;  %v6669_v55 = vpop.f32.mrb[14].mxu1  ;;  %15277 = vst [vmem:[#allocation42_spill] sm:$0xff] %v6844_v28  ;;  %15279 = vst [vmem:[#allocation44_spill] sm:$0xff] %v6858_v20 }
 0x113   : > { %v6673_v57 = vpop.f32.mrb[15].mxu0  ;;  %v6675_v58 = vpop.f32.mrb[15].mxu1  ;;  %1753 = vrot.lane.b32.xlu1 %v6597_v16, %s6258_s16  ;;  %1008 = vrot.lane.b32.xlu0 %v6665_v40, %s6256_s4 }
 0x114   : > { %v6832_v19 = vpop.permute.xlu0 %1505 }
 0x115   : > { %15275 = vst [vmem:[#allocation40_spill] sm:$0xff] %v6832_v19  ;;  %v549_v19 = vmul.f32 %v6838_v49, %v6539_v46  ;;  %v6862_v23 = vpop.permute.xlu1 %1685 }
 0x116   : > { %15280 = vst [vmem:[#allocation45_spill] sm:$0xff] %v6862_v23 }
 0x117   : > { %1010 = vrot.lane.b32.xlu1 %v6685_v62, %s6256_s4  ;;  %1024 = vrot.lane.b32.xlu0 %v6682_v59, %s6256_s4  ;;  %v922_v28 = vadd.f32 %v6620_v24, %v549_v19  ;;  %v6876_v24 = vadd.f32 %v6573_v7, %v839_v21  ;;  %v6904_v21 = vsub.s32 7, %v6529_v43 }
 0x118   : > { %v6847_v2 = vpop.permute.xlu0 %1680 }
 0x119   : > { %15278 = vst [vmem:[#allocation43_spill] sm:$0xff] %v6847_v2  ;;  %v557_v2 = vmul.f32 %v6838_v49, %v6554_v51  ;;  %v6873_v50 = vadd.f32 %v6562_v60, %v922_v28  ;;  %15283 = vst [vmem:[#allocation48_spill] sm:$0xff] %v6876_v24  ;;  %v6883_v18 = vpop.permute.xlu1 %1695  ;;  %v6891_v28 = vsub.s32 5, %v6529_v43  ;;  %v6916_v23 = vrot.slane %v6537_v45, %v6904_v21 }
 0x11a   : > { %15284 = vst [vmem:[#allocation49_spill] sm:$0xff] %v6883_v18  ;;  %15290 = vst [vmem:[#allocation55_spill] sm:$0xff] %v6904_v21 }
 0x11b   : > { %1026 = vrot.lane.b32.xlu1 %v6692_v1, %s6256_s4  ;;  %1180 = vrot.lane.b32.xlu0 %v6665_v40, %s6257_s30  ;;  %15282 = vst [vmem:[#allocation47_spill] sm:$0xff] %v6873_v50  ;;  %v928_v29 = vadd.f32 %v6638_v30, %v557_v2  ;;  %15287 = vst [vmem:[#allocation52_spill] sm:$0xff] %v6891_v28  ;;  %v6901_v2 = vrot.slane %v6537_v45, %v6891_v28 }
 0x11c   : > { %v6870_v42 = vpop.permute.xlu0 %1690  ;;  %15292 = vst [vmem:[#allocation57_spill] sm:$0xff] %v6916_v23 }
 0x11d   : > { %15281 = vst [vmem:[#allocation46_spill] sm:$0xff] %v6870_v42  ;;  %v6886_v19 = vadd.f32 %v6573_v7, %v928_v29  ;;  %v6897_v30 = vpop.permute.xlu1 %1838  ;;  %15289 = vst [vmem:[#allocation54_spill] sm:$0xff] %v6901_v2  ;;  %v548_v18 = vmul.f32 %v6901_v2, %v6539_v46  ;;  %v556_v56 = vmul.f32 %v6901_v2, %v6554_v51 }
 0x11e   : > { %15288 = vst [vmem:[#allocation53_spill] sm:$0xff] %v6897_v30 }
 0x11f   : > { %1182 = vrot.lane.b32.xlu1 %v6685_v62, %s6257_s30  ;;  %1196 = vrot.lane.b32.xlu0 %v6682_v59, %s6257_s30  ;;  %15285 = vst [vmem:[#allocation50_spill] sm:$0xff] %v6886_v19  ;;  %v835_v30 = vadd.f32 %v6622_v25, %v548_v18  ;;  %v841_v25 = vadd.f32 %v6640_v31, %v556_v56 }
 0x120   : > { %v6888_v42 = vpop.permute.xlu0 %1833 }
 0x121   : > { %15286 = vst [vmem:[#allocation51_spill] sm:$0xff] %v6888_v42  ;;  %v6922_v43 = vpop.permute.xlu1 %1848  ;;  %v6936_v45 = vadd.f32 %v6562_v60, %v835_v30 }
 0x122   : > { %15293 = vst [vmem:[#allocation58_spill] sm:$0xff] %v6922_v43 }
 0x123   : > { %1198 = vrot.lane.b32.xlu1 %v6692_v1, %s6257_s30  ;;  %1743 = vrot.lane.b32.xlu0 %v6665_v40, %s6258_s16  ;;  %15294 = vst [vmem:[#allocation59_spill] sm:$0xff] %v6936_v45 }
 0x124   : > { %v6910_v29 = vpop.permute.xlu0 %1843 }
 0x125   : > { %15291 = vst [vmem:[#allocation56_spill] sm:$0xff] %v6910_v29  ;;  %v550_v29 = vmul.f32 %v6916_v23, %v6539_v46  ;;  %v558_v46 = vmul.f32 %v6916_v23, %v6554_v51 }
 0x127   : > { %1745 = vrot.lane.b32.xlu1 %v6685_v62, %s6258_s16  ;;  %1759 = vrot.lane.b32.xlu0 %v6682_v59, %s6258_s16  ;;  %v924_v43 = vadd.f32 %v6624_v26, %v550_v29  ;;  %v6954_v26 = vadd.f32 %v6573_v7, %v841_v25  ;;  %v930_v31 = vadd.f32 %v6642_v32, %v558_v46 }
 0x129   : > { %v6951_v30 = vadd.f32 %v6562_v60, %v924_v43  ;;  %15296 = vst [vmem:[#allocation61_spill] sm:$0xff] %v6954_v26  ;;  %v6966_v51 = vadd.f32 %v6573_v7, %v930_v31  ;;  %v563_v31 = vmul.f32 %v6823_v13, %v6544_v48 }
 0x12b   : > { %1761 = vrot.lane.b32.xlu1 %v6692_v1, %s6258_s16  ;;  %1004 = vrot.lane.b32.xlu0 %v6720_v10, %s6256_s4  ;;  %15295 = vst [vmem:[#allocation60_spill] sm:$0xff] %v6951_v30  ;;  %15297 = vst [vmem:[#allocation62_spill] sm:$0xff] %v6966_v51  ;;  %v845_v0 = vadd.f32 %v6650_v35, %v563_v31 }
 0x12d   : > { %v7013_v35 = vadd.f32 %v6717_v6, %v845_v0 }
 0x12f   : > { %1006 = vrot.lane.b32.xlu1 %v6736_v41, %s6256_s4  ;;  %1020 = vrot.lane.b32.xlu0 %v6733_v37, %s6256_s4  ;;  %15302 = vst [vmem:[#allocation67_spill] sm:$0xff] %v7013_v35 }
 0x133   : > { %1022 = vrot.lane.b32.xlu1 %v6744_v17, %s6256_s4  ;;  %1176 = vrot.lane.b32.xlu0 %v6720_v10, %s6257_s30 }
 0x137   : > { %1178 = vrot.lane.b32.xlu1 %v6736_v41, %s6257_s30  ;;  %1192 = vrot.lane.b32.xlu0 %v6733_v37, %s6257_s30 }
 0x13b   : > { %1194 = vrot.lane.b32.xlu1 %v6744_v17, %s6257_s30  ;;  %1739 = vrot.lane.b32.xlu0 %v6720_v10, %s6258_s16 }
 0x13f   : > { %1741 = vrot.lane.b32.xlu1 %v6736_v41, %s6258_s16  ;;  %1755 = vrot.lane.b32.xlu0 %v6733_v37, %s6258_s16 }
 0x143   : > { %1757 = vrot.lane.b32.xlu1 %v6744_v17, %s6258_s16  ;;  %1012 = vrot.lane.b32.xlu0 %v6780_v11, %s6256_s4 }
 0x147   : > { %1014 = vrot.lane.b32.xlu1 %v6798_v14, %s6256_s4  ;;  %1028 = vrot.lane.b32.xlu0 %v6795_v3, %s6256_s4 }
 0x14b   : > { %1030 = vrot.lane.b32.xlu1 %v6808_v27, %s6256_s4  ;;  %1184 = vrot.lane.b32.xlu0 %v6780_v11, %s6257_s30 }
 0x14f   : > { %1186 = vrot.lane.b32.xlu1 %v6798_v14, %s6257_s30  ;;  %1200 = vrot.lane.b32.xlu0 %v6795_v3, %s6257_s30 }
 0x153   : > { %1202 = vrot.lane.b32.xlu1 %v6808_v27, %s6257_s30  ;;  %1747 = vrot.lane.b32.xlu0 %v6780_v11, %s6258_s16 }
 0x157   : > { %1749 = vrot.lane.b32.xlu1 %v6798_v14, %s6258_s16  ;;  %1763 = vrot.lane.b32.xlu0 %v6795_v3, %s6258_s16 }
 0x15b   : > { %1765 = vrot.lane.b32.xlu1 %v6808_v27, %s6258_s16  ;;  %1032 = vrot.lane.b32.xlu0 %v6858_v20, %s6256_s4 }
 0x15f   : > { %1034 = vrot.lane.b32.xlu1 %v6876_v24, %s6256_s4  ;;  %1048 = vrot.lane.b32.xlu0 %v6873_v50, %s6256_s4 }
 0x163   : > { %1050 = vrot.lane.b32.xlu1 %v6886_v19, %s6256_s4  ;;  %1204 = vrot.lane.b32.xlu0 %v6858_v20, %s6257_s30 }
 0x167   : > { %1206 = vrot.lane.b32.xlu1 %v6876_v24, %s6257_s30  ;;  %1220 = vrot.lane.b32.xlu0 %v6873_v50, %s6257_s30 }
 0x16b   : > { %1222 = vrot.lane.b32.xlu1 %v6886_v19, %s6257_s30  ;;  %1767 = vrot.lane.b32.xlu0 %v6858_v20, %s6258_s16  ;;  %v7209_v20 = vld [vmem:[%s14405_s3 + $0x1] ss:$4 sm:$0xff] }
 0x16c   : > { %v7232_v1 = vrot.slane %v7209_v20, %v6535_v44  ;;  %v7251_v17 = vrot.slane %v7209_v20, %v6594_v15  ;;  %v7284_v14 = vrot.slane %v7209_v20, %v6542_v47 }
 0x16d   : > { %v6925_v42 = vpop.permute.xlu0 %1000 }
 0x16e   : > { %15322 = vst [vmem:[#allocation86_spill] sm:$0xff] %v7232_v1  ;;  %15324 = vst [vmem:[#allocation88_spill] sm:$0xff] %v7251_v17 }
 0x16f   : > { %1769 = vrot.lane.b32.xlu1 %v6876_v24, %s6258_s16  ;;  %1783 = vrot.lane.b32.xlu0 %v6873_v50, %s6258_s16  ;;  %15330 = vst [vmem:[#allocation94_spill] sm:$0xff] %v7284_v14 }
 0x171   : > { %v6940_v18 = vpop.permute.xlu1 %1002  ;;  %v6942_v52 = vpop.permute.xlu0 %1016 }
 0x173   : > { %1785 = vrot.lane.b32.xlu1 %v6886_v19, %s6258_s16  ;;  %1040 = vrot.lane.b32.xlu0 %v6936_v45, %s6256_s4 }
 0x175   : > { %v6957_v56 = vpop.permute.xlu1 %1018  ;;  %v6959_v29 = vpop.permute.xlu0 %1172 }
 0x177   : > { %1042 = vrot.lane.b32.xlu1 %v6954_v26, %s6256_s4  ;;  %1056 = vrot.lane.b32.xlu0 %v6951_v30, %s6256_s4 }
 0x179   : > { %v6968_v60 = vpop.permute.xlu1 %1174  ;;  %v6970_v43 = vpop.permute.xlu0 %1188 }
 0x17b   : > { %1058 = vrot.lane.b32.xlu1 %v6966_v51, %s6256_s4  ;;  %1212 = vrot.lane.b32.xlu0 %v6936_v45, %s6257_s30 }
 0x17d   : > { %v6976_v32 = vpop.permute.xlu1 %1190  ;;  %v6978_v25 = vpop.permute.xlu0 %1735 }
 0x17e   : > { %15298 = vst [vmem:[#allocation63_spill] sm:$0xff] %v6978_v25 }
 0x17f   : > { %1214 = vrot.lane.b32.xlu1 %v6954_v26, %s6257_s30  ;;  %1228 = vrot.lane.b32.xlu0 %v6951_v30, %s6257_s30 }
 0x181   : > { %v6984_v7 = vpop.permute.xlu1 %1737  ;;  %v6986_v46 = vpop.permute.xlu0 %1751 }
 0x182   : > { %15299 = vst [vmem:[#allocation64_spill] sm:$0xff] %v6984_v7  ;;  %15300 = vst [vmem:[#allocation65_spill] sm:$0xff] %v6986_v46  ;;  %v571_v7 = vmul.f32 %v6823_v13, %v6558_v53  ;;  %v565_v46 = vmul.f32 %v6838_v49, %v6544_v48  ;;  %v573_v13 = vmul.f32 %v6838_v49, %v6558_v53 }
 0x183   : > { %1230 = vrot.lane.b32.xlu1 %v6966_v51, %s6257_s30  ;;  %1775 = vrot.lane.b32.xlu0 %v6936_v45, %s6258_s16 }
 0x184   : > { %v851_v12 = vadd.f32 %v6667_v54, %v571_v7  ;;  %v934_v31 = vadd.f32 %v6652_v36, %v565_v46  ;;  %v940_v7 = vadd.f32 %v6669_v55, %v573_v13 }
 0x185   : > { %v6994_v25 = vpop.permute.xlu1 %1753  ;;  %v6996_v5 = vpop.permute.xlu0 %1008 }
 0x186   : > { %15301 = vst [vmem:[#allocation66_spill] sm:$0xff] %v6994_v25  ;;  %v7023_v54 = vadd.f32 %v6730_v34, %v851_v12  ;;  %v7031_v36 = vadd.f32 %v6717_v6, %v934_v31  ;;  %v7038_v46 = vadd.f32 %v6730_v34, %v940_v7 }
 0x187   : > { %1777 = vrot.lane.b32.xlu1 %v6954_v26, %s6258_s16  ;;  %1791 = vrot.lane.b32.xlu0 %v6951_v30, %s6258_s16 }
 0x188   : > { %15303 = vst [vmem:[#allocation68_spill] sm:$0xff] %v7023_v54  ;;  %15304 = vst [vmem:[#allocation69_spill] sm:$0xff] %v7031_v36 }
 0x189   : > { %v7008_v4 = vpop.permute.xlu1 %1010  ;;  %v7010_v25 = vpop.permute.xlu0 %1024  ;;  %15305 = vst [vmem:[#allocation70_spill] sm:$0xff] %v7038_v46 }
 0x18b   : > { %1793 = vrot.lane.b32.xlu1 %v6966_v51, %s6258_s16  ;;  %1036 = vrot.lane.b32.xlu0 %v7013_v35, %s6256_s4  ;;  %v564_v51 = vmul.f32 %v6901_v2, %v6544_v48 }
 0x18d   : > { %v7026_v30 = vpop.permute.xlu1 %1026  ;;  %v7028_v0 = vpop.permute.xlu0 %1180  ;;  %v847_v50 = vadd.f32 %v6656_v38, %v564_v51 }
 0x18f   : > { %1038 = vrot.lane.b32.xlu1 %v7023_v54, %s6256_s4  ;;  %1052 = vrot.lane.b32.xlu0 %v7031_v36, %s6256_s4  ;;  %v7085_v38 = vadd.f32 %v6717_v6, %v847_v50 }
 0x191   : > { %v7040_v12 = vpop.permute.xlu1 %1182  ;;  %v7042_v49 = vpop.permute.xlu0 %1196  ;;  %15310 = vst [vmem:[#allocation75_spill] sm:$0xff] %v7085_v38 }
 0x193   : > { %1054 = vrot.lane.b32.xlu1 %v7038_v46, %s6256_s4  ;;  %1208 = vrot.lane.b32.xlu0 %v7013_v35, %s6257_s30 }
 0x195   : > { %v7048_v55 = vpop.permute.xlu1 %1198  ;;  %v7050_v13 = vpop.permute.xlu0 %1743 }
 0x196   : > { %15306 = vst [vmem:[#allocation71_spill] sm:$0xff] %v7050_v13 }
 0x197   : > { %1210 = vrot.lane.b32.xlu1 %v7023_v54, %s6257_s30  ;;  %1224 = vrot.lane.b32.xlu0 %v7031_v36, %s6257_s30 }
 0x199   : > { %v7056_v31 = vpop.permute.xlu1 %1745  ;;  %v7058_v7 = vpop.permute.xlu0 %1759 }
 0x19a   : > { %15307 = vst [vmem:[#allocation72_spill] sm:$0xff] %v7056_v31  ;;  %15308 = vst [vmem:[#allocation73_spill] sm:$0xff] %v7058_v7  ;;  %v572_v31 = vmul.f32 %v6901_v2, %v6558_v53  ;;  %v566_v7 = vmul.f32 %v6916_v23, %v6544_v48  ;;  %v574_v2 = vmul.f32 %v6916_v23, %v6558_v53  ;;  %v7138_v23 = vld [vmem:[%s14405_s3] ss:$4 sm:$0xff] }
 0x19b   : > { %1226 = vrot.lane.b32.xlu1 %v7038_v46, %s6257_s30  ;;  %1771 = vrot.lane.b32.xlu0 %v7013_v35, %s6258_s16 }
 0x19c   : > { %v853_v26 = vadd.f32 %v6673_v57, %v572_v31  ;;  %v936_v51 = vadd.f32 %v6658_v39, %v566_v7  ;;  %v942_v57 = vadd.f32 %v6675_v58, %v574_v2  ;;  %v15315_v2 = vlaneseq }
 0x19d   : > { %v7066_v13 = vpop.permute.xlu1 %1761  ;;  %v7068_v19 = vpop.permute.xlu0 %1004 }
 0x19e   : > { %15309 = vst [vmem:[#allocation74_spill] sm:$0xff] %v7066_v13  ;;  %v7095_v48 = vadd.f32 %v6730_v34, %v853_v26  ;;  %v7103_v39 = vadd.f32 %v6717_v6, %v936_v51  ;;  %v7110_v53 = vadd.f32 %v6730_v34, %v942_v57  ;;  %v7127_v34 = vand.u32 127, %v15315_v2 }
 0x19f   : > { %1773 = vrot.lane.b32.xlu1 %v7023_v54, %s6258_s16  ;;  %1787 = vrot.lane.b32.xlu0 %v7031_v36, %s6258_s16  ;;  %v7167_v36 = vrot.slane %v7138_v23, %v6542_v47 }
 0x1a0   : > { %15311 = vst [vmem:[#allocation76_spill] sm:$0xff] %v7095_v48  ;;  %15312 = vst [vmem:[#allocation77_spill] sm:$0xff] %v7103_v39  ;;  %vm1066_vm1 = vcmp.lt.s32.totalorder %v7127_v34, 1  ;;  %vm1236_vm2 = vcmp.lt.s32.totalorder %v7127_v34, 127  ;;  %vm1645_vm3 = vcmp.lt.s32.totalorder %v7127_v34, 32  ;;  %vm2169_vm4 = vcmp.lt.s32.totalorder %v7127_v34, 96 }
 0x1a1   : > { %v7080_v45 = vpop.permute.xlu1 %1006  ;;  %v7082_v13 = vpop.permute.xlu0 %1020  ;;  %15313 = vst [vmem:[#allocation78_spill] sm:$0xff] %v7110_v53  ;;  %15320 = vst [vmem:[#allocation84_spill] sm:$0xff] %v7167_v36  ;;  %v1092_v54 = vsel %vm1066_vm1, %v6940_v18, %v7008_v4  ;;  %v1084_v3 = vsel %vm1066_vm1, %v6957_v56, %v7026_v30  ;;  %v1262_v16 = vsel %vm1236_vm2, %v6968_v60, %v7040_v12 }
 0x1a3   : > { %1789 = vrot.lane.b32.xlu1 %v7038_v46, %s6258_s16  ;;  %1044 = vrot.lane.b32.xlu0 %v7085_v38, %s6256_s4 }
 0x1a5   : > { %v7098_v31 = vpop.permute.xlu1 %1022  ;;  %v7100_v50 = vpop.permute.xlu0 %1176 }
 0x1a7   : > { %1046 = vrot.lane.b32.xlu1 %v7095_v48, %s6256_s4  ;;  %1060 = vrot.lane.b32.xlu0 %v7103_v39, %s6256_s4 }
 0x1a9   : > { %v7112_v26 = vpop.permute.xlu1 %1178  ;;  %v7114_v7 = vpop.permute.xlu0 %1192 }
 0x1ab   : > { %1062 = vrot.lane.b32.xlu1 %v7110_v53, %s6256_s4  ;;  %1216 = vrot.lane.b32.xlu0 %v7085_v38, %s6257_s30 }
 0x1ad   : > { %v7120_v58 = vpop.permute.xlu1 %1194  ;;  %v7122_v6 = vpop.permute.xlu0 %1739 }
 0x1ae   : > { %15314 = vst [vmem:[#allocation79_spill] sm:$0xff] %v7122_v6 }
 0x1af   : > { %1218 = vrot.lane.b32.xlu1 %v7095_v48, %s6257_s30  ;;  %1232 = vrot.lane.b32.xlu0 %v7103_v39, %s6257_s30 }
 0x1b1   : > { %v7131_v51 = vpop.permute.xlu1 %1741  ;;  %v7133_v57 = vpop.permute.xlu0 %1755 }
 0x1b2   : > { %15316 = vst [vmem:[#allocation80_spill] sm:$0xff] %v7131_v51  ;;  %15317 = vst [vmem:[#allocation81_spill] sm:$0xff] %v7133_v57  ;;  %v7151_v51 = vrot.slane %v7138_v23, %v6594_v15  ;;  %v1091_v57 = vsel %vm1066_vm1, %v6925_v42, %v6996_v5 }
 0x1b3   : > { %1234 = vrot.lane.b32.xlu1 %v7110_v53, %s6257_s30  ;;  %1779 = vrot.lane.b32.xlu0 %v7085_v38, %s6258_s16 }
 0x1b4   : > { %15319 = vst [vmem:[#allocation83_spill] sm:$0xff] %v7151_v51  ;;  %v7170_v38 = vmul.f32 %v7151_v51, %v1091_v57 }
 0x1b5   : > { %v7145_v2 = vpop.permute.xlu1 %1757  ;;  %v7147_v6 = vpop.permute.xlu0 %1012 }
 0x1b6   : > { %15318 = vst [vmem:[#allocation82_spill] sm:$0xff] %v7145_v2  ;;  %v1093_v47 = vsel %vm1066_vm1, %v7068_v19, %v7147_v6 }
 0x1b7   : > { %1781 = vrot.lane.b32.xlu1 %v7095_v48, %s6258_s16  ;;  %1795 = vrot.lane.b32.xlu0 %v7103_v39, %s6258_s16  ;;  %v1087_v39 = vsel %vm1066_vm1, %v6996_v5, %v6942_v52  ;;  %v7185_v48 = vmul.f32 %v7151_v51, %v1092_v54  ;;  %v1088_v5 = vsel %vm1066_vm1, %v7008_v4, %v6957_v56 }
 0x1b8   : > { %v7192_v24 = vmul.f32 %v7167_v36, %v1087_v39  ;;  %v1083_v54 = vsel %vm1066_vm1, %v6942_v52, %v7010_v25  ;;  %v7217_v4 = vmul.f32 %v7167_v36, %v1088_v5  ;;  %v1261_v5 = vsel %vm1236_vm2, %v6959_v29, %v7028_v0 }
 0x1b9   : > { %v7161_v46 = vpop.permute.xlu1 %1014  ;;  %v7163_v2 = vpop.permute.xlu0 %1028  ;;  %v7254_v37 = vmul.f32 %v7232_v1, %v1261_v5 }
 0x1bb   : > { %1797 = vrot.lane.b32.xlu1 %v7110_v53, %s6258_s16  ;;  %1589 = vrot.lane.b32.xlu0 %v7170_v38, %s6258_s16  ;;  %v7200_v53 = vrot.slane %v7138_v23, %v6616_v22  ;;  %15325 = vst [vmem:[#allocation89_spill] sm:$0xff] %v7254_v37 }
 0x1bd   : > { %v7187_v57 = vpop.permute.xlu1 %1030  ;;  %v7189_v35 = vpop.permute.xlu0 %1184  ;;  %15321 = vst [vmem:[#allocation85_spill] sm:$0xff] %v7200_v53  ;;  %v7224_v52 = vmul.f32 %v7200_v53, %v1083_v54  ;;  %v7243_v54 = vmul.f32 %v7200_v53, %v1084_v3  ;;  %v1257_v3 = vsel %vm1236_vm2, %v7028_v0, %v6970_v43  ;;  %v1258_v0 = vsel %vm1236_vm2, %v7040_v12, %v6976_v32 }
 0x1be   : > { %v7276_v8 = vmul.f32 %v7251_v17, %v1257_v3  ;;  %v7295_v3 = vmul.f32 %v7251_v17, %v1258_v0  ;;  %v1259_v62 = vsel %vm1236_vm2, %v7189_v35, %v7114_v7 }
 0x1bf   : > { %1591 = vrot.lane.b32.xlu1 %v7185_v48, %s6258_s16  ;;  %1597 = vrot.lane.b32.xlu0 %v7192_v24, %s6258_s16 }
 0x1c0   : > { %15329 = vst [vmem:[#allocation93_spill] sm:$0xff] %v7276_v8  ;;  %15331 = vst [vmem:[#allocation95_spill] sm:$0xff] %v7295_v3 }
 0x1c1   : > { %v7219_v39 = vpop.permute.xlu1 %1186  ;;  %v7221_v27 = vpop.permute.xlu0 %1200 }
 0x1c2   : > { %v1264_v11 = vsel %vm1236_vm2, %v7112_v26, %v7219_v39 }
 0x1c3   : > { %1599 = vrot.lane.b32.xlu1 %v7217_v4, %s6258_s16  ;;  %1605 = vrot.lane.b32.xlu0 %v7224_v52, %s6258_s16 }
 0x1c5   : > { %v7245_v59 = vpop.permute.xlu1 %1202  ;;  %v7247_v56 = vpop.permute.xlu0 %1747 }
 0x1c6   : > { %15323 = vst [vmem:[#allocation87_spill] sm:$0xff] %v7247_v56  ;;  %v7269_v56 = vmul.f32 %v7232_v1, %v1262_v16  ;;  %v1253_v16 = vsel %vm1236_vm2, %v6970_v43, %v7042_v49  ;;  %v1254_v43 = vsel %vm1236_vm2, %v6976_v32, %v7048_v55  ;;  %v7324_v32 = vmul.f32 %v7151_v51, %v1093_v47 }
 0x1c7   : > { %1607 = vrot.lane.b32.xlu1 %v7243_v54, %s6258_s16  ;;  %1920 = vrot.lane.b32.xlu0 %v7254_v37, %s6258_s16  ;;  %v7317_v0 = vmul.f32 %v7284_v14, %v1254_v43  ;;  %v1263_v37 = vsel %vm1236_vm2, %v7100_v50, %v7189_v35  ;;  %v1260_v35 = vsel %vm1236_vm2, %v7219_v39, %v7120_v58 }
 0x1c8   : > { %15326 = vst [vmem:[#allocation90_spill] sm:$0xff] %v7269_v56  ;;  %v7440_v39 = vrot.slane %v7138_v23, %v6813_v33 }
 0x1c9   : > { %v7271_v5 = vpop.permute.xlu1 %1749  ;;  %v7273_v15 = vpop.permute.xlu0 %1763  ;;  %15334 = vst [vmem:[#allocation98_spill] sm:$0xff] %v7317_v0 }
 0x1ca   : > { %15327 = vst [vmem:[#allocation91_spill] sm:$0xff] %v7271_v5  ;;  %15328 = vst [vmem:[#allocation92_spill] sm:$0xff] %v7273_v15  ;;  %v7302_v5 = vmul.f32 %v7284_v14, %v1253_v16 }
 0x1cb   : > { %1922 = vrot.lane.b32.xlu1 %v7269_v56, %s6258_s16  ;;  %1928 = vrot.lane.b32.xlu0 %v7276_v8, %s6258_s16  ;;  %v1094_v8 = vsel %vm1066_vm1, %v7080_v45, %v7161_v46  ;;  %15349 = vst [vmem:[#allocation113_spill] sm:$0xff] %v7440_v39 }
 0x1cc   : > { %15333 = vst [vmem:[#allocation97_spill] sm:$0xff] %v7302_v5  ;;  %v7339_v43 = vmul.f32 %v7151_v51, %v1094_v8 }
 0x1cd   : > { %v7297_v15 = vpop.permute.xlu1 %1765  ;;  %v7299_v12 = vpop.permute.xlu0 %1032 }
 0x1ce   : > { %15332 = vst [vmem:[#allocation96_spill] sm:$0xff] %v7297_v15  ;;  %15335 = vst [vmem:[#allocation99_spill] sm:$0xff] %v7339_v43 }
 0x1cf   : > { %1930 = vrot.lane.b32.xlu1 %v7295_v3, %s6258_s16  ;;  %1936 = vrot.lane.b32.xlu0 %v7302_v5, %s6258_s16  ;;  %v1089_v5 = vsel %vm1066_vm1, %v7147_v6, %v7082_v13  ;;  %v1090_v6 = vsel %vm1066_vm1, %v7161_v46, %v7098_v31 }
 0x1d0   : > { %v7346_v56 = vmul.f32 %v7167_v36, %v1089_v5  ;;  %v7361_v8 = vmul.f32 %v7167_v36, %v1090_v6 }
 0x1d1   : > { %v7319_v16 = vpop.permute.xlu1 %1034  ;;  %v7321_v15 = vpop.permute.xlu0 %1048 }
 0x1d2   : > { %15336 = vst [vmem:[#allocation100_spill] sm:$0xff] %v7346_v56  ;;  %15337 = vst [vmem:[#allocation101_spill] sm:$0xff] %v7361_v8 }
 0x1d3   : > { %1938 = vrot.lane.b32.xlu1 %v7317_v0, %s6258_s16  ;;  %1593 = vrot.lane.b32.xlu0 %v7324_v32, %s6258_s16  ;;  %v1085_v0 = vsel %vm1066_vm1, %v7082_v13, %v7163_v2  ;;  %v1086_v13 = vsel %vm1066_vm1, %v7098_v31, %v7187_v57  ;;  %v7390_v31 = vmul.f32 %v7232_v1, %v1263_v37 }
 0x1d4   : > { %v7368_v46 = vmul.f32 %v7200_v53, %v1085_v0  ;;  %v7383_v6 = vmul.f32 %v7200_v53, %v1086_v13  ;;  %v7405_v13 = vmul.f32 %v7232_v1, %v1264_v11  ;;  %v7427_v11 = vmul.f32 %v7251_v17, %v1260_v35 }
 0x1d5   : > { %v7341_v47 = vpop.permute.xlu1 %1050  ;;  %v7343_v3 = vpop.permute.xlu0 %1204  ;;  %15341 = vst [vmem:[#allocation105_spill] sm:$0xff] %v7390_v31  ;;  %v1079_v35 = vsel %vm1066_vm1, %v7010_v25, %v7299_v12  ;;  %v7462_v25 = vrot.slane %v7209_v20, %v6616_v22 }
 0x1d6   : > { %15338 = vst [vmem:[#allocation102_spill] sm:$0xff] %v7368_v46  ;;  %15339 = vst [vmem:[#allocation103_spill] sm:$0xff] %v7383_v6 }
 0x1d7   : > { %1595 = vrot.lane.b32.xlu1 %v7339_v43, %s6258_s16  ;;  %1601 = vrot.lane.b32.xlu0 %v7346_v56, %s6258_s16  ;;  %15342 = vst [vmem:[#allocation106_spill] sm:$0xff] %v7405_v13  ;;  %15346 = vst [vmem:[#allocation110_spill] sm:$0xff] %v7427_v11 }
 0x1d8   : > { %15352 = vst [vmem:[#allocation116_spill] sm:$0xff] %v7462_v25 }
 0x1d9   : > { %v7363_v5 = vpop.permute.xlu1 %1206  ;;  %v7365_v51 = vpop.permute.xlu0 %1220 }
 0x1da   : > { %v1250_v22 = vsel %vm1236_vm2, %v7048_v55, %v7363_v5  ;;  %v7498_v55 = vrot.slane %v7138_v23, %v6891_v28 }
 0x1db   : > { %1603 = vrot.lane.b32.xlu1 %v7361_v8, %s6258_s16  ;;  %1609 = vrot.lane.b32.xlu0 %v7368_v46, %s6258_s16 }
 0x1dc   : > { %15357 = vst [vmem:[#allocation121_spill] sm:$0xff] %v7498_v55 }
 0x1dd   : > { %v7385_v0 = vpop.permute.xlu1 %1222  ;;  %v7387_v36 = vpop.permute.xlu0 %1767 }
 0x1de   : > { %15340 = vst [vmem:[#allocation104_spill] sm:$0xff] %v7387_v36  ;;  %v7412_v36 = vmul.f32 %v7251_v17, %v1259_v62 }
 0x1df   : > { %1611 = vrot.lane.b32.xlu1 %v7383_v6, %s6258_s16  ;;  %1924 = vrot.lane.b32.xlu0 %v7390_v31, %s6258_s16  ;;  %v1255_v31 = vsel %vm1236_vm2, %v7114_v7, %v7221_v27  ;;  %v1256_v7 = vsel %vm1236_vm2, %v7120_v58, %v7245_v59 }
 0x1e0   : > { %15345 = vst [vmem:[#allocation109_spill] sm:$0xff] %v7412_v36 }
 0x1e1   : > { %v7407_v37 = vpop.permute.xlu1 %1769  ;;  %v7409_v53 = vpop.permute.xlu0 %1783 }
 0x1e2   : > { %15343 = vst [vmem:[#allocation107_spill] sm:$0xff] %v7407_v37  ;;  %15344 = vst [vmem:[#allocation108_spill] sm:$0xff] %v7409_v53  ;;  %v7432_v53 = vmul.f32 %v7284_v14, %v1255_v31  ;;  %v7451_v31 = vmul.f32 %v7284_v14, %v1256_v7  ;;  %v1080_v37 = vsel %vm1066_vm1, %v7026_v30, %v7319_v16 }
 0x1e3   : > { %1926 = vrot.lane.b32.xlu1 %v7405_v13, %s6258_s16  ;;  %1932 = vrot.lane.b32.xlu0 %v7412_v36, %s6258_s16  ;;  %v1249_v7 = vsel %vm1236_vm2, %v7042_v49, %v7343_v3  ;;  %v7484_v49 = vrot.slane %v7138_v23, %v6535_v44  ;;  %v7520_v13 = vrot.slane %v7138_v23, %v6826_v63 }
 0x1e4   : > { %15348 = vst [vmem:[#allocation112_spill] sm:$0xff] %v7432_v53  ;;  %15350 = vst [vmem:[#allocation114_spill] sm:$0xff] %v7451_v31 }
 0x1e5   : > { %v7429_v62 = vpop.permute.xlu1 %1785  ;;  %v1041_v1 = vpop.permute.xlu0 %1040  ;;  %15355 = vst [vmem:[#allocation119_spill] sm:$0xff] %v7484_v49  ;;  %15361 = vst [vmem:[#allocation125_spill] sm:$0xff] %v7520_v13 }
 0x1e6   : > { %15347 = vst [vmem:[#allocation111_spill] sm:$0xff] %v7429_v62  ;;  %v7454_v62 = vmul.f32 %v7440_v39, %v1079_v35  ;;  %v7473_v35 = vmul.f32 %v7440_v39, %v1080_v37  ;;  %v7494_v37 = vmul.f32 %v7462_v25, %v1250_v22 }
 0x1e7   : > { %1934 = vrot.lane.b32.xlu1 %v7427_v11, %s6258_s16  ;;  %1940 = vrot.lane.b32.xlu0 %v7432_v53, %s6258_s16  ;;  %v7476_v53 = vmul.f32 %v7462_v25, %v1249_v7 }
 0x1e8   : > { %15351 = vst [vmem:[#allocation115_spill] sm:$0xff] %v7454_v62  ;;  %15353 = vst [vmem:[#allocation117_spill] sm:$0xff] %v7473_v35 }
 0x1e9   : > { %v1043_v17 = vpop.permute.xlu1 %1042  ;;  %v1057_v58 = vpop.permute.xlu0 %1056  ;;  %15354 = vst [vmem:[#allocation118_spill] sm:$0xff] %v7476_v53  ;;  %15356 = vst [vmem:[#allocation120_spill] sm:$0xff] %v7494_v37 }
 0x1eb   : > { %1942 = vrot.lane.b32.xlu1 %v7451_v31, %s6258_s16  ;;  %1613 = vrot.lane.b32.xlu0 %v7454_v62, %s6258_s16  ;;  %v1095_v31 = vsel %vm1066_vm1, %v1057_v58, %v6925_v42 }
 0x1ec   : > { %v7501_v44 = vmul.f32 %v7484_v49, %v1095_v31 }
 0x1ed   : > { %v1059_v14 = vpop.permute.xlu1 %1058  ;;  %v1213_v30 = vpop.permute.xlu0 %1212 }
 0x1ee   : > { %15358 = vst [vmem:[#allocation122_spill] sm:$0xff] %v7501_v44  ;;  %v1096_v42 = vsel %vm1066_vm1, %v1059_v14, %v6940_v18 }
 0x1ef   : > { %1615 = vrot.lane.b32.xlu1 %v7473_v35, %s6258_s16  ;;  %1944 = vrot.lane.b32.xlu0 %v7476_v53, %s6258_s16  ;;  %v1075_v53 = vsel %vm1066_vm1, %v7299_v12, %v1041_v1  ;;  %v7514_v22 = vmul.f32 %v7484_v49, %v1096_v42  ;;  %v1076_v12 = vsel %vm1066_vm1, %v7319_v16, %v1043_v17 }
 0x1f0   : > { %v7523_v18 = vmul.f32 %v7498_v55, %v1075_v53  ;;  %v7536_v42 = vmul.f32 %v7498_v55, %v1076_v12  ;;  %v7550_v16 = vrot.slane %v7138_v23, %v6904_v21  ;;  %v1067_v12 = vsel %vm1066_vm1, %v7321_v15, %v1057_v58 }
 0x1f1   : > { %v1215_v7 = vpop.permute.xlu1 %1214  ;;  %v1229_v11 = vpop.permute.xlu0 %1228  ;;  %15359 = vst [vmem:[#allocation123_spill] sm:$0xff] %v7514_v22  ;;  %v1068_v23 = vsel %vm1066_vm1, %v7341_v47, %v1059_v14  ;;  %v7588_v14 = vrot.slane %v7209_v20, %v6891_v28 }
 0x1f2   : > { %15362 = vst [vmem:[#allocation126_spill] sm:$0xff] %v7523_v18  ;;  %15363 = vst [vmem:[#allocation127_spill] sm:$0xff] %v7536_v42 }
 0x1f3   : > { %1946 = vrot.lane.b32.xlu1 %v7494_v37, %s6258_s16  ;;  %1581 = vrot.lane.b32.xlu0 %v7501_v44, %s6258_s16  ;;  %v1071_v37 = vsel %vm1066_vm1, %v1041_v1, %v7321_v15  ;;  %v1072_v1 = vsel %vm1066_vm1, %v1043_v17, %v7341_v47  ;;  %15367 = vst [vmem:[#allocation131_spill] sm:$0xff] %v7550_v16  ;;  %15373 = vst [vmem:[#allocation137_spill] sm:$0xff] %v7588_v14 }
 0x1f4   : > { %v7543_v40 = vmul.f32 %v7520_v13, %v1071_v37  ;;  %v7560_v37 = vmul.f32 %v7520_v13, %v1072_v1  ;;  %v7565_v17 = vmul.f32 %v7550_v16, %v1067_v12  ;;  %v7572_v15 = vrot.slane %v7209_v20, %v6813_v33 }
 0x1f5   : > { %v1231_v36 = vpop.permute.xlu1 %1230  ;;  %v7516_v31 = vpop.permute.xlu0 %1775  ;;  %v7582_v1 = vmul.f32 %v7550_v16, %v1068_v23  ;;  %v1241_v23 = vsel %vm1236_vm2, %v1213_v30, %v7365_v51 }
 0x1f6   : > { %15360 = vst [vmem:[#allocation124_spill] sm:$0xff] %v7516_v31  ;;  %15366 = vst [vmem:[#allocation130_spill] sm:$0xff] %v7543_v40  ;;  %v7611_v33 = vmul.f32 %v7588_v14, %v1241_v23 }
 0x1f7   : > { %1583 = vrot.lane.b32.xlu1 %v7514_v22, %s6258_s16  ;;  %1621 = vrot.lane.b32.xlu0 %v7523_v18, %s6258_s16  ;;  %15368 = vst [vmem:[#allocation132_spill] sm:$0xff] %v7560_v37  ;;  %15370 = vst [vmem:[#allocation134_spill] sm:$0xff] %v7565_v17 }
 0x1f8   : > { %15371 = vst [vmem:[#allocation135_spill] sm:$0xff] %v7572_v15  ;;  %15372 = vst [vmem:[#allocation136_spill] sm:$0xff] %v7582_v1 }
 0x1f9   : > { %v7538_v31 = vpop.permute.xlu1 %1777  ;;  %v7540_v53 = vpop.permute.xlu0 %1791  ;;  %15376 = vst [vmem:[#allocation140_spill] sm:$0xff] %v7611_v33 }
 0x1fa   : > { %15364 = vst [vmem:[#allocation128_spill] sm:$0xff] %v7538_v31  ;;  %15365 = vst [vmem:[#allocation129_spill] sm:$0xff] %v7540_v53  ;;  %v1245_v31 = vsel %vm1236_vm2, %v7343_v3, %v1213_v30  ;;  %v1246_v3 = vsel %vm1236_vm2, %v7363_v5, %v1215_v7  ;;  %v1242_v5 = vsel %vm1236_vm2, %v1215_v7, %v7385_v0 }
 0x1fb   : > { %1623 = vrot.lane.b32.xlu1 %v7536_v42, %s6258_s16  ;;  %1629 = vrot.lane.b32.xlu0 %v7543_v40, %s6258_s16  ;;  %v7591_v47 = vmul.f32 %v7572_v15, %v1245_v31  ;;  %v7606_v28 = vmul.f32 %v7572_v15, %v1246_v3  ;;  %v7618_v30 = vrot.slane %v7209_v20, %v6826_v63 }
 0x1fc   : > { %v1237_v3 = vsel %vm1236_vm2, %v7365_v51, %v1229_v11  ;;  %v7630_v23 = vmul.f32 %v7588_v14, %v1242_v5  ;;  %v1238_v51 = vsel %vm1236_vm2, %v7385_v0, %v1231_v36  ;;  %v1265_v5 = vsel %vm1236_vm2, %v1229_v11, %v6959_v29 }
 0x1fd   : > { %v7562_v53 = vpop.permute.xlu1 %1793  ;;  %v1037_v58 = vpop.permute.xlu0 %1036  ;;  %15374 = vst [vmem:[#allocation138_spill] sm:$0xff] %v7591_v47  ;;  %15375 = vst [vmem:[#allocation139_spill] sm:$0xff] %v7606_v28  ;;  %v7639_v63 = vmul.f32 %v7618_v30, %v1237_v3  ;;  %v1266_v0 = vsel %vm1236_vm2, %v1231_v36, %v6968_v60 }
 0x1fe   : > { %15369 = vst [vmem:[#allocation133_spill] sm:$0xff] %v7562_v53  ;;  %15377 = vst [vmem:[#allocation141_spill] sm:$0xff] %v7618_v30  ;;  %v1081_v29 = vsel %vm1066_vm1, %v7163_v2, %v1037_v58 }
 0x1ff   : > { %1631 = vrot.lane.b32.xlu1 %v7560_v37, %s6258_s16  ;;  %1637 = vrot.lane.b32.xlu0 %v7565_v17, %s6258_s16  ;;  %15379 = vst [vmem:[#allocation143_spill] sm:$0xff] %v7639_v63 }
 0x201   : > { %v7584_v12 = vpop.permute.xlu1 %1038  ;;  %v7596_v53 = vpop.permute.xlu0 %1052 }
 0x202   : > { %v1082_v60 = vsel %vm1066_vm1, %v7187_v57, %v7584_v12 }
 0x203   : > { %1639 = vrot.lane.b32.xlu1 %v7582_v1, %s6258_s16  ;;  %1952 = vrot.lane.b32.xlu0 %v7591_v47, %s6258_s16  ;;  %v7636_v47 = vrot.slane %v7209_v20, %v6904_v21  ;;  %v7654_v20 = vmul.f32 %v7618_v30, %v1238_v51 }
 0x205   : > { %v7608_v31 = vpop.permute.xlu1 %1054  ;;  %v7620_v41 = vpop.permute.xlu0 %1208  ;;  %15378 = vst [vmem:[#allocation142_spill] sm:$0xff] %v7636_v47  ;;  %15380 = vst [vmem:[#allocation144_spill] sm:$0xff] %v7654_v20  ;;  %v7674_v11 = vmul.f32 %v7636_v47, %v1266_v0  ;;  %v7696_v0 = vmul.f32 %v7440_v39, %v1082_v60 }
 0x206   : > { %v1251_v2 = vsel %vm1236_vm2, %v7221_v27, %v7620_v41 }
 0x207   : > { %1954 = vrot.lane.b32.xlu1 %v7606_v28, %s6258_s16  ;;  %1960 = vrot.lane.b32.xlu0 %v7611_v33, %s6258_s16  ;;  %v7659_v33 = vmul.f32 %v7636_v47, %v1265_v5  ;;  %15383 = vst [vmem:[#allocation147_spill] sm:$0xff] %v7674_v11  ;;  %v7679_v5 = vmul.f32 %v7440_v39, %v1081_v29  ;;  %15387 = vst [vmem:[#allocation151_spill] sm:$0xff] %v7696_v0 }
 0x208   : > { %v7701_v57 = vmul.f32 %v7462_v25, %v1251_v2 }
 0x209   : > { %v7632_v7 = vpop.permute.xlu1 %1210  ;;  %v7644_v28 = vpop.permute.xlu0 %1224  ;;  %15381 = vst [vmem:[#allocation145_spill] sm:$0xff] %v7659_v33  ;;  %15385 = vst [vmem:[#allocation149_spill] sm:$0xff] %v7679_v5 }
 0x20a   : > { %15389 = vst [vmem:[#allocation153_spill] sm:$0xff] %v7701_v57 }
 0x20b   : > { %1962 = vrot.lane.b32.xlu1 %v7630_v23, %s6258_s16  ;;  %1968 = vrot.lane.b32.xlu0 %v7639_v63, %s6258_s16  ;;  %v15536_v63 = vld [vmem:[#allocation112_spill] sm:$0xff] }
 0x20d   : > { %v7656_v3 = vpop.permute.xlu1 %1226  ;;  %v7664_v21 = vpop.permute.xlu0 %1771 }
 0x20e   : > { %15382 = vst [vmem:[#allocation146_spill] sm:$0xff] %v7664_v21 }
 0x20f   : > { %1970 = vrot.lane.b32.xlu1 %v7654_v20, %s6258_s16  ;;  %1976 = vrot.lane.b32.xlu0 %v7659_v33, %s6258_s16  ;;  %v15528_v20 = vld [vmem:[#allocation109_spill] sm:$0xff] }
 0x211   : > { %v7676_v51 = vpop.permute.xlu1 %1773  ;;  %v7685_v36 = vpop.permute.xlu0 %1787 }
 0x212   : > { %15384 = vst [vmem:[#allocation148_spill] sm:$0xff] %v7676_v51  ;;  %15386 = vst [vmem:[#allocation150_spill] sm:$0xff] %v7685_v36  ;;  %v1252_v36 = vsel %vm1236_vm2, %v7245_v59, %v7632_v7 }
 0x213   : > { %1978 = vrot.lane.b32.xlu1 %v7674_v11, %s6258_s16  ;;  %1617 = vrot.lane.b32.xlu0 %v7679_v5, %s6258_s16  ;;  %v7712_v60 = vmul.f32 %v7462_v25, %v1252_v36 }
 0x215   : > { %v7698_v29 = vpop.permute.xlu1 %1789  ;;  %v1045_v27 = vpop.permute.xlu0 %1044 }
 0x216   : > { %15388 = vst [vmem:[#allocation152_spill] sm:$0xff] %v7698_v29  ;;  %v1077_v51 = vsel %vm1066_vm1, %v1037_v58, %v1045_v27  ;;  %v1073_v58 = vsel %vm1066_vm1, %v1045_v27, %v7596_v53 }
 0x217   : > { %1619 = vrot.lane.b32.xlu1 %v7696_v0, %s6258_s16  ;;  %1948 = vrot.lane.b32.xlu0 %v7701_v57, %s6258_s16  ;;  %v7733_v11 = vmul.f32 %v7498_v55, %v1077_v51  ;;  %v7749_v51 = vmul.f32 %v7520_v13, %v1073_v58 }
 0x219   : > { %v1047_v39 = vpop.permute.xlu1 %1046  ;;  %v1061_v29 = vpop.permute.xlu0 %1060  ;;  %15392 = vst [vmem:[#allocation156_spill] sm:$0xff] %v7733_v11  ;;  %15394 = vst [vmem:[#allocation158_spill] sm:$0xff] %v7749_v51 }
 0x21a   : > { %v1097_v2 = vsel %vm1066_vm1, %v1061_v29, %v7068_v19  ;;  %v1069_v27 = vsel %vm1066_vm1, %v7596_v53, %v1061_v29 }
 0x21b   : > { %1950 = vrot.lane.b32.xlu1 %v7712_v60, %s6258_s16  ;;  %v7720_v59 = vmul.f32 %v7484_v49, %v1097_v2  ;;  %v1078_v2 = vsel %vm1066_vm1, %v7584_v12, %v1047_v39  ;;  %v1074_v12 = vsel %vm1066_vm1, %v1047_v39, %v7608_v31 }
 0x21c   : > { %v7764_v58 = vmul.f32 %v7520_v13, %v1074_v12 }
 0x21d   : > { %15390 = vst [vmem:[#allocation154_spill] sm:$0xff] %v7720_v59  ;;  %v1063_v21 = vpop.permute.xlu1 %1062  ;;  %1585 = vrot.lane.b32.xlu0 %v7720_v59, %s6258_s16  ;;  %v1217_v25 = vpop.permute.xlu0 %1216 }
 0x21e   : > { %v1098_v36 = vsel %vm1066_vm1, %v1063_v21, %v7080_v45  ;;  %15396 = vst [vmem:[#allocation160_spill] sm:$0xff] %v7764_v58  ;;  %v1070_v39 = vsel %vm1066_vm1, %v7608_v31, %v1063_v21  ;;  %v1247_v53 = vsel %vm1236_vm2, %v7620_v41, %v1217_v25  ;;  %v1243_v21 = vsel %vm1236_vm2, %v1217_v25, %v7644_v28 }
 0x21f   : > { %v7730_v19 = vmul.f32 %v7484_v49, %v1098_v36  ;;  %v7746_v49 = vmul.f32 %v7498_v55, %v1078_v2  ;;  %v7767_v55 = vmul.f32 %v7550_v16, %v1069_v27  ;;  %v7784_v27 = vmul.f32 %v7550_v16, %v1070_v39 }
 0x220   : > { %v7787_v13 = vmul.f32 %v7572_v15, %v1247_v53  ;;  %v7807_v16 = vmul.f32 %v7588_v14, %v1243_v21 }
 0x221   : > { %15391 = vst [vmem:[#allocation155_spill] sm:$0xff] %v7730_v19  ;;  %1587 = vrot.lane.b32.xlu1 %v7730_v19, %s6258_s16  ;;  %v1219_v45 = vpop.permute.xlu1 %1218  ;;  %1625 = vrot.lane.b32.xlu0 %v7733_v11, %s6258_s16  ;;  %v1233_v36 = vpop.permute.xlu0 %1232  ;;  %15393 = vst [vmem:[#allocation157_spill] sm:$0xff] %v7746_v49 }
 0x222   : > { %15397 = vst [vmem:[#allocation161_spill] sm:$0xff] %v7767_v55  ;;  %15400 = vst [vmem:[#allocation164_spill] sm:$0xff] %v7784_v27  ;;  %v1248_v41 = vsel %vm1236_vm2, %v7632_v7, %v1219_v45  ;;  %v1244_v25 = vsel %vm1236_vm2, %v1219_v45, %v7656_v3  ;;  %v1239_v7 = vsel %vm1236_vm2, %v7644_v28, %v1233_v36 }
 0x223   : > { %15401 = vst [vmem:[#allocation165_spill] sm:$0xff] %v7787_v13  ;;  %v7804_v53 = vmul.f32 %v7572_v15, %v1248_v41  ;;  %15405 = vst [vmem:[#allocation169_spill] sm:$0xff] %v7807_v16  ;;  %v7824_v21 = vmul.f32 %v7588_v14, %v1244_v25  ;;  %v7827_v15 = vmul.f32 %v7618_v30, %v1239_v7 }
 0x224   : > { %v1267_v45 = vsel %vm1236_vm2, %v1233_v36, %v7100_v50 }
 0x225   : > { %1627 = vrot.lane.b32.xlu1 %v7746_v49, %s6258_s16  ;;  %v1235_v33 = vpop.permute.xlu1 %1234  ;;  %1633 = vrot.lane.b32.xlu0 %v7749_v51, %s6258_s16  ;;  %v7761_v2 = vpop.permute.xlu0 %1779  ;;  %15404 = vst [vmem:[#allocation168_spill] sm:$0xff] %v7804_v53  ;;  %15408 = vst [vmem:[#allocation172_spill] sm:$0xff] %v7824_v21  ;;  %v7847_v14 = vmul.f32 %v7636_v47, %v1267_v45  ;;  %v5914_v45 = vld [vmem:[%s14409_s7 + $0x40] sm:$0xff] }
 0x226   : > { %15395 = vst [vmem:[#allocation159_spill] sm:$0xff] %v7761_v2  ;;  %15409 = vst [vmem:[#allocation173_spill] sm:$0xff] %v7827_v15  ;;  %v1240_v28 = vsel %vm1236_vm2, %v7656_v3, %v1235_v33  ;;  %v1268_v50 = vsel %vm1236_vm2, %v1235_v33, %v7112_v26  ;;  %v15479_v2 = vld [vmem:[#allocation31_spill] sm:$0xff] }
 0x227   : > { %v7844_v7 = vmul.f32 %v7618_v30, %v1240_v28  ;;  %15413 = vst [vmem:[#allocation177_spill] sm:$0xff] %v7847_v14  ;;  %v7861_v28 = vmul.f32 %v7636_v47, %v1268_v50  ;;  %v5915_v30 = vld [vmem:[%s14409_s7 + $0x48] sm:$0xff]  ;;  %v5916_v50 = vld [vmem:[%s14409_s7 + $0x50] sm:$0xff] }
 0x229   : > { %1635 = vrot.lane.b32.xlu1 %v7764_v58, %s6258_s16  ;;  %v7777_v29 = vpop.permute.xlu1 %1781  ;;  %1641 = vrot.lane.b32.xlu0 %v7767_v55, %s6258_s16  ;;  %v7781_v12 = vpop.permute.xlu0 %1795  ;;  %15412 = vst [vmem:[#allocation176_spill] sm:$0xff] %v7844_v7  ;;  %15416 = vst [vmem:[#allocation180_spill] sm:$0xff] %v7861_v28 }
 0x22a   : > { %15398 = vst [vmem:[#allocation162_spill] sm:$0xff] %v7777_v29  ;;  %15399 = vst [vmem:[#allocation163_spill] sm:$0xff] %v7781_v12 }
 0x22d   : > { %1643 = vrot.lane.b32.xlu1 %v7784_v27, %s6258_s16  ;;  %v7797_v31 = vpop.permute.xlu1 %1797  ;;  %1956 = vrot.lane.b32.xlu0 %v7787_v13, %s6258_s16  ;;  %v7801_v39 = vpop.permute.xlu0 %1589 }
 0x22e   : > { %15402 = vst [vmem:[#allocation166_spill] sm:$0xff] %v7797_v31  ;;  %15403 = vst [vmem:[#allocation167_spill] sm:$0xff] %v7801_v39  ;;  %v15475_v39 = vld [vmem:[#allocation17_spill] sm:$0xff] }
 0x231   : > { %1958 = vrot.lane.b32.xlu1 %v7804_v53, %s6258_s16  ;;  %v7817_v31 = vpop.permute.xlu1 %1591  ;;  %1964 = vrot.lane.b32.xlu0 %v7807_v16, %s6258_s16  ;;  %v7821_v41 = vpop.permute.xlu0 %1597 }
 0x232   : > { %15406 = vst [vmem:[#allocation170_spill] sm:$0xff] %v7817_v31  ;;  %15407 = vst [vmem:[#allocation171_spill] sm:$0xff] %v7821_v41  ;;  %v15477_v41 = vld [vmem:[#allocation19_spill] sm:$0xff] }
 0x235   : > { %1966 = vrot.lane.b32.xlu1 %v7824_v21, %s6258_s16  ;;  %v7837_v12 = vpop.permute.xlu1 %1599  ;;  %1972 = vrot.lane.b32.xlu0 %v7827_v15, %s6258_s16  ;;  %v7841_v25 = vpop.permute.xlu0 %1605 }
 0x236   : > { %15410 = vst [vmem:[#allocation174_spill] sm:$0xff] %v7837_v12  ;;  %15411 = vst [vmem:[#allocation175_spill] sm:$0xff] %v7841_v25  ;;  %v15469_v25 = vld [vmem:[#allocation10_spill] sm:$0xff]  ;;  %v15472_v12 = vld [vmem:[#allocation20_spill] sm:$0xff] }
 0x239   : > { %1974 = vrot.lane.b32.xlu1 %v7844_v7, %s6258_s16  ;;  %v7854_v3 = vpop.permute.xlu1 %1607  ;;  %1980 = vrot.lane.b32.xlu0 %v7847_v14, %s6258_s16  ;;  %v7858_v36 = vpop.permute.xlu0 %1920  ;;  %v15508_v14 = vld [vmem:[#allocation77_spill] sm:$0xff] }
 0x23a   : > { %15414 = vst [vmem:[#allocation178_spill] sm:$0xff] %v7854_v3  ;;  %15415 = vst [vmem:[#allocation179_spill] sm:$0xff] %v7858_v36  ;;  %v15516_v7 = vld [vmem:[#allocation89_spill] sm:$0xff] }
 0x23d   : > { %1982 = vrot.lane.b32.xlu1 %v7861_v28, %s6258_s16  ;;  %v7868_v33 = vpop.permute.xlu1 %1922  ;;  %2018 = vperm.xlu0 %6051, %v5914_v45   ;;  %v7870_v26 = vpop.permute.xlu0 %1928  ;;  %v5917_v45 = vld [vmem:[%s14409_s7 + $0x58] sm:$0xff] }
 0x23e   : > { %15417 = vst [vmem:[#allocation181_spill] sm:$0xff] %v7868_v33  ;;  %15418 = vst [vmem:[#allocation182_spill] sm:$0xff] %v7870_v26 }
 0x241   : > { %2023 = vperm.xlu1 %6052, %v5915_v30   ;;  %v7878_v47 = vpop.permute.xlu1 %1930  ;;  %2028 = vperm.xlu0 %6051, %v5916_v50   ;;  %v7880_v36 = vpop.permute.xlu0 %1936 }
 0x242   : > { %15419 = vst [vmem:[#allocation183_spill] sm:$0xff] %v7878_v47  ;;  %15420 = vst [vmem:[#allocation184_spill] sm:$0xff] %v7880_v36 }
 0x245   : > { %2033 = vperm.xlu1 %6052, %v5917_v45   ;;  %v7885_v33 = vpop.permute.xlu1 %1938  ;;  %2105 = vrot.lane.b32.xlu0 %v7501_v44, %s6259_s27  ;;  %v7889_v26 = vpop.permute.xlu0 %1593 }
 0x246   : > { %15421 = vst [vmem:[#allocation185_spill] sm:$0xff] %v7885_v33  ;;  %15422 = vst [vmem:[#allocation186_spill] sm:$0xff] %v7889_v26 }
 0x249   : > { %2107 = vrot.lane.b32.xlu1 %v7514_v22, %s6259_s27  ;;  %v7893_v30 = vpop.permute.xlu1 %1595  ;;  %2109 = vrot.lane.b32.xlu0 %v7720_v59, %s6259_s27  ;;  %v7897_v50 = vpop.permute.xlu0 %1601  ;;  %v15492_v59 = vld [vmem:[#allocation75_spill] sm:$0xff]  ;;  %v15511_v22 = vld [vmem:[#allocation78_spill] sm:$0xff] }
 0x24a   : > { %15423 = vst [vmem:[#allocation187_spill] sm:$0xff] %v7893_v30  ;;  %15424 = vst [vmem:[#allocation188_spill] sm:$0xff] %v7897_v50  ;;  %v5921_v50 = vld [vmem:[%s14409_s7 + $0xd8] sm:$0xff] }
 0x24d   : > { %2111 = vrot.lane.b32.xlu1 %v7730_v19, %s6259_s27  ;;  %v7901_v45 = vpop.permute.xlu1 %1603  ;;  %2113 = vrot.lane.b32.xlu0 %v7170_v38, %s6259_s27  ;;  %v7905_v33 = vpop.permute.xlu0 %1609 }
 0x24e   : > { %15425 = vst [vmem:[#allocation189_spill] sm:$0xff] %v7901_v45  ;;  %15426 = vst [vmem:[#allocation190_spill] sm:$0xff] %v7905_v33 }
 0x251   : > { %2115 = vrot.lane.b32.xlu1 %v7185_v48, %s6259_s27  ;;  %v7909_v36 = vpop.permute.xlu1 %1611  ;;  %2117 = vrot.lane.b32.xlu0 %v7324_v32, %s6259_s27  ;;  %v7913_v47 = vpop.permute.xlu0 %1924 }
 0x252   : > { %15427 = vst [vmem:[#allocation191_spill] sm:$0xff] %v7909_v36  ;;  %15428 = vst [vmem:[#allocation192_spill] sm:$0xff] %v7913_v47 }
 0x255   : > { %2119 = vrot.lane.b32.xlu1 %v7339_v43, %s6259_s27  ;;  %v7917_v30 = vpop.permute.xlu1 %1926  ;;  %2121 = vrot.lane.b32.xlu0 %v7192_v24, %s6259_s27  ;;  %v7921_v45 = vpop.permute.xlu0 %1932 }
 0x256   : > { %15429 = vst [vmem:[#allocation193_spill] sm:$0xff] %v7917_v30  ;;  %15430 = vst [vmem:[#allocation194_spill] sm:$0xff] %v7921_v45 }
 0x259   : > { %2123 = vrot.lane.b32.xlu1 %v7217_v4, %s6259_s27  ;;  %v7925_v33 = vpop.permute.xlu1 %1934  ;;  %2125 = vrot.lane.b32.xlu0 %v7346_v56, %s6259_s27  ;;  %v7929_v36 = vpop.permute.xlu0 %1940 }
 0x25a   : > { %15431 = vst [vmem:[#allocation195_spill] sm:$0xff] %v7925_v33  ;;  %15432 = vst [vmem:[#allocation196_spill] sm:$0xff] %v7929_v36 }
 0x25d   : > { %2127 = vrot.lane.b32.xlu1 %v7361_v8, %s6259_s27  ;;  %v7933_v47 = vpop.permute.xlu1 %1942  ;;  %2129 = vrot.lane.b32.xlu0 %v7224_v52, %s6259_s27  ;;  %v7937_v30 = vpop.permute.xlu0 %1613  ;;  %v15548_v8 = vld [vmem:[#allocation11_spill] sm:$0xff] }
 0x25e   : > { %15433 = vst [vmem:[#allocation197_spill] sm:$0xff] %v7933_v47  ;;  %15434 = vst [vmem:[#allocation198_spill] sm:$0xff] %v7937_v30 }
 0x261   : > { %2131 = vrot.lane.b32.xlu1 %v7243_v54, %s6259_s27  ;;  %v7941_v45 = vpop.permute.xlu1 %1615  ;;  %2133 = vrot.lane.b32.xlu0 %v7368_v46, %s6259_s27  ;;  %v7945_v33 = vpop.permute.xlu0 %1944 }
 0x262   : > { %15435 = vst [vmem:[#allocation199_spill] sm:$0xff] %v7941_v45  ;;  %15436 = vst [vmem:[#allocation200_spill] sm:$0xff] %v7945_v33 }
 0x265   : > { %2135 = vrot.lane.b32.xlu1 %v7383_v6, %s6259_s27  ;;  %v7949_v36 = vpop.permute.xlu1 %1946  ;;  %2137 = vrot.lane.b32.xlu0 %v7454_v62, %s6259_s27  ;;  %v7953_v47 = vpop.permute.xlu0 %1581 }
 0x266   : > { %15437 = vst [vmem:[#allocation201_spill] sm:$0xff] %v7949_v36  ;;  %15438 = vst [vmem:[#allocation202_spill] sm:$0xff] %v7953_v47 }
 0x269   : > { %2139 = vrot.lane.b32.xlu1 %v7473_v35, %s6259_s27  ;;  %v7957_v30 = vpop.permute.xlu1 %1583  ;;  %2141 = vrot.lane.b32.xlu0 %v7679_v5, %s6259_s27  ;;  %v7961_v45 = vpop.permute.xlu0 %1621 }
 0x26a   : > { %15439 = vst [vmem:[#allocation203_spill] sm:$0xff] %v7957_v30  ;;  %15440 = vst [vmem:[#allocation204_spill] sm:$0xff] %v7961_v45 }
 0x26d   : > { %2143 = vrot.lane.b32.xlu1 %v7696_v0, %s6259_s27  ;;  %v7965_v33 = vpop.permute.xlu1 %1623  ;;  %2145 = vrot.lane.b32.xlu0 %v7523_v18, %s6259_s27  ;;  %v7969_v36 = vpop.permute.xlu0 %1629 }
 0x26e   : > { %15441 = vst [vmem:[#allocation205_spill] sm:$0xff] %v7965_v33  ;;  %15442 = vst [vmem:[#allocation206_spill] sm:$0xff] %v7969_v36 }
 0x271   : > { %2147 = vrot.lane.b32.xlu1 %v7536_v42, %s6259_s27  ;;  %v7973_v47 = vpop.permute.xlu1 %1631  ;;  %2149 = vrot.lane.b32.xlu0 %v7733_v11, %s6259_s27  ;;  %v7977_v30 = vpop.permute.xlu0 %1637  ;;  %v15489_v11 = vld [vmem:[#allocation59_spill] sm:$0xff]  ;;  %v15504_v42 = vld [vmem:[#allocation60_spill] sm:$0xff] }
 0x272   : > { %15443 = vst [vmem:[#allocation207_spill] sm:$0xff] %v7973_v47  ;;  %15444 = vst [vmem:[#allocation208_spill] sm:$0xff] %v7977_v30 }
 0x275   : > { %2151 = vrot.lane.b32.xlu1 %v7746_v49, %s6259_s27  ;;  %v7981_v45 = vpop.permute.xlu1 %1639  ;;  %2153 = vrot.lane.b32.xlu0 %v7543_v40, %s6259_s27  ;;  %v7985_v33 = vpop.permute.xlu0 %1952  ;;  %v15485_v49 = vld [vmem:[#allocation67_spill] sm:$0xff] }
 0x276   : > { %15445 = vst [vmem:[#allocation209_spill] sm:$0xff] %v7981_v45  ;;  %15446 = vst [vmem:[#allocation210_spill] sm:$0xff] %v7985_v33 }
 0x279   : > { %2155 = vrot.lane.b32.xlu1 %v7560_v37, %s6259_s27  ;;  %v7989_v36 = vpop.permute.xlu1 %1954  ;;  %2157 = vrot.lane.b32.xlu0 %v7749_v51, %s6259_s27  ;;  %v7993_v47 = vpop.permute.xlu0 %1960  ;;  %v15487_v51 = vld [vmem:[#allocation68_spill] sm:$0xff] }
 0x27a   : > { %15447 = vst [vmem:[#allocation211_spill] sm:$0xff] %v7989_v36  ;;  %15448 = vst [vmem:[#allocation212_spill] sm:$0xff] %v7993_v47  ;;  %v5918_v47 = vld [vmem:[%s14409_s7 + $0xc0] sm:$0xff] }
 0x27d   : > { %2159 = vrot.lane.b32.xlu1 %v7764_v58, %s6259_s27  ;;  %v7997_v30 = vpop.permute.xlu1 %1962  ;;  %2161 = vrot.lane.b32.xlu0 %v7565_v17, %s6259_s27  ;;  %v8001_v45 = vpop.permute.xlu0 %1968  ;;  %v15500_v17 = vld [vmem:[#allocation69_spill] sm:$0xff] }
 0x27e   : > { %15449 = vst [vmem:[#allocation213_spill] sm:$0xff] %v7997_v30  ;;  %15450 = vst [vmem:[#allocation214_spill] sm:$0xff] %v8001_v45 }
 0x281   : > { %2163 = vrot.lane.b32.xlu1 %v7582_v1, %s6259_s27  ;;  %v8005_v33 = vpop.permute.xlu1 %1970  ;;  %2165 = vrot.lane.b32.xlu0 %v7767_v55, %s6259_s27  ;;  %v8009_v36 = vpop.permute.xlu0 %1976  ;;  %v15482_v55 = vld [vmem:[#allocation44_spill] sm:$0xff] }
 0x282   : > { %15451 = vst [vmem:[#allocation215_spill] sm:$0xff] %v8005_v33  ;;  %15452 = vst [vmem:[#allocation216_spill] sm:$0xff] %v8009_v36  ;;  %v5919_v33 = vld [vmem:[%s14409_s7 + $0xc8] sm:$0xff]  ;;  %v5920_v36 = vld [vmem:[%s14409_s7 + $0xd0] sm:$0xff] }
 0x285   : > { %2167 = vrot.lane.b32.xlu1 %v7784_v27, %s6259_s27  ;;  %v8016_v30 = vpop.permute.xlu1 %1978  ;;  %2204 = vperm.xlu0 %6051, %v5918_v47   ;;  %v8018_v45 = vpop.permute.xlu0 %1617 }
 0x286   : > { %15453 = vst [vmem:[#allocation217_spill] sm:$0xff] %v8016_v30  ;;  %15454 = vst [vmem:[#allocation218_spill] sm:$0xff] %v8018_v45 }
 0x289   : > { %2209 = vperm.xlu1 %6052, %v5919_v33   ;;  %v8026_v26 = vpop.permute.xlu1 %1619  ;;  %2214 = vperm.xlu0 %6051, %v5920_v36   ;;  %v8031_v30 = vpop.permute.xlu0 %1948 }
 0x28a   : > { %15455 = vst [vmem:[#allocation219_spill] sm:$0xff] %v8026_v26  ;;  %15456 = vst [vmem:[#allocation220_spill] sm:$0xff] %v8031_v30  ;;  %v15461_v30 = vld [vmem:[#allocation21_spill] sm:$0xff] }
 0x28d   : > { %2219 = vperm.xlu1 %6052, %v5921_v50   ;;  %2259 = vrot.lane.b32.xlu0 %v6565_v61, %s6259_s27  ;;  %v8035_v47 = vpop.permute.xlu1 %1950  ;;  %v15462_v50 = vld [vmem:[#allocation16_spill] sm:$0xff] }
 0x28e   : > { %15457 = vst [vmem:[#allocation221_spill] sm:$0xff] %v8035_v47  ;;  %v15464_v47 = vld [vmem:[#allocation18_spill] sm:$0xff] }
 0x28f   : > { %v8037_v45 = vpop.permute.xlu0 %1585 }
 0x290   : > { %15458 = vst [vmem:[#allocation222_spill] sm:$0xff] %v8037_v45  ;;  %v15465_v45 = vld [vmem:[#allocation28_spill] sm:$0xff] }
 0x291   : > { %2261 = vrot.lane.b32.xlu1 %v6579_v9, %s6259_s27  ;;  %2263 = vrot.lane.b32.xlu0 %v6720_v10, %s6259_s27 }
 0x293   : > { %v8043_v36 = vpop.permute.xlu1 %1587  ;;  %v8045_v33 = vpop.permute.xlu0 %1625 }
 0x294   : > { %15459 = vst [vmem:[#allocation223_spill] sm:$0xff] %v8043_v36  ;;  %15460 = vst [vmem:[#allocation224_spill] sm:$0xff] %v8045_v33  ;;  %v15467_v36 = vld [vmem:[#allocation32_spill] sm:$0xff] }
 0x295   : > { %2265 = vrot.lane.b32.xlu1 %v15461_v30, %s6259_s27  ;;  %2267 = vrot.lane.b32.xlu0 %v15462_v50, %s6259_s27 }
 0x297   : > { %v8051_v26 = vpop.permute.xlu1 %1627  ;;  %v8057_v3 = vpop.permute.xlu0 %1633 }
 0x298   : > { %15463 = vst [vmem:[#allocation21_spill] sm:$0xff] %v8051_v26  ;;  %15466 = vst [vmem:[#allocation16_spill] sm:$0xff] %v8057_v3  ;;  %v15471_v26 = vld [vmem:[#allocation12_spill] sm:$0xff]  ;;  %v15474_v3 = vld [vmem:[#allocation22_spill] sm:$0xff] }
 0x299   : > { %2269 = vrot.lane.b32.xlu1 %v15464_v47, %s6259_s27  ;;  %2271 = vrot.lane.b32.xlu0 %v15465_v45, %s6259_s27 }
 0x29b   : > { %v8061_v33 = vpop.permute.xlu1 %1635  ;;  %v8065_v31 = vpop.permute.xlu0 %1641 }
 0x29c   : > { %15468 = vst [vmem:[#allocation18_spill] sm:$0xff] %v8061_v33  ;;  %15470 = vst [vmem:[#allocation28_spill] sm:$0xff] %v8065_v31 }
 0x29d   : > { %2273 = vrot.lane.b32.xlu1 %v15467_v36, %s6259_s27  ;;  %2275 = vrot.lane.b32.xlu0 %v15469_v25, %s6259_s27 }
 0x29f   : > { %v8071_v29 = vpop.permute.xlu1 %1643  ;;  %v8077_v33 = vpop.permute.xlu0 %1956 }
 0x2a0   : > { %15473 = vst [vmem:[#allocation32_spill] sm:$0xff] %v8071_v29  ;;  %15476 = vst [vmem:[#allocation10_spill] sm:$0xff] %v8077_v33  ;;  %v15481_v29 = vld [vmem:[#allocation34_spill] sm:$0xff]  ;;  %v15484_v33 = vld [vmem:[#allocation48_spill] sm:$0xff] }
 0x2a1   : > { %2277 = vrot.lane.b32.xlu1 %v15471_v26, %s6259_s27  ;;  %2279 = vrot.lane.b32.xlu0 %v15472_v12, %s6259_s27 }
 0x2a3   : > { %v8081_v31 = vpop.permute.xlu1 %1958  ;;  %v8085_v27 = vpop.permute.xlu0 %1964 }
 0x2a4   : > { %15478 = vst [vmem:[#allocation12_spill] sm:$0xff] %v8081_v31  ;;  %15480 = vst [vmem:[#allocation20_spill] sm:$0xff] %v8085_v27 }
 0x2a5   : > { %2281 = vrot.lane.b32.xlu1 %v15474_v3, %s6259_s27  ;;  %2283 = vrot.lane.b32.xlu0 %v15475_v39, %s6259_s27 }
 0x2a7   : > { %v8091_v58 = vpop.permute.xlu1 %1966  ;;  %v8097_v31 = vpop.permute.xlu0 %1972 }
 0x2a8   : > { %15483 = vst [vmem:[#allocation22_spill] sm:$0xff] %v8091_v58  ;;  %15486 = vst [vmem:[#allocation17_spill] sm:$0xff] %v8097_v31  ;;  %v15491_v58 = vld [vmem:[#allocation61_spill] sm:$0xff]  ;;  %v15495_v31 = vld [vmem:[#allocation76_spill] sm:$0xff] }
 0x2a9   : > { %2285 = vrot.lane.b32.xlu1 %v15477_v41, %s6259_s27  ;;  %2287 = vrot.lane.b32.xlu0 %v15479_v2, %s6259_s27 }
 0x2ab   : > { %v8101_v27 = vpop.permute.xlu1 %1974  ;;  %v8105_v19 = vpop.permute.xlu0 %1980 }
 0x2ac   : > { %15488 = vst [vmem:[#allocation19_spill] sm:$0xff] %v8101_v27  ;;  %15490 = vst [vmem:[#allocation31_spill] sm:$0xff] %v8105_v19  ;;  %v15496_v27 = vld [vmem:[#allocation47_spill] sm:$0xff]  ;;  %v15499_v19 = vld [vmem:[#allocation50_spill] sm:$0xff] }
 0x2ad   : > { %2289 = vrot.lane.b32.xlu1 %v15481_v29, %s6259_s27  ;;  %2291 = vrot.lane.b32.xlu0 %v15482_v55, %s6259_s27 }
 0x2af   : > { %v8111_v0 = vpop.permute.xlu1 %1982 }
 0x2b0   : > { %15493 = vst [vmem:[#allocation34_spill] sm:$0xff] %v8111_v0 }
 0x2b1   : > { %2293 = vrot.lane.b32.xlu1 %v15484_v33, %s6259_s27  ;;  %2295 = vrot.lane.b32.xlu0 %v15485_v49, %s6259_s27 }
 0x2b5   : > { %2297 = vrot.lane.b32.xlu1 %v15487_v51, %s6259_s27  ;;  %2299 = vrot.lane.b32.xlu0 %v15489_v11, %s6259_s27 }
 0x2b9   : > { %2301 = vrot.lane.b32.xlu1 %v15491_v58, %s6259_s27  ;;  %2303 = vrot.lane.b32.xlu0 %v15492_v59, %s6259_s27 }
 0x2bc   : > { %v8113_v5 = vpop.permute.xlu0 %2018 }
 0x2bd   : > { %15494 = vst [vmem:[#allocation44_spill] sm:$0xff] %v8113_v5  ;;  %2305 = vrot.lane.b32.xlu1 %v15495_v31, %s6259_s27  ;;  %2307 = vrot.lane.b32.xlu0 %v15496_v27, %s6259_s27  ;;  %v15503_v5 = vld [vmem:[#allocation70_spill] sm:$0xff] }
 0x2c0   : > { %v8119_v28 = vpop.permute.xlu1 %2023  ;;  %v8121_v1 = vpop.permute.xlu0 %2028 }
 0x2c1   : > { %15497 = vst [vmem:[#allocation48_spill] sm:$0xff] %v8119_v28  ;;  %15498 = vst [vmem:[#allocation67_spill] sm:$0xff] %v8121_v1  ;;  %2309 = vrot.lane.b32.xlu1 %v15499_v19, %s6259_s27  ;;  %2311 = vrot.lane.b32.xlu0 %v15500_v17, %s6259_s27  ;;  %v15507_v1 = vld [vmem:[#allocation62_spill] sm:$0xff] }
 0x2c4   : > { %v8127_v37 = vpop.permute.xlu1 %2033  ;;  %v8129_v0 = vpop.permute.xlu0 %2105 }
 0x2c5   : > { %15501 = vst [vmem:[#allocation68_spill] sm:$0xff] %v8127_v37  ;;  %15502 = vst [vmem:[#allocation59_spill] sm:$0xff] %v8129_v0  ;;  %2313 = vrot.lane.b32.xlu1 %v15503_v5, %s6259_s27  ;;  %2315 = vrot.lane.b32.xlu0 %v15504_v42, %s6259_s27  ;;  %v5922_v0 = vld [vmem:[%s14409_s7 + $0xe0] sm:$0xff] }
 0x2c8   : > { %v8135_v40 = vpop.permute.xlu1 %2107  ;;  %v8137_v28 = vpop.permute.xlu0 %2109 }
 0x2c9   : > { %15505 = vst [vmem:[#allocation61_spill] sm:$0xff] %v8135_v40  ;;  %15506 = vst [vmem:[#allocation75_spill] sm:$0xff] %v8137_v28  ;;  %2317 = vrot.lane.b32.xlu1 %v15507_v1, %s6259_s27  ;;  %2319 = vrot.lane.b32.xlu0 %v15508_v14, %s6259_s27  ;;  %v5923_v28 = vld [vmem:[%s14409_s7 + $0xe8] sm:$0xff]  ;;  %v5924_v40 = vld [vmem:[%s14409_s7 + $0xf0] sm:$0xff] }
 0x2cc   : > { %v8146_v37 = vpop.permute.xlu1 %2111  ;;  %v8148_v18 = vpop.permute.xlu0 %2113 }
 0x2cd   : > { %15509 = vst [vmem:[#allocation76_spill] sm:$0xff] %v8146_v37  ;;  %15510 = vst [vmem:[#allocation47_spill] sm:$0xff] %v8148_v18  ;;  %2321 = vrot.lane.b32.xlu1 %v15511_v22, %s6259_s27  ;;  %2357 = vperm.xlu0 %6051, %v5922_v0   ;;  %v5925_v37 = vld [vmem:[%s14409_s7 + $0xf8] sm:$0xff] }
 0x2d0   : > { %v8158_v44 = vpop.permute.xlu1 %2115  ;;  %v8160_v35 = vpop.permute.xlu0 %2117 }
 0x2d1   : > { %15512 = vst [vmem:[#allocation50_spill] sm:$0xff] %v8158_v44  ;;  %15513 = vst [vmem:[#allocation69_spill] sm:$0xff] %v8160_v35  ;;  %2362 = vperm.xlu1 %6052, %v5923_v28   ;;  %2367 = vperm.xlu0 %6051, %v5924_v40   ;;  %v15519_v35 = vld [vmem:[#allocation90_spill] sm:$0xff]  ;;  %v15520_v40 = vld [vmem:[#allocation105_spill] sm:$0xff] }
 0x2d4   : > { %v8165_v18 = vpop.permute.xlu1 %2119  ;;  %v8167_v0 = vpop.permute.xlu0 %2121 }
 0x2d5   : > { %15514 = vst [vmem:[#allocation70_spill] sm:$0xff] %v8165_v18  ;;  %15515 = vst [vmem:[#allocation60_spill] sm:$0xff] %v8167_v0  ;;  %2372 = vperm.xlu1 %6052, %v5925_v37   ;;  %2444 = vrot.lane.b32.xlu0 %v15516_v7, %s6259_s27  ;;  %v15523_v0 = vld [vmem:[#allocation106_spill] sm:$0xff]  ;;  %v15524_v37 = vld [vmem:[#allocation93_spill] sm:$0xff] }
 0x2d8   : > { %v8171_v62 = vpop.permute.xlu1 %2123  ;;  %v8173_v15 = vpop.permute.xlu0 %2125 }
 0x2d9   : > { %15517 = vst [vmem:[#allocation62_spill] sm:$0xff] %v8171_v62  ;;  %15518 = vst [vmem:[#allocation77_spill] sm:$0xff] %v8173_v15  ;;  %2446 = vrot.lane.b32.xlu1 %v15519_v35, %s6259_s27  ;;  %2448 = vrot.lane.b32.xlu0 %v15520_v40, %s6259_s27  ;;  %v15527_v15 = vld [vmem:[#allocation95_spill] sm:$0xff] }
 0x2dc   : > { %v8179_v28 = vpop.permute.xlu1 %2127  ;;  %v8181_v44 = vpop.permute.xlu0 %2129 }
 0x2dd   : > { %15521 = vst [vmem:[#allocation78_spill] sm:$0xff] %v8179_v28  ;;  %15522 = vst [vmem:[#allocation89_spill] sm:$0xff] %v8181_v44  ;;  %2450 = vrot.lane.b32.xlu1 %v15523_v0, %s6259_s27  ;;  %2452 = vrot.lane.b32.xlu0 %v15524_v37, %s6259_s27  ;;  %v15531_v44 = vld [vmem:[#allocation110_spill] sm:$0xff]  ;;  %v15532_v0 = vld [vmem:[#allocation97_spill] sm:$0xff] }
 0x2e0   : > { %v8187_v18 = vpop.permute.xlu1 %2131  ;;  %v8189_v62 = vpop.permute.xlu0 %2133 }
 0x2e1   : > { %15525 = vst [vmem:[#allocation90_spill] sm:$0xff] %v8187_v18  ;;  %15526 = vst [vmem:[#allocation93_spill] sm:$0xff] %v8189_v62  ;;  %2454 = vrot.lane.b32.xlu1 %v15527_v15, %s6259_s27  ;;  %2456 = vrot.lane.b32.xlu0 %v15528_v20, %s6259_s27  ;;  %v15535_v62 = vld [vmem:[#allocation98_spill] sm:$0xff] }
 0x2e4   : > { %v8195_v40 = vpop.permute.xlu1 %2135  ;;  %v8197_v28 = vpop.permute.xlu0 %2137 }
 0x2e5   : > { %15529 = vst [vmem:[#allocation95_spill] sm:$0xff] %v8195_v40  ;;  %15530 = vst [vmem:[#allocation225_spill] sm:$0xff] %v8197_v28  ;;  %2458 = vrot.lane.b32.xlu1 %v15531_v44, %s6259_s27  ;;  %2460 = vrot.lane.b32.xlu0 %v15532_v0, %s6259_s27  ;;  %v15539_v28 = vld [vmem:[#allocation114_spill] sm:$0xff] }
 0x2e6   : > { %v15540_v44 = vld [vmem:[#allocation118_spill] sm:$0xff] }
 0x2e8   : > { %v8203_v6 = vpop.permute.xlu1 %2139  ;;  %v8205_v18 = vpop.permute.xlu0 %2141 }
 0x2e9   : > { %15533 = vst [vmem:[#allocation97_spill] sm:$0xff] %v8203_v6  ;;  %15534 = vst [vmem:[#allocation226_spill] sm:$0xff] %v8205_v18  ;;  %2462 = vrot.lane.b32.xlu1 %v15535_v62, %s6259_s27  ;;  %2464 = vrot.lane.b32.xlu0 %v15536_v63, %s6259_s27  ;;  %v8222_v18 = vld [vmem:[%s14405_s3 + $0x2] ss:$4 sm:$0xff]  ;;  %v5881_v6 = vld [vmem:[%s14405_s3 + $0x3] ss:$4 sm:$0xff] }
 0x2ea   : > { %15541 = vst [vmem:[#allocation228_spill] sm:$0xff] %v8222_v18  ;;  %v8244_v43 = vrot.slane %v8222_v18, %v15548_v8 }
 0x2ec   : > { %v8211_v20 = vpop.permute.xlu1 %2143  ;;  %v8213_v40 = vpop.permute.xlu0 %2145  ;;  %15549 = vst [vmem:[#allocation11_spill] sm:$0xff] %v8244_v43  ;;  %v15558_v43 = vld [vmem:[#allocation39_spill] sm:$0xff] }
 0x2ed   : > { %15537 = vst [vmem:[#allocation98_spill] sm:$0xff] %v8211_v20  ;;  %15538 = vst [vmem:[#allocation227_spill] sm:$0xff] %v8213_v40  ;;  %2466 = vrot.lane.b32.xlu1 %v15539_v28, %s6259_s27  ;;  %2468 = vrot.lane.b32.xlu0 %v15540_v44, %s6259_s27  ;;  %v15544_v40 = vld [vmem:[#allocation120_spill] sm:$0xff]  ;;  %v15545_v44 = vld [vmem:[#allocation7_spill] sm:$0xff] }
 0x2ee   : > { %v8237_v28 = vrot.slane %v8222_v18, %v15545_v44  ;;  %v8240_v46 = vrot.slane %v5881_v6, %v15545_v44 }
 0x2f0   : > { %v8227_v63 = vpop.permute.xlu1 %2147  ;;  %v8229_v20 = vpop.permute.xlu0 %2149  ;;  %15546 = vst [vmem:[#allocation7_spill] sm:$0xff] %v8237_v28  ;;  %15547 = vst [vmem:[#allocation231_spill] sm:$0xff] %v8240_v46  ;;  %v15555_v28 = vld [vmem:[#allocation36_spill] sm:$0xff] }
 0x2f1   : > { %15542 = vst [vmem:[#allocation229_spill] sm:$0xff] %v8227_v63  ;;  %15543 = vst [vmem:[#allocation230_spill] sm:$0xff] %v8229_v20  ;;  %2470 = vrot.lane.b32.xlu1 %v15544_v40, %s6259_s27  ;;  %2472 = vrot.lane.b32.xlu0 %v7701_v57, %s6259_s27  ;;  %v8247_v63 = vrot.slane %v5881_v6, %v15548_v8  ;;  %v15551_v20 = vld [vmem:[#allocation14_spill] sm:$0xff]  ;;  %v8260_v44 = vrot.slane %v8222_v18, %v15555_v28 }
 0x2f2   : > { %v8251_v40 = vrot.slane %v8222_v18, %v15551_v20  ;;  %v8254_v57 = vrot.slane %v5881_v6, %v15551_v20  ;;  %v8263_v46 = vrot.slane %v5881_v6, %v15555_v28  ;;  %v8267_v8 = vrot.slane %v8222_v18, %v15558_v43  ;;  %v15562_v20 = vld [vmem:[#allocation52_spill] sm:$0xff]  ;;  %v15565_v28 = vld [vmem:[#allocation55_spill] sm:$0xff] }
 0x2f3   : > { %15550 = vst [vmem:[#allocation232_spill] sm:$0xff] %v8247_v63  ;;  %15556 = vst [vmem:[#allocation36_spill] sm:$0xff] %v8260_v44  ;;  %v8270_v63 = vrot.slane %v5881_v6, %v15558_v43  ;;  %v15568_v43 = vld [vmem:[#allocation138_spill] sm:$0xff] }
 0x2f4   : > { %15552 = vst [vmem:[#allocation14_spill] sm:$0xff] %v8251_v40  ;;  %15553 = vst [vmem:[#allocation233_spill] sm:$0xff] %v8254_v57  ;;  %v8256_v56 = vpop.permute.xlu1 %2151  ;;  %v8272_v40 = vpop.permute.xlu0 %2153  ;;  %v8278_v57 = vrot.slane %v8222_v18, %v15562_v20 }
 0x2f5   : > { %15554 = vst [vmem:[#allocation234_spill] sm:$0xff] %v8256_v56  ;;  %15557 = vst [vmem:[#allocation235_spill] sm:$0xff] %v8263_v46  ;;  %2474 = vrot.lane.b32.xlu1 %v7712_v60, %s6259_s27  ;;  %v8281_v56 = vrot.slane %v5881_v6, %v15562_v20  ;;  %v8285_v46 = vrot.slane %v8222_v18, %v15565_v28  ;;  %2476 = vrot.lane.b32.xlu0 %v15568_v43, %s6259_s27 }
 0x2f6   : > { %15559 = vst [vmem:[#allocation39_spill] sm:$0xff] %v8267_v8  ;;  %15560 = vst [vmem:[#allocation236_spill] sm:$0xff] %v8270_v63  ;;  %v8288_v8 = vrot.slane %v5881_v6, %v15565_v28  ;;  %v15569_v63 = vld [vmem:[#allocation27_spill] sm:$0xff]  ;;  %v15570_v6 = vld [vmem:[#allocation29_spill] sm:$0xff] }
 0x2f7   : > { %15561 = vst [vmem:[#allocation237_spill] sm:$0xff] %v8272_v40  ;;  %15563 = vst [vmem:[#allocation52_spill] sm:$0xff] %v8278_v57  ;;  %v1425_v40 = vmul.f32 %v15569_v63, %v15462_v50  ;;  %v1426_v44 = vmul.f32 %v15569_v63, %v15469_v25  ;;  %v1427_v20 = vmul.f32 %v15569_v63, %v15475_v39 }
 0x2f8   : > { %15564 = vst [vmem:[#allocation238_spill] sm:$0xff] %v8281_v56  ;;  %15566 = vst [vmem:[#allocation55_spill] sm:$0xff] %v8285_v46  ;;  %v8300_v56 = vmul.f32 %v15569_v63, %v6565_v61  ;;  %v1433_v28 = vmul.f32 %v15570_v6, %v15464_v47  ;;  %v1435_v50 = vmul.f32 %v15570_v6, %v15477_v41  ;;  %v8313_v39 = vpop.permute.xlu1 %2155  ;;  %v15572_v61 = vld [vmem:[#allocation30_spill] sm:$0xff]  ;;  %v15575_v47 = vld [vmem:[#allocation139_spill] sm:$0xff] }
 0x2f9   : > { %15567 = vst [vmem:[#allocation239_spill] sm:$0xff] %v8288_v8  ;;  %v1434_v8 = vmul.f32 %v15570_v6, %v15471_v26  ;;  %v8311_v25 = vmul.f32 %v15570_v6, %v6579_v9  ;;  %15571 = vst [vmem:[#allocation138_spill] sm:$0xff] %v8313_v39  ;;  %v8317_v46 = vmul.f32 %v15572_v61, %v15465_v45  ;;  %v8331_v9 = vpop.permute.xlu0 %2157  ;;  %2478 = vrot.lane.b32.xlu1 %v15575_v47, %s6259_s27  ;;  %v15576_v45 = vld [vmem:[#allocation33_spill] sm:$0xff] }
 0x2fa   : > { %v8321_v57 = vmul.f32 %v15572_v61, %v15472_v12  ;;  %v8325_v26 = vmul.f32 %v15572_v61, %v15479_v2  ;;  %v8329_v41 = vmul.f32 %v15572_v61, %v6720_v10  ;;  %15574 = vst [vmem:[#allocation29_spill] sm:$0xff] %v8331_v9  ;;  %v8337_v39 = vmul.f32 %v15576_v45, %v15467_v36 }
 0x2fb   : > { %v8341_v12 = vmul.f32 %v15576_v45, %v15474_v3  ;;  %v8345_v2 = vmul.f32 %v15576_v45, %v15481_v29  ;;  %v8349_v10 = vmul.f32 %v15576_v45, %v15461_v30  ;;  %2480 = vrot.lane.b32.xlu0 %v7787_v13, %s6259_s27  ;;  %v8355_v9 = vmul.f32 %v15569_v63, %v15482_v55  ;;  %v15580_v13 = vld [vmem:[#allocation24_spill] sm:$0xff] }
 0x2fc   : > { %15573 = vst [vmem:[#allocation27_spill] sm:$0xff] %v8329_v41  ;;  %v8359_v36 = vmul.f32 %v15569_v63, %v15489_v11  ;;  %v8363_v3 = vmul.f32 %v15569_v63, %v15496_v27  ;;  %v8367_v29 = vmul.f32 %v15569_v63, %v15504_v42  ;;  %v8371_v30 = vmul.f32 %v15570_v6, %v15484_v33  ;;  %v8385_v18 = vpop.permute.xlu1 %2159  ;;  %v15579_v63 = vld [vmem:[#allocation23_spill] sm:$0xff] }
 0x2fd   : > { %15577 = vst [vmem:[#allocation30_spill] sm:$0xff] %v8349_v10  ;;  %v8375_v55 = vmul.f32 %v15570_v6, %v15491_v58  ;;  %v8379_v11 = vmul.f32 %v15570_v6, %v15499_v19  ;;  %v8383_v27 = vmul.f32 %v15570_v6, %v15507_v1  ;;  %15578 = vst [vmem:[#allocation139_spill] sm:$0xff] %v8385_v18  ;;  %v8397_v19 = vpop.permute.xlu0 %2161  ;;  %2482 = vrot.lane.b32.xlu1 %v7804_v53, %s6259_s27  ;;  %v15585_v6 = vld [vmem:[#allocation35_spill] sm:$0xff] }
 0x2fe   : > { %v1368_v42 = vmul.f32 %v15579_v63, %v7170_v38  ;;  %v1369_v33 = vmul.f32 %v15579_v63, %v7192_v24  ;;  %v1376_v58 = vmul.f32 %v15580_v13, %v7185_v48  ;;  %v8395_v10 = vmul.f32 %v15572_v61, %v15485_v49  ;;  %15582 = vst [vmem:[#allocation23_spill] sm:$0xff] %v8397_v19  ;;  %v15584_v49 = vld [vmem:[#allocation140_spill] sm:$0xff] }
 0x2ff   : > { %v1377_v1 = vmul.f32 %v15580_v13, %v7217_v4  ;;  %v1370_v38 = vmul.f32 %v15579_v63, %v7224_v52  ;;  %v1378_v24 = vmul.f32 %v15580_v13, %v7243_v54  ;;  %v8409_v48 = vmul.f32 %v15572_v61, %v15492_v59  ;;  %2484 = vrot.lane.b32.xlu0 %v15584_v49, %s6259_s27  ;;  %v15589_v54 = vld [vmem:[#allocation37_spill] sm:$0xff] }
 0x300   : > { %15581 = vst [vmem:[#allocation33_spill] sm:$0xff] %v8395_v10  ;;  %v1514_v19 = vmul.f32 %v15585_v6, %v15524_v37  ;;  %v8417_v18 = vmul.f32 %v15576_v45, %v15487_v51  ;;  %v8421_v4 = vmul.f32 %v15572_v61, %v15500_v17  ;;  %v8425_v52 = vmul.f32 %v15572_v61, %v15508_v14  ;;  %v8439_v17 = vpop.permute.xlu1 %2163 }
 0x301   : > { %15583 = vst [vmem:[#allocation24_spill] sm:$0xff] %v8409_v48  ;;  %v1522_v59 = vmul.f32 %v15589_v54, %v15527_v15  ;;  %v1515_v48 = vmul.f32 %v15585_v6, %v15532_v0  ;;  %v8433_v37 = vmul.f32 %v15576_v45, %v15495_v31  ;;  %v8437_v51 = vmul.f32 %v15576_v45, %v15503_v5  ;;  %v8445_v15 = vpop.permute.xlu0 %2165 }
 0x302   : > { %15586 = vst [vmem:[#allocation140_spill] sm:$0xff] %v8417_v18  ;;  %15587 = vst [vmem:[#allocation35_spill] sm:$0xff] %v8421_v4  ;;  %v1457_v4 = vadd.f32 %v1425_v40, %v1368_v42  ;;  %v1458_v53 = vadd.f32 %v1426_v44, %v1369_v33  ;;  %v1465_v14 = vadd.f32 %v1433_v28, %v1376_v58  ;;  %2486 = vrot.lane.b32.xlu1 %v7630_v23, %s6259_s27  ;;  %v15596_v44 = vld [vmem:[#allocation65_spill] sm:$0xff]  ;;  %v15597_v28 = vld [vmem:[#allocation71_spill] sm:$0xff] }
 0x303   : > { %15588 = vst [vmem:[#allocation240_spill] sm:$0xff] %v8425_v52  ;;  %15590 = vst [vmem:[#allocation37_spill] sm:$0xff] %v8433_v37  ;;  %v8443_v61 = vmul.f32 %v15576_v45, %v15511_v22  ;;  %v1466_v31 = vadd.f32 %v1434_v8, %v1377_v1  ;;  %v8449_v0 = vadd.f32 %v1427_v20, %v1370_v38  ;;  %2488 = vrot.lane.b32.xlu0 %v7807_v16, %s6259_s27  ;;  %v15598_v20 = vld [vmem:[#allocation63_spill] sm:$0xff]  ;;  %v15601_v33 = vld [vmem:[#allocation66_spill] sm:$0xff] }
 0x304   : > { %15591 = vst [vmem:[#allocation241_spill] sm:$0xff] %v8437_v51  ;;  %15592 = vst [vmem:[#allocation242_spill] sm:$0xff] %v8439_v17  ;;  %v8451_v52 = vadd.f32 %v1435_v50, %v1378_v24  ;;  %v8455_v5 = vmul.f32 %v15585_v6, %v15516_v7  ;;  %v8459_v40 = vadd.f32 %v1514_v19, %v1457_v4  ;;  %v8483_v19 = vpop.permute.xlu1 %2167  ;;  %v15604_v1 = vld [vmem:[#allocation64_spill] sm:$0xff]  ;;  %v15605_v24 = vld [vmem:[#allocation73_spill] sm:$0xff] }
 0x305   : > { %15593 = vst [vmem:[#allocation243_spill] sm:$0xff] %v8443_v61  ;;  %15594 = vst [vmem:[#allocation244_spill] sm:$0xff] %v8445_v15  ;;  %v8463_v22 = vmul.f32 %v15589_v54, %v15519_v35  ;;  %v1819_v8 = vsel %vm1645_vm3, %v15597_v28, %v15596_v44  ;;  %v1823_v7 = vsel %vm1645_vm3, %v15598_v20, %v15597_v28  ;;  %v15602_v35 = vld [vmem:[#allocation72_spill] sm:$0xff]  ;;  %v15607_v4 = vld [vmem:[#allocation25_spill] sm:$0xff] }
 0x306   : > { %15595 = vst [vmem:[#allocation245_spill] sm:$0xff] %v8459_v40  ;;  %v8473_v50 = vadd.f32 %v1522_v59, %v1465_v14  ;;  %v8475_v45 = vadd.f32 %v1515_v48, %v1458_v53  ;;  %v1523_v42 = vmul.f32 %v15589_v54, %v15535_v62  ;;  %v1820_v58 = vsel %vm1645_vm3, %v15602_v35, %v15601_v33  ;;  %v15606_v48 = vld [vmem:[#allocation74_spill] sm:$0xff]  ;;  %v8499_v14 = vpop.permute.xlu0 %2204  ;;  %v15609_v28 = vld [vmem:[#allocation100_spill] sm:$0xff]  ;;  %v15614_v40 = vld [vmem:[#allocation143_spill] sm:$0xff] }
 0x307   : > { %15603 = vst [vmem:[#allocation63_spill] sm:$0xff] %v8483_v19  ;;  %v1824_v38 = vsel %vm1645_vm3, %v15604_v1, %v15602_v35  ;;  %v1815_v53 = vsel %vm1645_vm3, %v15596_v44, %v15605_v24  ;;  %v1816_v62 = vsel %vm1645_vm3, %v15601_v33, %v15606_v48  ;;  %v1384_v59 = vmul.f32 %v15607_v4, %v7324_v32  ;;  %v15610_v19 = vld [vmem:[#allocation99_spill] sm:$0xff]  ;;  %v15611_v15 = vld [vmem:[#allocation26_spill] sm:$0xff]  ;;  %v15612_v44 = vld [vmem:[#allocation101_spill] sm:$0xff] }
 0x308   : > { %15599 = vst [vmem:[#allocation65_spill] sm:$0xff] %v8473_v50  ;;  %15600 = vst [vmem:[#allocation71_spill] sm:$0xff] %v8475_v45  ;;  %2490 = vrot.lane.b32.xlu1 %v7824_v21, %s6259_s27  ;;  %v1385_v35 = vmul.f32 %v15607_v4, %v15609_v28  ;;  %v1392_v17 = vmul.f32 %v15611_v15, %v15610_v19  ;;  %v1393_v50 = vmul.f32 %v15611_v15, %v15612_v44  ;;  %v15613_v45 = vld [vmem:[#allocation102_spill] sm:$0xff]  ;;  %v15615_v32 = vld [vmem:[#allocation51_spill] sm:$0xff]  ;;  %v8533_v10 = vpop.permute.xlu1 %2209 }
 0x309   : > { %15608 = vst [vmem:[#allocation66_spill] sm:$0xff] %v8499_v14  ;;  %v1386_v33 = vmul.f32 %v15607_v4, %v15613_v45  ;;  %2492 = vrot.lane.b32.xlu0 %v15614_v40, %s6259_s27  ;;  %v8514_v14 = vmul.f32 %v15615_v32, %v1823_v7  ;;  %v8517_v61 = vmul.f32 %v15615_v32, %v1819_v8  ;;  %v15618_v51 = vld [vmem:[#allocation103_spill] sm:$0xff]  ;;  %v15619_v37 = vld [vmem:[#allocation109_spill] sm:$0xff]  ;;  %v15620_v19 = vld [vmem:[#allocation40_spill] sm:$0xff] }
 0x30a   : > { %v1394_v28 = vmul.f32 %v15611_v15, %v15618_v51  ;;  %v1530_v21 = vmul.f32 %v15620_v19, %v15619_v37  ;;  %v8523_v16 = vadd.f32 %v1523_v42, %v1466_v31  ;;  %v15622_v44 = vld [vmem:[#allocation53_spill] sm:$0xff]  ;;  %v15625_v18 = vld [vmem:[#allocation110_spill] sm:$0xff]  ;;  %15627 = vst [vmem:[#allocation100_spill] sm:$0xff] %v8533_v10  ;;  %v8536_v8 = vmul.f32 %v15615_v32, %v1815_v53  ;;  %v15630_v31 = vld [vmem:[#allocation112_spill] sm:$0xff] }
 0x30b   : > { %15616 = vst [vmem:[#allocation72_spill] sm:$0xff] %v8514_v14  ;;  %15617 = vst [vmem:[#allocation64_spill] sm:$0xff] %v8517_v61  ;;  %v8526_v41 = vmul.f32 %v15622_v44, %v1824_v38  ;;  %v8529_v45 = vmul.f32 %v15622_v44, %v1820_v58  ;;  %v15626_v7 = vld [vmem:[#allocation42_spill] sm:$0xff]  ;;  %v8539_v51 = vmul.f32 %v15622_v44, %v1816_v62  ;;  %v8544_v38 = vpop.permute.xlu0 %2214  ;;  %v15632_v58 = vld [vmem:[#allocation144_spill] sm:$0xff] }
 0x30c   : > { %15621 = vst [vmem:[#allocation73_spill] sm:$0xff] %v8523_v16  ;;  %v1538_v14 = vmul.f32 %v15626_v7, %v15625_v18  ;;  %15628 = vst [vmem:[#allocation99_spill] sm:$0xff] %v8536_v8  ;;  %v1473_v37 = vadd.f32 %v8317_v46, %v1384_v59  ;;  %v1531_v42 = vmul.f32 %v15620_v19, %v15630_v31  ;;  %2494 = vrot.lane.b32.xlu1 %v15632_v58, %s6259_s27  ;;  %v15633_v62 = vld [vmem:[#allocation173_spill] sm:$0xff]  ;;  %v15655_v8 = vld [vmem:[#allocation118_spill] sm:$0xff] }
 0x30d   : > { %15623 = vst [vmem:[#allocation74_spill] sm:$0xff] %v8526_v41  ;;  %15624 = vst [vmem:[#allocation25_spill] sm:$0xff] %v8529_v45  ;;  %v1474_v18 = vadd.f32 %v8321_v57, %v1385_v35  ;;  %v1481_v10 = vadd.f32 %v8337_v39, %v1392_v17  ;;  %v1482_v53 = vadd.f32 %v8341_v12, %v1393_v50  ;;  %2496 = vrot.lane.b32.xlu0 %v15633_v62, %s6259_s27  ;;  %v15634_v59 = vld [vmem:[#allocation105_spill] sm:$0xff]  ;;  %v15637_v57 = vld [vmem:[#allocation114_spill] sm:$0xff] }
 0x30e   : > { %15629 = vst [vmem:[#allocation26_spill] sm:$0xff] %v8539_v51  ;;  %15631 = vst [vmem:[#allocation101_spill] sm:$0xff] %v8544_v38  ;;  %v8552_v16 = vadd.f32 %v8325_v26, %v1386_v33  ;;  %v8557_v46 = vadd.f32 %v8345_v2, %v1394_v28  ;;  %v8561_v31 = vmul.f32 %v15620_v19, %v15634_v59  ;;  %v15638_v17 = vld [vmem:[#allocation106_spill] sm:$0xff]  ;;  %v15641_v50 = vld [vmem:[#allocation81_spill] sm:$0xff]  ;;  %v8581_v28 = vpop.permute.xlu1 %2219 }
 0x30f   : > { %v8563_v38 = vadd.f32 %v1530_v21, %v1473_v37  ;;  %v1539_v39 = vmul.f32 %v15626_v7, %v15637_v57  ;;  %v8569_v12 = vmul.f32 %v15626_v7, %v15638_v17  ;;  %v8571_v26 = vadd.f32 %v1538_v14, %v1481_v10  ;;  %v15642_v35 = vld [vmem:[#allocation87_spill] sm:$0xff]  ;;  %15644 = vst [vmem:[#allocation109_spill] sm:$0xff] %v8581_v28  ;;  %v15646_v59 = vld [vmem:[#allocation82_spill] sm:$0xff]  ;;  %v15648_v14 = vld [vmem:[#allocation80_spill] sm:$0xff]  ;;  %v8595_v41 = vpop.permute.xlu0 %2259 }
 0x310   : > { %15635 = vst [vmem:[#allocation102_spill] sm:$0xff] %v8561_v31  ;;  %v1821_v2 = vsel %vm1645_vm3, %v15642_v35, %v15641_v50  ;;  %v15643_v33 = vld [vmem:[#allocation79_spill] sm:$0xff]  ;;  %v8583_v37 = vadd.f32 %v1531_v42, %v1474_v18  ;;  %15650 = vst [vmem:[#allocation53_spill] sm:$0xff] %v8595_v41  ;;  %v15652_v42 = vld [vmem:[#allocation92_spill] sm:$0xff] }
 0x311   : > { %15636 = vst [vmem:[#allocation143_spill] sm:$0xff] %v8563_v38  ;;  %15639 = vst [vmem:[#allocation51_spill] sm:$0xff] %v8569_v12  ;;  %v1825_v21 = vsel %vm1645_vm3, %v15643_v33, %v15642_v35  ;;  %v15647_v57 = vld [vmem:[#allocation91_spill] sm:$0xff]  ;;  %v15651_v35 = vld [vmem:[#allocation176_spill] sm:$0xff]  ;;  %v1817_v18 = vsel %vm1645_vm3, %v15641_v50, %v15652_v42  ;;  %v8613_v45 = vadd.f32 %v1539_v39, %v1482_v53 }
 0x312   : > { %15640 = vst [vmem:[#allocation103_spill] sm:$0xff] %v8571_v26  ;;  %15645 = vst [vmem:[#allocation40_spill] sm:$0xff] %v8583_v37  ;;  %v1822_v10 = vsel %vm1645_vm3, %v15647_v57, %v15646_v59  ;;  %v1826_v17 = vsel %vm1645_vm3, %v15648_v14, %v15647_v57  ;;  %v15649_v26 = vld [vmem:[#allocation115_spill] sm:$0xff]  ;;  %2498 = vrot.lane.b32.xlu1 %v15651_v35, %s6259_s27  ;;  %v15653_v28 = vld [vmem:[#allocation96_spill] sm:$0xff] }
 0x313   : > { %v1371_v38 = vmul.f32 %v15579_v63, %v15649_v26  ;;  %v1818_v37 = vsel %vm1645_vm3, %v15646_v59, %v15653_v28  ;;  %v15654_v51 = vld [vmem:[#allocation117_spill] sm:$0xff]  ;;  %v1516_v26 = vmul.f32 %v15585_v6, %v15655_v8  ;;  %15657 = vst [vmem:[#allocation110_spill] sm:$0xff] %v8613_v45  ;;  %v15658_v61 = vld [vmem:[#allocation56_spill] sm:$0xff]  ;;  %v15661_v35 = vld [vmem:[#allocation58_spill] sm:$0xff] }
 0x314   : > { %v1379_v57 = vmul.f32 %v15580_v13, %v15654_v51  ;;  %v15656_v41 = vld [vmem:[#allocation145_spill] sm:$0xff]  ;;  %v8616_v14 = vmul.f32 %v15658_v61, %v1825_v21  ;;  %v8619_v50 = vmul.f32 %v15658_v61, %v1821_v2  ;;  %v15660_v33 = vld [vmem:[#allocation120_spill] sm:$0xff]  ;;  %v8624_v12 = vmul.f32 %v15661_v35, %v1826_v17  ;;  %v15664_v8 = vld [vmem:[#allocation122_spill] sm:$0xff]  ;;  %v8633_v21 = vpop.permute.xlu1 %2261 }
 0x315   : > { %2500 = vrot.lane.b32.xlu0 %v15656_v41, %s6259_s27  ;;  %v1524_v59 = vmul.f32 %v15589_v54, %v15660_v33  ;;  %v8627_v51 = vmul.f32 %v15661_v35, %v1822_v10  ;;  %v1367_v31 = vmul.f32 %v15579_v63, %v15664_v8  ;;  %v15665_v53 = vld [vmem:[#allocation123_spill] sm:$0xff]  ;;  %15666 = vst [vmem:[#allocation173_spill] sm:$0xff] %v8633_v21  ;;  %v15669_v17 = vld [vmem:[#allocation126_spill] sm:$0xff] }
 0x316   : > { %15659 = vst [vmem:[#allocation42_spill] sm:$0xff] %v8616_v14  ;;  %15662 = vst [vmem:[#allocation112_spill] sm:$0xff] %v8624_v12  ;;  %v1375_v39 = vmul.f32 %v15580_v13, %v15665_v53  ;;  %v8636_v2 = vmul.f32 %v15658_v61, %v1817_v18  ;;  %v8639_v45 = vmul.f32 %v15661_v35, %v1818_v37  ;;  %v8644_v12 = vpop.permute.xlu0 %2263  ;;  %v15671_v8 = vld [vmem:[#allocation147_spill] sm:$0xff]  ;;  %v15673_v18 = vld [vmem:[#allocation104_spill] sm:$0xff] }
 0x317   : > { %15663 = vst [vmem:[#allocation144_spill] sm:$0xff] %v8627_v51  ;;  %v1460_v33 = vadd.f32 %v8355_v9, %v1371_v38  ;;  %v1372_v10 = vmul.f32 %v15579_v63, %v15669_v17  ;;  %15670 = vst [vmem:[#allocation106_spill] sm:$0xff] %v8644_v12  ;;  %2502 = vrot.lane.b32.xlu1 %v15671_v8, %s6259_s27  ;;  %v1468_v53 = vadd.f32 %v8371_v30, %v1379_v57  ;;  %v15674_v14 = vld [vmem:[#allocation107_spill] sm:$0xff]  ;;  %v15675_v38 = vld [vmem:[#allocation177_spill] sm:$0xff] }
 0x318   : > { %15667 = vst [vmem:[#allocation105_spill] sm:$0xff] %v8636_v2  ;;  %15668 = vst [vmem:[#allocation114_spill] sm:$0xff] %v8639_v45  ;;  %v8650_v21 = vadd.f32 %v1516_v26, %v8449_v0  ;;  %v1811_v37 = vsel %vm1645_vm3, %v15605_v24, %v15673_v18  ;;  %v1812_v9 = vsel %vm1645_vm3, %v15606_v48, %v15674_v14  ;;  %v15677_v30 = vld [vmem:[#allocation130_spill] sm:$0xff]  ;;  %v15678_v57 = vld [vmem:[#allocation127_spill] sm:$0xff] }
 0x319   : > { %2504 = vrot.lane.b32.xlu0 %v15675_v38, %s6259_s27  ;;  %v8663_v17 = vadd.f32 %v1524_v59, %v8451_v52  ;;  %v1373_v0 = vmul.f32 %v15579_v63, %v15677_v30  ;;  %v1380_v26 = vmul.f32 %v15580_v13, %v15678_v57  ;;  %v15679_v12 = vld [vmem:[#allocation132_spill] sm:$0xff]  ;;  %v15680_v48 = vld [vmem:[#allocation134_spill] sm:$0xff]  ;;  %v1456_v2 = vadd.f32 %v8300_v56, %v1367_v31 }
 0x31a   : > { %15672 = vst [vmem:[#allocation81_spill] sm:$0xff] %v8650_v21  ;;  %v1381_v24 = vmul.f32 %v15580_v13, %v15679_v12  ;;  %v5926_v21 = vld [vmem:[%s14409_s7 + $0x100] sm:$0xff]  ;;  %v1374_v45 = vmul.f32 %v15579_v63, %v15680_v48  ;;  %v15681_v52 = vld [vmem:[#allocation136_spill] sm:$0xff]  ;;  %v1464_v30 = vadd.f32 %v8311_v25, %v1375_v39  ;;  %v8683_v57 = vmul.f32 %v15615_v32, %v1811_v37  ;;  %v8691_v48 = vpop.permute.xlu0 %2267 }
 0x31b   : > { %15676 = vst [vmem:[#allocation87_spill] sm:$0xff] %v8663_v17  ;;  %v1382_v59 = vmul.f32 %v15580_v13, %v15681_v52  ;;  %v8680_v17 = vpop.permute.xlu1 %2265  ;;  %v8686_v12 = vmul.f32 %v15622_v44, %v1812_v9  ;;  %v1461_v51 = vadd.f32 %v8359_v36, %v1372_v10  ;;  %v1517_v63 = vmul.f32 %v15585_v6, %v15568_v43  ;;  %v15684_v56 = vld [vmem:[#allocation180_spill] sm:$0xff]  ;;  %v5927_v43 = vld [vmem:[%s14409_s7 + $0x108] sm:$0xff] }
 0x31c   : > { %15682 = vst [vmem:[#allocation82_spill] sm:$0xff] %v8680_v17  ;;  %15683 = vst [vmem:[#allocation91_spill] sm:$0xff] %v8691_v48  ;;  %2506 = vrot.lane.b32.xlu1 %v15684_v56, %s6259_s27  ;;  %v1518_v13 = vmul.f32 %v15585_v6, %v15584_v49  ;;  %v1525_v25 = vmul.f32 %v15589_v54, %v15575_v47  ;;  %v1526_v31 = vmul.f32 %v15589_v54, %v7630_v23  ;;  %v5928_v23 = vld [vmem:[%s14409_s7 + $0x110] sm:$0xff]  ;;  %v15737_v48 = vld [vmem:[#allocation150_spill] sm:$0xff] }
 0x31d   : > { %v1519_v36 = vmul.f32 %v15585_v6, %v15614_v40  ;;  %2542 = vperm.xlu0 %6051, %v5926_v21   ;;  %v1462_v39 = vadd.f32 %v8363_v3, %v1373_v0  ;;  %v1469_v10 = vadd.f32 %v8375_v55, %v1380_v26  ;;  %v1470_v49 = vadd.f32 %v8379_v11, %v1381_v24  ;;  %v15690_v9 = vld [vmem:[#allocation124_spill] sm:$0xff]  ;;  %v15697_v26 = vld [vmem:[#allocation111_spill] sm:$0xff] }
 0x31e   : > { %v1520_v47 = vmul.f32 %v15585_v6, %v15656_v41  ;;  %v1463_v40 = vadd.f32 %v8367_v29, %v1374_v45  ;;  %v8716_v21 = vadd.f32 %v8455_v5, %v1456_v2  ;;  %v1471_v37 = vadd.f32 %v8383_v27, %v1382_v59  ;;  %v15689_v6 = vld [vmem:[#allocation108_spill] sm:$0xff]  ;;  %v8736_v5 = vpop.permute.xlu0 %2271 }
 0x31f   : > { %v8720_v3 = vadd.f32 %v8463_v22, %v1464_v30  ;;  %v8722_v55 = vpop.permute.xlu1 %2269  ;;  %v8724_v11 = vadd.f32 %v1517_v63, %v1460_v33  ;;  %v1527_v41 = vmul.f32 %v15589_v54, %v15632_v58  ;;  %v1803_v29 = vsel %vm1645_vm3, %v15690_v9, %v15689_v6  ;;  %15691 = vst [vmem:[#allocation118_spill] sm:$0xff] %v8736_v5  ;;  %v5929_v33 = vld [vmem:[%s14409_s7 + $0x118] sm:$0xff]  ;;  %v15698_v24 = vld [vmem:[#allocation128_spill] sm:$0xff] }
 0x320   : > { %15685 = vst [vmem:[#allocation115_spill] sm:$0xff] %v8716_v21  ;;  %15687 = vst [vmem:[#allocation96_spill] sm:$0xff] %v8722_v55  ;;  %v1807_v27 = vsel %vm1645_vm3, %v15673_v18, %v15690_v9  ;;  %2547 = vperm.xlu1 %6052, %v5927_v43   ;;  %v8738_v22 = vadd.f32 %v1518_v13, %v1461_v51  ;;  %v8740_v45 = vadd.f32 %v1525_v25, %v1468_v53  ;;  %v15699_v30 = vld [vmem:[#allocation129_spill] sm:$0xff]  ;;  %v15704_v43 = vld [vmem:[#allocation151_spill] sm:$0xff] }
 0x321   : > { %15686 = vst [vmem:[#allocation92_spill] sm:$0xff] %v8720_v3  ;;  %15688 = vst [vmem:[#allocation117_spill] sm:$0xff] %v8724_v11  ;;  %v8742_v2 = vadd.f32 %v1526_v31, %v1469_v10  ;;  %v8744_v58 = vadd.f32 %v1519_v36, %v1462_v39  ;;  %2552 = vperm.xlu0 %6051, %v5928_v23   ;;  %v8749_v0 = vadd.f32 %v1520_v47, %v1463_v40  ;;  %v15703_v31 = vld [vmem:[#allocation149_spill] sm:$0xff]  ;;  %v15729_v17 = vld [vmem:[#allocation168_spill] sm:$0xff] }
 0x322   : > { %15692 = vst [vmem:[#allocation145_spill] sm:$0xff] %v8738_v22  ;;  %15693 = vst [vmem:[#allocation56_spill] sm:$0xff] %v8740_v45  ;;  %v1528_v18 = vmul.f32 %v15589_v54, %v15671_v8  ;;  %v1804_v51 = vsel %vm1645_vm3, %v15698_v24, %v15697_v26  ;;  %v1808_v53 = vsel %vm1645_vm3, %v15674_v14, %v15698_v24  ;;  %v15702_v14 = vld [vmem:[#allocation133_spill] sm:$0xff]  ;;  %v8787_v10 = vpop.permute.xlu0 %2275  ;;  %v15802_v11 = vld [vmem:[#allocation144_spill] sm:$0xff] }
 0x323   : > { %15694 = vst [vmem:[#allocation120_spill] sm:$0xff] %v8742_v2  ;;  %15695 = vst [vmem:[#allocation58_spill] sm:$0xff] %v8744_v58  ;;  %v8762_v52 = vmul.f32 %v15615_v32, %v1807_v27  ;;  %v8765_v59 = vmul.f32 %v15615_v32, %v1803_v29  ;;  %v1799_v54 = vsel %vm1645_vm3, %v15689_v6, %v15699_v30  ;;  %v8775_v63 = vpop.permute.xlu1 %2273  ;;  %v15706_v47 = vld [vmem:[#allocation153_spill] sm:$0xff]  ;;  %v15708_v27 = vld [vmem:[#allocation146_spill] sm:$0xff] }
 0x324   : > { %15696 = vst [vmem:[#allocation122_spill] sm:$0xff] %v8749_v0  ;;  %v1827_v8 = vsel %vm1645_vm3, %v15699_v30, %v15598_v20  ;;  %15700 = vst [vmem:[#allocation123_spill] sm:$0xff] %v8775_v63  ;;  %v8777_v13 = vadd.f32 %v1527_v41, %v1470_v49  ;;  %v1828_v25 = vsel %vm1645_vm3, %v15702_v14, %v15604_v1  ;;  %2557 = vperm.xlu1 %6052, %v5929_v33   ;;  %v15713_v30 = vld [vmem:[#allocation140_spill] sm:$0xff]  ;;  %v15735_v63 = vld [vmem:[#allocation241_spill] sm:$0xff] }
 0x325   : > { %v1387_v36 = vmul.f32 %v15607_v4, %v15703_v31  ;;  %v1395_v39 = vmul.f32 %v15611_v15, %v15704_v43  ;;  %15705 = vst [vmem:[#allocation147_spill] sm:$0xff] %v8787_v10  ;;  %v8790_v20 = vmul.f32 %v15622_v44, %v1808_v53  ;;  %v8793_v49 = vmul.f32 %v15622_v44, %v1804_v51  ;;  %v15717_v31 = vld [vmem:[#allocation156_spill] sm:$0xff]  ;;  %v15728_v10 = vld [vmem:[#allocation169_spill] sm:$0xff]  ;;  %v15809_v3 = vld [vmem:[#allocation194_spill] sm:$0xff] }
 0x326   : > { %15701 = vst [vmem:[#allocation126_spill] sm:$0xff] %v8777_v13  ;;  %v1800_v1 = vsel %vm1645_vm3, %v15697_v26, %v15702_v14  ;;  %v1532_v23 = vmul.f32 %v15620_v19, %v15706_v47  ;;  %v8801_v40 = vadd.f32 %v1528_v18, %v1471_v37  ;;  %v8804_v41 = vmul.f32 %v15615_v32, %v1827_v8  ;;  %v15709_v26 = vld [vmem:[#allocation154_spill] sm:$0xff]  ;;  %v15710_v18 = vld [vmem:[#allocation155_spill] sm:$0xff]  ;;  %v15714_v8 = vld [vmem:[#allocation148_spill] sm:$0xff]  ;;  %v8833_v14 = vpop.permute.xlu0 %2279 }
 0x327   : > { %v8807_v6 = vmul.f32 %v15615_v32, %v1799_v54  ;;  %v1540_v9 = vmul.f32 %v15626_v7, %v7712_v60  ;;  %v8812_v29 = vmul.f32 %v15622_v44, %v1828_v25  ;;  %v1813_v33 = vsel %vm1645_vm3, %v15652_v42, %v15708_v27  ;;  %v8822_v51 = vpop.permute.xlu1 %2277  ;;  %v15712_v60 = vld [vmem:[#allocation33_spill] sm:$0xff]  ;;  %15715 = vst [vmem:[#allocation177_spill] sm:$0xff] %v8833_v14  ;;  %v15718_v47 = vld [vmem:[#allocation158_spill] sm:$0xff]  ;;  %v15823_v21 = vld [vmem:[#allocation208_spill] sm:$0xff] }
 0x328   : > { %15707 = vst [vmem:[#allocation104_spill] sm:$0xff] %v8801_v40  ;;  %v1383_v37 = vmul.f32 %v15607_v4, %v15709_v26  ;;  %v1391_v24 = vmul.f32 %v15611_v15, %v15710_v18  ;;  %15711 = vst [vmem:[#allocation107_spill] sm:$0xff] %v8822_v51  ;;  %v8825_v32 = vmul.f32 %v15622_v44, %v1800_v1  ;;  %v15719_v1 = vld [vmem:[#allocation157_spill] sm:$0xff]  ;;  %v15725_v14 = vld [vmem:[#allocation30_spill] sm:$0xff] }
 0x329   : > { %v1476_v53 = vadd.f32 %v15712_v60, %v1387_v36  ;;  %v1484_v54 = vadd.f32 %v15713_v30, %v1395_v39  ;;  %v1814_v42 = vsel %vm1645_vm3, %v15653_v28, %v15714_v8  ;;  %v8836_v25 = vadd.f32 %v1532_v23, %v8552_v16  ;;  %v15721_v28 = vld [vmem:[#allocation160_spill] sm:$0xff]  ;;  %v15722_v16 = vld [vmem:[#allocation161_spill] sm:$0xff]  ;;  %v15723_v30 = vld [vmem:[#allocation27_spill] sm:$0xff] }
 0x32a   : > { %v1388_v43 = vmul.f32 %v15607_v4, %v15717_v31  ;;  %v1389_v44 = vmul.f32 %v15607_v4, %v15718_v47  ;;  %v1396_v36 = vmul.f32 %v15611_v15, %v15719_v1  ;;  %v8845_v39 = vadd.f32 %v1540_v9, %v8557_v46  ;;  %v15724_v47 = vld [vmem:[#allocation164_spill] sm:$0xff] }
 0x32b   : > { %15716 = vst [vmem:[#allocation130_spill] sm:$0xff] %v8836_v25  ;;  %v8848_v26 = vmul.f32 %v15658_v61, %v1813_v33  ;;  %v1397_v18 = vmul.f32 %v15611_v15, %v15721_v28  ;;  %v1390_v23 = vmul.f32 %v15607_v4, %v15722_v16  ;;  %v8855_v60 = vmul.f32 %v15661_v35, %v1814_v42  ;;  %v8861_v9 = vpop.permute.xlu1 %2281  ;;  %v15727_v33 = vld [vmem:[#allocation165_spill] sm:$0xff]  ;;  %v15730_v42 = vld [vmem:[#allocation172_spill] sm:$0xff] }
 0x32c   : > { %15720 = vst [vmem:[#allocation127_spill] sm:$0xff] %v8845_v39  ;;  %v1472_v31 = vadd.f32 %v15723_v30, %v1383_v37  ;;  %v1398_v1 = vmul.f32 %v15611_v15, %v15724_v47  ;;  %v1480_v46 = vadd.f32 %v15725_v14, %v1391_v24  ;;  %15726 = vst [vmem:[#allocation132_spill] sm:$0xff] %v8861_v9  ;;  %v8871_v37 = vpop.permute.xlu0 %2283  ;;  %v15732_v30 = vld [vmem:[#allocation24_spill] sm:$0xff]  ;;  %v15733_v47 = vld [vmem:[#allocation35_spill] sm:$0xff] }
 0x32d   : > { %v1533_v51 = vmul.f32 %v15620_v19, %v15727_v33  ;;  %v1534_v28 = vmul.f32 %v15620_v19, %v15728_v10  ;;  %v1541_v4 = vmul.f32 %v15626_v7, %v15729_v17  ;;  %v1542_v16 = vmul.f32 %v15626_v7, %v15730_v42  ;;  %15731 = vst [vmem:[#allocation134_spill] sm:$0xff] %v8871_v37  ;;  %v15734_v14 = vld [vmem:[#allocation37_spill] sm:$0xff]  ;;  %v15736_v10 = vld [vmem:[#allocation240_spill] sm:$0xff]  ;;  %v15738_v42 = vld [vmem:[#allocation159_spill] sm:$0xff] }
 0x32e   : > { %v1477_v15 = vadd.f32 %v15732_v30, %v1388_v43  ;;  %v1478_v24 = vadd.f32 %v15733_v47, %v1389_v44  ;;  %v1485_v9 = vadd.f32 %v15734_v14, %v1396_v36  ;;  %v1535_v33 = vmul.f32 %v15620_v19, %v15633_v62  ;;  %v15739_v43 = vld [vmem:[#allocation102_spill] sm:$0xff]  ;;  %v15741_v44 = vld [vmem:[#allocation243_spill] sm:$0xff] }
 0x32f   : > { %v1486_v5 = vadd.f32 %v15735_v63, %v1397_v18  ;;  %v1479_v55 = vadd.f32 %v15736_v10, %v1390_v23  ;;  %v1536_v17 = vmul.f32 %v15620_v19, %v15675_v38  ;;  %v1805_v37 = vsel %vm1645_vm3, %v15738_v42, %v15737_v48  ;;  %v15743_v47 = vld [vmem:[#allocation51_spill] sm:$0xff]  ;;  %v8899_v19 = vpop.permute.xlu1 %2285 }
 0x330   : > { %v8887_v30 = vadd.f32 %v15739_v43, %v1472_v31  ;;  %v8890_v36 = vadd.f32 %v15741_v44, %v1398_v1  ;;  %v8893_v62 = vadd.f32 %v15743_v47, %v1480_v46  ;;  %v1809_v63 = vsel %vm1645_vm3, %v15708_v27, %v15738_v42  ;;  %15745 = vst [vmem:[#allocation124_spill] sm:$0xff] %v8899_v19  ;;  %v8909_v1 = vpop.permute.xlu0 %2287  ;;  %v15752_v46 = vld [vmem:[#allocation176_spill] sm:$0xff]  ;;  %v15753_v27 = vld [vmem:[#allocation171_spill] sm:$0xff] }
 0x331   : > { %v8901_v38 = vadd.f32 %v1533_v51, %v1476_v53  ;;  %v8903_v18 = vadd.f32 %v1534_v28, %v1477_v15  ;;  %v8905_v23 = vadd.f32 %v1541_v4, %v1484_v54  ;;  %v8907_v31 = vadd.f32 %v1542_v16, %v1485_v9  ;;  %15750 = vst [vmem:[#allocation149_spill] sm:$0xff] %v8909_v1  ;;  %v15754_v42 = vld [vmem:[#allocation167_spill] sm:$0xff]  ;;  %v15757_v28 = vld [vmem:[#allocation152_spill] sm:$0xff]  ;;  %v15758_v4 = vld [vmem:[#allocation162_spill] sm:$0xff] }
 0x332   : > { %15740 = vst [vmem:[#allocation136_spill] sm:$0xff] %v8887_v30  ;;  %15742 = vst [vmem:[#allocation180_spill] sm:$0xff] %v8890_v36  ;;  %v8911_v14 = vadd.f32 %v1535_v33, %v1478_v24  ;;  %v1543_v10 = vmul.f32 %v15626_v7, %v15752_v46  ;;  %v8916_v43 = vmul.f32 %v15658_v61, %v1805_v37  ;;  %v15759_v15 = vld [vmem:[#allocation174_spill] sm:$0xff]  ;;  %v15764_v47 = vld [vmem:[#allocation163_spill] sm:$0xff] }
 0x333   : > { %15744 = vst [vmem:[#allocation108_spill] sm:$0xff] %v8893_v62  ;;  %15746 = vst [vmem:[#allocation111_spill] sm:$0xff] %v8901_v38  ;;  %v1666_v51 = vsel %vm1645_vm3, %v15754_v42, %v15753_v27  ;;  %v8922_v53 = vadd.f32 %v1536_v17, %v1479_v55  ;;  %v8926_v54 = vmul.f32 %v15626_v7, %v15684_v56  ;;  %v15760_v55 = vld [vmem:[#allocation170_spill] sm:$0xff]  ;;  %v15761_v7 = vld [vmem:[#allocation175_spill] sm:$0xff]  ;;  %v8951_v44 = vpop.permute.xlu1 %2289 }
 0x334   : > { %15747 = vst [vmem:[#allocation128_spill] sm:$0xff] %v8903_v18  ;;  %15748 = vst [vmem:[#allocation129_spill] sm:$0xff] %v8905_v23  ;;  %v8929_v9 = vmul.f32 %v15658_v61, %v1809_v63  ;;  %v1806_v16 = vsel %vm1645_vm3, %v15758_v4, %v15757_v28  ;;  %v1810_v37 = vsel %vm1645_vm3, %v15714_v8, %v15758_v4  ;;  %v15762_v33 = vld [vmem:[#allocation178_spill] sm:$0xff]  ;;  %v15765_v63 = vld [vmem:[#allocation79_spill] sm:$0xff] }
 0x335   : > { %15749 = vst [vmem:[#allocation133_spill] sm:$0xff] %v8907_v31  ;;  %15751 = vst [vmem:[#allocation151_spill] sm:$0xff] %v8911_v14  ;;  %v1667_v24 = vsel %vm1645_vm3, %v15760_v55, %v15759_v15  ;;  %v1662_v56 = vsel %vm1645_vm3, %v15753_v27, %v15761_v7  ;;  %v1663_v17 = vsel %vm1645_vm3, %v15759_v15, %v15762_v33  ;;  %v15766_v4 = vld [vmem:[#allocation166_spill] sm:$0xff]  ;;  %v8966_v15 = vpop.permute.xlu0 %2291  ;;  %v15772_v19 = vld [vmem:[#allocation187_spill] sm:$0xff] }
 0x336   : > { %15755 = vst [vmem:[#allocation153_spill] sm:$0xff] %v8922_v53  ;;  %15756 = vst [vmem:[#allocation146_spill] sm:$0xff] %v8926_v54  ;;  %v1801_v8 = vsel %vm1645_vm3, %v15737_v48, %v15764_v47  ;;  %v1829_v46 = vsel %vm1645_vm3, %v15764_v47, %v15765_v63  ;;  %v1802_v27 = vsel %vm1645_vm3, %v15757_v28, %v15766_v4  ;;  %v15767_v54 = vld [vmem:[#allocation43_spill] sm:$0xff]  ;;  %v15769_v53 = vld [vmem:[#allocation188_spill] sm:$0xff] }
 0x337   : > { %15763 = vst [vmem:[#allocation154_spill] sm:$0xff] %v8951_v44  ;;  %v1700_v36 = vmul.f32 %v15767_v54, %v1666_v51  ;;  %15768 = vst [vmem:[#allocation155_spill] sm:$0xff] %v8966_v15  ;;  %v15770_v44 = vld [vmem:[#allocation186_spill] sm:$0xff]  ;;  %v15771_v48 = vld [vmem:[#allocation189_spill] sm:$0xff]  ;;  %v1701_v58 = vmul.f32 %v15767_v54, %v1662_v56  ;;  %v8991_v18 = vadd.f32 %v1543_v10, %v1486_v5  ;;  %v9002_v23 = vpop.permute.xlu1 %2293 }
 0x338   : > { %v1668_v1 = vsel %vm1645_vm3, %v15770_v44, %v15769_v53  ;;  %v1669_v40 = vsel %vm1645_vm3, %v15772_v19, %v15771_v48  ;;  %v15773_v47 = vld [vmem:[#allocation190_spill] sm:$0xff]  ;;  %v15774_v28 = vld [vmem:[#allocation191_spill] sm:$0xff]  ;;  %v15775_v15 = vld [vmem:[#allocation80_spill] sm:$0xff]  ;;  %v8997_v2 = vmul.f32 %v15661_v35, %v1806_v16  ;;  %15778 = vst [vmem:[#allocation140_spill] sm:$0xff] %v9002_v23 }
 0x339   : > { %v1664_v63 = vsel %vm1645_vm3, %v15769_v53, %v15773_v47  ;;  %v1665_v51 = vsel %vm1645_vm3, %v15771_v48, %v15774_v28  ;;  %v1830_v0 = vsel %vm1645_vm3, %v15766_v4, %v15775_v15  ;;  %v15776_v14 = vld [vmem:[#allocation45_spill] sm:$0xff]  ;;  %15777 = vst [vmem:[#allocation33_spill] sm:$0xff] %v8991_v18  ;;  %v8994_v53 = vmul.f32 %v15661_v35, %v1810_v37  ;;  %v15779_v4 = vld [vmem:[#allocation46_spill] sm:$0xff]  ;;  %v9008_v10 = vpop.permute.xlu0 %2295 }
 0x33a   : > { %v1708_v13 = vmul.f32 %v15776_v14, %v1667_v24  ;;  %v1709_v31 = vmul.f32 %v15776_v14, %v1663_v17  ;;  %v9000_v48 = vmul.f32 %v15658_v61, %v1801_v8  ;;  %v1716_v15 = vmul.f32 %v15779_v4, %v1668_v1  ;;  %v15780_v24 = vld [vmem:[#allocation49_spill] sm:$0xff]  ;;  %15781 = vst [vmem:[#allocation148_spill] sm:$0xff] %v9008_v10  ;;  %v15782_v8 = vld [vmem:[#allocation64_spill] sm:$0xff]  ;;  %v15806_v62 = vld [vmem:[#allocation114_spill] sm:$0xff] }
 0x33b   : > { %v1724_v22 = vmul.f32 %v15780_v24, %v1669_v40  ;;  %v1717_v56 = vmul.f32 %v15779_v4, %v1664_v63  ;;  %v1725_v5 = vmul.f32 %v15780_v24, %v1665_v51  ;;  %v9011_v37 = vmul.f32 %v15658_v61, %v1829_v46  ;;  %v15784_v1 = vld [vmem:[#allocation25_spill] sm:$0xff]  ;;  %v15786_v63 = vld [vmem:[#allocation99_spill] sm:$0xff]  ;;  %v15788_v51 = vld [vmem:[#allocation26_spill] sm:$0xff] }
 0x33c   : > { %v9014_v16 = vmul.f32 %v15661_v35, %v1830_v0  ;;  %v9017_v17 = vmul.f32 %v15661_v35, %v1802_v27  ;;  %v9020_v23 = vadd.f32 %v15782_v8, %v1700_v36  ;;  %v9023_v40 = vadd.f32 %v15784_v1, %v1708_v13  ;;  %v15790_v61 = vld [vmem:[#allocation182_spill] sm:$0xff]  ;;  %v15791_v46 = vld [vmem:[#allocation179_spill] sm:$0xff]  ;;  %v15793_v27 = vld [vmem:[#allocation181_spill] sm:$0xff]  ;;  %v9055_v1 = vpop.permute.xlu1 %2297 }
 0x33d   : > { %v9026_v18 = vadd.f32 %v15786_v63, %v1701_v58  ;;  %v9029_v10 = vadd.f32 %v15788_v51, %v1709_v31  ;;  %v9035_v0 = vsel %vm1645_vm3, %v15791_v46, %v15790_v61  ;;  %v15792_v35 = vld [vmem:[#allocation183_spill] sm:$0xff]  ;;  %v15794_v13 = vld [vmem:[#allocation184_spill] sm:$0xff]  ;;  %v15795_v31 = vld [vmem:[#allocation185_spill] sm:$0xff]  ;;  %15797 = vst [vmem:[#allocation27_spill] sm:$0xff] %v9055_v1  ;;  %v9062_v45 = vadd.f32 %v8619_v50, %v1716_v15 }
 0x33e   : > { %15783 = vst [vmem:[#allocation156_spill] sm:$0xff] %v9020_v23  ;;  %15785 = vst [vmem:[#allocation158_spill] sm:$0xff] %v9023_v40  ;;  %v9041_v36 = vsel %vm1645_vm3, %v15793_v27, %v15792_v35  ;;  %v9047_v58 = vsel %vm1645_vm3, %v15790_v61, %v15794_v13  ;;  %v9053_v8 = vsel %vm1645_vm3, %v15792_v35, %v15795_v31  ;;  %v15798_v63 = vld [vmem:[#allocation6_spill] sm:$0xff]  ;;  %v15799_v51 = vld [vmem:[#allocation228_spill] sm:$0xff]  ;;  %v9073_v35 = vpop.permute.xlu0 %2299 }
 0x33f   : > { %15787 = vst [vmem:[#allocation157_spill] sm:$0xff] %v9026_v18  ;;  %15789 = vst [vmem:[#allocation160_spill] sm:$0xff] %v9029_v10  ;;  %v9059_v38 = vrot.slane %v15799_v51, %v15798_v63  ;;  %v9065_v39 = vadd.f32 %v15802_v11, %v1724_v22  ;;  %v15804_v61 = vld [vmem:[#allocation105_spill] sm:$0xff]  ;;  %v9071_v30 = vadd.f32 %v15806_v62, %v1725_v5  ;;  %v15810_v1 = vld [vmem:[#allocation192_spill] sm:$0xff] }
 0x340   : > { %15796 = vst [vmem:[#allocation161_spill] sm:$0xff] %v9053_v8  ;;  %15801 = vst [vmem:[#allocation30_spill] sm:$0xff] %v9062_v45  ;;  %v9068_v25 = vadd.f32 %v15804_v61, %v1717_v56  ;;  %v9079_v51 = vsel %vm1645_vm3, %v15810_v1, %v15809_v3  ;;  %v15812_v63 = vld [vmem:[#allocation195_spill] sm:$0xff]  ;;  %v15813_v50 = vld [vmem:[#allocation193_spill] sm:$0xff]  ;;  %v9127_v18 = vpop.permute.xlu1 %2301 }
 0x341   : > { %15800 = vst [vmem:[#allocation164_spill] sm:$0xff] %v9059_v38  ;;  %15803 = vst [vmem:[#allocation165_spill] sm:$0xff] %v9065_v39  ;;  %v9085_v11 = vsel %vm1645_vm3, %v15813_v50, %v15812_v63  ;;  %v15815_v22 = vld [vmem:[#allocation198_spill] sm:$0xff]  ;;  %v15816_v15 = vld [vmem:[#allocation199_spill] sm:$0xff] }
 0x342   : > { %15805 = vst [vmem:[#allocation169_spill] sm:$0xff] %v9068_v25  ;;  %15807 = vst [vmem:[#allocation168_spill] sm:$0xff] %v9071_v30  ;;  %v1658_v62 = vsel %vm1645_vm3, %v15761_v7, %v15815_v22  ;;  %v1659_v56 = vsel %vm1645_vm3, %v15762_v33, %v15816_v15  ;;  %v15817_v5 = vld [vmem:[#allocation202_spill] sm:$0xff]  ;;  %v15819_v25 = vld [vmem:[#allocation204_spill] sm:$0xff]  ;;  %v9139_v23 = vpop.permute.xlu0 %2303 }
 0x343   : > { %15808 = vst [vmem:[#allocation172_spill] sm:$0xff] %v9073_v35  ;;  %15811 = vst [vmem:[#allocation24_spill] sm:$0xff] %v9079_v51  ;;  %v1670_v61 = vsel %vm1645_vm3, %v15817_v5, %v15754_v42  ;;  %v15818_v35 = vld [vmem:[#allocation203_spill] sm:$0xff]  ;;  %v1654_v7 = vsel %vm1645_vm3, %v15815_v22, %v15819_v25  ;;  %v15820_v39 = vld [vmem:[#allocation205_spill] sm:$0xff]  ;;  %v1702_v40 = vmul.f32 %v15767_v54, %v1658_v62 }
 0x344   : > { %15814 = vst [vmem:[#allocation35_spill] sm:$0xff] %v9085_v11  ;;  %v1671_v30 = vsel %vm1645_vm3, %v15818_v35, %v15760_v55  ;;  %v1655_v33 = vsel %vm1645_vm3, %v15816_v15, %v15820_v39  ;;  %v15821_v10 = vld [vmem:[#allocation206_spill] sm:$0xff]  ;;  %v15822_v45 = vld [vmem:[#allocation207_spill] sm:$0xff]  ;;  %v1674_v15 = vsel %vm1645_vm3, %v15823_v21, %v15817_v5  ;;  %15824 = vst [vmem:[#allocation37_spill] sm:$0xff] %v9127_v18 }
 0x345   : > { %v1650_v42 = vsel %vm1645_vm3, %v15819_v25, %v15821_v10  ;;  %v1651_v55 = vsel %vm1645_vm3, %v15820_v39, %v15822_v45  ;;  %v1646_v22 = vsel %vm1645_vm3, %v15821_v10, %v15823_v21  ;;  %v1710_v25 = vmul.f32 %v15776_v14, %v1659_v56  ;;  %v15825_v38 = vld [vmem:[#allocation209_spill] sm:$0xff]  ;;  %15826 = vst [vmem:[#allocation241_spill] sm:$0xff] %v9139_v23  ;;  %v15827_v51 = vld [vmem:[#allocation196_spill] sm:$0xff] }
 0x346   : > { %v1647_v39 = vsel %vm1645_vm3, %v15822_v45, %v15825_v38  ;;  %v1675_v10 = vsel %vm1645_vm3, %v15825_v38, %v15818_v35  ;;  %v1699_v21 = vmul.f32 %v15767_v54, %v1670_v61  ;;  %v1707_v5 = vmul.f32 %v15776_v14, %v1671_v30  ;;  %v15828_v35 = vld [vmem:[#allocation197_spill] sm:$0xff]  ;;  %v15856_v23 = vld [vmem:[#allocation28_spill] sm:$0xff] }
 0x347   : > { %v1703_v62 = vmul.f32 %v15767_v54, %v1654_v7  ;;  %v1711_v56 = vmul.f32 %v15776_v14, %v1655_v33  ;;  %v1704_v18 = vmul.f32 %v15767_v54, %v1650_v42  ;;  %v1712_v11 = vmul.f32 %v15776_v14, %v1651_v55  ;;  %v9163_v33 = vpop.permute.xlu1 %2305 }
 0x348   : > { %v1698_v45 = vmul.f32 %v15767_v54, %v1674_v15  ;;  %v1705_v8 = vmul.f32 %v15767_v54, %v1646_v22  ;;  %v9153_v38 = vsel %vm1645_vm3, %v15809_v3, %v15827_v51  ;;  %v9159_v30 = vsel %vm1645_vm3, %v15812_v63, %v15828_v35  ;;  %15829 = vst [vmem:[#allocation240_spill] sm:$0xff] %v9163_v33  ;;  %v15830_v3 = vld [vmem:[#allocation200_spill] sm:$0xff]  ;;  %v15831_v63 = vld [vmem:[#allocation201_spill] sm:$0xff] }
 0x349   : > { %v1706_v61 = vmul.f32 %v15776_v14, %v1675_v10  ;;  %v1713_v7 = vmul.f32 %v15776_v14, %v1647_v39  ;;  %v9166_v54 = vadd.f32 %v8683_v57, %v1702_v40  ;;  %v9169_v42 = vadd.f32 %v8686_v12, %v1710_v25  ;;  %v9183_v14 = vpop.permute.xlu0 %2307  ;;  %v15833_v15 = vld [vmem:[#allocation72_spill] sm:$0xff]  ;;  %v15834_v40 = vld [vmem:[#allocation74_spill] sm:$0xff] }
 0x34a   : > { %v9175_v55 = vsel %vm1645_vm3, %v15794_v13, %v15830_v3  ;;  %v9181_v22 = vsel %vm1645_vm3, %v15795_v31, %v15831_v63  ;;  %15832 = vst [vmem:[#allocation150_spill] sm:$0xff] %v9183_v14  ;;  %v9186_v57 = vadd.f32 %v15833_v15, %v1699_v21  ;;  %v9189_v12 = vadd.f32 %v15834_v40, %v1707_v5  ;;  %v15849_v40 = vld [vmem:[#allocation219_spill] sm:$0xff]  ;;  %v15854_v33 = vld [vmem:[#allocation16_spill] sm:$0xff] }
 0x34b   : > { %v9192_v25 = vadd.f32 %v8762_v52, %v1703_v62  ;;  %v9195_v13 = vadd.f32 %v8790_v20, %v1711_v56  ;;  %v9198_v39 = vadd.f32 %v8765_v59, %v1704_v18  ;;  %v9201_v31 = vadd.f32 %v8793_v49, %v1712_v11  ;;  %v15838_v20 = vld [vmem:[#allocation210_spill] sm:$0xff]  ;;  %v15839_v49 = vld [vmem:[#allocation211_spill] sm:$0xff]  ;;  %v15841_v18 = vld [vmem:[#allocation212_spill] sm:$0xff] }
 0x34c   : > { %v9204_v10 = vadd.f32 %v8804_v41, %v1698_v45  ;;  %v9207_v21 = vadd.f32 %v8807_v6, %v1705_v8  ;;  %v9210_v5 = vadd.f32 %v8812_v29, %v1706_v61  ;;  %v9213_v52 = vadd.f32 %v8825_v32, %v1713_v7  ;;  %v9227_v6 = vpop.permute.xlu1 %2309  ;;  %v15842_v32 = vld [vmem:[#allocation213_spill] sm:$0xff]  ;;  %v15843_v11 = vld [vmem:[#allocation214_spill] sm:$0xff]  ;;  %v15846_v7 = vld [vmem:[#allocation215_spill] sm:$0xff] }
 0x34d   : > { %15835 = vst [vmem:[#allocation159_spill] sm:$0xff] %v9201_v31  ;;  %v9219_v59 = vsel %vm1645_vm3, %v15830_v3, %v15838_v20  ;;  %v9225_v41 = vsel %vm1645_vm3, %v15831_v63, %v15839_v49  ;;  %15840 = vst [vmem:[#allocation51_spill] sm:$0xff] %v9227_v6  ;;  %v9233_v29 = vsel %vm1645_vm3, %v15838_v20, %v15841_v18  ;;  %v15844_v56 = vld [vmem:[#allocation218_spill] sm:$0xff]  ;;  %v9251_v61 = vpop.permute.xlu0 %2311  ;;  %v15847_v63 = vld [vmem:[#allocation216_spill] sm:$0xff] }
 0x34e   : > { %15836 = vst [vmem:[#allocation102_spill] sm:$0xff] %v9207_v21  ;;  %15837 = vst [vmem:[#allocation243_spill] sm:$0xff] %v9213_v52  ;;  %v9239_v8 = vsel %vm1645_vm3, %v15839_v49, %v15842_v32  ;;  %v9245_v62 = vsel %vm1645_vm3, %v15841_v18, %v15843_v11  ;;  %v1660_v45 = vsel %vm1645_vm3, %v15773_v47, %v15844_v56  ;;  %v15850_v47 = vld [vmem:[#allocation222_spill] sm:$0xff]  ;;  %v15853_v6 = vld [vmem:[#allocation21_spill] sm:$0xff] }
 0x34f   : > { %15845 = vst [vmem:[#allocation176_spill] sm:$0xff] %v9251_v61  ;;  %v9257_v3 = vsel %vm1645_vm3, %v15842_v32, %v15846_v7  ;;  %v9263_v15 = vsel %vm1645_vm3, %v15843_v11, %v15847_v63  ;;  %v1661_v20 = vsel %vm1645_vm3, %v15774_v28, %v15849_v40  ;;  %v1672_v49 = vsel %vm1645_vm3, %v15850_v47, %v15770_v44  ;;  %v15851_v32 = vld [vmem:[#allocation223_spill] sm:$0xff]  ;;  %v15852_v61 = vld [vmem:[#allocation224_spill] sm:$0xff]  ;;  %v15860_v31 = vld [vmem:[#allocation217_spill] sm:$0xff] }
 0x350   : > { %15848 = vst [vmem:[#allocation171_spill] sm:$0xff] %v9263_v15  ;;  %v2012_v18 = vsel %vm1645_vm3, %v15847_v63, %v15791_v46  ;;  %v1673_v11 = vsel %vm1645_vm3, %v15851_v32, %v15772_v19  ;;  %v1656_v28 = vsel %vm1645_vm3, %v15844_v56, %v15852_v61  ;;  %v1657_v44 = vsel %vm1645_vm3, %v15849_v40, %v15853_v6  ;;  %v15855_v63 = vld [vmem:[#allocation18_spill] sm:$0xff]  ;;  %v9302_v52 = vpop.permute.xlu1 %2313  ;;  %v15858_v21 = vld [vmem:[#allocation32_spill] sm:$0xff] }
 0x351   : > { %v1718_v14 = vmul.f32 %v15779_v4, %v1660_v45  ;;  %v1652_v46 = vsel %vm1645_vm3, %v15852_v61, %v15854_v33  ;;  %v1653_v19 = vsel %vm1645_vm3, %v15853_v6, %v15855_v63  ;;  %v1676_v56 = vsel %vm1645_vm3, %v15856_v23, %v15850_v47  ;;  %15857 = vst [vmem:[#allocation167_spill] sm:$0xff] %v9302_v52  ;;  %v9314_v15 = vpop.permute.xlu0 %2315 }
 0x352   : > { %v1726_v40 = vmul.f32 %v15780_v24, %v1661_v20  ;;  %v1715_v45 = vmul.f32 %v15779_v4, %v1672_v49  ;;  %v1648_v61 = vsel %vm1645_vm3, %v15854_v33, %v15856_v23  ;;  %v1677_v6 = vsel %vm1645_vm3, %v15858_v21, %v15851_v32  ;;  %15859 = vst [vmem:[#allocation152_spill] sm:$0xff] %v9314_v15  ;;  %v15864_v15 = vld [vmem:[#allocation221_spill] sm:$0xff] }
 0x353   : > { %v1723_v47 = vmul.f32 %v15780_v24, %v1673_v11  ;;  %v1719_v52 = vmul.f32 %v15779_v4, %v1656_v28  ;;  %v1727_v20 = vmul.f32 %v15780_v24, %v1657_v44  ;;  %v1649_v49 = vsel %vm1645_vm3, %v15855_v63, %v15858_v21 }
 0x354   : > { %v9327_v23 = vsel %vm1645_vm3, %v15846_v7, %v15860_v31  ;;  %v1720_v33 = vmul.f32 %v15779_v4, %v1652_v46  ;;  %v1728_v32 = vmul.f32 %v15780_v24, %v1653_v19  ;;  %v1714_v11 = vmul.f32 %v15779_v4, %v1676_v56  ;;  %v9341_v7 = vpop.permute.xlu1 %2317  ;;  %v15863_v19 = vld [vmem:[#allocation220_spill] sm:$0xff] }
 0x355   : > { %15861 = vst [vmem:[#allocation162_spill] sm:$0xff] %v9327_v23  ;;  %v2013_v28 = vsel %vm1645_vm3, %v15860_v31, %v15793_v27  ;;  %v9337_v44 = vadd.f32 %v8848_v26, %v1718_v14  ;;  %v1721_v21 = vmul.f32 %v15779_v4, %v1648_v61  ;;  %v1722_v63 = vmul.f32 %v15780_v24, %v1677_v6  ;;  %v9359_v27 = vpop.permute.xlu0 %2319  ;;  %v15866_v14 = vld [vmem:[#allocation42_spill] sm:$0xff] }
 0x356   : > { %15862 = vst [vmem:[#allocation174_spill] sm:$0xff] %v9341_v7  ;;  %v9344_v46 = vadd.f32 %v8855_v60, %v1726_v40  ;;  %v9350_v56 = vsel %vm1645_vm3, %v15827_v51, %v15863_v19  ;;  %v9356_v26 = vsel %vm1645_vm3, %v15828_v35, %v15864_v15  ;;  %v1729_v4 = vmul.f32 %v15780_v24, %v1649_v49  ;;  %v15867_v60 = vld [vmem:[#allocation112_spill] sm:$0xff] }
 0x357   : > { %15865 = vst [vmem:[#allocation170_spill] sm:$0xff] %v9359_v27  ;;  %v1900_v31 = vadd.f32 %v15866_v14, %v1715_v45  ;;  %v1908_v40 = vadd.f32 %v15867_v60, %v1723_v47  ;;  %v9364_v61 = vadd.f32 %v8929_v9, %v1719_v52  ;;  %v9367_v51 = vadd.f32 %v8994_v53, %v1727_v20  ;;  %v15868_v49 = vld [vmem:[#allocation44_spill] sm:$0xff]  ;;  %v15870_v9 = vld [vmem:[#allocation10_spill] sm:$0xff]  ;;  %v15881_v60 = vld [vmem:[#allocation161_spill] sm:$0xff] }
 0x358   : > { %v9370_v6 = vadd.f32 %v8916_v43, %v1720_v33  ;;  %v9373_v35 = vadd.f32 %v8997_v2, %v1728_v32  ;;  %v1899_v24 = vadd.f32 %v9011_v37, %v1714_v11  ;;  %v2036_v27 = vmul.f32 %v15868_v49, %v2012_v18  ;;  %v9387_v43 = vpop.permute.xlu1 %2321  ;;  %v15873_v52 = vld [vmem:[#allocation12_spill] sm:$0xff] }
 0x359   : > { %v9378_v45 = vadd.f32 %v9000_v48, %v1721_v21  ;;  %v1907_v47 = vadd.f32 %v9014_v16, %v1722_v63  ;;  %v9385_v53 = vsel %vm1645_vm3, %v15863_v19, %v15870_v9  ;;  %15871 = vst [vmem:[#allocation178_spill] sm:$0xff] %v9387_v43  ;;  %v2037_v2 = vmul.f32 %v15868_v49, %v9035_v0  ;;  %v15874_v16 = vld [vmem:[#allocation31_spill] sm:$0xff]  ;;  %v9404_v20 = vpop.permute.xlu0 %2357  ;;  %v15876_v0 = vld [vmem:[#allocation20_spill] sm:$0xff] }
 0x35a   : > { %v9392_v37 = vadd.f32 %v9017_v17, %v1729_v4  ;;  %v9398_v48 = vsel %vm1645_vm3, %v15864_v15, %v15873_v52  ;;  %v2014_v18 = vsel %vm1645_vm3, %v15874_v16, %v15810_v1  ;;  %15875 = vst [vmem:[#allocation79_spill] sm:$0xff] %v9404_v20  ;;  %v2038_v33 = vmul.f32 %v15868_v49, %v9047_v58  ;;  %v15877_v32 = vld [vmem:[#allocation48_spill] sm:$0xff]  ;;  %v15878_v15 = vld [vmem:[#allocation67_spill] sm:$0xff]  ;;  %v15879_v1 = vld [vmem:[#allocation34_spill] sm:$0xff] }
 0x35b   : > { %15869 = vst [vmem:[#allocation175_spill] sm:$0xff] %v9378_v45  ;;  %v9412_v17 = vsel %vm1645_vm3, %v15870_v9, %v15876_v0  ;;  %v2044_v11 = vmul.f32 %v15877_v32, %v2013_v28  ;;  %v2052_v21 = vmul.f32 %v15878_v15, %v2014_v18  ;;  %v2045_v63 = vmul.f32 %v15877_v32, %v9041_v36  ;;  %v15880_v4 = vld [vmem:[#allocation24_spill] sm:$0xff]  ;;  %v15885_v20 = vld [vmem:[#allocation35_spill] sm:$0xff] }
 0x35c   : > { %15872 = vst [vmem:[#allocation163_spill] sm:$0xff] %v9392_v37  ;;  %v2015_v19 = vsel %vm1645_vm3, %v15879_v1, %v15813_v50  ;;  %v2068_v58 = vadd.f32 %v2036_v27, %v9204_v10  ;;  %v2053_v14 = vmul.f32 %v15878_v15, %v15880_v4  ;;  %v2046_v9 = vmul.f32 %v15877_v32, %v15881_v60  ;;  %v15882_v37 = vld [vmem:[#allocation22_spill] sm:$0xff]  ;;  %v9433_v36 = vpop.permute.xlu1 %2362  ;;  %v15884_v18 = vld [vmem:[#allocation68_spill] sm:$0xff]  ;;  %v15886_v27 = vld [vmem:[#allocation17_spill] sm:$0xff] }
 0x35d   : > { %v9431_v28 = vsel %vm1645_vm3, %v15873_v52, %v15882_v37  ;;  %15883 = vst [vmem:[#allocation166_spill] sm:$0xff] %v9433_v36  ;;  %v2060_v43 = vmul.f32 %v15884_v18, %v2015_v19  ;;  %v2069_v50 = vadd.f32 %v2037_v2, %v9186_v57  ;;  %v2061_v10 = vmul.f32 %v15884_v18, %v15885_v20  ;;  %v15887_v60 = vld [vmem:[#allocation19_spill] sm:$0xff]  ;;  %v9457_v2 = vpop.permute.xlu0 %2367  ;;  %v15890_v20 = vld [vmem:[#allocation156_spill] sm:$0xff] }
 0x35e   : > { %v9443_v4 = vsel %vm1645_vm3, %v15876_v0, %v15886_v27  ;;  %v9449_v52 = vsel %vm1645_vm3, %v15882_v37, %v15887_v60  ;;  %v9455_v57 = vsel %vm1645_vm3, %v15886_v27, %v15874_v16  ;;  %15889 = vst [vmem:[#allocation188_spill] sm:$0xff] %v9457_v2  ;;  %v2070_v19 = vadd.f32 %v2038_v33, %v15890_v20  ;;  %v15892_v16 = vld [vmem:[#allocation164_spill] sm:$0xff]  ;;  %v15893_v2 = vld [vmem:[#allocation158_spill] sm:$0xff] }
 0x35f   : > { %15888 = vst [vmem:[#allocation43_spill] sm:$0xff] %v9455_v57  ;;  %v2076_v36 = vadd.f32 %v2044_v11, %v9210_v5  ;;  %v2084_v0 = vadd.f32 %v2052_v21, %v1899_v24  ;;  %v2077_v7 = vadd.f32 %v2045_v63, %v9189_v12  ;;  %v2039_v45 = vmul.f32 %v15868_v49, %v9175_v55  ;;  %v15895_v12 = vld [vmem:[#allocation11_spill] sm:$0xff] }
 0x360   : > { %v9468_v37 = vsel %vm1645_vm3, %v15887_v60, %v15879_v1  ;;  %v2665_v27 = vmul.f32 %v15892_v16, %v2068_v58  ;;  %v2085_v57 = vadd.f32 %v2053_v14, %v1900_v31  ;;  %v2078_v23 = vadd.f32 %v2046_v9, %v15893_v2  ;;  %v9473_v5 = vpop.permute.xlu1 %2372  ;;  %v15897_v63 = vld [vmem:[#allocation7_spill] sm:$0xff] }
 0x361   : > { %15891 = vst [vmem:[#allocation186_spill] sm:$0xff] %v9468_v37  ;;  %15894 = vst [vmem:[#allocation189_spill] sm:$0xff] %v9473_v5  ;;  %v2092_v24 = vadd.f32 %v2060_v43, %v1907_v47  ;;  %v2666_v33 = vmul.f32 %v15895_v12, %v2069_v50  ;;  %v2093_v11 = vadd.f32 %v2061_v10, %v1908_v40  ;;  %v9478_v21 = vpop.permute.xlu0 %2444  ;;  %v15899_v50 = vld [vmem:[#allocation115_spill] sm:$0xff]  ;;  %v16061_v37 = vld [vmem:[#allocation148_spill] sm:$0xff] }
 0x362   : > { %v2040_v55 = vmul.f32 %v15868_v49, %v9219_v59  ;;  %15896 = vst [vmem:[#allocation187_spill] sm:$0xff] %v9478_v21  ;;  %v2667_v1 = vmul.f32 %v15897_v63, %v2070_v19  ;;  %v2054_v31 = vmul.f32 %v15878_v15, %v9153_v38  ;;  %v2047_v58 = vmul.f32 %v15877_v32, %v9181_v22  ;;  %v15898_v59 = vld [vmem:[#allocation157_spill] sm:$0xff] }
 0x363   : > { %v2041_v14 = vmul.f32 %v15868_v49, %v9233_v29  ;;  %v2673_v47 = vmul.f32 %v15892_v16, %v2076_v36  ;;  %v2681_v40 = vmul.f32 %v15892_v16, %v2084_v0  ;;  %v2674_v43 = vmul.f32 %v15895_v12, %v2077_v7  ;;  %v15902_v36 = vld [vmem:[#allocation245_spill] sm:$0xff] }
 0x364   : > { %v2071_v9 = vadd.f32 %v2039_v45, %v15898_v59  ;;  %v9492_v10 = vadd.f32 %v2665_v27, %v15899_v50  ;;  %v2682_v60 = vmul.f32 %v15895_v12, %v2085_v57  ;;  %v2675_v38 = vmul.f32 %v15897_v63, %v2078_v23  ;;  %v9498_v2 = vpop.permute.xlu1 %2446  ;;  %v15905_v57 = vld [vmem:[#allocation71_spill] sm:$0xff]  ;;  %v15907_v23 = vld [vmem:[#allocation30_spill] sm:$0xff]  ;;  %v15909_v50 = vld [vmem:[#allocation92_spill] sm:$0xff] }
 0x365   : > { %v2062_v22 = vmul.f32 %v15884_v18, %v9159_v30  ;;  %15901 = vst [vmem:[#allocation191_spill] sm:$0xff] %v9498_v2  ;;  %v2689_v29 = vmul.f32 %v15892_v16, %v2092_v24  ;;  %v9502_v20 = vadd.f32 %v2666_v33, %v15902_v36  ;;  %v2690_v7 = vmul.f32 %v15895_v12, %v2093_v11  ;;  %v9507_v19 = vpop.permute.xlu0 %2448  ;;  %v15908_v30 = vld [vmem:[#allocation160_spill] sm:$0xff]  ;;  %v15913_v16 = vld [vmem:[#allocation65_spill] sm:$0xff]  ;;  %v15915_v12 = vld [vmem:[#allocation14_spill] sm:$0xff] }
 0x366   : > { %15900 = vst [vmem:[#allocation190_spill] sm:$0xff] %v9492_v10  ;;  %v2055_v45 = vmul.f32 %v15878_v15, %v9350_v56  ;;  %15904 = vst [vmem:[#allocation45_spill] sm:$0xff] %v9507_v19  ;;  %v9510_v0 = vadd.f32 %v2667_v1, %v15905_v57  ;;  %v2086_v27 = vadd.f32 %v2054_v31, %v15907_v23  ;;  %v15911_v36 = vld [vmem:[#allocation136_spill] sm:$0xff]  ;;  %v15916_v1 = vld [vmem:[#allocation143_spill] sm:$0xff] }
 0x367   : > { %15903 = vst [vmem:[#allocation80_spill] sm:$0xff] %v9502_v20  ;;  %v2079_v59 = vadd.f32 %v2047_v58, %v15908_v30  ;;  %v2063_v24 = vmul.f32 %v15884_v18, %v9356_v26  ;;  %v9517_v33 = vadd.f32 %v2673_v47, %v15909_v50  ;;  %v9520_v11 = vadd.f32 %v2681_v40, %v15911_v36  ;;  %v15918_v31 = vld [vmem:[#allocation73_spill] sm:$0xff]  ;;  %v15922_v40 = vld [vmem:[#allocation108_spill] sm:$0xff]  ;;  %v16051_v19 = vld [vmem:[#allocation107_spill] sm:$0xff] }
 0x368   : > { %15906 = vst [vmem:[#allocation46_spill] sm:$0xff] %v9510_v0  ;;  %v9523_v56 = vadd.f32 %v2674_v43, %v15913_v16  ;;  %v2668_v20 = vmul.f32 %v15915_v12, %v2071_v9  ;;  %v9527_v57 = vadd.f32 %v2682_v60, %v15916_v1  ;;  %v9530_v23 = vadd.f32 %v2675_v38, %v15918_v31  ;;  %v15920_v58 = vld [vmem:[#allocation165_spill] sm:$0xff]  ;;  %v9535_v47 = vpop.permute.xlu1 %2450  ;;  %v15924_v16 = vld [vmem:[#allocation103_spill] sm:$0xff]  ;;  %v16053_v2 = vld [vmem:[#allocation132_spill] sm:$0xff] }
 0x369   : > { %15910 = vst [vmem:[#allocation49_spill] sm:$0xff] %v9517_v33  ;;  %15912 = vst [vmem:[#allocation64_spill] sm:$0xff] %v9520_v11  ;;  %v2094_v30 = vadd.f32 %v2062_v22, %v15920_v58  ;;  %v2048_v26 = vmul.f32 %v15877_v32, %v9225_v41  ;;  %v9538_v50 = vadd.f32 %v2689_v29, %v15922_v40  ;;  %v15926_v9 = vld [vmem:[#allocation169_spill] sm:$0xff]  ;;  %v9546_v38 = vpop.permute.xlu0 %2452  ;;  %v15928_v41 = vld [vmem:[#allocation168_spill] sm:$0xff] }
 0x36a   : > { %15914 = vst [vmem:[#allocation25_spill] sm:$0xff] %v9523_v56  ;;  %15917 = vst [vmem:[#allocation99_spill] sm:$0xff] %v9527_v57  ;;  %v9541_v43 = vadd.f32 %v2690_v7, %v15924_v16  ;;  %v2087_v36 = vadd.f32 %v2055_v45, %v15926_v9  ;;  %v2056_v60 = vmul.f32 %v15878_v15, %v9385_v53  ;;  %v15929_v58 = vld [vmem:[#allocation81_spill] sm:$0xff]  ;;  %v15931_v16 = vld [vmem:[#allocation47_spill] sm:$0xff] }
 0x36b   : > { %15919 = vst [vmem:[#allocation26_spill] sm:$0xff] %v9530_v23  ;;  %15921 = vst [vmem:[#allocation182_spill] sm:$0xff] %v9535_v47  ;;  %v2683_v22 = vmul.f32 %v15897_v63, %v2086_v27  ;;  %v2676_v1 = vmul.f32 %v15915_v12, %v2079_v59  ;;  %v2095_v31 = vadd.f32 %v2063_v24, %v15928_v41  ;;  %v15932_v27 = vld [vmem:[#allocation59_spill] sm:$0xff]  ;;  %v16011_v11 = vld [vmem:[#allocation242_spill] sm:$0xff] }
 0x36c   : > { %15923 = vst [vmem:[#allocation179_spill] sm:$0xff] %v9538_v50  ;;  %15925 = vst [vmem:[#allocation183_spill] sm:$0xff] %v9541_v43  ;;  %v2064_v29 = vmul.f32 %v15884_v18, %v9398_v48  ;;  %v9554_v40 = vadd.f32 %v2668_v20, %v15929_v58  ;;  %v2072_v7 = vadd.f32 %v2040_v55, %v9166_v54  ;;  %v9571_v54 = vpop.permute.xlu1 %2454  ;;  %v15935_v58 = vld [vmem:[#allocation40_spill] sm:$0xff]  ;;  %v15995_v43 = vld [vmem:[#allocation98_spill] sm:$0xff] }
 0x36d   : > { %15927 = vst [vmem:[#allocation181_spill] sm:$0xff] %v9546_v38  ;;  %v2049_v45 = vmul.f32 %v15877_v32, %v9239_v8  ;;  %v2057_v53 = vmul.f32 %v15878_v15, %v9412_v17  ;;  %v9565_v59 = vsel %vm2169_vm4, %v15932_v27, %v15931_v16  ;;  %v2691_v24 = vmul.f32 %v15897_v63, %v2094_v30  ;;  %v9578_v41 = vpop.permute.xlu0 %2456  ;;  %v15996_v0 = vld [vmem:[#allocation227_spill] sm:$0xff]  ;;  %v16057_v21 = vld [vmem:[#allocation149_spill] sm:$0xff]  ;;  %v16058_v38 = vld [vmem:[#allocation154_spill] sm:$0xff] }
 0x36e   : > { %15930 = vst [vmem:[#allocation184_spill] sm:$0xff] %v9554_v40  ;;  %v2080_v48 = vadd.f32 %v2048_v26, %v9169_v42  ;;  %v2065_v20 = vmul.f32 %v15884_v18, %v9431_v28  ;;  %15933 = vst [vmem:[#allocation185_spill] sm:$0xff] %v9571_v54  ;;  %v2684_v8 = vmul.f32 %v15915_v12, %v2087_v36  ;;  %v15937_v42 = vld [vmem:[#allocation87_spill] sm:$0xff]  ;;  %v15939_v36 = vld [vmem:[#allocation36_spill] sm:$0xff] }
 0x36f   : > { %v2088_v55 = vadd.f32 %v2056_v60, %v9337_v44  ;;  %v2073_v17 = vadd.f32 %v2041_v14, %v9192_v25  ;;  %v2042_v9 = vmul.f32 %v15868_v49, %v9245_v62  ;;  %15934 = vst [vmem:[#allocation228_spill] sm:$0xff] %v9578_v41  ;;  %v9581_v30 = vadd.f32 %v2683_v22, %v15935_v58  ;;  %v15940_v14 = vld [vmem:[#allocation110_spill] sm:$0xff]  ;;  %v15951_v58 = vld [vmem:[#allocation117_spill] sm:$0xff]  ;;  %v16007_v57 = vld [vmem:[#allocation23_spill] sm:$0xff] }
 0x370   : > { %v9584_v26 = vadd.f32 %v2676_v1, %v15937_v42  ;;  %v2692_v28 = vmul.f32 %v15915_v12, %v2095_v31  ;;  %v2096_v63 = vadd.f32 %v2064_v29, %v9344_v46  ;;  %v2669_v40 = vmul.f32 %v15939_v36, %v2072_v7  ;;  %v9600_v46 = vpop.permute.xlu1 %2458  ;;  %v15943_v29 = vld [vmem:[#allocation130_spill] sm:$0xff]  ;;  %v15953_v42 = vld [vmem:[#allocation159_spill] sm:$0xff]  ;;  %v16056_v54 = vld [vmem:[#allocation124_spill] sm:$0xff] }
 0x371   : > { %15936 = vst [vmem:[#allocation144_spill] sm:$0xff] %v9581_v30  ;;  %v2081_v44 = vadd.f32 %v2049_v45, %v9195_v13  ;;  %v2089_v25 = vadd.f32 %v2057_v53, %v9364_v61  ;;  %v2050_v62 = vmul.f32 %v15877_v32, %v9257_v3  ;;  %v9594_v60 = vadd.f32 %v2691_v24, %v15940_v14  ;;  %v15945_v61 = vld [vmem:[#allocation52_spill] sm:$0xff]  ;;  %v15946_v53 = vld [vmem:[#allocation50_spill] sm:$0xff]  ;;  %v15947_v24 = vld [vmem:[#allocation61_spill] sm:$0xff] }
 0x372   : > { %15938 = vst [vmem:[#allocation105_spill] sm:$0xff] %v9584_v26  ;;  %v2677_v22 = vmul.f32 %v15939_v36, %v2080_v48  ;;  %v2097_v1 = vadd.f32 %v2065_v20, %v9367_v51  ;;  %v2058_v31 = vmul.f32 %v15878_v15, %v9443_v4  ;;  %15942 = vst [vmem:[#allocation194_spill] sm:$0xff] %v9600_v46  ;;  %v9614_v51 = vpop.permute.xlu0 %2460  ;;  %v15949_v4 = vld [vmem:[#allocation127_spill] sm:$0xff] }
 0x373   : > { %15941 = vst [vmem:[#allocation114_spill] sm:$0xff] %v9594_v60  ;;  %v9603_v7 = vadd.f32 %v2684_v8, %v15943_v29  ;;  %v2685_v13 = vmul.f32 %v15939_v36, %v2088_v55  ;;  %v2670_v45 = vmul.f32 %v15945_v61, %v2073_v17  ;;  %v2074_v3 = vadd.f32 %v2042_v9, %v9198_v39  ;;  %v15954_v29 = vld [vmem:[#allocation69_spill] sm:$0xff]  ;;  %v15955_v12 = vld [vmem:[#allocation75_spill] sm:$0xff] }
 0x374   : > { %v9612_v48 = vsel %vm2169_vm4, %v15947_v24, %v15946_v53  ;;  %15948 = vst [vmem:[#allocation195_spill] sm:$0xff] %v9614_v51  ;;  %v9617_v20 = vadd.f32 %v2692_v28, %v15949_v4  ;;  %v2693_v8 = vmul.f32 %v15939_v36, %v2096_v63  ;;  %v2066_v55 = vmul.f32 %v15884_v18, %v9449_v52  ;;  %v15956_v4 = vld [vmem:[#allocation56_spill] sm:$0xff]  ;;  %v15976_v60 = vld [vmem:[#allocation77_spill] sm:$0xff]  ;;  %v16012_v33 = vld [vmem:[#allocation55_spill] sm:$0xff] }
 0x375   : > { %15944 = vst [vmem:[#allocation192_spill] sm:$0xff] %v9603_v7  ;;  %v9623_v17 = vadd.f32 %v2669_v40, %v15951_v58  ;;  %v2678_v39 = vmul.f32 %v15945_v61, %v2081_v44  ;;  %v2686_v9 = vmul.f32 %v15945_v61, %v2089_v25  ;;  %v2082_v14 = vadd.f32 %v2050_v62, %v15953_v42  ;;  %v15958_v58 = vld [vmem:[#allocation70_spill] sm:$0xff]  ;;  %v15959_v36 = vld [vmem:[#allocation76_spill] sm:$0xff]  ;;  %v9645_v25 = vpop.permute.xlu1 %2462  ;;  %v15961_v62 = vld [vmem:[#allocation111_spill] sm:$0xff] }
 0x376   : > { %15950 = vst [vmem:[#allocation193_spill] sm:$0xff] %v9617_v20  ;;  %v9632_v28 = vsel %vm2169_vm4, %v15955_v12, %v15954_v29  ;;  %v9635_v63 = vadd.f32 %v2677_v22, %v15956_v4  ;;  %v2694_v52 = vmul.f32 %v15945_v61, %v2097_v1  ;;  %v2090_v40 = vadd.f32 %v2058_v31, %v9370_v6  ;;  %v15965_v22 = vld [vmem:[#allocation39_spill] sm:$0xff]  ;;  %v15967_v1 = vld [vmem:[#allocation62_spill] sm:$0xff]  ;;  %v9662_v61 = vpop.permute.xlu0 %2464  ;;  %v15969_v7 = vld [vmem:[#allocation129_spill] sm:$0xff] }
 0x377   : > { %15952 = vst [vmem:[#allocation198_spill] sm:$0xff] %v9623_v17  ;;  %v9643_v44 = vsel %vm2169_vm4, %v15959_v36, %v15958_v58  ;;  %15960 = vst [vmem:[#allocation202_spill] sm:$0xff] %v9645_v25  ;;  %v9648_v42 = vadd.f32 %v2685_v13, %v15961_v62  ;;  %v15963_v17 = vld [vmem:[#allocation145_spill] sm:$0xff]  ;;  %v2671_v4 = vmul.f32 %v15965_v22, %v2074_v3  ;;  %v15973_v3 = vld [vmem:[#allocation128_spill] sm:$0xff] }
 0x378   : > { %15957 = vst [vmem:[#allocation199_spill] sm:$0xff] %v9635_v63  ;;  %v9651_v20 = vadd.f32 %v2670_v45, %v15963_v17  ;;  %v15966_v63 = vld [vmem:[#allocation60_spill] sm:$0xff]  ;;  %v2191_v31 = vsel %vm2169_vm4, %v15946_v53, %v15967_v1  ;;  %15968 = vst [vmem:[#allocation205_spill] sm:$0xff] %v9662_v61  ;;  %v9665_v13 = vadd.f32 %v2693_v8, %v15969_v7  ;;  %v15977_v7 = vld [vmem:[#allocation78_spill] sm:$0xff] }
 0x379   : > { %15962 = vst [vmem:[#allocation203_spill] sm:$0xff] %v9648_v42  ;;  %v2190_v6 = vsel %vm2169_vm4, %v15931_v16, %v15966_v63  ;;  %v2098_v45 = vadd.f32 %v2066_v55, %v9373_v35  ;;  %v15971_v17 = vld [vmem:[#allocation120_spill] sm:$0xff]  ;;  %v2679_v16 = vmul.f32 %v15965_v22, %v2082_v14  ;;  %v15975_v42 = vld [vmem:[#allocation171_spill] sm:$0xff]  ;;  %v2192_v53 = vsel %vm2169_vm4, %v15954_v29, %v15976_v60  ;;  %v15978_v8 = vld [vmem:[#allocation133_spill] sm:$0xff] }
 0x37a   : > { %15964 = vst [vmem:[#allocation204_spill] sm:$0xff] %v9651_v20  ;;  %15970 = vst [vmem:[#allocation206_spill] sm:$0xff] %v9665_v13  ;;  %v9669_v62 = vadd.f32 %v2678_v39, %v15971_v17  ;;  %v9672_v20 = vadd.f32 %v2686_v9, %v15973_v3  ;;  %v2043_v26 = vmul.f32 %v15868_v49, %v15975_v42  ;;  %v15980_v9 = vld [vmem:[#allocation89_spill] sm:$0xff]  ;;  %v15981_v14 = vld [vmem:[#allocation90_spill] sm:$0xff]  ;;  %v9703_v17 = vpop.permute.xlu1 %2466 }
 0x37b   : > { %v9685_v35 = vsel %vm2169_vm4, %v15958_v58, %v15977_v7  ;;  %v9688_v55 = vadd.f32 %v2694_v52, %v15978_v8  ;;  %v2687_v39 = vmul.f32 %v15965_v22, %v2090_v40  ;;  %v2186_v49 = vsel %vm2169_vm4, %v15966_v63, %v15980_v9  ;;  %v15982_v42 = vld [vmem:[#allocation93_spill] sm:$0xff]  ;;  %15983 = vst [vmem:[#allocation196_spill] sm:$0xff] %v9703_v17  ;;  %v15984_v52 = vld [vmem:[#allocation58_spill] sm:$0xff]  ;;  %v15986_v40 = vld [vmem:[#allocation95_spill] sm:$0xff] }
 0x37c   : > { %15972 = vst [vmem:[#allocation207_spill] sm:$0xff] %v9669_v62  ;;  %15974 = vst [vmem:[#allocation208_spill] sm:$0xff] %v9672_v20  ;;  %v2187_v29 = vsel %vm2169_vm4, %v15967_v1, %v15981_v14  ;;  %v2188_v58 = vsel %vm2169_vm4, %v15976_v60, %v15982_v42  ;;  %v9706_v3 = vadd.f32 %v2671_v4, %v15984_v52  ;;  %v15987_v8 = vld [vmem:[#allocation225_spill] sm:$0xff]  ;;  %v9720_v20 = vpop.permute.xlu0 %2468  ;;  %v15990_v52 = vld [vmem:[#allocation226_spill] sm:$0xff] }
 0x37d   : > { %15979 = vst [vmem:[#allocation209_spill] sm:$0xff] %v9688_v55  ;;  %v2189_v63 = vsel %vm2169_vm4, %v15977_v7, %v15986_v40  ;;  %v2182_v1 = vsel %vm2169_vm4, %v15980_v9, %v15987_v8  ;;  %v15988_v55 = vld [vmem:[#allocation97_spill] sm:$0xff]  ;;  %15989 = vst [vmem:[#allocation200_spill] sm:$0xff] %v9720_v20  ;;  %v2695_v4 = vmul.f32 %v15965_v22, %v2098_v45  ;;  %v15991_v7 = vld [vmem:[#allocation126_spill] sm:$0xff] }
 0x37e   : > { %15985 = vst [vmem:[#allocation197_spill] sm:$0xff] %v9706_v3  ;;  %v2183_v60 = vsel %vm2169_vm4, %v15981_v14, %v15988_v55  ;;  %v2184_v3 = vsel %vm2169_vm4, %v15982_v42, %v15990_v52  ;;  %v9728_v62 = vadd.f32 %v2679_v16, %v15991_v7  ;;  %v15993_v13 = vld [vmem:[#allocation102_spill] sm:$0xff]  ;;  %v2185_v14 = vsel %vm2169_vm4, %v15986_v40, %v15995_v43  ;;  %v15997_v22 = vld [vmem:[#allocation229_spill] sm:$0xff]  ;;  %v15998_v42 = vld [vmem:[#allocation151_spill] sm:$0xff] }
 0x37f   : > { %v2075_v30 = vadd.f32 %v2043_v26, %v15993_v13  ;;  %v15994_v9 = vld [vmem:[#allocation162_spill] sm:$0xff]  ;;  %v2178_v45 = vsel %vm2169_vm4, %v15987_v8, %v15996_v0  ;;  %v2179_v16 = vsel %vm2169_vm4, %v15988_v55, %v15997_v22  ;;  %v9746_v26 = vadd.f32 %v2687_v39, %v15998_v42  ;;  %v9764_v39 = vpop.permute.xlu1 %2470  ;;  %v16005_v42 = vld [vmem:[#allocation29_spill] sm:$0xff]  ;;  %v16045_v61 = vld [vmem:[#allocation123_spill] sm:$0xff] }
 0x380   : > { %15992 = vst [vmem:[#allocation201_spill] sm:$0xff] %v9728_v62  ;;  %v2051_v23 = vmul.f32 %v15877_v32, %v15994_v9  ;;  %v16000_v13 = vld [vmem:[#allocation230_spill] sm:$0xff]  ;;  %v16002_v9 = vld [vmem:[#allocation237_spill] sm:$0xff]  ;;  %16004 = vst [vmem:[#allocation74_spill] sm:$0xff] %v9764_v39  ;;  %v9778_v56 = vpop.permute.xlu0 %2472 }
 0x381   : > { %15999 = vst [vmem:[#allocation72_spill] sm:$0xff] %v9746_v26  ;;  %v2180_v32 = vsel %vm2169_vm4, %v15990_v52, %v16000_v13  ;;  %v16001_v7 = vld [vmem:[#allocation234_spill] sm:$0xff]  ;;  %v2174_v8 = vsel %vm2169_vm4, %v15996_v0, %v16002_v9  ;;  %v2176_v52 = vsel %vm2169_vm4, %v16000_v13, %v16005_v42  ;;  %v16006_v26 = vld [vmem:[#allocation139_spill] sm:$0xff]  ;;  %v2170_v0 = vsel %vm2169_vm4, %v16002_v9, %v16007_v57  ;;  %v16037_v20 = vld [vmem:[#allocation53_spill] sm:$0xff] }
 0x382   : > { %v2181_v40 = vsel %vm2169_vm4, %v15995_v43, %v16001_v7  ;;  %v16003_v62 = vld [vmem:[#allocation138_spill] sm:$0xff]  ;;  %v2177_v43 = vsel %vm2169_vm4, %v16001_v7, %v16006_v26  ;;  %16008 = vst [vmem:[#allocation210_spill] sm:$0xff] %v9778_v56  ;;  %v9787_v13 = vsel %vm2169_vm4, %v16007_v57, %v15932_v27  ;;  %v2672_v10 = vmul.f32 %v16012_v33, %v2075_v30  ;;  %v16013_v39 = vld [vmem:[#allocation243_spill] sm:$0xff]  ;;  %v16060_v18 = vld [vmem:[#allocation140_spill] sm:$0xff] }
 0x383   : > { %v2175_v55 = vsel %vm2169_vm4, %v15997_v22, %v16003_v62  ;;  %v16009_v22 = vld [vmem:[#allocation33_spill] sm:$0xff]  ;;  %v2171_v7 = vsel %vm2169_vm4, %v16003_v62, %v16011_v11  ;;  %v2083_v9 = vadd.f32 %v2051_v23, %v16013_v39  ;;  %v16016_v30 = vld [vmem:[#allocation63_spill] sm:$0xff]  ;;  %v16019_v62 = vld [vmem:[#allocation66_spill] sm:$0xff] }
 0x384   : > { %v9781_v50 = vadd.f32 %v2695_v4, %v16009_v22  ;;  %v9799_v4 = vsel %vm2169_vm4, %v16011_v11, %v15947_v24  ;;  %v16014_v22 = vld [vmem:[#allocation244_spill] sm:$0xff]  ;;  %v9815_v23 = vsel %vm2169_vm4, %v16006_v26, %v16016_v30  ;;  %v9821_v11 = vsel %vm2169_vm4, %v16016_v30, %v15959_v36  ;;  %v9823_v24 = vpop.permute.xlu1 %2474  ;;  %v9835_v26 = vpop.permute.xlu0 %2476  ;;  %v16046_v25 = vld [vmem:[#allocation82_spill] sm:$0xff]  ;;  %v16050_v47 = vld [vmem:[#allocation147_spill] sm:$0xff] }
 0x385   : > { %v2172_v57 = vsel %vm2169_vm4, %v16005_v42, %v16014_v22  ;;  %v9809_v27 = vsel %vm2169_vm4, %v16014_v22, %v15955_v12  ;;  %16017 = vst [vmem:[#allocation213_spill] sm:$0xff] %v9821_v11  ;;  %16018 = vst [vmem:[#allocation214_spill] sm:$0xff] %v9823_v24  ;;  %v9827_v39 = vmul.f32 %v16019_v62, %v9565_v59  ;;  %v16022_v11 = vld [vmem:[#allocation43_spill] sm:$0xff]  ;;  %v16048_v51 = vld [vmem:[#allocation6_spill] sm:$0xff] }
 0x386   : > { %16010 = vst [vmem:[#allocation211_spill] sm:$0xff] %v9781_v50  ;;  %16015 = vst [vmem:[#allocation212_spill] sm:$0xff] %v9809_v27  ;;  %v9830_v12 = vmul.f32 %v16019_v62, %v2190_v6  ;;  %v9833_v42 = vmul.f32 %v16019_v62, %v2186_v49  ;;  %v9838_v22 = vmul.f32 %v16019_v62, %v2182_v1  ;;  %v16023_v6 = vld [vmem:[#allocation100_spill] sm:$0xff] }
 0x387   : > { %16020 = vst [vmem:[#allocation218_spill] sm:$0xff] %v9835_v26  ;;  %v9841_v36 = vmul.f32 %v16019_v62, %v2178_v45  ;;  %v9844_v30 = vmul.f32 %v16019_v62, %v2174_v8  ;;  %v2059_v59 = vmul.f32 %v15878_v15, %v16022_v11  ;;  %v9850_v50 = vmul.f32 %v16023_v6, %v9612_v48  ;;  %v16024_v26 = vld [vmem:[#allocation122_spill] sm:$0xff]  ;;  %v16026_v45 = vld [vmem:[#allocation101_spill] sm:$0xff] }
 0x388   : > { %v9853_v49 = vmul.f32 %v16023_v6, %v2191_v31  ;;  %v9856_v24 = vadd.f32 %v2672_v10, %v16024_v26  ;;  %v2680_v1 = vmul.f32 %v16012_v33, %v2083_v9  ;;  %v9861_v56 = vmul.f32 %v16026_v45, %v9632_v28  ;;  %v9872_v31 = vpop.permute.xlu1 %2478  ;;  %v9886_v11 = vpop.permute.xlu0 %2480 }
 0x389   : > { %16021 = vst [vmem:[#allocation215_spill] sm:$0xff] %v9844_v30  ;;  %v9864_v8 = vmul.f32 %v16026_v45, %v2192_v53  ;;  %v9867_v15 = vmul.f32 %v16023_v6, %v2187_v29  ;;  %v9870_v48 = vmul.f32 %v16023_v6, %v2183_v60  ;;  %16027 = vst [vmem:[#allocation219_spill] sm:$0xff] %v9872_v31  ;;  %v16030_v29 = vld [vmem:[#allocation109_spill] sm:$0xff] }
 0x38a   : > { %16025 = vst [vmem:[#allocation216_spill] sm:$0xff] %v9856_v24  ;;  %v9875_v10 = vmul.f32 %v16026_v45, %v2188_v58  ;;  %v9878_v9 = vmul.f32 %v16026_v45, %v2184_v3  ;;  %v9881_v28 = vmul.f32 %v16023_v6, %v2179_v16  ;;  %v9884_v53 = vmul.f32 %v16026_v45, %v2180_v32  ;;  %v16031_v3 = vld [vmem:[#allocation175_spill] sm:$0xff] }
 0x38b   : > { %16029 = vst [vmem:[#allocation223_spill] sm:$0xff] %v9886_v11  ;;  %v9890_v60 = vmul.f32 %v16030_v29, %v9643_v44  ;;  %v9894_v26 = vmul.f32 %v16030_v29, %v9685_v35  ;;  %v9897_v58 = vmul.f32 %v16030_v29, %v2189_v63  ;;  %v9900_v24 = vadd.f32 %v2059_v59, %v16031_v3  ;;  %v16034_v44 = vld [vmem:[#allocation104_spill] sm:$0xff]  ;;  %v16036_v35 = vld [vmem:[#allocation91_spill] sm:$0xff] }
 0x38c   : > { %16028 = vst [vmem:[#allocation222_spill] sm:$0xff] %v9884_v53  ;;  %v9903_v16 = vmul.f32 %v16030_v29, %v2185_v14  ;;  %v9906_v32 = vmul.f32 %v16030_v29, %v2181_v40  ;;  %v9909_v11 = vmul.f32 %v16023_v6, %v2175_v55  ;;  %v9912_v31 = vadd.f32 %v2680_v1, %v16034_v44  ;;  %v16041_v3 = vld [vmem:[#allocation96_spill] sm:$0xff]  ;;  %v16042_v55 = vld [vmem:[#allocation173_spill] sm:$0xff]  ;;  %v16043_v44 = vld [vmem:[#allocation118_spill] sm:$0xff] }
 0x38d   : > { %v2347_v63 = vsel %vm2169_vm4, %v16037_v20, %v16036_v35  ;;  %v9919_v59 = vmul.f32 %v16026_v45, %v2176_v52  ;;  %v9922_v14 = vmul.f32 %v16030_v29, %v2177_v43  ;;  %v9925_v40 = vmul.f32 %v16019_v62, %v2170_v0  ;;  %v9941_v43 = vpop.permute.xlu1 %2482  ;;  %v6181_v0 = vld [vmem:[%s14405_s3 + $0x3] ss:$4 sm:$0xff] }
 0x38e   : > { %16032 = vst [vmem:[#allocation224_spill] sm:$0xff] %v9906_v32  ;;  %16033 = vst [vmem:[#allocation21_spill] sm:$0xff] %v9909_v11  ;;  %v2348_v1 = vsel %vm2169_vm4, %v16042_v55, %v16041_v3  ;;  %v9939_v52 = vsel %vm2169_vm4, %v16046_v25, %v16045_v61  ;;  %v2343_v46 = vsel %vm2169_vm4, %v16036_v35, %v16050_v47  ;;  %v16064_v11 = vld [vmem:[#allocation172_spill] sm:$0xff] }
 0x38f   : > { %16035 = vst [vmem:[#allocation16_spill] sm:$0xff] %v9912_v31  ;;  %16038 = vst [vmem:[#allocation18_spill] sm:$0xff] %v9919_v59  ;;  %v16044_v31 = vld [vmem:[#allocation106_spill] sm:$0xff]  ;;  %v2344_v41 = vsel %vm2169_vm4, %v16041_v3, %v16051_v19  ;;  %v2340_v3 = vsel %vm2169_vm4, %v16051_v19, %v16056_v54  ;;  %v2336_v19 = vsel %vm2169_vm4, %v16056_v54, %v16060_v18  ;;  %v16063_v59 = vld [vmem:[#allocation27_spill] sm:$0xff] }
 0x390   : > { %16039 = vst [vmem:[#allocation28_spill] sm:$0xff] %v9922_v14  ;;  %16040 = vst [vmem:[#allocation32_spill] sm:$0xff] %v9925_v40  ;;  %v2349_v17 = vsel %vm2169_vm4, %v16044_v31, %v16043_v44  ;;  %v9947_v14 = vrot.slane %v6181_v0, %v16048_v51  ;;  %v16052_v40 = vld [vmem:[#allocation177_spill] sm:$0xff]  ;;  %v2346_v0 = vsel %vm2169_vm4, %v16045_v61, %v16053_v2  ;;  %v9965_v51 = vpop.permute.xlu0 %2484 }
 0x391   : > { %16047 = vst [vmem:[#allocation217_spill] sm:$0xff] %v9941_v43  ;;  %v2345_v43 = vsel %vm2169_vm4, %v16043_v44, %v16052_v40  ;;  %16054 = vst [vmem:[#allocation221_spill] sm:$0xff] %v9965_v51  ;;  %v2341_v44 = vsel %vm2169_vm4, %v16052_v40, %v16057_v21  ;;  %v2342_v61 = vsel %vm2169_vm4, %v16053_v2, %v16058_v38  ;;  %v16059_v51 = vld [vmem:[#allocation155_spill] sm:$0xff]  ;;  %v10006_v30 = vpop.permute.xlu1 %2486 }
 0x392   : > { %16049 = vst [vmem:[#allocation220_spill] sm:$0xff] %v9947_v14  ;;  %v16055_v14 = vld [vmem:[#allocation134_spill] sm:$0xff]  ;;  %v2337_v40 = vsel %vm2169_vm4, %v16057_v21, %v16061_v37  ;;  %v9996_v27 = vmul.f32 %v16023_v6, %v2171_v7  ;;  %v2338_v2 = vsel %vm2169_vm4, %v16058_v38, %v16063_v59  ;;  %16065 = vst [vmem:[#allocation112_spill] sm:$0xff] %v10006_v30  ;;  %v16068_v7 = vld [vmem:[#allocation37_spill] sm:$0xff] }
 0x393   : > { %v2339_v35 = vsel %vm2169_vm4, %v16050_v47, %v16055_v14  ;;  %v2335_v47 = vsel %vm2169_vm4, %v16055_v14, %v16059_v51  ;;  %v2331_v14 = vsel %vm2169_vm4, %v16059_v51, %v16064_v11  ;;  %v10009_v54 = vmul.f32 %v16026_v45, %v2172_v57  ;;  %v16069_v38 = vld [vmem:[#allocation241_spill] sm:$0xff]  ;;  %v16070_v51 = vld [vmem:[#allocation240_spill] sm:$0xff]  ;;  %v16082_v45 = vld [vmem:[#allocation170_spill] sm:$0xff] }
 0x394   : > { %16062 = vst [vmem:[#allocation42_spill] sm:$0xff] %v9996_v27  ;;  %v10013_v21 = vmul.f32 %v16019_v62, %v9787_v13  ;;  %v2332_v27 = vsel %vm2169_vm4, %v16060_v18, %v16068_v7  ;;  %v2333_v32 = vsel %vm2169_vm4, %v16061_v37, %v16069_v38  ;;  %v2334_v57 = vsel %vm2169_vm4, %v16063_v59, %v16070_v51  ;;  %v10027_v30 = vpop.permute.xlu0 %2488  ;;  %v16073_v62 = vld [vmem:[#allocation150_spill] sm:$0xff] }
 0x395   : > { %16066 = vst [vmem:[#allocation44_spill] sm:$0xff] %v10009_v54  ;;  %16071 = vst [vmem:[#allocation12_spill] sm:$0xff] %v10027_v30  ;;  %v10031_v13 = vmul.f32 %v16030_v29, %v9815_v23  ;;  %v2327_v18 = vsel %vm2169_vm4, %v16064_v11, %v16073_v62  ;;  %v16075_v54 = vld [vmem:[#allocation176_spill] sm:$0xff]  ;;  %v16076_v30 = vld [vmem:[#allocation167_spill] sm:$0xff] }
 0x396   : > { %16067 = vst [vmem:[#allocation10_spill] sm:$0xff] %v10013_v21  ;;  %v16074_v21 = vld [vmem:[#allocation51_spill] sm:$0xff]  ;;  %v2329_v59 = vsel %vm2169_vm4, %v16069_v38, %v16075_v54  ;;  %v2330_v23 = vsel %vm2169_vm4, %v16070_v51, %v16076_v30  ;;  %v16077_v29 = vld [vmem:[#allocation152_spill] sm:$0xff] }
 0x397   : > { %16072 = vst [vmem:[#allocation31_spill] sm:$0xff] %v10031_v13  ;;  %v2328_v37 = vsel %vm2169_vm4, %v16068_v7, %v16074_v21  ;;  %v2323_v11 = vsel %vm2169_vm4, %v16073_v62, %v16077_v29  ;;  %v10057_v7 = vsel %vm2169_vm4, %v16077_v29, %v16037_v20  ;;  %v16079_v13 = vld [vmem:[#allocation174_spill] sm:$0xff]  ;;  %v10075_v62 = vsel %vm2169_vm4, %v16075_v54, %v16082_v45  ;;  %v10077_v20 = vpop.permute.xlu1 %2490  ;;  %v16084_v29 = vld [vmem:[#allocation79_spill] sm:$0xff] }
 0x398   : > { %16078 = vst [vmem:[#allocation20_spill] sm:$0xff] %v10057_v7  ;;  %v10063_v38 = vsel %vm2169_vm4, %v16074_v21, %v16079_v13  ;;  %v10069_v51 = vsel %vm2169_vm4, %v16079_v13, %v16042_v55  ;;  %16083 = vst [vmem:[#allocation34_spill] sm:$0xff] %v10077_v20  ;;  %v2375_v7 = vmul.f32 %v16084_v29, %v2347_v63  ;;  %v10088_v13 = vpop.permute.xlu0 %2492  ;;  %v16088_v63 = vld [vmem:[#allocation178_spill] sm:$0xff] }
 0x399   : > { %16080 = vst [vmem:[#allocation48_spill] sm:$0xff] %v10063_v38  ;;  %16081 = vst [vmem:[#allocation67_spill] sm:$0xff] %v10069_v51  ;;  %v2376_v53 = vmul.f32 %v16084_v29, %v2343_v46  ;;  %v2377_v21 = vmul.f32 %v16084_v29, %v2339_v35  ;;  %v10086_v55 = vsel %vm2169_vm4, %v16082_v45, %v16044_v31  ;;  %v16086_v51 = vld [vmem:[#allocation166_spill] sm:$0xff] }
 0x39a   : > { %16085 = vst [vmem:[#allocation24_spill] sm:$0xff] %v10086_v55  ;;  %v2383_v38 = vmul.f32 %v16086_v51, %v2348_v1  ;;  %v2378_v54 = vmul.f32 %v16084_v29, %v2335_v47  ;;  %v10094_v20 = vmul.f32 %v16023_v6, %v9799_v4  ;;  %v10100_v46 = vsel %vm2169_vm4, %v16076_v30, %v16088_v63  ;;  %v16090_v4 = vld [vmem:[#allocation188_spill] sm:$0xff] }
 0x39b   : > { %v2384_v35 = vmul.f32 %v16086_v51, %v2344_v41  ;;  %v2385_v45 = vmul.f32 %v16086_v51, %v2340_v3  ;;  %v2386_v31 = vmul.f32 %v16086_v51, %v2336_v19  ;;  %v10109_v1 = vsel %vm2169_vm4, %v16088_v63, %v16046_v25  ;;  %v10114_v30 = vpop.permute.xlu1 %2494 }
 0x39c   : > { %16087 = vst [vmem:[#allocation161_spill] sm:$0xff] %v10094_v20  ;;  %16089 = vst [vmem:[#allocation22_spill] sm:$0xff] %v10109_v1  ;;  %v2391_v6 = vmul.f32 %v16090_v4, %v2349_v17  ;;  %v2379_v47 = vmul.f32 %v16084_v29, %v2331_v14  ;;  %v2380_v55 = vmul.f32 %v16084_v29, %v2327_v18  ;;  %v10126_v25 = vpop.permute.xlu0 %2496  ;;  %v16135_v1 = vld [vmem:[#allocation200_spill] sm:$0xff] }
 0x39d   : > { %16091 = vst [vmem:[#allocation35_spill] sm:$0xff] %v10114_v30  ;;  %v10117_v41 = vadd.f32 %v2375_v7, %v9827_v39  ;;  %v10120_v3 = vadd.f32 %v2376_v53, %v9830_v12  ;;  %v2392_v19 = vmul.f32 %v16090_v4, %v2345_v43  ;;  %v10124_v20 = vadd.f32 %v2377_v21, %v9833_v42 }
 0x39e   : > { %16092 = vst [vmem:[#allocation17_spill] sm:$0xff] %v10126_v25  ;;  %v10129_v17 = vadd.f32 %v2383_v38, %v9850_v50  ;;  %v2393_v14 = vmul.f32 %v16090_v4, %v2341_v44  ;;  %v10133_v18 = vadd.f32 %v2378_v54, %v9838_v22  ;;  %v2394_v39 = vmul.f32 %v16090_v4, %v2337_v40 }
 0x39f   : > { %v2399_v12 = vmul.f32 %v9473_v5, %v9939_v52  ;;  %v10139_v53 = vadd.f32 %v2384_v35, %v9853_v49  ;;  %v10142_v42 = vadd.f32 %v2385_v45, %v9867_v15  ;;  %v10145_v43 = vadd.f32 %v2386_v31, %v9870_v48  ;;  %v10153_v7 = vpop.permute.xlu1 %2498  ;;  %v16109_v31 = vld [vmem:[#allocation212_spill] sm:$0xff] }
 0x3a0   : > { %v10148_v50 = vadd.f32 %v2391_v6, %v9861_v56  ;;  %v2400_v22 = vmul.f32 %v9473_v5, %v2346_v0  ;;  %v2401_v44 = vmul.f32 %v9473_v5, %v2342_v61  ;;  %v2402_v40 = vmul.f32 %v9473_v5, %v2338_v2  ;;  %16093 = vst [vmem:[#allocation19_spill] sm:$0xff] %v10153_v7  ;;  %v10161_v38 = vpop.permute.xlu0 %2500 }
 0x3a1   : > { %v10156_v49 = vadd.f32 %v2392_v19, %v9864_v8  ;;  %v2387_v15 = vmul.f32 %v16086_v51, %v2332_v27  ;;  %v2395_v52 = vmul.f32 %v16090_v4, %v2333_v32  ;;  %v2403_v48 = vmul.f32 %v9473_v5, %v2334_v57  ;;  %v16113_v19 = vld [vmem:[#allocation68_spill] sm:$0xff] }
 0x3a2   : > { %v10164_v56 = vadd.f32 %v2393_v14, %v9875_v10  ;;  %v10167_v0 = vadd.f32 %v2394_v39, %v9878_v9  ;;  %v2388_v61 = vmul.f32 %v16086_v51, %v2328_v37  ;;  %v2396_v2 = vmul.f32 %v16090_v4, %v2329_v59  ;;  %v16115_v39 = vld [vmem:[#allocation181_spill] sm:$0xff] }
 0x3a3   : > { %v10172_v8 = vadd.f32 %v2399_v12, %v9890_v60  ;;  %v10175_v27 = vadd.f32 %v2379_v47, %v9841_v36  ;;  %v2381_v32 = vmul.f32 %v16084_v29, %v2323_v11  ;;  %v2688_v57 = vmul.f32 %v16012_v33, %v9900_v24  ;;  %v10190_v59 = vpop.permute.xlu1 %2502  ;;  %v16098_v11 = vld [vmem:[#allocation222_spill] sm:$0xff]  ;;  %v16100_v24 = vld [vmem:[#allocation224_spill] sm:$0xff]  ;;  %v16116_v12 = vld [vmem:[#allocation187_spill] sm:$0xff] }
 0x3a4   : > { %16094 = vst [vmem:[#allocation156_spill] sm:$0xff] %v10167_v0  ;;  %v10181_v10 = vadd.f32 %v2400_v22, %v9894_v26  ;;  %v10184_v9 = vadd.f32 %v2401_v44, %v9897_v58  ;;  %v10187_v37 = vadd.f32 %v2402_v40, %v9903_v16  ;;  %v2404_v60 = vmul.f32 %v9473_v5, %v2330_v23  ;;  %v16102_v26 = vld [vmem:[#allocation215_spill] sm:$0xff]  ;;  %v10204_v58 = vpop.permute.xlu0 %2504  ;;  %v16105_v16 = vld [vmem:[#allocation21_spill] sm:$0xff]  ;;  %v16107_v23 = vld [vmem:[#allocation18_spill] sm:$0xff] }
 0x3a5   : > { %16095 = vst [vmem:[#allocation158_spill] sm:$0xff] %v10175_v27  ;;  %v10193_v36 = vadd.f32 %v2387_v15, %v9881_v28  ;;  %v10196_v21 = vadd.f32 %v2395_v52, %v16098_v11  ;;  %v10199_v54 = vadd.f32 %v2403_v48, %v16100_v24  ;;  %v10202_v63 = vadd.f32 %v2380_v55, %v16102_v26  ;;  %v16110_v28 = vld [vmem:[#allocation101_spill] sm:$0xff]  ;;  %v16112_v47 = vld [vmem:[#allocation186_spill] sm:$0xff]  ;;  %v16118_v44 = vld [vmem:[#allocation191_spill] sm:$0xff] }
 0x3a6   : > { %16096 = vst [vmem:[#allocation157_spill] sm:$0xff] %v10187_v37  ;;  %16104 = vst [vmem:[#allocation160_spill] sm:$0xff] %v10204_v58  ;;  %v10207_v35 = vadd.f32 %v2388_v61, %v16105_v16  ;;  %v10210_v45 = vadd.f32 %v2396_v2, %v16107_v23  ;;  %v10214_v6 = vmul.f32 %v16110_v28, %v16109_v31  ;;  %v16117_v22 = vld [vmem:[#allocation185_spill] sm:$0xff]  ;;  %v16119_v15 = vld [vmem:[#allocation32_spill] sm:$0xff] }
 0x3a7   : > { %16097 = vst [vmem:[#allocation115_spill] sm:$0xff] %v10193_v36  ;;  %16099 = vst [vmem:[#allocation245_spill] sm:$0xff] %v10196_v21  ;;  %v10218_v14 = vmul.f32 %v16113_v19, %v16112_v47  ;;  %v2532_v55 = vsel %vm2169_vm4, %v16116_v12, %v16115_v39  ;;  %v2533_v40 = vsel %vm2169_vm4, %v16118_v44, %v16117_v22  ;;  %v16121_v48 = vld [vmem:[#allocation153_spill] sm:$0xff]  ;;  %v16123_v2 = vld [vmem:[#allocation228_spill] sm:$0xff] }
 0x3a8   : > { %16101 = vst [vmem:[#allocation71_spill] sm:$0xff] %v10199_v54  ;;  %16103 = vst [vmem:[#allocation30_spill] sm:$0xff] %v10202_v63  ;;  %v10229_v52 = vadd.f32 %v2381_v32, %v16119_v15  ;;  %v10232_v61 = vadd.f32 %v2688_v57, %v16121_v48  ;;  %v16124_v11 = vld [vmem:[#allocation45_spill] sm:$0xff]  ;;  %v16125_v26 = vld [vmem:[#allocation194_spill] sm:$0xff] }
 0x3a9   : > { %16106 = vst [vmem:[#allocation92_spill] sm:$0xff] %v10207_v35  ;;  %16108 = vst [vmem:[#allocation136_spill] sm:$0xff] %v10210_v45  ;;  %v2534_v24 = vsel %vm2169_vm4, %v16124_v11, %v16123_v2  ;;  %v16126_v16 = vld [vmem:[#allocation182_spill] sm:$0xff]  ;;  %v16127_v31 = vld [vmem:[#allocation28_spill] sm:$0xff] }
 0x3aa   : > { %16111 = vst [vmem:[#allocation65_spill] sm:$0xff] %v10214_v6  ;;  %16114 = vst [vmem:[#allocation143_spill] sm:$0xff] %v10218_v14  ;;  %v2535_v23 = vsel %vm2169_vm4, %v16126_v16, %v16125_v26  ;;  %v10243_v28 = vadd.f32 %v2404_v60, %v16127_v31  ;;  %v16129_v47 = vld [vmem:[#allocation48_spill] sm:$0xff]  ;;  %v16130_v19 = vld [vmem:[#allocation195_spill] sm:$0xff]  ;;  %v10261_v60 = vpop.permute.xlu1 %2506  ;;  %v2397_v31 = vmul.f32 %v16090_v4, %v10075_v62  ;;  %v10285_v4 = vpop.permute.xlu0 %2542 }
 0x3ab   : > { %16120 = vst [vmem:[#allocation73_spill] sm:$0xff] %v10229_v52  ;;  %16122 = vst [vmem:[#allocation165_spill] sm:$0xff] %v10232_v61  ;;  %v2389_v32 = vmul.f32 %v16086_v51, %v16129_v47  ;;  %v2528_v57 = vsel %vm2169_vm4, %v16115_v39, %v16130_v19  ;;  %v16131_v15 = vld [vmem:[#allocation202_spill] sm:$0xff]  ;;  %v16132_v61 = vld [vmem:[#allocation205_spill] sm:$0xff] }
 0x3ac   : > { %16128 = vst [vmem:[#allocation108_spill] sm:$0xff] %v10243_v28  ;;  %v2529_v48 = vsel %vm2169_vm4, %v16117_v22, %v16131_v15  ;;  %v10259_v33 = vsel %vm2169_vm4, %v16123_v2, %v16132_v61  ;;  %16133 = vst [vmem:[#allocation103_spill] sm:$0xff] %v10261_v60  ;;  %v16134_v47 = vld [vmem:[#allocation196_spill] sm:$0xff]  ;;  %v2524_v22 = vsel %vm2169_vm4, %v16130_v19, %v16135_v1  ;;  %v16136_v6 = vld [vmem:[#allocation74_spill] sm:$0xff] }
 0x3ad   : > { %v10269_v39 = vsel %vm2169_vm4, %v16125_v26, %v16134_v47  ;;  %v2525_v2 = vsel %vm2169_vm4, %v16131_v15, %v16136_v6  ;;  %v16137_v16 = vld [vmem:[#allocation210_spill] sm:$0xff]  ;;  %16138 = vst [vmem:[#allocation169_spill] sm:$0xff] %v10285_v4  ;;  %v2560_v15 = vmul.f32 %v10285_v4, %v2532_v55  ;;  %v2561_v52 = vmul.f32 %v10285_v4, %v2528_v57  ;;  %v16141_v28 = vld [vmem:[#allocation219_spill] sm:$0xff]  ;;  %v16147_v35 = vld [vmem:[#allocation217_spill] sm:$0xff] }
 0x3ae   : > { %v10283_v62 = vsel %vm2169_vm4, %v16132_v61, %v16137_v16  ;;  %v16139_v26 = vld [vmem:[#allocation214_spill] sm:$0xff]  ;;  %v10303_v61 = vsel %vm2169_vm4, %v16136_v6, %v16141_v28  ;;  %v16142_v45 = vld [vmem:[#allocation223_spill] sm:$0xff]  ;;  %v10322_v6 = vpop.permute.xlu1 %2547 }
 0x3af   : > { %v10291_v14 = vsel %vm2169_vm4, %v16134_v47, %v16139_v26  ;;  %v16140_v19 = vld [vmem:[#allocation218_spill] sm:$0xff]  ;;  %v10309_v47 = vsel %vm2169_vm4, %v16137_v16, %v16142_v45  ;;  %v10320_v57 = vsel %vm2169_vm4, %v16139_v26, %v16147_v35  ;;  %v2592_v63 = vadd.f32 %v2560_v15, %v10117_v41  ;;  %v16149_v16 = vld [vmem:[#allocation44_spill] sm:$0xff] }
 0x3b0   : > { %v2520_v11 = vsel %vm2169_vm4, %v16135_v1, %v16140_v19  ;;  %16143 = vst [vmem:[#allocation168_spill] sm:$0xff] %v10309_v47  ;;  %v16144_v60 = vld [vmem:[#allocation42_spill] sm:$0xff]  ;;  %v16146_v1 = vld [vmem:[#allocation20_spill] sm:$0xff]  ;;  %16148 = vst [vmem:[#allocation47_spill] sm:$0xff] %v10320_v57  ;;  %v2593_v54 = vadd.f32 %v2561_v52, %v10120_v3  ;;  %v10327_v21 = vadd.f32 %v2397_v31, %v16149_v16 }
 0x3b1   : > { %v10312_v51 = vadd.f32 %v2389_v32, %v16144_v60  ;;  %v2382_v55 = vmul.f32 %v16084_v29, %v16146_v1  ;;  %v16151_v32 = vld [vmem:[#allocation221_spill] sm:$0xff]  ;;  %v16153_v60 = vld [vmem:[#allocation112_spill] sm:$0xff]  ;;  %v10341_v1 = vpop.permute.xlu0 %2552  ;;  %v2568_v41 = vmul.f32 %v10322_v6, %v2533_v40  ;;  %v2405_v3 = vmul.f32 %v9473_v5, %v10100_v46  ;;  %v16159_v36 = vld [vmem:[#allocation34_spill] sm:$0xff] }
 0x3b2   : > { %16150 = vst [vmem:[#allocation59_spill] sm:$0xff] %v10327_v21  ;;  %v10333_v29 = vsel %vm2169_vm4, %v16140_v19, %v16151_v32  ;;  %v10339_v26 = vsel %vm2169_vm4, %v16141_v28, %v16153_v60  ;;  %v16155_v52 = vld [vmem:[#allocation220_spill] sm:$0xff]  ;;  %v2576_v15 = vmul.f32 %v10341_v1, %v2534_v24  ;;  %v2569_v21 = vmul.f32 %v10322_v6, %v2529_v48  ;;  %v10372_v48 = vpop.permute.xlu1 %2557 }
 0x3b3   : > { %16145 = vst [vmem:[#allocation81_spill] sm:$0xff] %v10312_v51  ;;  %16152 = vst [vmem:[#allocation40_spill] sm:$0xff] %v10333_v29  ;;  %v2770_v31 = vmul.f32 %v16155_v52, %v2592_v63  ;;  %v16156_v16 = vld [vmem:[#allocation232_spill] sm:$0xff]  ;;  %v10360_v40 = vsel %vm2169_vm4, %v16147_v35, %v16159_v36  ;;  %v2600_v46 = vadd.f32 %v2568_v41, %v10129_v17  ;;  %v16161_v63 = vld [vmem:[#allocation10_spill] sm:$0xff] }
 0x3b4   : > { %16154 = vst [vmem:[#allocation87_spill] sm:$0xff] %v10339_v26  ;;  %v2771_v19 = vmul.f32 %v16156_v16, %v2593_v54  ;;  %v16157_v51 = vld [vmem:[#allocation12_spill] sm:$0xff]  ;;  %16160 = vst [vmem:[#allocation130_spill] sm:$0xff] %v10360_v40  ;;  %v10364_v24 = vadd.f32 %v2382_v55, %v16161_v63  ;;  %v10370_v54 = vsel %vm2169_vm4, %v16151_v32, %v10088_v13  ;;  %v16166_v41 = vld [vmem:[#allocation31_spill] sm:$0xff] }
 0x3b5   : > { %v10354_v28 = vsel %vm2169_vm4, %v16142_v45, %v16157_v51  ;;  %16163 = vst [vmem:[#allocation61_spill] sm:$0xff] %v10370_v54  ;;  %v16164_v45 = vld [vmem:[#allocation190_spill] sm:$0xff]  ;;  %v16165_v26 = vld [vmem:[#allocation80_spill] sm:$0xff]  ;;  %v2778_v40 = vmul.f32 %v16155_v52, %v2600_v46  ;;  %v2584_v17 = vmul.f32 %v10372_v48, %v2535_v23  ;;  %v2562_v55 = vmul.f32 %v10285_v4, %v2524_v22  ;;  %v16169_v23 = vld [vmem:[#allocation49_spill] sm:$0xff] }
 0x3b6   : > { %16158 = vst [vmem:[#allocation110_spill] sm:$0xff] %v10354_v28  ;;  %16162 = vst [vmem:[#allocation50_spill] sm:$0xff] %v10364_v24  ;;  %v2802_v5 = vadd.f32 %v2770_v31, %v16164_v45  ;;  %v2608_v28 = vadd.f32 %v2576_v15, %v10148_v50  ;;  %v2803_v35 = vadd.f32 %v2771_v19, %v16165_v26 }
 0x3b7   : > { %v10381_v63 = vadd.f32 %v2405_v3, %v16166_v41  ;;  %v2601_v31 = vadd.f32 %v2569_v21, %v10139_v53  ;;  %v10393_v50 = vsel %vm2169_vm4, %v16153_v60, %v10114_v30  ;;  %v2810_v26 = vadd.f32 %v2778_v40, %v16169_v23  ;;  %v16172_v60 = vld [vmem:[#allocation64_spill] sm:$0xff]  ;;  %v16174_v41 = vld [vmem:[#allocation179_spill] sm:$0xff] }
 0x3b8   : > { %v10383_v24 = vmul.f32 0.70710677, %v2802_v5  ;;  %v2786_v32 = vmul.f32 %v16155_v52, %v2608_v28  ;;  %v10386_v27 = vmul.f32 0.70710677, %v2803_v35  ;;  %16168 = vst [vmem:[#allocation117_spill] sm:$0xff] %v10393_v50  ;;  %v2616_v22 = vadd.f32 %v2584_v17, %v10172_v8 }
 0x3b9   : > { %16167 = vst [vmem:[#allocation127_spill] sm:$0xff] %v10381_v63  ;;  %v2563_v3 = vmul.f32 %v10285_v4, %v2520_v11  ;;  %v10402_v15 = vsel %vm2169_vm4, %v16157_v51, %v10126_v25  ;;  %v10408_v53 = vsel %vm2169_vm4, %v16159_v36, %v10153_v7  ;;  %v10418_v8 = vsel %vm2169_vm4, %v10088_v13, %v10161_v38 }
 0x3ba   : > { %16170 = vst [vmem:[#allocation159_spill] sm:$0xff] %v10402_v15  ;;  %16171 = vst [vmem:[#allocation69_spill] sm:$0xff] %v10408_v53  ;;  %v2866_v21 = vand.u32 2147483647, %v10383_v24  ;;  %v10412_v19 = vadd.f32 %v2786_v32, %v16172_v60  ;;  %v10420_v11 = vmul.f32 0.70710677, %v2810_v26  ;;  %v2794_v51 = vmul.f32 %v16155_v52, %v2616_v22 }
 0x3bb   : > { %16173 = vst [vmem:[#allocation75_spill] sm:$0xff] %v10418_v8  ;;  %v2594_v28 = vadd.f32 %v2562_v55, %v10124_v20  ;;  %v2867_v46 = vand.u32 2147483647, %v10386_v27  ;;  %v2779_v45 = vmul.f32 %v16156_v16, %v2601_v31  ;;  %v2570_v13 = vmul.f32 %v10322_v6, %v2525_v2  ;;  %v16175_v8 = vld [vmem:[#allocation231_spill] sm:$0xff]  ;;  %v16176_v53 = vld [vmem:[#allocation25_spill] sm:$0xff] }
 0x3bc   : > { %v2898_v40 = vmul.f32 0.3275911, %v2866_v21  ;;  %v10425_v36 = vmul.f32 0.70710677, %v10412_v19  ;;  %v2874_v17 = vand.u32 2147483647, %v10420_v11  ;;  %v10431_v32 = vadd.f32 %v2794_v51, %v16174_v41 }
 0x3bd   : > { %v10435_v23 = vadd.f32 %v2563_v3, %v10133_v18  ;;  %v3282_v20 = vsub.f32 0.0, %v2866_v21  ;;  %v2577_v60 = vmul.f32 %v10341_v1, %v10259_v33  ;;  %v2772_v51 = vmul.f32 %v16175_v8, %v2594_v28 }
 0x3be   : > { %v2930_v22 = vadd.f32 1.0, %v2898_v40  ;;  %v2882_v55 = vand.u32 2147483647, %v10425_v36  ;;  %v2906_v52 = vmul.f32 0.3275911, %v2874_v17  ;;  %v3290_v63 = vsub.f32 0.0, %v2874_v17 }
 0x3bf   : > { %v10441_v31 = vmul.f32 0.70710677, %v10431_v32  ;;  %v2899_v2 = vmul.f32 0.3275911, %v2867_v46  ;;  %v10445_v18 = vadd.f32 %v2779_v45, %v16176_v53  ;;  %v10449_v7 = vadd.f32 %v2570_v13, %v10142_v42 }
 0x3c0   : > { %6053 = vrcp.f32 %v2930_v22  ;;  %v2914_v41 = vmul.f32 0.3275911, %v2882_v55  ;;  %v2938_v3 = vadd.f32 1.0, %v2906_v52  ;;  %v3298_v40 = vsub.f32 0.0, %v2882_v55 }
 0x3c1   : > { %v2890_v15 = vand.u32 2147483647, %v10441_v31  ;;  %v3314_v33 = vmul.f32 %v3282_v20, %v2866_v21  ;;  %v2609_v37 = vadd.f32 %v2577_v60, %v10156_v49  ;;  %v2585_v28 = vmul.f32 %v10372_v48, %v10269_v39 }
 0x3c2   : > { %v2946_v50 = vadd.f32 1.0, %v2914_v41  ;;  %6055 = vrcp.f32 %v2938_v3  ;;  %v3322_v22 = vmul.f32 %v3290_v63, %v2874_v17  ;;  %v2931_v53 = vadd.f32 1.0, %v2899_v2  ;;  %v16178_v3 = vld [vmem:[#allocation46_spill] sm:$0xff] }
 0x3c3   : > { %v2922_v57 = vmul.f32 0.3275911, %v2890_v15  ;;  %v3306_v0 = vsub.f32 0.0, %v2890_v15  ;;  %v3283_v52 = vsub.f32 0.0, %v2867_v46  ;;  %v10455_v45 = vmul.f32 0.70710677, %v10445_v18 }
 0x3c4   : > { %6057 = vrcp.f32 %v2946_v50  ;;  %v10457_v54 = vmul.f32 0.5, %v2802_v5  ;;  %v3330_v42 = vmul.f32 %v3298_v40, %v2882_v55  ;;  %v10459_v13 = vmul.f32 0.5, %v2803_v35 }
 0x3c5   : > { %v2954_v21 = vadd.f32 1.0, %v2922_v57  ;;  %v3346_v49 = vmul.f32 1.442695, %v3314_v33  ;;  %v10461_v20 = vmul.f32 0.5, %v2810_v26  ;;  %v3338_v39 = vmul.f32 %v3306_v0, %v2890_v15  ;;  %v16177_v57 = vld [vmem:[#allocation99_spill] sm:$0xff] }
 0x3c6   : > { %v2875_v63 = vand.u32 2147483647, %v10455_v45  ;;  %v3362_v17 = vmul.f32 1.442695, %v3322_v22  ;;  %v2787_v50 = vmul.f32 %v16156_v16, %v2609_v37  ;;  %v2617_v60 = vadd.f32 %v2585_v28, %v10181_v10  ;;  %v16180_v28 = vld [vmem:[#allocation183_spill] sm:$0xff] }
 0x3c7   : > { %6059 = vrcp.f32 %v2954_v21  ;;  %v3315_v41 = vmul.f32 %v3283_v52, %v2867_v46  ;;  %v3378_v55 = vmul.f32 1.442695, %v3330_v42  ;;  %v10471_v0 = vadd.f32 %v2772_v51, %v16178_v3 }
 0x3c8   : > { %6061 = vrcp.f32 %v2931_v53  ;;  %v2907_v5 = vmul.f32 0.3275911, %v2875_v63  ;;  %v3291_v2 = vsub.f32 0.0, %v2875_v63  ;;  %v10467_v35 = vadd.f32 %v2787_v50, %v16177_v57 }
 0x3c9   : > { %v2795_v26 = vmul.f32 %v16156_v16, %v2617_v60  ;;  %16179 = vst [vmem:[#allocation56_spill] sm:$0xff] %v10471_v0  ;;  %6063 = vpow2.f32 %v3346_v49  ;;  %v3394_v40 = vmul.f32 1.442695, %v3338_v39  ;;  %v10483_v53 = vmul.f32 0.5, %v10412_v19 }
 0x3ca   : > { %v10473_v15 = vpop.eup %6053  ;;  %v2939_v37 = vadd.f32 1.0, %v2907_v5  ;;  %v3323_v33 = vmul.f32 %v3291_v2, %v2875_v63  ;;  %6065 = vpow2.f32 %v3362_v17  ;;  %v10477_v46 = vmul.f32 0.70710677, %v10467_v35 }
 0x3cb   : > { %v2994_v10 = vmul.f32 1.0614054, %v10473_v15  ;;  %v10480_v22 = vadd.f32 %v2795_v26, %v16180_v28  ;;  %v3348_v51 = vmul.f32 1.442695, %v3315_v41  ;;  %v10486_v52 = vmul.f32 0.70710677, %v10471_v0 }
 0x3cc   : > { %6067 = vrcp.f32 %v2939_v37  ;;  %v10488_v42 = vpop.eup %6055  ;;  %v10491_v49 = vmul.f32 0.5, %v10431_v32  ;;  %v2883_v39 = vand.u32 2147483647, %v10477_v46  ;;  %v3364_v19 = vmul.f32 1.442695, %v3323_v33 }
 0x3cd   : > { %16181 = vst [vmem:[#allocation70_spill] sm:$0xff] %v10480_v22  ;;  %16182 = vst [vmem:[#allocation76_spill] sm:$0xff] %v10486_v52  ;;  %v3026_v21 = vadd.f32 -1.4531521, %v2994_v10  ;;  %6069 = vpow2.f32 %v3378_v55  ;;  %v3002_v17 = vmul.f32 1.0614054, %v10488_v42  ;;  %v10508_v33 = vmul.f32 %v16175_v8, %v10449_v7 }
 0x3ce   : > { %v10494_v63 = vpop.eup %6057  ;;  %6071 = vpow2.f32 %v3394_v40  ;;  %v10498_v50 = vmul.f32 0.70710677, %v10480_v22  ;;  %v2915_v5 = vmul.f32 0.3275911, %v2883_v39  ;;  %v3299_v2 = vsub.f32 0.0, %v2883_v39 }
 0x3cf   : > { %v3058_v60 = vmul.f32 %v10473_v15, %v3026_v21  ;;  %v3010_v41 = vmul.f32 1.0614054, %v10494_v63  ;;  %v3034_v55 = vadd.f32 -1.4531521, %v3002_v17  ;;  %6073 = vpow2.f32 %v3348_v51 }
 0x3d0   : > { %16183 = vst [vmem:[#allocation111_spill] sm:$0xff] %v10498_v50  ;;  %v2891_v32 = vand.u32 2147483647, %v10498_v50  ;;  %v2868_v57 = vand.u32 2147483647, %v10486_v52  ;;  %v2947_v37 = vadd.f32 1.0, %v2915_v5  ;;  %v3331_v51 = vmul.f32 %v3299_v2, %v2883_v39 }
 0x3d1   : > { %v10504_v26 = vpop.eup %6059  ;;  %v3090_v3 = vadd.f32 1.4214138, %v3058_v60  ;;  %v3042_v40 = vadd.f32 -1.4531521, %v3010_v41  ;;  %v3066_v28 = vmul.f32 %v10488_v42, %v3034_v55  ;;  %vm3474_vm5 = vcmp.ge.f32.partialorder %v10383_v24, 0.0 }
 0x3d2   : > { %v10510_v10 = vpop.eup %6061  ;;  %v3018_v21 = vmul.f32 1.0614054, %v10504_v26  ;;  %v2923_v17 = vmul.f32 0.3275911, %v2891_v32  ;;  %6075 = vrcp.f32 %v2947_v37  ;;  %v3307_v7 = vsub.f32 0.0, %v2891_v32 }
 0x3d3   : > { %v3122_v16 = vmul.f32 %v10473_v15, %v3090_v3  ;;  %v3074_v0 = vmul.f32 %v10494_v63, %v3042_v40  ;;  %v2995_v60 = vmul.f32 1.0614054, %v10510_v10  ;;  %v6064_v41 = vpop.eup %6063  ;;  %v3098_v5 = vadd.f32 1.4214138, %v3066_v28 }
 0x3d4   : > { %v3050_v47 = vadd.f32 -1.4531521, %v3018_v21  ;;  %v3284_v52 = vsub.f32 0.0, %v2868_v57  ;;  %v6066_v4 = vpop.eup %6065  ;;  %6077 = vpow2.f32 %v3364_v19  ;;  %v3380_v3 = vmul.f32 1.442695, %v3331_v51 }
 0x3d5   : > { %v3154_v29 = vadd.f32 -0.28449672, %v3122_v16  ;;  %v3106_v25 = vadd.f32 1.4214138, %v3074_v0  ;;  %v3027_v55 = vadd.f32 -1.4531521, %v2995_v60  ;;  %v3130_v39 = vmul.f32 %v10488_v42, %v3098_v5 }
 0x3d6   : > { %v10517_v58 = vpop.eup %6067  ;;  %v3082_v2 = vmul.f32 %v10504_v26, %v3050_v47  ;;  %v2955_v40 = vadd.f32 1.0, %v2923_v17  ;;  %v3339_v22 = vmul.f32 %v3307_v7, %v2891_v32  ;;  %v10525_v47 = vmul.f32 %v3284_v52, %v2868_v57 }
 0x3d7   : > { %v6070_v44 = vpop.eup %6069  ;;  %v3186_v37 = vmul.f32 %v10473_v15, %v3154_v29  ;;  %v3138_v28 = vmul.f32 %v10494_v63, %v3106_v25  ;;  %v3059_v21 = vmul.f32 %v10510_v10, %v3027_v55  ;;  %v3003_v16 = vmul.f32 1.0614054, %v10517_v58 }
 0x3d8   : > { %v6072_v0 = vpop.eup %6071  ;;  %v3162_v60 = vadd.f32 -0.28449672, %v3130_v39  ;;  %v3114_v19 = vadd.f32 1.4214138, %v3082_v2  ;;  %6079 = vrcp.f32 %v2955_v40  ;;  %v2900_v7 = vmul.f32 0.3275911, %v2868_v57 }
 0x3d9   : > { %v3218_v50 = vadd.f32 0.2548296, %v3186_v37  ;;  %v3170_v5 = vadd.f32 -0.28449672, %v3138_v28  ;;  %v3091_v30 = vadd.f32 1.4214138, %v3059_v21  ;;  %v6074_v51 = vpop.eup %6073  ;;  %6081 = vpow2.f32 %v3380_v3 }
 0x3da   : > { %v3194_v29 = vmul.f32 %v10488_v42, %v3162_v60  ;;  %v3146_v25 = vmul.f32 %v10504_v26, %v3114_v19  ;;  %v3035_v17 = vadd.f32 -1.4531521, %v3003_v16  ;;  %v3396_v37 = vmul.f32 1.442695, %v3339_v22 }
 0x3db   : > { %v3250_v55 = vmul.f32 %v10473_v15, %v3218_v50  ;;  %v3202_v39 = vmul.f32 %v10494_v63, %v3170_v5  ;;  %v3123_v32 = vmul.f32 %v10510_v10, %v3091_v30  ;;  %vm3482_vm6 = vcmp.ge.f32.partialorder %v10420_v11, 0.0 }
 0x3dc   : > { %v3226_v2 = vadd.f32 0.2548296, %v3194_v29  ;;  %v3178_v40 = vadd.f32 -0.28449672, %v3146_v25  ;;  %v3067_v52 = vmul.f32 %v10517_v58, %v3035_v17  ;;  %v10534_v28 = vpop.eup %6075  ;;  %v2932_v3 = vadd.f32 1.0, %v2900_v7  ;;  %v16184_v7 = vld [vmem:[#allocation26_spill] sm:$0xff] }
 0x3dd   : > { %v3410_v21 = vmul.f32 %v6064_v41, %v3250_v55  ;;  %v3234_v60 = vadd.f32 0.2548296, %v3202_v39  ;;  %v3155_v16 = vadd.f32 -0.28449672, %v3123_v32  ;;  %vm3490_vm7 = vcmp.ge.f32.partialorder %v10425_v36, 0.0 }
 0x3de   : > { %v3258_v15 = vmul.f32 %v10488_v42, %v3226_v2  ;;  %v3210_v30 = vmul.f32 %v10504_v26, %v3178_v40  ;;  %v3099_v50 = vadd.f32 1.4214138, %v3067_v52  ;;  %v3011_v57 = vmul.f32 1.0614054, %v10534_v28  ;;  %v6078_v19 = vpop.eup %6077 }
 0x3df   : > { %v3442_v5 = vsub.f32 1.0, %v3410_v21  ;;  %v3266_v22 = vmul.f32 %v10494_v63, %v3234_v60  ;;  %v3187_v41 = vmul.f32 %v10510_v10, %v3155_v16  ;;  %6083 = vrcp.f32 %v2932_v3 }
 0x3e0   : > { %v3418_v29 = vmul.f32 %v6066_v4, %v3258_v15  ;;  %v3242_v25 = vadd.f32 0.2548296, %v3210_v30  ;;  %v3131_v17 = vmul.f32 %v10517_v58, %v3099_v50  ;;  %v3043_v55 = vadd.f32 -1.4531521, %v3011_v57 }
 0x3e1   : > { %v3506_v42 = vsub.f32 0.0, %v3442_v5  ;;  %v3426_v39 = vmul.f32 %v6070_v44, %v3266_v22  ;;  %vm3498_vm8 = vcmp.ge.f32.partialorder %v10441_v31, 0.0  ;;  %v3219_v32 = vadd.f32 0.2548296, %v3187_v41 }
 0x3e2   : > { %v10547_v2 = vadd.f32 %v10508_v33, %v16184_v7  ;;  %v10549_v40 = vpop.eup %6079  ;;  %v3450_v63 = vsub.f32 1.0, %v3418_v29  ;;  %v3274_v52 = vmul.f32 %v10504_v26, %v3242_v25  ;;  %vm3475_vm9 = vcmp.ge.f32.partialorder %v10386_v27, 0.0 }
 0x3e3   : > { %v3163_v4 = vadd.f32 -0.28449672, %v3131_v17  ;;  %v3075_v21 = vmul.f32 %v10534_v28, %v3043_v55  ;;  %v3538_v44 = vsel %vm3474_vm5, %v3442_v5, %v3506_v42  ;;  %v3458_v60 = vsub.f32 1.0, %v3426_v39  ;;  %v6082_v33 = vpop.eup %6081 }
 0x3e4   : > { %v3251_v16 = vmul.f32 %v10510_v10, %v3219_v32  ;;  %v3019_v3 = vmul.f32 1.0614054, %v10549_v40  ;;  %v3602_v15 = vadd.f32 1.0, %v3538_v44  ;;  %v3514_v30 = vsub.f32 0.0, %v3450_v63 }
 0x3e5   : > { %v3434_v50 = vmul.f32 %v6072_v0, %v3274_v52  ;;  %v3195_v57 = vmul.f32 %v10517_v58, %v3163_v4  ;;  %v3522_v26 = vsub.f32 0.0, %v3458_v60  ;;  %v3107_v41 = vadd.f32 1.4214138, %v3075_v21 }
 0x3e6   : > { %v3411_v22 = vmul.f32 %v6074_v51, %v3251_v16  ;;  %v3051_v29 = vadd.f32 -1.4531521, %v3019_v3  ;;  %v10560_v25 = vmul.f32 %v3602_v15, %v10457_v54  ;;  %v3546_v24 = vsel %vm3482_vm6, %v3450_v63, %v3514_v30 }
 0x3e7   : > { %v3466_v5 = vsub.f32 1.0, %v3434_v50  ;;  %v3227_v10 = vadd.f32 0.2548296, %v3195_v57  ;;  %v3610_v17 = vadd.f32 1.0, %v3546_v24  ;;  %v3554_v55 = vsel %vm3490_vm7, %v3458_v60, %v3522_v26 }
 0x3e8   : > { %16185 = vst [vmem:[#allocation145_spill] sm:$0xff] %v10560_v25  ;;  %v3443_v42 = vsub.f32 1.0, %v3411_v22  ;;  %v3139_v0 = vmul.f32 %v10534_v28, %v3107_v41  ;;  %3666 = vrot.lane.b32.xlu0 %v10560_v25, %s6256_s4  ;;  %v3618_v51 = vadd.f32 1.0, %v3554_v55  ;;  %v3083_v32 = vmul.f32 %v10549_v40, %v3051_v29 }
 0x3e9   : > { %v3530_v39 = vsub.f32 0.0, %v3466_v5  ;;  %v3259_v54 = vmul.f32 %v10517_v58, %v3227_v10  ;;  %v10571_v11 = vpop.eup %6083  ;;  %v10574_v7 = vmul.f32 %v3610_v17, %v10461_v20  ;;  %6085 = vpow2.f32 %v3396_v37 }
 0x3ea   : > { %v3507_v63 = vsub.f32 0.0, %v3443_v42  ;;  %v3171_v36 = vadd.f32 -0.28449672, %v3139_v0  ;;  %v10577_v52 = vmul.f32 %v3618_v51, %v10483_v53  ;;  %v3115_v44 = vadd.f32 1.4214138, %v3083_v32 }
 0x3eb   : > { %16186 = vst [vmem:[#allocation60_spill] sm:$0xff] %v10574_v7  ;;  %v3562_v4 = vsel %vm3498_vm8, %v3466_v5, %v3530_v39  ;;  %v3419_v21 = vmul.f32 %v6078_v19, %v3259_v54  ;;  %3668 = vrot.lane.b32.xlu1 %v10574_v7, %s6256_s4  ;;  %v2996_v16 = vmul.f32 1.0614054, %v10571_v11  ;;  %v10591_v19 = vmul.f32 0.70710677, %v10547_v2 }
 0x3ec   : > { %16187 = vst [vmem:[#allocation62_spill] sm:$0xff] %v10577_v52  ;;  %v3626_v58 = vadd.f32 1.0, %v3562_v4  ;;  %v3539_v60 = vsel %vm3475_vm9, %v3443_v42, %v3507_v63  ;;  %v3203_v20 = vmul.f32 %v10534_v28, %v3171_v36  ;;  %3670 = vrot.lane.b32.xlu0 %v10577_v52, %s6256_s4  ;;  %v3147_v31 = vmul.f32 %v10549_v40, %v3115_v44  ;;  %v16191_v36 = vld [vmem:[#allocation144_spill] sm:$0xff] }
 0x3ed   : > { %v3603_v53 = vadd.f32 1.0, %v3539_v60  ;;  %v3451_v37 = vsub.f32 1.0, %v3419_v21  ;;  %v3028_v27 = vadd.f32 -1.4531521, %v2996_v16  ;;  %v3350_v30 = vmul.f32 1.442695, %v10525_v47 }
 0x3ee   : > { %v10594_v3 = vmul.f32 %v3626_v58, %v10491_v49  ;;  %v3235_v15 = vadd.f32 0.2548296, %v3203_v20  ;;  %v3179_v26 = vadd.f32 -0.28449672, %v3147_v31  ;;  %v2876_v22 = vand.u32 2147483647, %v10591_v19 }
 0x3ef   : > { %v10598_v50 = vmul.f32 %v3603_v53, %v10459_v13  ;;  %v3515_v57 = vsub.f32 0.0, %v3451_v37  ;;  %vm3483_vm10 = vcmp.ge.f32.partialorder %v10455_v45, 0.0  ;;  %v3060_v49 = vmul.f32 %v10571_v11, %v3028_v27  ;;  %v16192_v21 = vld [vmem:[#allocation233_spill] sm:$0xff]  ;;  %v16193_v31 = vld [vmem:[#allocation114_spill] sm:$0xff] }
 0x3f0   : > { %16188 = vst [vmem:[#allocation129_spill] sm:$0xff] %v10594_v3  ;;  %3672 = vrot.lane.b32.xlu1 %v10594_v3, %s6256_s4  ;;  %v3267_v41 = vmul.f32 %v10534_v28, %v3235_v15  ;;  %v2578_v29 = vmul.f32 %v10341_v1, %v10283_v62  ;;  %v3579_v47 = vmul.f32 0.5, %v10445_v18  ;;  %v3211_v24 = vmul.f32 %v10549_v40, %v3179_v26  ;;  %v16195_v26 = vld [vmem:[#allocation35_spill] sm:$0xff] }
 0x3f1   : > { %16189 = vst [vmem:[#allocation120_spill] sm:$0xff] %v10598_v50  ;;  %3674 = vrot.lane.b32.xlu0 %v10598_v50, %s6256_s4  ;;  %v3547_v13 = vsel %vm3483_vm10, %v3451_v37, %v3515_v57  ;;  %v2908_v5 = vmul.f32 0.3275911, %v2876_v22  ;;  %v3092_v55 = vadd.f32 1.4214138, %v3060_v49  ;;  %6087 = vpow2.f32 %v3350_v30 }
 0x3f2   : > { %v3611_v10 = vadd.f32 1.0, %v3547_v13  ;;  %v3427_v17 = vmul.f32 %v6082_v33, %v3267_v41  ;;  %v2610_v45 = vadd.f32 %v2578_v29, %v10164_v56  ;;  %v3243_v28 = vadd.f32 0.2548296, %v3211_v24 }
 0x3f3   : > { %v2940_v42 = vadd.f32 1.0, %v2908_v5  ;;  %v2586_v62 = vmul.f32 %v10372_v48, %v10291_v14  ;;  %v6086_v0 = vpop.eup %6085  ;;  %v3124_v18 = vmul.f32 %v10571_v11, %v3092_v55  ;;  %v2571_v56 = vmul.f32 %v10322_v6, %v10303_v61 }
 0x3f4   : > { %v10615_v51 = vmul.f32 %v3611_v10, %v3579_v47  ;;  %v3459_v39 = vsub.f32 1.0, %v3427_v17  ;;  %v2788_v54 = vmul.f32 %v16175_v8, %v2610_v45  ;;  %v3275_v32 = vmul.f32 %v10549_v40, %v3243_v28  ;;  %v16197_v47 = vld [vmem:[#allocation111_spill] sm:$0xff]  ;;  %v16198_v10 = vld [vmem:[#allocation70_spill] sm:$0xff] }
 0x3f5   : > { %6089 = vrcp.f32 %v2940_v42  ;;  %v2618_v33 = vadd.f32 %v2586_v62, %v10184_v9  ;;  %v3156_v63 = vadd.f32 -0.28449672, %v3124_v18  ;;  %v2773_v44 = vmul.f32 %v16192_v21, %v10435_v23  ;;  %v16194_v23 = vld [vmem:[#allocation184_spill] sm:$0xff] }
 0x3f6   : > { %16190 = vst [vmem:[#allocation128_spill] sm:$0xff] %v10615_v51  ;;  %3676 = vrot.lane.b32.xlu1 %v10615_v51, %s6256_s4  ;;  %v3523_v14 = vsub.f32 0.0, %v3459_v39  ;;  %v10626_v4 = vadd.f32 %v2788_v54, %v16191_v36  ;;  %vm3491_vm11 = vcmp.ge.f32.partialorder %v10477_v46, 0.0  ;;  %v3587_v40 = vmul.f32 0.5, %v10467_v35  ;;  %v16200_v54 = vld [vmem:[#allocation160_spill] sm:$0xff] }
 0x3f7   : > { %v3435_v58 = vmul.f32 %v6086_v0, %v3275_v32  ;;  %v2796_v9 = vmul.f32 %v16175_v8, %v2618_v33  ;;  %v3188_v61 = vmul.f32 %v10571_v11, %v3156_v63  ;;  %v3292_v20 = vsub.f32 0.0, %v2876_v22  ;;  %v16201_v32 = vld [vmem:[#allocation17_spill] sm:$0xff] }
 0x3f8   : > { %v3555_v60 = vsel %vm3491_vm11, %v3459_v39, %v3523_v14  ;;  %v10635_v16 = vmul.f32 0.70710677, %v10626_v4  ;;  %v10641_v27 = vadd.f32 %v2773_v44, %v16194_v23  ;;  %v10647_v35 = vsel %vm2169_vm4, %v10161_v38, %v16116_v12  ;;  %v16199_v39 = vld [vmem:[#allocation191_spill] sm:$0xff]  ;;  %v16206_v23 = vld [vmem:[#allocation76_spill] sm:$0xff] }
 0x3f9   : > { %v3619_v53 = vadd.f32 1.0, %v3555_v60  ;;  %v3467_v37 = vsub.f32 1.0, %v3435_v58  ;;  %v10638_v15 = vadd.f32 %v2796_v9, %v16193_v31  ;;  %v3220_v46 = vadd.f32 0.2548296, %v3188_v61  ;;  %v16204_v9 = vld [vmem:[#allocation169_spill] sm:$0xff] }
 0x3fa   : > { %v2884_v30 = vand.u32 2147483647, %v10635_v16  ;;  %v2603_v57 = vadd.f32 %v2571_v56, %v10145_v43  ;;  %v10655_v41 = vsel %vm2169_vm4, %v16195_v26, %v10190_v59  ;;  %vm3499_vm12 = vcmp.ge.f32.partialorder %v16197_v47, 0.0 }
 0x3fb   : > { %v10657_v49 = vmul.f32 %v3619_v53, %v3587_v40  ;;  %v3531_v29 = vsub.f32 0.0, %v3467_v37  ;;  %v10660_v13 = vmul.f32 0.70710677, %v10638_v15  ;;  %v3252_v38 = vmul.f32 %v10571_v11, %v3220_v46  ;;  %v6088_v43 = vpop.eup %6087 }
 0x3fc   : > { %v2916_v12 = vmul.f32 0.3275911, %v2884_v30  ;;  %v10665_v24 = vmul.f32 0.70710677, %v10641_v27  ;;  %v3595_v17 = vmul.f32 0.5, %v16198_v10  ;;  %v3324_v55 = vmul.f32 %v3292_v20, %v2876_v22 }
 0x3fd   : > { %16196 = vst [vmem:[#allocation171_spill] sm:$0xff] %v10657_v49  ;;  %3678 = vrot.lane.b32.xlu0 %v10657_v49, %s6256_s4  ;;  %v3563_v5 = vsel %vm3499_vm12, %v3467_v37, %v3531_v29  ;;  %v2892_v45 = vand.u32 2147483647, %v10660_v13  ;;  %v3412_v42 = vmul.f32 %v6088_v43, %v3252_v38  ;;  %v2781_v0 = vmul.f32 %v16192_v21, %v2603_v57  ;;  %v16205_v37 = vld [vmem:[#allocation105_spill] sm:$0xff]  ;;  %v16207_v57 = vld [vmem:[#allocation168_spill] sm:$0xff] }
 0x3fe   : > { %v3627_v28 = vadd.f32 1.0, %v3563_v5  ;;  %v2948_v62 = vadd.f32 1.0, %v2916_v12  ;;  %v10678_v18 = vsel %vm2169_vm4, %v10190_v59, %v16199_v39  ;;  %v10684_v22 = vsel %vm2169_vm4, %v16201_v32, %v16200_v54  ;;  %v16203_v59 = vld [vmem:[#allocation40_spill] sm:$0xff]  ;;  %v16208_v29 = vld [vmem:[#allocation61_spill] sm:$0xff] }
 0x3ff   : > { %v10672_v11 = vpop.eup %6089  ;;  %v2924_v33 = vmul.f32 0.3275911, %v2892_v45  ;;  %v2869_v56 = vand.u32 2147483647, %v10665_v24  ;;  %v3444_v63 = vsub.f32 1.0, %v3412_v42  ;;  %v2564_v60 = vmul.f32 %v16204_v9, %v16203_v59  ;;  %v16209_v5 = vld [vmem:[#allocation56_spill] sm:$0xff] }
 0x400   : > { %v10687_v14 = vmul.f32 %v3627_v28, %v3595_v17  ;;  %v3004_v36 = vmul.f32 1.0614054, %v10672_v11  ;;  %6091 = vrcp.f32 %v2948_v62  ;;  %v3366_v44 = vmul.f32 1.442695, %v3324_v55  ;;  %v16210_v62 = vld [vmem:[#allocation156_spill] sm:$0xff] }
 0x401   : > { %v2956_v40 = vadd.f32 1.0, %v2924_v33  ;;  %v2901_v58 = vmul.f32 0.3275911, %v2869_v56  ;;  %v3508_v61 = vsub.f32 0.0, %v3444_v63  ;;  %v3300_v53 = vsub.f32 0.0, %v2884_v30 }
 0x402   : > { %16202 = vst [vmem:[#allocation77_spill] sm:$0xff] %v10687_v14  ;;  %3680 = vrot.lane.b32.xlu1 %v10687_v14, %s6256_s4  ;;  %v3036_v20 = vadd.f32 -1.4531521, %v3004_v36  ;;  %v10695_v31 = vadd.f32 %v2781_v0, %v16205_v37  ;;  %vm3476_vm13 = vcmp.ge.f32.partialorder %v16206_v23, 0.0  ;;  %v2579_v26 = vmul.f32 %v10341_v1, %v16207_v57  ;;  %v16214_v57 = vld [vmem:[#allocation192_spill] sm:$0xff] }
 0x403   : > { %v2933_v46 = vadd.f32 1.0, %v2901_v58  ;;  %v10702_v47 = vmul.f32 %v16204_v9, %v16208_v29  ;;  %v3540_v38 = vsel %vm3476_vm13, %v3444_v63, %v3508_v61  ;;  %6093 = vrcp.f32 %v2956_v40  ;;  %v16212_v63 = vld [vmem:[#allocation47_spill] sm:$0xff] }
 0x404   : > { %v3068_v12 = vmul.f32 %v10672_v11, %v3036_v20  ;;  %v3308_v43 = vsub.f32 0.0, %v2892_v45  ;;  %v3572_v10 = vmul.f32 0.5, %v16209_v5  ;;  %v3604_v17 = vadd.f32 1.0, %v3540_v38 }
 0x405   : > { %6095 = vpow2.f32 %v3366_v44  ;;  %v10707_v55 = vmul.f32 0.70710677, %v10695_v31  ;;  %v3332_v42 = vmul.f32 %v3300_v53, %v2884_v30  ;;  %v2611_v0 = vadd.f32 %v2579_v26, %v16210_v62  ;;  %v16213_v53 = vld [vmem:[#allocation157_spill] sm:$0xff]  ;;  %v16215_v26 = vld [vmem:[#allocation158_spill] sm:$0xff] }
 0x406   : > { %v3100_v28 = vadd.f32 1.4214138, %v3068_v12  ;;  %6097 = vrcp.f32 %v2933_v46  ;;  %v10710_v39 = vmul.f32 %v3604_v17, %v3572_v10  ;;  %v3285_v32 = vsub.f32 0.0, %v2869_v56  ;;  %v16216_v62 = vld [vmem:[#allocation193_spill] sm:$0xff] }
 0x407   : > { %v2877_v33 = vand.u32 2147483647, %v10707_v55  ;;  %v2587_v36 = vmul.f32 %v10372_v48, %v16212_v63  ;;  %v10717_v44 = vmul.f32 0.5, %v10547_v2  ;;  %v3340_v58 = vmul.f32 %v3308_v43, %v2892_v45  ;;  %v16217_v63 = vld [vmem:[#allocation235_spill] sm:$0xff] }
 0x408   : > { %16211 = vst [vmem:[#allocation78_spill] sm:$0xff] %v10710_v39  ;;  %v3132_v40 = vmul.f32 %v10672_v11, %v3100_v28  ;;  %v2789_v59 = vmul.f32 %v16192_v21, %v2611_v0  ;;  %3682 = vrot.lane.b32.xlu0 %v10710_v39, %s6256_s4  ;;  %v10723_v30 = vmul.f32 0.5, %v10626_v4  ;;  %v10726_v61 = vmul.f32 0.5, %v10638_v15 }
 0x409   : > { %v2909_v20 = vmul.f32 0.3275911, %v2877_v33  ;;  %v2619_v37 = vadd.f32 %v2587_v36, %v16213_v53  ;;  %v3382_v2 = vmul.f32 1.442695, %v3332_v42  ;;  %v2596_v29 = vadd.f32 %v2564_v60, %v16215_v26 }
 0x40a   : > { %v10729_v23 = vpop.eup %6091  ;;  %v3164_v46 = vadd.f32 -0.28449672, %v3132_v40  ;;  %v10732_v45 = vadd.f32 %v2789_v59, %v16214_v57  ;;  %v3317_v12 = vmul.f32 %v3285_v32, %v2869_v56  ;;  %v3398_v5 = vmul.f32 1.442695, %v3340_v58 }
 0x40b   : > { %v3012_v38 = vmul.f32 1.0614054, %v10729_v23  ;;  %v2941_v4 = vadd.f32 1.0, %v2909_v20  ;;  %v2797_v43 = vmul.f32 %v16192_v21, %v2619_v37  ;;  %v3293_v10 = vsub.f32 0.0, %v2877_v33 }
 0x40c   : > { %v3196_v15 = vmul.f32 %v10672_v11, %v3164_v46  ;;  %v10739_v17 = vmul.f32 0.70710677, %v10732_v45  ;;  %v10742_v42 = vmul.f32 0.5, %v10641_v27  ;;  %v2774_v36 = vmul.f32 %v16217_v63, %v2596_v29 }
 0x40d   : > { %v3044_v28 = vadd.f32 -1.4531521, %v3012_v38  ;;  %6099 = vrcp.f32 %v2941_v4  ;;  %v10745_v60 = vadd.f32 %v2797_v43, %v16216_v62  ;;  %v10747_v0 = vpop.eup %6093  ;;  %vm3484_vm14 = vcmp.ge.f32.partialorder %v10591_v19, 0.0  ;;  %v16218_v38 = vld [vmem:[#allocation87_spill] sm:$0xff] }
 0x40e   : > { %v3228_v56 = vadd.f32 0.2548296, %v3196_v15  ;;  %6101 = vpow2.f32 %v3382_v2  ;;  %v2885_v32 = vand.u32 2147483647, %v10739_v17  ;;  %v3020_v27 = vmul.f32 1.0614054, %v10747_v0 }
 0x40f   : > { %v6096_v40 = vpop.eup %6095  ;;  %v3076_v58 = vmul.f32 %v10729_v23, %v3044_v28  ;;  %v3352_v59 = vmul.f32 1.442695, %v3317_v12  ;;  %v10755_v20 = vmul.f32 0.70710677, %v10745_v60  ;;  %6103 = vpow2.f32 %v3398_v5  ;;  %v16219_v28 = vld [vmem:[#allocation198_spill] sm:$0xff] }
 0x410   : > { %v10757_v53 = vpop.eup %6097  ;;  %v3260_v37 = vmul.f32 %v10672_v11, %v3228_v56  ;;  %v3325_v46 = vmul.f32 %v3293_v10, %v2877_v33  ;;  %v2917_v2 = vmul.f32 0.3275911, %v2885_v32  ;;  %v3052_v26 = vadd.f32 -1.4531521, %v3020_v27 }
 0x411   : > { %v3108_v57 = vadd.f32 1.4214138, %v3076_v58  ;;  %v2997_v29 = vmul.f32 1.0614054, %v10757_v53  ;;  %v2572_v4 = vmul.f32 %v10322_v6, %v16218_v38  ;;  %v2893_v12 = vand.u32 2147483647, %v10755_v20 }
 0x412   : > { %v3420_v43 = vmul.f32 %v6096_v40, %v3260_v37  ;;  %v2949_v15 = vadd.f32 1.0, %v2917_v2  ;;  %v10765_v62 = vadd.f32 %v2774_v36, %v16219_v28  ;;  %v3084_v11 = vmul.f32 %v10747_v0, %v3052_v26  ;;  %v16220_v28 = vld [vmem:[#allocation115_spill] sm:$0xff] }
 0x413   : > { %v3140_v21 = vmul.f32 %v10729_v23, %v3108_v57  ;;  %v3029_v33 = vadd.f32 -1.4531521, %v2997_v29  ;;  %6105 = vpow2.f32 %v3352_v59  ;;  %v3368_v10 = vmul.f32 1.442695, %v3325_v46 }
 0x414   : > { %v3452_v5 = vsub.f32 1.0, %v3420_v43  ;;  %6107 = vrcp.f32 %v2949_v15  ;;  %v2925_v56 = vmul.f32 0.3275911, %v2893_v12  ;;  %v3116_v27 = vadd.f32 1.4214138, %v3084_v11 }
 0x415   : > { %v3172_v58 = vadd.f32 -0.28449672, %v3140_v21  ;;  %v3061_v40 = vmul.f32 %v10757_v53, %v3029_v33  ;;  %v3301_v37 = vsub.f32 0.0, %v2885_v32  ;;  %v10771_v36 = vmul.f32 0.70710677, %v10765_v62 }
 0x416   : > { %v3516_v2 = vsub.f32 0.0, %v3452_v5  ;;  %v2957_v38 = vadd.f32 1.0, %v2925_v56  ;;  %v2604_v57 = vadd.f32 %v2572_v4, %v16220_v28  ;;  %v3148_v46 = vmul.f32 %v10747_v0, %v3116_v27 }
 0x417   : > { %v10774_v8 = vpop.eup %6099  ;;  %v3204_v59 = vmul.f32 %v10729_v23, %v3172_v58  ;;  %v3093_v26 = vadd.f32 1.4214138, %v3061_v40  ;;  %v3309_v29 = vsub.f32 0.0, %v2893_v12  ;;  %v10782_v11 = vand.u32 2147483647, %v10771_v36 }
 0x418   : > { %v6102_v21 = vpop.eup %6101  ;;  %v3548_v43 = vsel %vm3484_vm14, %v3452_v5, %v3516_v2  ;;  %v3005_v15 = vmul.f32 1.0614054, %v10774_v8  ;;  %6109 = vrcp.f32 %v2957_v38  ;;  %v3180_v56 = vadd.f32 -0.28449672, %v3148_v46 }
 0x419   : > { %v3612_v33 = vadd.f32 1.0, %v3548_v43  ;;  %v3236_v4 = vadd.f32 0.2548296, %v3204_v59  ;;  %v3125_v28 = vmul.f32 %v10757_v53, %v3093_v26  ;;  %v6104_v58 = vpop.eup %6103  ;;  %vm3492_vm15 = vcmp.ge.f32.partialorder %v10635_v16, 0.0 }
 0x41a   : > { %v3037_v27 = vadd.f32 -1.4531521, %v3005_v15  ;;  %v3333_v40 = vmul.f32 %v3301_v37, %v2885_v32  ;;  %v2902_v14 = vmul.f32 0.3275911, %v10782_v11  ;;  %v2782_v19 = vmul.f32 %v16217_v63, %v2604_v57 }
 0x41b   : > { %v10789_v5 = vmul.f32 %v3612_v33, %v10717_v44  ;;  %v3268_v2 = vmul.f32 %v10729_v23, %v3236_v4  ;;  %v3212_v38 = vmul.f32 %v10747_v0, %v3180_v56  ;;  %v3157_v59 = vadd.f32 -0.28449672, %v3125_v28 }
 0x41c   : > { %v3069_v46 = vmul.f32 %v10774_v8, %v3037_v27  ;;  %v10795_v26 = vmul.f32 0.5, %v10695_v31  ;;  %v3341_v43 = vmul.f32 %v3309_v29, %v2893_v12  ;;  %v2934_v15 = vadd.f32 1.0, %v2902_v14  ;;  %v16222_v31 = vld [vmem:[#allocation199_spill] sm:$0xff] }
 0x41d   : > { %16221 = vst [vmem:[#allocation133_spill] sm:$0xff] %v10789_v5  ;;  %v6106_v32 = vpop.eup %6105  ;;  %3684 = vrot.lane.b32.xlu1 %v10789_v5, %s6256_s4  ;;  %v3428_v37 = vmul.f32 %v6102_v21, %v3268_v2  ;;  %v3244_v57 = vadd.f32 0.2548296, %v3212_v38  ;;  %v3189_v44 = vmul.f32 %v10757_v53, %v3157_v59  ;;  %6111 = vpow2.f32 %v3368_v10  ;;  %v16223_v2 = vld [vmem:[#allocation110_spill] sm:$0xff] }
 0x41e   : > { %v10800_v23 = vpop.eup %6107  ;;  %vm3500_vm0 = vcmp.ge.f32.partialorder %v10660_v13, 0.0  ;;  %v3101_v33 = vadd.f32 1.4214138, %v3069_v46  ;;  %v3384_v4 = vmul.f32 1.442695, %v3333_v40  ;;  %6113 = vrcp.f32 %v2934_v15 }
 0x41f   : > { %v10804_v56 = vadd.f32 %v2782_v19, %v16222_v31  ;;  %v3460_v14 = vsub.f32 1.0, %v3428_v37  ;;  %v3276_v12 = vmul.f32 %v10747_v0, %v3244_v57  ;;  %v3221_v29 = vadd.f32 0.2548296, %v3189_v44 }
 0x420   : > { %v3013_v21 = vmul.f32 1.0614054, %v10800_v23  ;;  %vm3477_vm5 = vcmp.ge.f32.partialorder %v10665_v24, 0.0  ;;  %v3133_v10 = vmul.f32 %v10774_v8, %v3101_v33  ;;  %v3400_v28 = vmul.f32 1.442695, %v3341_v43 }
 0x421   : > { %v10811_v27 = vmul.f32 0.70710677, %v10804_v56  ;;  %v2580_v40 = vmul.f32 %v10341_v1, %v16223_v2  ;;  %v3524_v38 = vsub.f32 0.0, %v3460_v14  ;;  %v3436_v19 = vmul.f32 %v6104_v58, %v3276_v12 }
 0x422   : > { %v3253_v59 = vmul.f32 %v10757_v53, %v3221_v29  ;;  %v3045_v46 = vadd.f32 -1.4531521, %v3013_v21  ;;  %v10816_v0 = vpop.eup %6109  ;;  %v3165_v15 = vadd.f32 -0.28449672, %v3133_v10  ;;  %6115 = vpow2.f32 %v3384_v4 }
 0x423   : > { %v3286_v37 = vsub.f32 0.0, %v10782_v11  ;;  %v2878_v57 = vand.u32 2147483647, %v10811_v27  ;;  %v3556_v43 = vsel %vm3492_vm15, %v3460_v14, %v3524_v38  ;;  %v3468_v44 = vsub.f32 1.0, %v3436_v19 }
 0x424   : > { %v3413_v33 = vmul.f32 %v6106_v32, %v3253_v59  ;;  %v3077_v31 = vmul.f32 %v10800_v23, %v3045_v46  ;;  %v3620_v2 = vadd.f32 1.0, %v3556_v43  ;;  %v3197_v58 = vmul.f32 %v10774_v8, %v3165_v15 }
 0x425   : > { %v3021_v53 = vmul.f32 1.0614054, %v10816_v0  ;;  %v2910_v12 = vmul.f32 0.3275911, %v2878_v57  ;;  %v3532_v29 = vsub.f32 0.0, %v3468_v44  ;;  %6117 = vpow2.f32 %v3400_v28 }
 0x426   : > { %v3445_v21 = vsub.f32 1.0, %v3413_v33  ;;  %v3109_v4 = vadd.f32 1.4214138, %v3077_v31  ;;  %v10826_v10 = vmul.f32 %v3620_v2, %v10723_v30  ;;  %v3229_v5 = vadd.f32 0.2548296, %v3197_v58 }
 0x427   : > { %v3053_v16 = vadd.f32 -1.4531521, %v3021_v53  ;;  %v2942_v14 = vadd.f32 1.0, %v2910_v12  ;;  %v6112_v38 = vpop.eup %6111  ;;  %v3564_v32 = vsel %vm3500_vm0, %v3468_v44, %v3532_v29  ;;  %v3318_v46 = vmul.f32 %v3286_v37, %v10782_v11 }
 0x428   : > { %16224 = vst [vmem:[#allocation89_spill] sm:$0xff] %v10826_v10  ;;  %v3509_v19 = vsub.f32 0.0, %v3445_v21  ;;  %v3141_v59 = vmul.f32 %v10800_v23, %v3109_v4  ;;  %v10832_v15 = vpop.eup %6113  ;;  %3686 = vrot.lane.b32.xlu0 %v10826_v10, %s6256_s4  ;;  %v3628_v28 = vadd.f32 1.0, %v3564_v32  ;;  %v3261_v30 = vmul.f32 %v10774_v8, %v3229_v5  ;;  %v16226_v5 = vld [vmem:[#allocation245_spill] sm:$0xff] }
 0x429   : > { %v3085_v43 = vmul.f32 %v10816_v0, %v3053_v16  ;;  %6119 = vrcp.f32 %v2942_v14  ;;  %v2998_v33 = vmul.f32 1.0614054, %v10832_v15  ;;  %v3294_v31 = vsub.f32 0.0, %v2878_v57  ;;  %v16228_v16 = vld [vmem:[#allocation130_spill] sm:$0xff] }
 0x42a   : > { %v3541_v13 = vsel %vm3477_vm5, %v3445_v21, %v3509_v19  ;;  %v3173_v44 = vadd.f32 -0.28449672, %v3141_v59  ;;  %v10842_v11 = vmul.f32 %v3628_v28, %v10726_v61  ;;  %v3421_v2 = vmul.f32 %v6112_v38, %v3261_v30 }
 0x42b   : > { %v3605_v37 = vadd.f32 1.0, %v3541_v13  ;;  %v3117_v58 = vadd.f32 1.4214138, %v3085_v43  ;;  %v3030_v12 = vadd.f32 -1.4531521, %v2998_v33  ;;  %v2612_v29 = vadd.f32 %v2580_v40, %v16226_v5 }
 0x42c   : > { %16225 = vst [vmem:[#allocation90_spill] sm:$0xff] %v10842_v11  ;;  %v3205_v53 = vmul.f32 %v10800_v23, %v3173_v44  ;;  %v3354_v8 = vmul.f32 1.442695, %v3318_v46  ;;  %v6116_v4 = vpop.eup %6115  ;;  %3688 = vrot.lane.b32.xlu1 %v10842_v11, %s6256_s4  ;;  %v3453_v21 = vsub.f32 1.0, %v3421_v2  ;;  %v2588_v14 = vmul.f32 %v10372_v48, %v16228_v16  ;;  %v16229_v46 = vld [vmem:[#allocation71_spill] sm:$0xff] }
 0x42d   : > { %v10849_v24 = vmul.f32 %v3605_v37, %v10742_v42  ;;  %v3149_v61 = vmul.f32 %v10816_v0, %v3117_v58  ;;  %vm3485_vm6 = vcmp.ge.f32.partialorder %v10707_v55, 0.0  ;;  %v3062_v32 = vmul.f32 %v10832_v15, %v3030_v12  ;;  %v16230_v44 = vld [vmem:[#allocation203_spill] sm:$0xff]  ;;  %v16231_v58 = vld [vmem:[#allocation30_spill] sm:$0xff] }
 0x42e   : > { %v3237_v38 = vadd.f32 0.2548296, %v3205_v53  ;;  %v2790_v40 = vmul.f32 %v16217_v63, %v2612_v29  ;;  %v3517_v19 = vsub.f32 0.0, %v3453_v21  ;;  %v3326_v42 = vmul.f32 %v3294_v31, %v2878_v57 }
 0x42f   : > { %16227 = vst [vmem:[#allocation93_spill] sm:$0xff] %v10849_v24  ;;  %3690 = vrot.lane.b32.xlu0 %v10849_v24, %s6256_s4  ;;  %v3181_v59 = vadd.f32 -0.28449672, %v3149_v61  ;;  %v2620_v28 = vadd.f32 %v2588_v14, %v16229_v46  ;;  %v6118_v30 = vpop.eup %6117  ;;  %v3094_v13 = vadd.f32 1.4214138, %v3062_v32  ;;  %6121 = vpow2.f32 %v3354_v8  ;;  %v16232_v61 = vld [vmem:[#allocation206_spill] sm:$0xff] }
 0x430   : > { %v3269_v43 = vmul.f32 %v10800_v23, %v3237_v38  ;;  %v10862_v55 = vadd.f32 %v2790_v40, %v16230_v44  ;;  %v3549_v33 = vsel %vm3485_vm6, %v3453_v21, %v3517_v19  ;;  %v2597_v53 = vadd.f32 %v10702_v47, %v16231_v58 }
 0x431   : > { %v3213_v37 = vmul.f32 %v10816_v0, %v3181_v59  ;;  %v2798_v2 = vmul.f32 %v16217_v63, %v2620_v28  ;;  %v3613_v12 = vadd.f32 1.0, %v3549_v33  ;;  %v3126_v31 = vmul.f32 %v10832_v15, %v3094_v13  ;;  %v16235_v28 = vld [vmem:[#allocation117_spill] sm:$0xff] }
 0x432   : > { %v3429_v57 = vmul.f32 %v6116_v4, %v3269_v43  ;;  %v10870_v5 = vmul.f32 0.70710677, %v10862_v55  ;;  %v3589_v8 = vmul.f32 0.5, %v10732_v45  ;;  %v3370_v21 = vmul.f32 1.442695, %v3326_v42  ;;  %v16234_v45 = vld [vmem:[#allocation238_spill] sm:$0xff] }
 0x433   : > { %v10872_v23 = vpop.eup %6119  ;;  %v3245_v29 = vadd.f32 0.2548296, %v3213_v37  ;;  %v10876_v16 = vadd.f32 %v2798_v2, %v16232_v61  ;;  %v10879_v14 = vmul.f32 %v3613_v12, %v10795_v26  ;;  %v3158_v38 = vadd.f32 -0.28449672, %v3126_v31 }
 0x434   : > { %v3461_v47 = vsub.f32 1.0, %v3429_v57  ;;  %v3006_v4 = vmul.f32 1.0614054, %v10872_v23  ;;  %v2886_v40 = vand.u32 2147483647, %v10870_v5  ;;  %v2775_v59 = vmul.f32 %v16234_v45, %v2597_v53  ;;  %v16236_v57 = vld [vmem:[#allocation204_spill] sm:$0xff] }
 0x435   : > { %16233 = vst [vmem:[#allocation58_spill] sm:$0xff] %v10879_v14  ;;  %v3277_v32 = vmul.f32 %v10816_v0, %v3245_v29  ;;  %v10885_v19 = vmul.f32 0.70710677, %v10876_v16  ;;  %3692 = vrot.lane.b32.xlu1 %v10879_v14, %s6256_s4  ;;  %v3190_v26 = vmul.f32 %v10832_v15, %v3158_v38  ;;  %v2573_v43 = vmul.f32 %v10322_v6, %v16235_v28  ;;  %v16237_v38 = vld [vmem:[#allocation92_spill] sm:$0xff] }
 0x436   : > { %v3525_v42 = vsub.f32 0.0, %v3461_v47  ;;  %v3038_v46 = vadd.f32 -1.4531521, %v3006_v4  ;;  %vm3493_vm7 = vcmp.ge.f32.partialorder %v10739_v17, 0.0  ;;  %v2918_v13 = vmul.f32 0.3275911, %v2886_v40 }
 0x437   : > { %v3437_v0 = vmul.f32 %v6118_v30, %v3277_v32  ;;  %v10895_v44 = vand.u32 2147483647, %v10885_v19  ;;  %v3222_v37 = vadd.f32 0.2548296, %v3190_v26  ;;  %6123 = vpow2.f32 %v3370_v21 }
 0x438   : > { %v3557_v33 = vsel %vm3493_vm7, %v3461_v47, %v3525_v42  ;;  %v3070_v2 = vmul.f32 %v10872_v23, %v3038_v46  ;;  %v2950_v12 = vadd.f32 1.0, %v2918_v13  ;;  %v10899_v31 = vadd.f32 %v2775_v59, %v16236_v57 }
 0x439   : > { %v3621_v58 = vadd.f32 1.0, %v3557_v33  ;;  %v3469_v53 = vsub.f32 1.0, %v3437_v0  ;;  %v6122_v29 = vpop.eup %6121  ;;  %v3254_v61 = vmul.f32 %v10832_v15, %v3222_v37  ;;  %v2926_v30 = vmul.f32 0.3275911, %v10895_v44  ;;  %v16241_v37 = vld [vmem:[#allocation103_spill] sm:$0xff] }
 0x43a   : > { %v3102_v17 = vadd.f32 1.4214138, %v3070_v2  ;;  %v2605_v4 = vadd.f32 %v2573_v43, %v16237_v38  ;;  %6125 = vrcp.f32 %v2950_v12  ;;  %v3302_v42 = vsub.f32 0.0, %v2886_v40  ;;  %v16240_v43 = vld [vmem:[#allocation166_spill] sm:$0xff]  ;;  %v16242_v2 = vld [vmem:[#allocation19_spill] sm:$0xff] }
 0x43b   : > { %v10904_v32 = vmul.f32 %v3621_v58, %v3589_v8  ;;  %v3533_v47 = vsub.f32 0.0, %v3469_v53  ;;  %vm3501_vm8 = vcmp.ge.f32.partialorder %v10755_v20, 0.0  ;;  %v3414_v21 = vmul.f32 %v6122_v29, %v3254_v61  ;;  %v16239_v8 = vld [vmem:[#allocation67_spill] sm:$0xff] }
 0x43c   : > { %v3134_v26 = vmul.f32 %v10872_v23, %v3102_v17  ;;  %v2958_v59 = vadd.f32 1.0, %v2926_v30  ;;  %v3597_v46 = vmul.f32 0.5, %v10745_v60  ;;  %v10912_v28 = vmul.f32 0.70710677, %v10899_v31  ;;  %v16244_v17 = vld [vmem:[#allocation159_spill] sm:$0xff] }
 0x43d   : > { %16238 = vst [vmem:[#allocation95_spill] sm:$0xff] %v10904_v32  ;;  %3694 = vrot.lane.b32.xlu0 %v10904_v32, %s6256_s4  ;;  %v3565_v15 = vsel %vm3501_vm8, %v3469_v53, %v3533_v47  ;;  %v10916_v0 = vmul.f32 %v16240_v43, %v16239_v8  ;;  %v3446_v33 = vsub.f32 1.0, %v3414_v21  ;;  %v10922_v58 = vsel %vm2169_vm4, %v16242_v2, %v16241_v37  ;;  %v16245_v21 = vld [vmem:[#allocation207_spill] sm:$0xff] }
 0x43e   : > { %v3629_v13 = vadd.f32 1.0, %v3565_v15  ;;  %v3166_v20 = vadd.f32 -0.28449672, %v3134_v26  ;;  %6127 = vrcp.f32 %v2958_v59  ;;  %v3334_v53 = vmul.f32 %v3302_v42, %v2886_v40  ;;  %v16246_v59 = vld [vmem:[#allocation136_spill] sm:$0xff] }
 0x43f   : > { %v2871_v60 = vand.u32 2147483647, %v10912_v28  ;;  %v2783_v12 = vmul.f32 %v16234_v45, %v2605_v4  ;;  %v3510_v29 = vsub.f32 0.0, %v3446_v33  ;;  %v2581_v30 = vmul.f32 %v10341_v1, %v16244_v17 }
 0x440   : > { %v10926_v57 = vmul.f32 %v3629_v13, %v3597_v46  ;;  %v3198_v61 = vmul.f32 %v10872_v23, %v3166_v20  ;;  %vm3478_vm9 = vcmp.ge.f32.partialorder %v10771_v36, 0.0  ;;  %v3310_v38 = vsub.f32 0.0, %v10895_v44  ;;  %v16247_v46 = vld [vmem:[#allocation69_spill] sm:$0xff] }
 0x441   : > { %v2903_v47 = vmul.f32 0.3275911, %v2871_v60  ;;  %v10934_v26 = vadd.f32 %v2783_v12, %v16245_v21  ;;  %v6124_v40 = vpop.eup %6123  ;;  %v3542_v4 = vsel %vm3478_vm9, %v3446_v33, %v3510_v29  ;;  %v2613_v15 = vadd.f32 %v2581_v30, %v16246_v59  ;;  %v16248_v21 = vld [vmem:[#allocation108_spill] sm:$0xff] }
 0x442   : > { %16243 = vst [vmem:[#allocation225_spill] sm:$0xff] %v10926_v57  ;;  %3696 = vrot.lane.b32.xlu1 %v10926_v57, %s6256_s4  ;;  %v3230_v42 = vadd.f32 0.2548296, %v3198_v61  ;;  %v2589_v8 = vmul.f32 %v10372_v48, %v16247_v46  ;;  %v3574_v43 = vmul.f32 0.5, %v10765_v62  ;;  %v3606_v36 = vadd.f32 1.0, %v3542_v4 }
 0x443   : > { %v2935_v13 = vadd.f32 1.0, %v2903_v47  ;;  %v10943_v20 = vmul.f32 0.70710677, %v10934_v26  ;;  %v3386_v12 = vmul.f32 1.442695, %v3334_v53  ;;  %v2791_v17 = vmul.f32 %v16234_v45, %v2613_v15 }
 0x444   : > { %v3262_v2 = vmul.f32 %v10872_v23, %v3230_v42  ;;  %v2621_v33 = vadd.f32 %v2589_v8, %v16248_v21  ;;  %v10948_v29 = vpop.eup %6125  ;;  %v10950_v61 = vmul.f32 %v3606_v36, %v3574_v43  ;;  %v3582_v30 = vmul.f32 0.5, %v10804_v56  ;;  %v16250_v23 = vld [vmem:[#allocation208_spill] sm:$0xff] }
 0x445   : > { %6129 = vrcp.f32 %v2935_v13  ;;  %v2879_v62 = vand.u32 2147483647, %v10943_v20  ;;  %v3014_v4 = vmul.f32 1.0614054, %v10948_v29  ;;  %v3342_v59 = vmul.f32 %v3310_v38, %v10895_v44  ;;  %v16251_v13 = vld [vmem:[#allocation209_spill] sm:$0xff] }
 0x446   : > { %16249 = vst [vmem:[#allocation97_spill] sm:$0xff] %v10950_v61  ;;  %v3422_v47 = vmul.f32 %v6124_v40, %v3262_v2  ;;  %v10957_v53 = vadd.f32 %v2791_v17, %v16250_v23  ;;  %3698 = vrot.lane.b32.xlu0 %v10950_v61, %s6256_s4  ;;  %vm3486_vm10 = vcmp.ge.f32.partialorder %v10811_v27, 0.0  ;;  %v3287_v42 = vsub.f32 0.0, %v2871_v60 }
 0x447   : > { %v2911_v15 = vmul.f32 0.3275911, %v2879_v62  ;;  %v2799_v56 = vmul.f32 %v16234_v45, %v2621_v33  ;;  %v3046_v40 = vadd.f32 -1.4531521, %v3014_v4  ;;  %6131 = vpow2.f32 %v3386_v12 }
 0x448   : > { %v10963_v46 = vpop.eup %6127  ;;  %v3454_v8 = vsub.f32 1.0, %v3422_v47  ;;  %v10966_v43 = vmul.f32 0.70710677, %v10957_v53  ;;  %v3295_v36 = vsub.f32 0.0, %v2879_v62  ;;  %v3402_v23 = vmul.f32 1.442695, %v3342_v59 }
 0x449   : > { %v3022_v44 = vmul.f32 1.0614054, %v10963_v46  ;;  %v2943_v38 = vadd.f32 1.0, %v2911_v15  ;;  %v10970_v2 = vadd.f32 %v2799_v56, %v16251_v13  ;;  %v3078_v21 = vmul.f32 %v10948_v29, %v3046_v40 }
 0x44a   : > { %v3518_v17 = vsub.f32 0.0, %v3454_v8  ;;  %v2887_v33 = vand.u32 2147483647, %v10966_v43  ;;  %v3319_v47 = vmul.f32 %v3287_v42, %v2871_v60  ;;  %v3327_v61 = vmul.f32 %v3295_v36, %v2879_v62  ;;  %v16252_v42 = vld [vmem:[#allocation161_spill] sm:$0xff] }
 0x44b   : > { %v3054_v45 = vadd.f32 -1.4531521, %v3022_v44  ;;  %6133 = vrcp.f32 %v2943_v38  ;;  %v10975_v12 = vmul.f32 0.70710677, %v10970_v2  ;;  %v3110_v15 = vadd.f32 1.4214138, %v3078_v21 }
 0x44c   : > { %v3550_v4 = vsel %vm3486_vm10, %v3454_v8, %v3518_v17  ;;  %v2919_v63 = vmul.f32 0.3275911, %v2887_v33  ;;  %v3303_v57 = vsub.f32 0.0, %v2887_v33  ;;  %6135 = vpow2.f32 %v3402_v23 }
 0x44d   : > { %v3614_v56 = vadd.f32 1.0, %v3550_v4  ;;  %v3086_v13 = vmul.f32 %v10963_v46, %v3054_v45  ;;  %v2895_v59 = vand.u32 2147483647, %v10975_v12  ;;  %v3142_v40 = vmul.f32 %v10948_v29, %v3110_v15 }
 0x44e   : > { %v2951_v60 = vadd.f32 1.0, %v2919_v63  ;;  %v10984_v44 = vadd.f32 %v10916_v0, %v16252_v42  ;;  %v3335_v17 = vmul.f32 %v3303_v57, %v2887_v33  ;;  %v3356_v62 = vmul.f32 1.442695, %v3319_v47  ;;  %v16254_v33 = vld [vmem:[#allocation75_spill] sm:$0xff] }
 0x44f   : > { %v10986_v38 = vpop.eup %6129  ;;  %v10988_v27 = vmul.f32 %v3614_v56, %v3582_v30  ;;  %v3118_v8 = vadd.f32 1.4214138, %v3086_v13  ;;  %v2927_v21 = vmul.f32 0.3275911, %v2895_v59  ;;  %v3174_v4 = vadd.f32 -0.28449672, %v3142_v40 }
 0x450   : > { %v2999_v45 = vmul.f32 1.0614054, %v10986_v38  ;;  %6137 = vrcp.f32 %v2951_v60  ;;  %v3372_v36 = vmul.f32 1.442695, %v3327_v61  ;;  %v3311_v23 = vsub.f32 0.0, %v2895_v59 }
 0x451   : > { %16253 = vst [vmem:[#allocation226_spill] sm:$0xff] %v10988_v27  ;;  %3700 = vrot.lane.b32.xlu1 %v10988_v27, %s6256_s4  ;;  %v3150_v63 = vmul.f32 %v10963_v46, %v3118_v8  ;;  %v2959_v0 = vadd.f32 1.0, %v2927_v21  ;;  %v6132_v15 = vpop.eup %6131  ;;  %v3206_v30 = vmul.f32 %v10948_v29, %v3174_v4  ;;  %v10996_v56 = vmul.f32 0.5, %v10862_v55  ;;  %v16255_v8 = vld [vmem:[#allocation73_spill] sm:$0xff] }
 0x452   : > { %v3031_v57 = vadd.f32 -1.4531521, %v2999_v45  ;;  %v2566_v13 = vmul.f32 %v16204_v9, %v16254_v33  ;;  %v3388_v40 = vmul.f32 1.442695, %v3335_v17  ;;  %v2574_v60 = vmul.f32 %v10322_v6, %v10655_v41 }
 0x453   : > { %v3182_v47 = vadd.f32 -0.28449672, %v3150_v63  ;;  %6139 = vrcp.f32 %v2959_v0  ;;  %v3238_v42 = vadd.f32 0.2548296, %v3206_v30  ;;  %vm3494_vm11 = vcmp.ge.f32.partialorder %v10870_v5, 0.0  ;;  %v16256_v63 = vld [vmem:[#allocation81_spill] sm:$0xff] }
 0x454   : > { %v3063_v61 = vmul.f32 %v10986_v38, %v3031_v57  ;;  %6141 = vpow2.f32 %v3356_v62  ;;  %v2598_v21 = vadd.f32 %v2566_v13, %v16255_v8  ;;  %v3343_v45 = vmul.f32 %v3311_v23, %v2895_v59  ;;  %v16257_v30 = vld [vmem:[#allocation236_spill] sm:$0xff]  ;;  %v16258_v23 = vld [vmem:[#allocation197_spill] sm:$0xff] }
 0x455   : > { %v11004_v4 = vpop.eup %6133  ;;  %v3214_v55 = vmul.f32 %v10963_v46, %v3182_v47  ;;  %6143 = vpow2.f32 %v3372_v36  ;;  %v2606_v17 = vadd.f32 %v2574_v60, %v16256_v63  ;;  %v3270_v0 = vmul.f32 %v10948_v29, %v3238_v42  ;;  %v16259_v42 = vld [vmem:[#allocation201_spill] sm:$0xff] }
 0x456   : > { %v3095_v33 = vadd.f32 1.4214138, %v3063_v61  ;;  %v3007_v41 = vmul.f32 1.0614054, %v11004_v4  ;;  %v2776_v57 = vmul.f32 %v16257_v30, %v2598_v21  ;;  %v3598_v13 = vmul.f32 0.5, %v10876_v16  ;;  %v6136_v27 = vpop.eup %6135 }
 0x457   : > { %v3246_v62 = vadd.f32 0.2548296, %v3214_v55  ;;  %6145 = vpow2.f32 %v3388_v40  ;;  %v2784_v8 = vmul.f32 %v16257_v30, %v2606_v17  ;;  %v3430_v14 = vmul.f32 %v6132_v15, %v3270_v0 }
 0x458   : > { %vm3502_vm12 = vcmp.ge.f32.partialorder %v10885_v19, 0.0  ;;  %v3127_v59 = vmul.f32 %v10986_v38, %v3095_v33  ;;  %v3039_v36 = vadd.f32 -1.4531521, %v3007_v41  ;;  %v11017_v29 = vadd.f32 %v2776_v57, %v16258_v23 }
 0x459   : > { %v3278_v47 = vmul.f32 %v10963_v46, %v3246_v62  ;;  %v3404_v60 = vmul.f32 1.442695, %v3343_v45  ;;  %v11021_v61 = vadd.f32 %v2784_v8, %v16259_v42  ;;  %v2582_v16 = vmul.f32 %v10341_v1, %v10684_v22 }
 0x45a   : > { %v11025_v40 = vpop.eup %6137  ;;  %v3462_v15 = vsub.f32 1.0, %v3430_v14  ;;  %v3159_v21 = vadd.f32 -0.28449672, %v3127_v59  ;;  %v3071_v55 = vmul.f32 %v11004_v4, %v3039_v36  ;;  %v11029_v63 = vmul.f32 0.70710677, %v11017_v29  ;;  %v16260_v59 = vld [vmem:[#allocation59_spill] sm:$0xff] }
 0x45b   : > { %v3438_v17 = vmul.f32 %v6136_v27, %v3278_v47  ;;  %v3015_v0 = vmul.f32 1.0614054, %v11025_v40  ;;  %v11033_v46 = vmul.f32 0.70710677, %v11021_v61  ;;  %v2590_v45 = vmul.f32 %v10372_v48, %v10922_v58 }
 0x45c   : > { %v3526_v33 = vsub.f32 0.0, %v3462_v15  ;;  %v3191_v22 = vmul.f32 %v10986_v38, %v3159_v21  ;;  %v3103_v41 = vadd.f32 1.4214138, %v3071_v55  ;;  %v11039_v14 = vand.u32 2147483647, %v11029_v63 }
 0x45d   : > { %v11041_v57 = vpop.eup %6139  ;;  %v3470_v62 = vsub.f32 1.0, %v3438_v17  ;;  %v3047_v8 = vadd.f32 -1.4531521, %v3015_v0  ;;  %v11044_v27 = vand.u32 2147483647, %v11033_v46  ;;  %v2614_v36 = vadd.f32 %v2582_v16, %v16260_v59  ;;  %v16261_v59 = vld [vmem:[#allocation127_spill] sm:$0xff] }
 0x45e   : > { %v6142_v23 = vpop.eup %6141  ;;  %v3558_v58 = vsel %vm3494_vm11, %v3462_v15, %v3526_v33  ;;  %v3223_v47 = vadd.f32 0.2548296, %v3191_v22  ;;  %v3135_v42 = vmul.f32 %v11004_v4, %v3103_v41  ;;  %v3023_v21 = vmul.f32 1.0614054, %v11041_v57 }
 0x45f   : > { %v6144_v55 = vpop.eup %6143  ;;  %v3622_v32 = vadd.f32 1.0, %v3558_v58  ;;  %v3534_v11 = vsub.f32 0.0, %v3470_v62  ;;  %v3079_v17 = vmul.f32 %v11025_v40, %v3047_v8  ;;  %v2904_v0 = vmul.f32 0.3275911, %v11039_v14 }
 0x460   : > { %v3255_v24 = vmul.f32 %v10986_v38, %v3223_v47  ;;  %v3167_v10 = vadd.f32 -0.28449672, %v3135_v42  ;;  %v3055_v16 = vadd.f32 -1.4531521, %v3023_v21  ;;  %v2622_v39 = vadd.f32 %v2590_v45, %v16261_v59 }
 0x461   : > { %v6146_v5 = vpop.eup %6145  ;;  %v11056_v15 = vmul.f32 %v3622_v32, %v10996_v56  ;;  %v3566_v33 = vsel %vm3502_vm12, %v3470_v62, %v3534_v11  ;;  %v3111_v22 = vadd.f32 1.4214138, %v3079_v17  ;;  %v2936_v41 = vadd.f32 1.0, %v2904_v0 }
 0x462   : > { %v3630_v58 = vadd.f32 1.0, %v3566_v33  ;;  %v3415_v51 = vmul.f32 %v6142_v23, %v3255_v24  ;;  %v3199_v8 = vmul.f32 %v11004_v4, %v3167_v10  ;;  %v3087_v49 = vmul.f32 %v11041_v57, %v3055_v16  ;;  %v16264_v16 = vld [vmem:[#allocation72_spill] sm:$0xff]  ;;  %v16265_v33 = vld [vmem:[#allocation211_spill] sm:$0xff] }
 0x463   : > { %16262 = vst [vmem:[#allocation126_spill] sm:$0xff] %v11056_v15  ;;  %3702 = vrot.lane.b32.xlu0 %v11056_v15, %s6256_s4  ;;  %v3575_v38 = vmul.f32 0.5, %v10899_v31  ;;  %v3143_v45 = vmul.f32 %v11025_v40, %v3111_v22  ;;  %6147 = vrcp.f32 %v2936_v41  ;;  %v2912_v32 = vmul.f32 0.3275911, %v11044_v27 }
 0x464   : > { %v11067_v19 = vmul.f32 %v3630_v58, %v3598_v13  ;;  %v3447_v11 = vsub.f32 1.0, %v3415_v51  ;;  %v3231_v56 = vadd.f32 0.2548296, %v3199_v8  ;;  %v3119_v62 = vadd.f32 1.4214138, %v3087_v49 }
 0x465   : > { %v3175_v24 = vadd.f32 -0.28449672, %v3143_v45  ;;  %6149 = vpow2.f32 %v3404_v60  ;;  %v2944_v10 = vadd.f32 1.0, %v2912_v32  ;;  %v2792_v23 = vmul.f32 %v16257_v30, %v2614_v36 }
 0x466   : > { %16263 = vst [vmem:[#allocation102_spill] sm:$0xff] %v11067_v19  ;;  %3704 = vrot.lane.b32.xlu1 %v11067_v19, %s6256_s4  ;;  %v3511_v47 = vsub.f32 0.0, %v3447_v11  ;;  %v3263_v31 = vmul.f32 %v11004_v4, %v3231_v56  ;;  %v3151_v42 = vmul.f32 %v11041_v57, %v3119_v62  ;;  %v2800_v21 = vmul.f32 %v16257_v30, %v2622_v39  ;;  %v5941_v30 = vld [vmem:[%s14410_s8 + $0xb8] sm:$0xff] }
 0x467   : > { %vm3479_vm13 = vcmp.ge.f32.partialorder %v10912_v28, 0.0  ;;  %v3583_v51 = vmul.f32 0.5, %v10934_v26  ;;  %v3207_v49 = vmul.f32 %v11025_v40, %v3175_v24  ;;  %v3288_v13 = vsub.f32 0.0, %v11039_v14 }
 0x468   : > { %v3543_v60 = vsel %vm3479_vm13, %v3447_v11, %v3511_v47  ;;  %v3423_v36 = vmul.f32 %v6144_v55, %v3263_v31  ;;  %v3183_v17 = vadd.f32 -0.28449672, %v3151_v42  ;;  %6151 = vrcp.f32 %v2944_v10 }
 0x469   : > { %v3607_v0 = vadd.f32 1.0, %v3543_v60  ;;  %vm3487_vm14 = vcmp.ge.f32.partialorder %v10943_v20, 0.0  ;;  %v3239_v4 = vadd.f32 0.2548296, %v3207_v49  ;;  %v11081_v59 = vadd.f32 %v2792_v23, %v16264_v16 }
 0x46a   : > { %v3455_v39 = vsub.f32 1.0, %v3423_v36  ;;  %v3591_v28 = vmul.f32 0.5, %v10957_v53  ;;  %v3215_v26 = vmul.f32 %v11041_v57, %v3183_v17  ;;  %v11086_v22 = vadd.f32 %v2800_v21, %v16265_v33 }
 0x46b   : > { %v11088_v41 = vmul.f32 %v3607_v0, %v3575_v38  ;;  %v3271_v55 = vmul.f32 %v11025_v40, %v3239_v4  ;;  %v3320_v58 = vmul.f32 %v3288_v13, %v11039_v14  ;;  %v11093_v8 = vmul.f32 0.70710677, %v11081_v59 }
 0x46c   : > { %v3519_v45 = vsub.f32 0.0, %v3455_v39  ;;  %v3247_v32 = vadd.f32 0.2548296, %v3215_v26  ;;  %v3296_v11 = vsub.f32 0.0, %v11044_v27  ;;  %v11097_v53 = vmul.f32 0.70710677, %v11086_v22 }
 0x46d   : > { %16266 = vst [vmem:[#allocation162_spill] sm:$0xff] %v11088_v41  ;;  %v11099_v56 = vpop.eup %6147  ;;  %3706 = vrot.lane.b32.xlu0 %v11088_v41, %s6256_s4  ;;  %v3431_v38 = vmul.f32 %v6146_v5, %v3271_v55  ;;  %vm3495_vm15 = vcmp.ge.f32.partialorder %v10966_v43, 0.0  ;;  %vm3503_vm0 = vcmp.ge.f32.partialorder %v10975_v12, 0.0  ;;  %v2888_v40 = vand.u32 2147483647, %v11093_v8 }
 0x46e   : > { %v3551_v14 = vsel %vm3487_vm14, %v3455_v39, %v3519_v45  ;;  %v3279_v62 = vmul.f32 %v11041_v57, %v3247_v32  ;;  %v3000_v24 = vmul.f32 1.0614054, %v11099_v56  ;;  %v2896_v10 = vand.u32 2147483647, %v11097_v53 }
 0x46f   : > { %v6150_v23 = vpop.eup %6149  ;;  %v3615_v47 = vadd.f32 1.0, %v3551_v14  ;;  %v3463_v31 = vsub.f32 1.0, %v3431_v38  ;;  %v3358_v42 = vmul.f32 1.442695, %v3320_v58  ;;  %v2920_v5 = vmul.f32 0.3275911, %v2888_v40 }
 0x470   : > { %v3439_v21 = vmul.f32 %v6150_v23, %v3279_v62  ;;  %v3032_v49 = vadd.f32 -1.4531521, %v3000_v24  ;;  %v3328_v13 = vmul.f32 %v3296_v11, %v11044_v27  ;;  %v2928_v60 = vmul.f32 0.3275911, %v2896_v10  ;;  %v16269_v14 = vld [vmem:[#allocation50_spill] sm:$0xff] }
 0x471   : > { %v11112_v36 = vmul.f32 %v3615_v47, %v3583_v51  ;;  %v3527_v20 = vsub.f32 0.0, %v3463_v31  ;;  %v2952_v17 = vadd.f32 1.0, %v2920_v5  ;;  %v3304_v0 = vsub.f32 0.0, %v2888_v40  ;;  %v16272_v5 = vld [vmem:[#allocation163_spill] sm:$0xff] }
 0x472   : > { %v11114_v57 = vpop.eup %6151  ;;  %v3471_v4 = vsub.f32 1.0, %v3439_v21  ;;  %v3064_v16 = vmul.f32 %v11099_v56, %v3032_v49  ;;  %v2960_v39 = vadd.f32 1.0, %v2928_v60  ;;  %v2567_v26 = vmul.f32 %v16204_v9, %v10647_v35  ;;  %v16273_v21 = vld [vmem:[#allocation143_spill] sm:$0xff] }
 0x473   : > { %16267 = vst [vmem:[#allocation98_spill] sm:$0xff] %v11112_v36  ;;  %3708 = vrot.lane.b32.xlu1 %v11112_v36, %s6256_s4  ;;  %v3559_v27 = vsel %vm3495_vm15, %v3463_v31, %v3527_v20  ;;  %v3599_v51 = vmul.f32 0.5, %v10970_v2  ;;  %v3008_v33 = vmul.f32 1.0614054, %v11114_v57  ;;  %6153 = vrcp.f32 %v2952_v17  ;;  %v16270_v31 = vld [vmem:[#allocation45_spill] sm:$0xff]  ;;  %v16275_v17 = vld [vmem:[#allocation216_spill] sm:$0xff] }
 0x474   : > { %v3623_v55 = vadd.f32 1.0, %v3559_v27  ;;  %v3535_v58 = vsub.f32 0.0, %v3471_v4  ;;  %v3096_v45 = vadd.f32 1.4214138, %v3064_v16  ;;  %6155 = vrcp.f32 %v2960_v39  ;;  %v16278_v39 = vld [vmem:[#allocation182_spill] sm:$0xff] }
 0x475   : > { %6157 = vpow2.f32 %v3358_v42  ;;  %v3040_v32 = vadd.f32 -1.4531521, %v3008_v33  ;;  %v3374_v11 = vmul.f32 1.442695, %v3328_v13  ;;  %v3336_v38 = vmul.f32 %v3304_v0, %v2888_v40  ;;  %v16271_v40 = vld [vmem:[#allocation239_spill] sm:$0xff]  ;;  %v16276_v0 = vld [vmem:[#allocation24_spill] sm:$0xff] }
 0x476   : > { %v11125_v35 = vmul.f32 %v3623_v55, %v3591_v28  ;;  %v3567_v9 = vsel %vm3503_vm0, %v3471_v4, %v3535_v58  ;;  %v3128_v43 = vmul.f32 %v11099_v56, %v3096_v45  ;;  %v2599_v2 = vadd.f32 %v2567_v26, %v16269_v14  ;;  %v16277_v4 = vld [vmem:[#allocation188_spill] sm:$0xff]  ;;  %v16280_v14 = vld [vmem:[#allocation65_spill] sm:$0xff] }
 0x477   : > { %v3631_v62 = vadd.f32 1.0, %v3567_v9  ;;  %v3072_v24 = vmul.f32 %v11114_v57, %v3040_v32  ;;  %v3312_v23 = vsub.f32 0.0, %v2896_v10  ;;  %v2575_v47 = vmul.f32 %v10322_v6, %v10678_v18 }
 0x478   : > { %16268 = vst [vmem:[#allocation227_spill] sm:$0xff] %v11125_v35  ;;  %v2538_v28 = vsel %vm2169_vm4, %v16200_v54, %v16270_v31  ;;  %3710 = vrot.lane.b32.xlu0 %v11125_v35, %s6256_s4  ;;  %v3160_v12 = vadd.f32 -0.28449672, %v3128_v43  ;;  %v2777_v42 = vmul.f32 %v16271_v40, %v2599_v2  ;;  %v2099_v49 = vadd.f32 %v16273_v21, %v16272_v5 }
 0x479   : > { %v11143_v13 = vmul.f32 %v3631_v62, %v3599_v51  ;;  %v3104_v60 = vadd.f32 1.4214138, %v3072_v24  ;;  %v3390_v20 = vmul.f32 1.442695, %v3336_v38  ;;  %v2607_v6 = vadd.f32 %v2575_v47, %v10984_v44 }
 0x47a   : > { %v3192_v18 = vmul.f32 %v11099_v56, %v3160_v12  ;;  %6159 = vpow2.f32 %v3374_v11  ;;  %v11148_v54 = vadd.f32 %v2777_v42, %v16275_v17  ;;  %v2398_v16 = vmul.f32 %v16277_v4, %v16276_v0  ;;  %v16279_v11 = vld [vmem:[#allocation16_spill] sm:$0xff]  ;;  %v16283_v4 = vld [vmem:[#allocation22_spill] sm:$0xff] }
 0x47b   : > { %16274 = vst [vmem:[#allocation229_spill] sm:$0xff] %v11143_v13  ;;  %v2539_v26 = vsel %vm2169_vm4, %v16241_v37, %v16278_v39  ;;  %3712 = vrot.lane.b32.xlu1 %v11143_v13, %s6256_s4  ;;  %v3136_v27 = vmul.f32 %v11114_v57, %v3104_v60  ;;  %v3344_v44 = vmul.f32 %v3312_v23, %v2896_v10  ;;  %v3576_v55 = vmul.f32 0.5, %v11017_v29  ;;  %v16281_v60 = vld [vmem:[#allocation213_spill] sm:$0xff] }
 0x47c   : > { %v2785_v51 = vmul.f32 %v16271_v40, %v2607_v6  ;;  %v3224_v33 = vadd.f32 0.2548296, %v3192_v18  ;;  %v11162_v58 = vmul.f32 0.70710677, %v11148_v54  ;;  %v2583_v45 = vmul.f32 %v10341_v1, %v2538_v28 }
 0x47d   : > { %v11165_v32 = vpop.eup %6153  ;;  %vm3480_vm5 = vcmp.ge.f32.partialorder %v11029_v63, 0.0  ;;  %v3168_v37 = vadd.f32 -0.28449672, %v3136_v27  ;;  %6161 = vpow2.f32 %v3390_v20  ;;  %v2430_v1 = vadd.f32 %v2398_v16, %v16280_v14  ;;  %v16282_v20 = vld [vmem:[#allocation109_spill] sm:$0xff] }
 0x47e   : > { %v11169_v38 = vadd.f32 %v2785_v51, %v16279_v11  ;;  %v11171_v10 = vpop.eup %6155  ;;  %v3256_v9 = vmul.f32 %v11099_v56, %v3224_v33  ;;  %v3016_v29 = vmul.f32 1.0614054, %v11165_v32  ;;  %v11176_v43 = vand.u32 2147483647, %v11162_v58  ;;  %v16284_v16 = vld [vmem:[#allocation189_spill] sm:$0xff] }
 0x47f   : > { %v6158_v2 = vpop.eup %6157  ;;  %v3200_v62 = vmul.f32 %v11114_v57, %v3168_v37  ;;  %v3024_v24 = vmul.f32 1.0614054, %v11171_v10  ;;  %v3406_v23 = vmul.f32 1.442695, %v3344_v44  ;;  %v2615_v12 = vadd.f32 %v2583_v45, %v2430_v1 }
 0x480   : > { %v11182_v47 = vmul.f32 0.70710677, %v11169_v38  ;;  %v3416_v31 = vmul.f32 %v6158_v2, %v3256_v9  ;;  %v3048_v28 = vadd.f32 -1.4531521, %v3016_v29  ;;  %v2905_v56 = vmul.f32 0.3275911, %v11176_v43 }
 0x481   : > { %v3232_v42 = vadd.f32 0.2548296, %v3200_v62  ;;  %v3056_v5 = vadd.f32 -1.4531521, %v3024_v24  ;;  %v2253_v6 = vmul.f32 %v16282_v20, %v16281_v60  ;;  %v2406_v39 = vmul.f32 %v16284_v16, %v16283_v4  ;;  %v16285_v24 = vld [vmem:[#allocation55_spill] sm:$0xff]  ;;  %v16287_v60 = vld [vmem:[#allocation180_spill] sm:$0xff] }
 0x482   : > { %v11186_v21 = vand.u32 2147483647, %v11182_v47  ;;  %v3448_v18 = vsub.f32 1.0, %v3416_v31  ;;  %v3080_v17 = vmul.f32 %v11165_v32, %v3048_v28  ;;  %v2937_v0 = vadd.f32 1.0, %v2905_v56  ;;  %v16288_v20 = vld [vmem:[#allocation146_spill] sm:$0xff] }
 0x483   : > { %v3264_v27 = vmul.f32 %v11114_v57, %v3232_v42  ;;  %v3088_v44 = vmul.f32 %v11171_v10, %v3056_v5  ;;  %v2591_v33 = vmul.f32 %v10372_v48, %v2539_v26  ;;  %v2793_v9 = vmul.f32 %v16271_v40, %v2615_v12  ;;  %v16286_v12 = vld [vmem:[#allocation165_spill] sm:$0xff] }
 0x484   : > { %v2913_v51 = vmul.f32 0.3275911, %v11186_v21  ;;  %v6160_v45 = vpop.eup %6159  ;;  %v3512_v37 = vsub.f32 0.0, %v3448_v18  ;;  %v3112_v11 = vadd.f32 1.4214138, %v3080_v17  ;;  %6163 = vrcp.f32 %v2937_v0 }
 0x485   : > { %v3424_v29 = vmul.f32 %v6160_v45, %v3264_v27  ;;  %v3120_v14 = vadd.f32 1.4214138, %v3088_v44  ;;  %6165 = vpow2.f32 %v3406_v23  ;;  %v2438_v62 = vadd.f32 %v2406_v39, %v2253_v6 }
 0x486   : > { %v2945_v1 = vadd.f32 1.0, %v2913_v51  ;;  %v3544_v2 = vsel %vm3480_vm5, %v3448_v18, %v3512_v37  ;;  %v3144_v57 = vmul.f32 %v11165_v32, %v3112_v11  ;;  %v2696_v31 = vmul.f32 %v16285_v24, %v2099_v49 }
 0x487   : > { %v6162_v28 = vpop.eup %6161  ;;  %v3608_v48 = vadd.f32 1.0, %v3544_v2  ;;  %v3456_v26 = vsub.f32 1.0, %v3424_v29  ;;  %v3152_v56 = vmul.f32 %v11171_v10, %v3120_v14  ;;  %v11204_v5 = vadd.f32 %v2793_v9, %v16286_v12 }
 0x488   : > { %6167 = vrcp.f32 %v2945_v1  ;;  %v3176_v42 = vadd.f32 -0.28449672, %v3144_v57  ;;  %v2623_v23 = vadd.f32 %v2591_v33, %v2438_v62  ;;  %v1576_v63 = vadd.f32 %v16288_v20, %v16287_v60 }
 0x489   : > { %v11208_v18 = vmul.f32 %v3608_v48, %v3576_v55  ;;  %v3520_v17 = vsub.f32 0.0, %v3456_v26  ;;  %v3184_v6 = vadd.f32 -0.28449672, %v3152_v56  ;;  %vm3488_vm6 = vcmp.ge.f32.partialorder %v11033_v46, 0.0 }
 0x48a   : > { %v3208_v49 = vmul.f32 %v11165_v32, %v3176_v42  ;;  %v3289_v0 = vsub.f32 0.0, %v11176_v43  ;;  %v11214_v4 = vmul.f32 0.70710677, %v11204_v5  ;;  %v2728_v27 = vadd.f32 %v2696_v31, %v1576_v63 }
 0x48b   : > { %16289 = vst [vmem:[#allocation151_spill] sm:$0xff] %v11208_v18  ;;  %3714 = vrot.lane.b32.xlu0 %v11208_v18, %s6256_s4  ;;  %v3552_v16 = vsel %vm3488_vm6, %v3456_v26, %v3520_v17  ;;  %v3216_v39 = vmul.f32 %v11171_v10, %v3184_v6  ;;  %v2801_v55 = vmul.f32 %v16271_v40, %v2623_v23  ;;  %v3584_v44 = vmul.f32 0.5, %v11021_v61 }
 0x48c   : > { %v3616_v51 = vadd.f32 1.0, %v3552_v16  ;;  %v3240_v46 = vadd.f32 0.2548296, %v3208_v49  ;;  %v2889_v33 = vand.u32 2147483647, %v11214_v4  ;;  %v3297_v37 = vsub.f32 0.0, %v11186_v21 }
 0x48d   : > { %v3248_v45 = vadd.f32 0.2548296, %v3216_v39  ;;  %v11223_v11 = vadd.f32 %v2801_v55, %v2728_v27  ;;  %v3321_v1 = vmul.f32 %v3289_v0, %v11176_v43  ;;  %vm3496_vm7 = vcmp.ge.f32.partialorder %v11093_v8, 0.0 }
 0x48e   : > { %v6164_v9 = vpop.eup %6163  ;;  %v11225_v29 = vmul.f32 %v3616_v51, %v3584_v44  ;;  %v3272_v14 = vmul.f32 %v11165_v32, %v3240_v46  ;;  %v2921_v2 = vmul.f32 0.3275911, %v2889_v33  ;;  %v3329_v32 = vmul.f32 %v3297_v37, %v11186_v21 }
 0x48f   : > { %v6166_v57 = vpop.eup %6165  ;;  %v3280_v61 = vmul.f32 %v11171_v10, %v3248_v45  ;;  %v3001_v62 = vmul.f32 1.0614054, %v6164_v9  ;;  %v11231_v31 = vmul.f32 0.70710677, %v11223_v11  ;;  %v3360_v60 = vmul.f32 1.442695, %v3321_v1 }
 0x490   : > { %16290 = vst [vmem:[#allocation230_spill] sm:$0xff] %v11225_v29  ;;  %3716 = vrot.lane.b32.xlu1 %v11225_v29, %s6256_s4  ;;  %v3432_v48 = vmul.f32 %v6162_v28, %v3272_v14  ;;  %v2953_v26 = vadd.f32 1.0, %v2921_v2  ;;  %v3592_v28 = vmul.f32 0.5, %v11081_v59  ;;  %v3376_v39 = vmul.f32 1.442695, %v3329_v32 }
 0x491   : > { %v3440_v42 = vmul.f32 %v6166_v57, %v3280_v61  ;;  %v3033_v12 = vadd.f32 -1.4531521, %v3001_v62  ;;  %v2897_v43 = vand.u32 2147483647, %v11231_v31  ;;  %vm3504_vm8 = vcmp.ge.f32.partialorder %v11097_v53, 0.0 }
 0x492   : > { %v6168_v56 = vpop.eup %6167  ;;  %v3464_v23 = vsub.f32 1.0, %v3432_v48  ;;  %6169 = vrcp.f32 %v2953_v26  ;;  %v3600_v45 = vmul.f32 0.5, %v11086_v22  ;;  %v3305_v14 = vsub.f32 0.0, %v2889_v33 }
 0x493   : > { %v3009_v20 = vmul.f32 1.0614054, %v6168_v56  ;;  %v3472_v10 = vsub.f32 1.0, %v3440_v42  ;;  %v3065_v63 = vmul.f32 %v6164_v9, %v3033_v12  ;;  %v2929_v17 = vmul.f32 0.3275911, %v2897_v43 }
 0x494   : > { %v3528_v6 = vsub.f32 0.0, %v3464_v23  ;;  %6171 = vpow2.f32 %v3360_v60  ;;  %v3337_v22 = vmul.f32 %v3305_v14, %v2889_v33  ;;  %v3313_v42 = vsub.f32 0.0, %v2897_v43 }
 0x495   : > { %v3041_v49 = vadd.f32 -1.4531521, %v3009_v20  ;;  %v3536_v0 = vsub.f32 0.0, %v3472_v10  ;;  %v3097_v16 = vadd.f32 1.4214138, %v3065_v63  ;;  %v2961_v27 = vadd.f32 1.0, %v2929_v17 }
 0x496   : > { %v3560_v21 = vsel %vm3496_vm7, %v3464_v23, %v3528_v6  ;;  %vm3481_vm9 = vcmp.ge.f32.partialorder %v11162_v58, 0.0  ;;  %vm3489_vm10 = vcmp.ge.f32.partialorder %v11182_v47, 0.0  ;;  %vm3497_vm11 = vcmp.ge.f32.partialorder %v11214_v4, 0.0  ;;  %v11285_v4 = vpop.permute.xlu0 %3666 }
 0x497   : > { %v3073_v55 = vmul.f32 %v6168_v56, %v3041_v49  ;;  %v3624_v44 = vadd.f32 1.0, %v3560_v21  ;;  %v3568_v51 = vsel %vm3504_vm8, %v3472_v10, %v3536_v0  ;;  %v3129_v46 = vmul.f32 %v6164_v9, %v3097_v16 }
 0x498   : > { %6173 = vrcp.f32 %v2961_v27  ;;  %v3632_v8 = vadd.f32 1.0, %v3568_v51  ;;  %v3392_v10 = vmul.f32 1.442695, %v3337_v22  ;;  %v3585_v22 = vmul.f32 0.5, %v11169_v38 }
 0x499   : > { %v3105_v37 = vadd.f32 1.4214138, %v3073_v55  ;;  %v11241_v59 = vmul.f32 %v3624_v44, %v3592_v28  ;;  %v3161_v1 = vadd.f32 -0.28449672, %v3129_v46  ;;  %6175 = vpow2.f32 %v3376_v39 }
 0x49a   : > { %v11243_v2 = vmul.f32 %v3632_v8, %v3600_v45  ;;  %v3345_v28 = vmul.f32 %v3313_v42, %v2897_v43  ;;  %6177 = vpow2.f32 %v3392_v10  ;;  %vm3505_vm12 = vcmp.ge.f32.partialorder %v11231_v31, 0.0  ;;  %v11289_v31 = vpop.permute.xlu1 %3668 }
 0x49b   : > { %16291 = vst [vmem:[#allocation234_spill] sm:$0xff] %v11241_v59  ;;  %v3137_v57 = vmul.f32 %v6168_v56, %v3105_v37  ;;  %3718 = vrot.lane.b32.xlu0 %v11241_v59, %s6256_s4  ;;  %v3193_v53 = vmul.f32 %v6164_v9, %v3161_v1  ;;  %v3577_v37 = vmul.f32 0.5, %v11148_v54 }
 0x49c   : > { %16292 = vst [vmem:[#allocation237_spill] sm:$0xff] %v11243_v2  ;;  %v6170_v61 = vpop.eup %6169  ;;  %3720 = vrot.lane.b32.xlu1 %v11243_v2, %s6256_s4  ;;  %v3408_v51 = vmul.f32 1.442695, %v3345_v28  ;;  %v3593_v28 = vmul.f32 0.5, %v11204_v5  ;;  %v16297_v5 = vld [vmem:[#allocation171_spill] sm:$0xff] }
 0x49d   : > { %v3169_v62 = vadd.f32 -0.28449672, %v3137_v57  ;;  %v3225_v48 = vadd.f32 0.2548296, %v3193_v53  ;;  %v3017_v26 = vmul.f32 1.0614054, %v6170_v61 }
 0x49e   : > { %v6172_v60 = vpop.eup %6171  ;;  %6179 = vpow2.f32 %v3408_v51  ;;  %v16301_v51 = vld [vmem:[#allocation89_spill] sm:$0xff] }
 0x49f   : > { %v3201_v12 = vmul.f32 %v6168_v56, %v3169_v62  ;;  %v3257_v32 = vmul.f32 %v6164_v9, %v3225_v48  ;;  %v3049_v23 = vadd.f32 -1.4531521, %v3017_v26 }
 0x4a1   : > { %v3233_v20 = vadd.f32 0.2548296, %v3201_v12  ;;  %v3417_v17 = vmul.f32 %v6172_v60, %v3257_v32  ;;  %v3081_v6 = vmul.f32 %v6170_v61, %v3049_v23 }
 0x4a2   : > { %v6174_v63 = vpop.eup %6173 }
 0x4a3   : > { %v3265_v49 = vmul.f32 %v6168_v56, %v3233_v20  ;;  %v3025_v0 = vmul.f32 1.0614054, %v6174_v63  ;;  %v6176_v16 = vpop.eup %6175  ;;  %v3449_v39 = vsub.f32 1.0, %v3417_v17  ;;  %v3113_v27 = vadd.f32 1.4214138, %v3081_v6 }
 0x4a4   : > { %v6178_v12 = vpop.eup %6177 }
 0x4a5   : > { %v3425_v21 = vmul.f32 %v6176_v16, %v3265_v49  ;;  %v3057_v33 = vadd.f32 -1.4531521, %v3025_v0  ;;  %v3513_v55 = vsub.f32 0.0, %v3449_v39  ;;  %v3145_v44 = vmul.f32 %v6170_v61, %v3113_v27 }
 0x4a7   : > { %v3457_v9 = vsub.f32 1.0, %v3425_v21  ;;  %v3089_v46 = vmul.f32 %v6174_v63, %v3057_v33  ;;  %v3545_v45 = vsel %vm3481_vm9, %v3449_v39, %v3513_v55  ;;  %v3177_v8 = vadd.f32 -0.28449672, %v3145_v44  ;;  %v16299_v33 = vld [vmem:[#allocation78_spill] sm:$0xff]  ;;  %v16300_v55 = vld [vmem:[#allocation77_spill] sm:$0xff]  ;;  %v11295_v44 = vpop.permute.xlu0 %3670 }
 0x4a8   : > { %v3609_v43 = vadd.f32 1.0, %v3545_v45  ;;  %v6180_v10 = vpop.eup %6179  ;;  %v16303_v45 = vld [vmem:[#allocation93_spill] sm:$0xff] }
 0x4a9   : > { %v3521_v56 = vsub.f32 0.0, %v3457_v9  ;;  %v3121_v14 = vadd.f32 1.4214138, %v3089_v46  ;;  %v3209_v1 = vmul.f32 %v6170_v61, %v3177_v8  ;;  %v11301_v46 = vpop.permute.xlu1 %3672 }
 0x4aa   : > { %v11252_v57 = vmul.f32 %v3609_v43, %v3577_v37  ;;  %v16304_v37 = vld [vmem:[#allocation90_spill] sm:$0xff] }
 0x4ab   : > { %v3553_v53 = vsel %vm3489_vm10, %v3457_v9, %v3521_v56  ;;  %v3153_v62 = vmul.f32 %v6174_v63, %v3121_v14  ;;  %v3241_v48 = vadd.f32 0.2548296, %v3209_v1  ;;  %v16302_v9 = vld [vmem:[#allocation133_spill] sm:$0xff]  ;;  %v11305_v8 = vpop.permute.xlu0 %3674  ;;  %v16305_v56 = vld [vmem:[#allocation95_spill] sm:$0xff]  ;;  %v16306_v14 = vld [vmem:[#allocation58_spill] sm:$0xff] }
 0x4ac   : > { %16293 = vst [vmem:[#allocation138_spill] sm:$0xff] %v11252_v57  ;;  %v3617_v58 = vadd.f32 1.0, %v3553_v53  ;;  %3722 = vrot.lane.b32.xlu0 %v11252_v57, %s6256_s4  ;;  %v16307_v53 = vld [vmem:[#allocation97_spill] sm:$0xff] }
 0x4ad   : > { %v3185_v26 = vadd.f32 -0.28449672, %v3153_v62  ;;  %v3273_v42 = vmul.f32 %v6170_v61, %v3241_v48  ;;  %v11309_v43 = vpop.permute.xlu1 %3676  ;;  %v16308_v62 = vld [vmem:[#allocation225_spill] sm:$0xff]  ;;  %v16309_v48 = vld [vmem:[#allocation226_spill] sm:$0xff] }
 0x4ae   : > { %v11257_v54 = vmul.f32 %v3617_v58, %v3585_v22 }
 0x4af   : > { %v3217_v32 = vmul.f32 %v6174_v63, %v3185_v26  ;;  %v3433_v47 = vmul.f32 %v6178_v12, %v3273_v42  ;;  %v11315_v1 = vpop.permute.xlu0 %3678 }
 0x4b0   : > { %16294 = vst [vmem:[#allocation29_spill] sm:$0xff] %v11257_v54  ;;  %3724 = vrot.lane.b32.xlu1 %v11257_v54, %s6256_s4 }
 0x4b1   : > { %v3249_v23 = vadd.f32 0.2548296, %v3217_v32  ;;  %v3465_v60 = vsub.f32 1.0, %v3433_v47  ;;  %v11321_v22 = vpop.permute.xlu1 %3680 }
 0x4b3   : > { %v3281_v20 = vmul.f32 %v6174_v63, %v3249_v23  ;;  %v3529_v38 = vsub.f32 0.0, %v3465_v60  ;;  %v3601_v63 = vmul.f32 0.5, %v11223_v11  ;;  %v16298_v11 = vld [vmem:[#allocation128_spill] sm:$0xff]  ;;  %v11325_v58 = vpop.permute.xlu0 %3682 }
 0x4b5   : > { %v3441_v17 = vmul.f32 %v6180_v10, %v3281_v20  ;;  %v3561_v6 = vsel %vm3497_vm11, %v3465_v60, %v3529_v38  ;;  %v11329_v26 = vpop.permute.xlu1 %3684  ;;  %v5930_v10 = vld [vmem:[%s14410_s8 + $0x60] sm:$0xff] }
 0x4b6   : > { %v3625_v49 = vadd.f32 1.0, %v3561_v6  ;;  %v5931_v6 = vld [vmem:[%s14410_s8 + $0x68] sm:$0xff] }
 0x4b7   : > { %v3473_v0 = vsub.f32 1.0, %v3441_v17  ;;  %v11335_v42 = vpop.permute.xlu0 %3686  ;;  %v5932_v17 = vld [vmem:[%s14410_s8 + $0x70] sm:$0xff] }
 0x4b8   : > { %v11263_v61 = vmul.f32 %v3625_v49, %v3593_v28  ;;  %v5934_v49 = vld [vmem:[%s14410_s8 + $0x80] sm:$0xff] }
 0x4b9   : > { %v3537_v16 = vsub.f32 0.0, %v3473_v0  ;;  %v11341_v12 = vpop.permute.xlu1 %3688 }
 0x4ba   : > { %16295 = vst [vmem:[#allocation139_spill] sm:$0xff] %v11263_v61  ;;  %3726 = vrot.lane.b32.xlu0 %v11263_v61, %s6256_s4 }
 0x4bb   : > { %v3569_v39 = vsel %vm3505_vm12, %v3473_v0, %v3537_v16  ;;  %v11345_v32 = vpop.permute.xlu0 %3690  ;;  %v5933_v16 = vld [vmem:[%s14410_s8 + $0x78] sm:$0xff] }
 0x4bc   : > { %v3633_v27 = vadd.f32 1.0, %v3569_v39 }
 0x4bd   : > { %v11349_v47 = vpop.permute.xlu1 %3692 }
 0x4be   : > { %v11269_v21 = vmul.f32 %v3633_v27, %v3601_v63  ;;  %3794 = vrot.lane.b32.xlu0 %v10560_v25, %s6257_s30  ;;  %v5936_v63 = vld [vmem:[%s14410_s8 + $0x90] sm:$0xff]  ;;  %v5935_v27 = vld [vmem:[%s14410_s8 + $0x88] sm:$0xff] }
 0x4bf   : > { %v11355_v23 = vpop.permute.xlu0 %3694 }
 0x4c0   : > { %16296 = vst [vmem:[#allocation23_spill] sm:$0xff] %v11269_v21  ;;  %3728 = vrot.lane.b32.xlu1 %v11269_v21, %s6256_s4  ;;  %s5873_s4 = sshll.u32 %s433_s21, 6 }
 0x4c1   : > { %v11361_v60 = vpop.permute.xlu1 %3696 }
 0x4c2   : > { %3798 = vrot.lane.b32.xlu0 %v10577_v52, %s6257_s30 }
 0x4c3   : > { %v11365_v20 = vpop.permute.xlu0 %3698 }
 0x4c4   : > { %3796 = vrot.lane.b32.xlu1 %v10574_v7, %s6257_s30 }
 0x4c5   : > { %v11372_v38 = vpop.permute.xlu1 %3700 }
 0x4c6   : > { %3802 = vrot.lane.b32.xlu0 %v10598_v50, %s6257_s30 }
 0x4c8   : > { %3800 = vrot.lane.b32.xlu1 %v10594_v3, %s6257_s30 }
 0x4ca   : > { %3806 = vrot.lane.b32.xlu0 %v16297_v5, %s6257_s30 }
 0x4cc   : > { %3804 = vrot.lane.b32.xlu1 %v16298_v11, %s6257_s30 }
 0x4ce   : > { %3810 = vrot.lane.b32.xlu0 %v16299_v33, %s6257_s30 }
 0x4d0   : > { %3808 = vrot.lane.b32.xlu1 %v16300_v55, %s6257_s30 }
 0x4d2   : > { %3814 = vrot.lane.b32.xlu0 %v16301_v51, %s6257_s30 }
 0x4d4   : > { %3812 = vrot.lane.b32.xlu1 %v16302_v9, %s6257_s30 }
 0x4d5   : > { %v11382_v28 = vpop.permute.xlu0 %3702 }
 0x4d6   : > { %3818 = vrot.lane.b32.xlu0 %v16303_v45, %s6257_s30 }
 0x4d8   : > { %3816 = vrot.lane.b32.xlu1 %v16304_v37, %s6257_s30  ;;  %v11387_v0 = vpop.permute.xlu1 %3704 }
 0x4da   : > { %3822 = vrot.lane.b32.xlu0 %v16305_v56, %s6257_s30 }
 0x4dc   : > { %3820 = vrot.lane.b32.xlu1 %v16306_v14, %s6257_s30 }
 0x4de   : > { %3826 = vrot.lane.b32.xlu0 %v16307_v53, %s6257_s30 }
 0x4df   : > { %v11392_v39 = vpop.permute.xlu0 %3706 }
 0x4e0   : > { %3824 = vrot.lane.b32.xlu1 %v16308_v62, %s6257_s30 }
 0x4e2   : > { %3830 = vrot.lane.b32.xlu0 %v11056_v15, %s6257_s30 }
 0x4e4   : > { %3828 = vrot.lane.b32.xlu1 %v16309_v48, %s6257_s30 }
 0x4e6   : > { %3834 = vrot.lane.b32.xlu0 %v11088_v41, %s6257_s30 }
 0x4e8   : > { %3832 = vrot.lane.b32.xlu1 %v11067_v19, %s6257_s30 }
 0x4ea   : > { %3838 = vrot.lane.b32.xlu0 %v11125_v35, %s6257_s30 }
 0x4ec   : > { %3836 = vrot.lane.b32.xlu1 %v11112_v36, %s6257_s30 }
 0x4ee   : > { %3842 = vrot.lane.b32.xlu0 %v11208_v18, %s6257_s30 }
 0x4f0   : > { %3840 = vrot.lane.b32.xlu1 %v11143_v13, %s6257_s30 }
 0x4f2   : > { %3846 = vrot.lane.b32.xlu0 %v11241_v59, %s6257_s30  ;;  %v16315_v59 = vld [vmem:[#allocation83_spill] sm:$0xff] }
 0x4f4   : > { %3844 = vrot.lane.b32.xlu1 %v11225_v29, %s6257_s30 }
 0x4f6   : > { %3850 = vrot.lane.b32.xlu0 %v11252_v57, %s6257_s30 }
 0x4f8   : > { %3848 = vrot.lane.b32.xlu1 %v11243_v2, %s6257_s30 }
 0x4fa   : > { %3854 = vrot.lane.b32.xlu0 %v11263_v61, %s6257_s30 }
 0x4fc   : > { %3852 = vrot.lane.b32.xlu1 %v11257_v54, %s6257_s30  ;;  %v16310_v54 = vld [vmem:[#allocation119_spill] sm:$0xff] }
 0x4fe   : > { %3929 = vperm.xlu0 %6051, %v5930_v10   ;;  %v11400_v10 = vpop.permute.xlu1 %3708 }
 0x500   : > { %3856 = vrot.lane.b32.xlu1 %v11269_v21, %s6257_s30 }
 0x502   : > { %3939 = vperm.xlu0 %6051, %v5932_v17   ;;  %v5938_v17 = vld [vmem:[%s14410_s8 + $0xa0] sm:$0xff]  ;;  %v11413_v40 = vpop.permute.xlu1 %3712 }
 0x504   : > { %3934 = vperm.xlu1 %6052, %v5931_v6   ;;  %v5937_v6 = vld [vmem:[%s14410_s8 + $0x98] sm:$0xff] }
 0x506   : > { %3986 = vperm.xlu0 %6051, %v5934_v49   ;;  %v11408_v49 = vpop.permute.xlu0 %3710 }
 0x508   : > { %3944 = vperm.xlu1 %6052, %v5933_v16   ;;  %v5940_v16 = vld [vmem:[%s14410_s8 + $0xb0] sm:$0xff] }
 0x50a   : > { %3996 = vperm.xlu0 %6051, %v5936_v63   ;;  %v5939_v63 = vld [vmem:[%s14410_s8 + $0xa8] sm:$0xff] }
 0x50c   : > { %3991 = vperm.xlu1 %6052, %v5935_v27   ;;  %v11418_v27 = vpop.permute.xlu0 %3714 }
 0x50e   : > { %4075 = vperm.xlu0 %6051, %v5938_v17   ;;  %v11423_v17 = vpop.permute.xlu1 %3716 }
 0x510   : > { %4001 = vperm.xlu1 %6052, %v5937_v6   ;;  %v11425_v6 = vpop.permute.xlu0 %3718 }
 0x512   : > { %4085 = vperm.xlu0 %6051, %v5940_v16   ;;  %v11427_v24 = vpop.permute.xlu1 %3720 }
 0x514   : > { %4080 = vperm.xlu1 %6052, %v5939_v63  }
 0x518   : > { %4090 = vperm.xlu1 %6052, %v5941_v30  }
 0x51e   : > { %v11429_v21 = vpop.permute.xlu0 %3722 }
 0x51f   : > { %v3758_v16 = vsel %vm1066_vm1, %v11429_v21, %v11285_v4 }
 0x520   : > { %v11436_v63 = vmul.f32 %v3758_v16, %v16310_v54 }
 0x522   : > { %16311 = vst [vmem:[#allocation33_spill] sm:$0xff] %v11436_v63  ;;  %v11438_v61 = vpop.permute.xlu1 %3724  ;;  %4161 = vrot.lane.b32.xlu0 %v11436_v63, %s6258_s16  ;;  %v3754_v63 = vsel %vm1066_vm1, %v11285_v4, %v11305_v8  ;;  %v3756_v4 = vsel %vm1066_vm1, %v11295_v44, %v11315_v1 }
 0x523   : > { %v3759_v30 = vsel %vm1066_vm1, %v11438_v61, %v11289_v31  ;;  %v11471_v13 = vmul.f32 %v3754_v63, %v16315_v59 }
 0x524   : > { %v11447_v2 = vmul.f32 %v3759_v30, %v16310_v54 }
 0x525   : > { %16316 = vst [vmem:[#allocation63_spill] sm:$0xff] %v11471_v13 }
 0x526   : > { %16312 = vst [vmem:[#allocation242_spill] sm:$0xff] %v11447_v2  ;;  %4163 = vrot.lane.b32.xlu1 %v11447_v2, %s6258_s16 }
 0x52c   : > { %v11451_v57 = vpop.permute.xlu0 %3726 }
 0x52d   : > { %v3760_v16 = vsel %vm1066_vm1, %v11451_v57, %v11295_v44  ;;  %v11497_v44 = vmul.f32 %v3756_v4, %v16315_v59  ;;  %v16322_v4 = vld [vmem:[#allocation84_spill] sm:$0xff] }
 0x52e   : > { %v11458_v29 = vmul.f32 %v3760_v16, %v16310_v54 }
 0x52f   : > { %16319 = vst [vmem:[#allocation100_spill] sm:$0xff] %v11497_v44 }
 0x530   : > { %16313 = vst [vmem:[#allocation243_spill] sm:$0xff] %v11458_v29  ;;  %4165 = vrot.lane.b32.xlu0 %v11458_v29, %s6258_s16  ;;  %v11466_v30 = vpop.permute.xlu0 %3794  ;;  %v3755_v29 = vsel %vm1066_vm1, %v11289_v31, %v11309_v43  ;;  %v3750_v31 = vsel %vm1066_vm1, %v11305_v8, %v11325_v58 }
 0x531   : > { %16314 = vst [vmem:[#allocation244_spill] sm:$0xff] %v11466_v30 }
 0x532   : > { %v11468_v2 = vpop.permute.xlu1 %3728 }
 0x533   : > { %v3761_v16 = vsel %vm1066_vm1, %v11468_v2, %v11301_v46 }
 0x534   : > { %v11482_v18 = vmul.f32 %v3761_v16, %v16310_v54  ;;  %4169 = vrot.lane.b32.xlu0 %v11471_v13, %s6258_s16  ;;  %v11490_v63 = vpop.permute.xlu0 %3798  ;;  %v11500_v54 = vmul.f32 %v3755_v29, %v16315_v59  ;;  %v3757_v16 = vsel %vm1066_vm1, %v11301_v46, %v11321_v22  ;;  %v3752_v46 = vsel %vm1066_vm1, %v11315_v1, %v11335_v42 }
 0x535   : > { %16318 = vst [vmem:[#allocation43_spill] sm:$0xff] %v11490_v63  ;;  %v11519_v63 = vmul.f32 %v3750_v31, %v16322_v4  ;;  %v11522_v8 = vmul.f32 %v3757_v16, %v16315_v59  ;;  %v11541_v31 = vmul.f32 %v3752_v46, %v16322_v4  ;;  %v3753_v16 = vsel %vm1066_vm1, %v11321_v22, %v11341_v12  ;;  %v16327_v46 = vld [vmem:[#allocation85_spill] sm:$0xff] }
 0x536   : > { %16317 = vst [vmem:[#allocation66_spill] sm:$0xff] %v11482_v18  ;;  %4167 = vrot.lane.b32.xlu1 %v11482_v18, %s6258_s16  ;;  %v11494_v30 = vpop.permute.xlu1 %3796  ;;  %16320 = vst [vmem:[#allocation122_spill] sm:$0xff] %v11500_v54  ;;  %v3748_v22 = vsel %vm1066_vm1, %v11335_v42, %v11355_v23 }
 0x537   : > { %16323 = vst [vmem:[#allocation104_spill] sm:$0xff] %v11522_v8  ;;  %16325 = vst [vmem:[#allocation53_spill] sm:$0xff] %v11541_v31 }
 0x538   : > { %4173 = vrot.lane.b32.xlu0 %v11497_v44, %s6258_s16  ;;  %v11512_v18 = vpop.permute.xlu0 %3802  ;;  %v3751_v44 = vsel %vm1066_vm1, %v11309_v43, %v11329_v26  ;;  %v3746_v43 = vsel %vm1066_vm1, %v11325_v58, %v11345_v32  ;;  %v11566_v58 = vmul.f32 %v3753_v16, %v16322_v4  ;;  %v3749_v16 = vsel %vm1066_vm1, %v11341_v12, %v11361_v60 }
 0x539   : > { %v11544_v1 = vmul.f32 %v3751_v44, %v16322_v4  ;;  %v3744_v12 = vsel %vm1066_vm1, %v11355_v23, %v11382_v28 }
 0x53a   : > { %4171 = vrot.lane.b32.xlu1 %v11500_v54, %s6258_s16  ;;  %v11516_v29 = vpop.permute.xlu1 %3800  ;;  %16328 = vst [vmem:[#allocation173_spill] sm:$0xff] %v11566_v58 }
 0x53b   : > { %16321 = vst [vmem:[#allocation175_spill] sm:$0xff] %v11516_v29 }
 0x53c   : > { %4177 = vrot.lane.b32.xlu0 %v11519_v63, %s6258_s16  ;;  %v11534_v29 = vpop.permute.xlu0 %3806 }
 0x53d   : > { %16324 = vst [vmem:[#allocation91_spill] sm:$0xff] %v11534_v29  ;;  %v11563_v29 = vmul.f32 %v3746_v43, %v16327_v46  ;;  %v11585_v43 = vmul.f32 %v3748_v22, %v16327_v46  ;;  %v16333_v22 = vld [vmem:[#allocation113_spill] sm:$0xff] }
 0x53e   : > { %4175 = vrot.lane.b32.xlu1 %v11522_v8, %s6258_s16  ;;  %v11538_v59 = vpop.permute.xlu1 %3804 }
 0x53f   : > { %16330 = vst [vmem:[#allocation106_spill] sm:$0xff] %v11585_v43 }
 0x540   : > { %4181 = vrot.lane.b32.xlu0 %v11541_v31, %s6258_s16  ;;  %v11556_v8 = vpop.permute.xlu0 %3810  ;;  %v3747_v31 = vsel %vm1066_vm1, %v11329_v26, %v11349_v47  ;;  %v3742_v26 = vsel %vm1066_vm1, %v11345_v32, %v11365_v20  ;;  %v11610_v32 = vmul.f32 %v3749_v16, %v16327_v46  ;;  %v3745_v16 = vsel %vm1066_vm1, %v11361_v60, %v11387_v0 }
 0x541   : > { %v11588_v42 = vmul.f32 %v3747_v31, %v16327_v46  ;;  %v3740_v60 = vsel %vm1066_vm1, %v11382_v28, %v11408_v49 }
 0x542   : > { %4179 = vrot.lane.b32.xlu1 %v11544_v1, %s6258_s16  ;;  %v11560_v44 = vpop.permute.xlu1 %3808  ;;  %16335 = vst [vmem:[#allocation107_spill] sm:$0xff] %v11610_v32 }
 0x543   : > { %16326 = vst [vmem:[#allocation96_spill] sm:$0xff] %v11560_v44  ;;  %16331 = vst [vmem:[#allocation123_spill] sm:$0xff] %v11588_v42 }
 0x544   : > { %4185 = vrot.lane.b32.xlu0 %v11563_v29, %s6258_s16  ;;  %v11578_v44 = vpop.permute.xlu0 %3814 }
 0x545   : > { %16329 = vst [vmem:[#allocation118_spill] sm:$0xff] %v11578_v44  ;;  %v11607_v44 = vmul.f32 %v3742_v26, %v16333_v22  ;;  %v11629_v26 = vmul.f32 %v3744_v12, %v16333_v22  ;;  %v16340_v12 = vld [vmem:[#allocation121_spill] sm:$0xff] }
 0x546   : > { %4183 = vrot.lane.b32.xlu1 %v11566_v58, %s6258_s16  ;;  %v11582_v4 = vpop.permute.xlu1 %3812 }
 0x547   : > { %16334 = vst [vmem:[#allocation147_spill] sm:$0xff] %v11607_v44  ;;  %16337 = vst [vmem:[#allocation132_spill] sm:$0xff] %v11629_v26 }
 0x548   : > { %4189 = vrot.lane.b32.xlu0 %v11585_v43, %s6258_s16  ;;  %v11600_v58 = vpop.permute.xlu0 %3818  ;;  %v3743_v43 = vsel %vm1066_vm1, %v11349_v47, %v11372_v38  ;;  %v3738_v47 = vsel %vm1066_vm1, %v11365_v20, %v11392_v39  ;;  %v11654_v20 = vmul.f32 %v3745_v16, %v16333_v22  ;;  %v11673_v16 = vmul.f32 %v3740_v60, %v16340_v12  ;;  %v16345_v60 = vld [vmem:[#allocation125_spill] sm:$0xff] }
 0x549   : > { %v11632_v23 = vmul.f32 %v3743_v43, %v16333_v22 }
 0x54a   : > { %4187 = vrot.lane.b32.xlu1 %v11588_v42, %s6258_s16  ;;  %v11604_v31 = vpop.permute.xlu1 %3816  ;;  %16342 = vst [vmem:[#allocation154_spill] sm:$0xff] %v11654_v20  ;;  %16343 = vst [vmem:[#allocation155_spill] sm:$0xff] %v11673_v16 }
 0x54b   : > { %16332 = vst [vmem:[#allocation82_spill] sm:$0xff] %v11604_v31  ;;  %16338 = vst [vmem:[#allocation134_spill] sm:$0xff] %v11632_v23 }
 0x54c   : > { %4193 = vrot.lane.b32.xlu0 %v11607_v44, %s6258_s16  ;;  %v11622_v31 = vpop.permute.xlu0 %3822 }
 0x54d   : > { %16336 = vst [vmem:[#allocation177_spill] sm:$0xff] %v11622_v31  ;;  %v11651_v31 = vmul.f32 %v3738_v47, %v16340_v12 }
 0x54e   : > { %4191 = vrot.lane.b32.xlu1 %v11610_v32, %s6258_s16  ;;  %v11626_v46 = vpop.permute.xlu1 %3820 }
 0x54f   : > { %16341 = vst [vmem:[#allocation149_spill] sm:$0xff] %v11651_v31 }
 0x550   : > { %4197 = vrot.lane.b32.xlu0 %v11629_v26, %s6258_s16  ;;  %v11644_v32 = vpop.permute.xlu0 %3826  ;;  %v3739_v26 = vsel %vm1066_vm1, %v11372_v38, %v11400_v10  ;;  %v3734_v38 = vsel %vm1066_vm1, %v11392_v39, %v11418_v27  ;;  %v3736_v39 = vsel %vm1066_vm1, %v11408_v49, %v11425_v6  ;;  %v3730_v49 = vsel %vm1066_vm1, %v11418_v27, %v11429_v21 }
 0x551   : > { %v11676_v28 = vmul.f32 %v3739_v26, %v16340_v12  ;;  %v3731_v27 = vsel %vm1066_vm1, %v11423_v17, %v11438_v61  ;;  %v3733_v61 = vsel %vm1066_vm1, %v11427_v24, %v11468_v2  ;;  %v4158_v2 = vld [vmem:[%s14410_s8 + $0x8] sm:$0xff] }
 0x552   : > { %4195 = vrot.lane.b32.xlu1 %v11632_v23, %s6258_s16  ;;  %v11648_v43 = vpop.permute.xlu1 %3824 }
 0x553   : > { %16339 = vst [vmem:[#allocation124_spill] sm:$0xff] %v11648_v43  ;;  %16344 = vst [vmem:[#allocation140_spill] sm:$0xff] %v11676_v28 }
 0x554   : > { %4201 = vrot.lane.b32.xlu0 %v11651_v31, %s6258_s16  ;;  %v11670_v22 = vpop.permute.xlu0 %3830  ;;  %v3741_v31 = vsel %vm1066_vm1, %v11387_v0, %v11413_v40 }
 0x555   : > { %v11696_v43 = vmul.f32 %v3741_v31, %v16340_v12  ;;  %v11713_v31 = vmul.f32 %v3736_v39, %v16345_v60 }
 0x556   : > { %4199 = vrot.lane.b32.xlu1 %v11654_v20, %s6258_s16  ;;  %v11668_v47 = vpop.permute.xlu1 %3828  ;;  %v11691_v20 = vmul.f32 %v3734_v38, %v16345_v60 }
 0x557   : > { %16347 = vst [vmem:[#allocation27_spill] sm:$0xff] %v11696_v43  ;;  %16348 = vst [vmem:[#allocation172_spill] sm:$0xff] %v11713_v31 }
 0x558   : > { %4205 = vrot.lane.b32.xlu0 %v11673_v16, %s6258_s16  ;;  %16346 = vst [vmem:[#allocation148_spill] sm:$0xff] %v11691_v20  ;;  %v11702_v0 = vpop.permute.xlu0 %3834  ;;  %v3735_v16 = vsel %vm1066_vm1, %v11400_v10, %v11423_v17  ;;  %v3737_v10 = vsel %vm1066_vm1, %v11413_v40, %v11427_v24  ;;  %v3732_v40 = vsel %vm1066_vm1, %v11425_v6, %v11451_v57  ;;  %v4157_v17 = vld [vmem:[%s14410_s8] sm:$0xff]  ;;  %v4159_v24 = vld [vmem:[%s14410_s8 + $0x10] sm:$0xff]  ;;  %vm5337_vm1 = vcmask 261120  }
 0x559   : > { %v11716_v12 = vmul.f32 %v3735_v16, %v16345_v60  ;;  %v16351_v16 = vld [vmem:[#allocation131_spill] sm:$0xff]  ;;  %v11738_v21 = vmul.f32 %v3737_v10, %v16345_v60 }
 0x55a   : > { %4203 = vrot.lane.b32.xlu1 %v11676_v28, %s6258_s16  ;;  %v11693_v26 = vpop.permute.xlu1 %3832  ;;  %v11758_v10 = vmul.f32 %v3731_v27, %v16351_v16  ;;  %v11774_v6 = vmul.f32 %v3733_v61, %v16351_v16  ;;  %v4160_v61 = vld [vmem:[%s14410_s8 + $0x18] sm:$0xff] }
 0x55b   : > { %16349 = vst [vmem:[#allocation37_spill] sm:$0xff] %v11716_v12  ;;  %16353 = vst [vmem:[#allocation150_spill] sm:$0xff] %v11738_v21 }
 0x55c   : > { %4209 = vrot.lane.b32.xlu0 %v11691_v20, %s6258_s16  ;;  %v11730_v39 = vpop.permute.xlu0 %3838  ;;  %16356 = vst [vmem:[#allocation167_spill] sm:$0xff] %v11758_v10  ;;  %16358 = vst [vmem:[#allocation174_spill] sm:$0xff] %v11774_v6 }
 0x55d   : > { %16350 = vst [vmem:[#allocation241_spill] sm:$0xff] %v11730_v39 }
 0x55e   : > { %4207 = vrot.lane.b32.xlu1 %v11696_v43, %s6258_s16  ;;  %v11726_v38 = vpop.permute.xlu1 %3836  ;;  %v11735_v43 = vmul.f32 %v3730_v49, %v16351_v16  ;;  %v11753_v49 = vmul.f32 %v3732_v40, %v16351_v16 }
 0x560   : > { %4213 = vrot.lane.b32.xlu0 %v11713_v31, %s6258_s16  ;;  %16352 = vst [vmem:[#allocation240_spill] sm:$0xff] %v11735_v43  ;;  %16354 = vst [vmem:[#allocation51_spill] sm:$0xff] %v11753_v49  ;;  %v11760_v57 = vpop.permute.xlu0 %3842 }
 0x561   : > { %16357 = vst [vmem:[#allocation152_spill] sm:$0xff] %v11760_v57  ;;  %v3878_v57 = vsel %vm1236_vm2, %v11512_v18, %v11556_v8 }
 0x562   : > { %4211 = vrot.lane.b32.xlu1 %v11716_v12, %s6258_s16  ;;  %v11755_v60 = vpop.permute.xlu1 %3840 }
 0x563   : > { %16355 = vst [vmem:[#allocation176_spill] sm:$0xff] %v11755_v60 }
 0x564   : > { %4217 = vrot.lane.b32.xlu0 %v11735_v43, %s6258_s16  ;;  %v11778_v27 = vpop.permute.xlu0 %3846 }
 0x565   : > { %16360 = vst [vmem:[#allocation79_spill] sm:$0xff] %v11778_v27 }
 0x566   : > { %4215 = vrot.lane.b32.xlu1 %v11738_v21, %s6258_s16  ;;  %v11776_v40 = vpop.permute.xlu1 %3844 }
 0x567   : > { %16359 = vst [vmem:[#allocation170_spill] sm:$0xff] %v11776_v40 }
 0x568   : > { %4221 = vrot.lane.b32.xlu0 %v11753_v49, %s6258_s16 }
 0x56a   : > { %4219 = vrot.lane.b32.xlu1 %v11758_v10, %s6258_s16  ;;  %v11788_v16 = vpop.permute.xlu1 %3848 }
 0x56b   : > { %16361 = vst [vmem:[#allocation178_spill] sm:$0xff] %v11788_v16 }
 0x56c   : > { %4259 = vperm.xlu0 %6051, %v4157_v17   ;;  %v11793_v17 = vpop.permute.xlu0 %3850 }
 0x56e   : > { %4223 = vrot.lane.b32.xlu1 %v11774_v6, %s6258_s16  ;;  %v11797_v6 = vpop.permute.xlu1 %3852 }
 0x570   : > { %4269 = vperm.xlu0 %6051, %v4159_v24   ;;  %v11801_v21 = vpop.permute.xlu0 %3854 }
 0x572   : > { %4264 = vperm.xlu1 %6052, %v4158_v2   ;;  %v11811_v2 = vpop.permute.xlu1 %3856 }
 0x573   : > { %16363 = vst [vmem:[#allocation224_spill] sm:$0xff] %v11811_v2 }
 0x574   : > { %4314 = vrot.lane.b32.xlu0 %v10560_v25, %s6258_s16 }
 0x576   : > { %4274 = vperm.xlu1 %6052, %v4160_v61  }
 0x578   : > { %4318 = vrot.lane.b32.xlu0 %v10577_v52, %s6258_s16 }
 0x57a   : > { %4316 = vrot.lane.b32.xlu1 %v10574_v7, %s6258_s16 }
 0x57c   : > { %4322 = vrot.lane.b32.xlu0 %v10598_v50, %s6258_s16 }
 0x57d   : > { %v11809_v24 = vpop.permute.xlu0 %3929 }
 0x57e   : > { %4320 = vrot.lane.b32.xlu1 %v10594_v3, %s6258_s16  ;;  %16362 = vst [vmem:[#allocation222_spill] sm:$0xff] %v11809_v24 }
 0x580   : > { %4326 = vrot.lane.b32.xlu0 %v16297_v5, %s6258_s16 }
 0x581   : > { %v11817_v61 = vpop.permute.xlu0 %3939 }
 0x582   : > { %4324 = vrot.lane.b32.xlu1 %v16298_v11, %s6258_s16  ;;  %16364 = vst [vmem:[#allocation215_spill] sm:$0xff] %v11817_v61 }
 0x583   : > { %v11819_v49 = vpop.permute.xlu1 %3934 }
 0x584   : > { %16365 = vst [vmem:[#allocation21_spill] sm:$0xff] %v11819_v49  ;;  %4330 = vrot.lane.b32.xlu0 %v16299_v33, %s6258_s16  ;;  %v16381_v49 = vld [vmem:[#allocation234_spill] sm:$0xff] }
 0x585   : > { %v11827_v16 = vpop.permute.xlu0 %3986 }
 0x586   : > { %4328 = vrot.lane.b32.xlu1 %v16300_v55, %s6258_s16  ;;  %16367 = vst [vmem:[#allocation212_spill] sm:$0xff] %v11827_v16 }
 0x587   : > { %v11825_v31 = vpop.permute.xlu1 %3944 }
 0x588   : > { %16366 = vst [vmem:[#allocation18_spill] sm:$0xff] %v11825_v31  ;;  %4334 = vrot.lane.b32.xlu0 %v16301_v51, %s6258_s16 }
 0x589   : > { %v11835_v61 = vpop.permute.xlu0 %3996 }
 0x58a   : > { %4332 = vrot.lane.b32.xlu1 %v16302_v9, %s6258_s16  ;;  %16369 = vst [vmem:[#allocation186_spill] sm:$0xff] %v11835_v61 }
 0x58b   : > { %v11833_v10 = vpop.permute.xlu1 %3991 }
 0x58c   : > { %16368 = vst [vmem:[#allocation101_spill] sm:$0xff] %v11833_v10  ;;  %4338 = vrot.lane.b32.xlu0 %v16303_v45, %s6258_s16 }
 0x58d   : > { %v11847_v12 = vpop.permute.xlu0 %4075 }
 0x58e   : > { %4336 = vrot.lane.b32.xlu1 %v16304_v37, %s6258_s16  ;;  %16371 = vst [vmem:[#allocation181_spill] sm:$0xff] %v11847_v12 }
 0x58f   : > { %v11843_v31 = vpop.permute.xlu1 %4001 }
 0x590   : > { %4342 = vrot.lane.b32.xlu0 %v16305_v56, %s6258_s16  ;;  %16370 = vst [vmem:[#allocation68_spill] sm:$0xff] %v11843_v31 }
 0x591   : > { %v11855_v43 = vpop.permute.xlu0 %4085 }
 0x592   : > { %4340 = vrot.lane.b32.xlu1 %v16306_v14, %s6258_s16  ;;  %16373 = vst [vmem:[#allocation185_spill] sm:$0xff] %v11855_v43 }
 0x593   : > { %v11853_v61 = vpop.permute.xlu1 %4080 }
 0x594   : > { %4346 = vrot.lane.b32.xlu0 %v16307_v53, %s6258_s16  ;;  %16372 = vst [vmem:[#allocation187_spill] sm:$0xff] %v11853_v61  ;;  %v16378_v61 = vld [vmem:[#allocation151_spill] sm:$0xff] }
 0x595   : > { %v11863_v31 = vpop.permute.xlu0 %4161 }
 0x596   : > { %4344 = vrot.lane.b32.xlu1 %v16308_v62, %s6258_s16  ;;  %16374 = vst [vmem:[#allocation32_spill] sm:$0xff] %v11863_v31 }
 0x597   : > { %v11865_v28 = vpop.permute.xlu1 %4090 }
 0x598   : > { %4350 = vrot.lane.b32.xlu0 %v11056_v15, %s6258_s16  ;;  %16375 = vst [vmem:[#allocation153_spill] sm:$0xff] %v11865_v28 }
 0x59a   : > { %4348 = vrot.lane.b32.xlu1 %v16309_v48, %s6258_s16 }
 0x59b   : > { %v11873_v43 = vpop.permute.xlu1 %4163 }
 0x59c   : > { %4354 = vrot.lane.b32.xlu0 %v11088_v41, %s6258_s16  ;;  %16376 = vst [vmem:[#allocation228_spill] sm:$0xff] %v11873_v43  ;;  %v16379_v41 = vld [vmem:[#allocation229_spill] sm:$0xff] }
 0x59e   : > { %4352 = vrot.lane.b32.xlu1 %v11067_v19, %s6258_s16 }
 0x5a0   : > { %4358 = vrot.lane.b32.xlu0 %v11125_v35, %s6258_s16  ;;  %v16382_v35 = vld [vmem:[#allocation230_spill] sm:$0xff] }
 0x5a2   : > { %4356 = vrot.lane.b32.xlu1 %v11112_v36, %s6258_s16  ;;  %v11875_v20 = vpop.permute.xlu0 %4165 }
 0x5a3   : > { %16377 = vst [vmem:[#allocation194_spill] sm:$0xff] %v11875_v20  ;;  %v16385_v20 = vld [vmem:[#allocation138_spill] sm:$0xff] }
 0x5a4   : > { %4362 = vrot.lane.b32.xlu0 %v16378_v61, %s6258_s16  ;;  %v16386_v61 = vld [vmem:[#allocation237_spill] sm:$0xff] }
 0x5a6   : > { %4360 = vrot.lane.b32.xlu1 %v16379_v41, %s6258_s16  ;;  %v11881_v28 = vpop.permute.xlu0 %4169 }
 0x5a8   : > { %v11883_v31 = vpop.permute.xlu1 %4167  ;;  %4366 = vrot.lane.b32.xlu0 %v16381_v49, %s6258_s16  ;;  %v16389_v49 = vld [vmem:[#allocation29_spill] sm:$0xff] }
 0x5a9   : > { %16380 = vst [vmem:[#allocation28_spill] sm:$0xff] %v11883_v31  ;;  %v16388_v31 = vld [vmem:[#allocation139_spill] sm:$0xff] }
 0x5aa   : > { %4364 = vrot.lane.b32.xlu1 %v16382_v35, %s6258_s16  ;;  %v11889_v36 = vpop.permute.xlu0 %4173 }
 0x5ab   : > { %16383 = vst [vmem:[#allocation48_spill] sm:$0xff] %v11889_v36  ;;  %v5942_v36 = vld [vmem:[%s14410_s8 + $0x20] sm:$0xff] }
 0x5ac   : > { %v11891_v43 = vpop.permute.xlu1 %4171  ;;  %4370 = vrot.lane.b32.xlu0 %v16385_v20, %s6258_s16 }
 0x5ad   : > { %16384 = vst [vmem:[#allocation195_spill] sm:$0xff] %v11891_v43 }
 0x5ae   : > { %4368 = vrot.lane.b32.xlu1 %v16386_v61, %s6258_s16  ;;  %v11897_v41 = vpop.permute.xlu0 %4177  ;;  %v16392_v61 = vld [vmem:[#allocation23_spill] sm:$0xff] }
 0x5b0   : > { %v11899_v10 = vpop.permute.xlu1 %4175  ;;  %4374 = vrot.lane.b32.xlu0 %v16388_v31, %s6258_s16 }
 0x5b1   : > { %16387 = vst [vmem:[#allocation202_spill] sm:$0xff] %v11899_v10  ;;  %v5946_v10 = vld [vmem:[%s14410_s8 + $0x40] sm:$0xff] }
 0x5b2   : > { %4372 = vrot.lane.b32.xlu1 %v16389_v49, %s6258_s16  ;;  %v11908_v35 = vpop.permute.xlu0 %4181  ;;  %v5943_v49 = vld [vmem:[%s14410_s8 + $0x28] sm:$0xff] }
 0x5b3   : > { %16390 = vst [vmem:[#allocation205_spill] sm:$0xff] %v11908_v35 }
 0x5b4   : > { %v11910_v20 = vpop.permute.xlu1 %4179  ;;  %4412 = vperm.xlu0 %6051, %v5942_v36   ;;  %v5950_v36 = vld [vmem:[%s14410_s8 + $0xc0] sm:$0xff] }
 0x5b5   : > { %16391 = vst [vmem:[#allocation196_spill] sm:$0xff] %v11910_v20 }
 0x5b6   : > { %4376 = vrot.lane.b32.xlu1 %v16392_v61, %s6258_s16  ;;  %v11917_v31 = vpop.permute.xlu0 %4185  ;;  %v5947_v61 = vld [vmem:[%s14410_s8 + $0x48] sm:$0xff] }
 0x5b7   : > { %16393 = vst [vmem:[#allocation200_spill] sm:$0xff] %v11917_v31 }
 0x5b8   : > { %v11922_v43 = vpop.permute.xlu1 %4183  ;;  %4597 = vperm.xlu0 %6051, %v5946_v10  }
 0x5b9   : > { %16394 = vst [vmem:[#allocation74_spill] sm:$0xff] %v11922_v43  ;;  %v5954_v43 = vld [vmem:[%s14410_s8 + $0xe0] sm:$0xff] }
 0x5ba   : > { %4417 = vperm.xlu1 %6052, %v5943_v49   ;;  %v11927_v35 = vpop.permute.xlu0 %4189  ;;  %v5951_v49 = vld [vmem:[%s14410_s8 + $0xc8] sm:$0xff] }
 0x5bb   : > { %16395 = vst [vmem:[#allocation210_spill] sm:$0xff] %v11927_v35  ;;  %v5944_v35 = vld [vmem:[%s14410_s8 + $0x30] sm:$0xff] }
 0x5bc   : > { %v11932_v20 = vpop.permute.xlu1 %4187  ;;  %4782 = vperm.xlu0 %6051, %v5950_v36  }
 0x5bd   : > { %16396 = vst [vmem:[#allocation214_spill] sm:$0xff] %v11932_v20 }
 0x5be   : > { %4602 = vperm.xlu1 %6052, %v5947_v61   ;;  %v11937_v10 = vpop.permute.xlu0 %4193  ;;  %v5955_v61 = vld [vmem:[%s14410_s8 + $0xe8] sm:$0xff] }
 0x5bf   : > { %16397 = vst [vmem:[#allocation218_spill] sm:$0xff] %v11937_v10  ;;  %v5958_v10 = vld [vmem:[%s14410_s8 + $0x100] sm:$0xff] }
 0x5c0   : > { %v11942_v27 = vpop.permute.xlu1 %4191  ;;  %4935 = vperm.xlu0 %6051, %v5954_v43   ;;  %v5945_v43 = vld [vmem:[%s14410_s8 + $0x38] sm:$0xff] }
 0x5c1   : > { %16398 = vst [vmem:[#allocation219_spill] sm:$0xff] %v11942_v27 }
 0x5c2   : > { %4787 = vperm.xlu1 %6052, %v5951_v49   ;;  %v11952_v20 = vpop.permute.xlu0 %4197 }
 0x5c3   : > { %16400 = vst [vmem:[#allocation42_spill] sm:$0xff] %v11952_v20  ;;  %v5948_v20 = vld [vmem:[%s14410_s8 + $0x50] sm:$0xff] }
 0x5c4   : > { %v11950_v36 = vpop.permute.xlu1 %4195  ;;  %4422 = vperm.xlu0 %6051, %v5944_v35   ;;  %v5959_v35 = vld [vmem:[%s14410_s8 + $0x108] sm:$0xff] }
 0x5c5   : > { %16399 = vst [vmem:[#allocation223_spill] sm:$0xff] %v11950_v36 }
 0x5c6   : > { %4940 = vperm.xlu1 %6052, %v5955_v61   ;;  %v11962_v27 = vpop.permute.xlu0 %4201  ;;  %v5952_v61 = vld [vmem:[%s14410_s8 + $0xd0] sm:$0xff] }
 0x5c7   : > { %16402 = vst [vmem:[#allocation217_spill] sm:$0xff] %v11962_v27  ;;  %v5956_v27 = vld [vmem:[%s14410_s8 + $0xf0] sm:$0xff] }
 0x5c8   : > { %v11960_v49 = vpop.permute.xlu1 %4199  ;;  %5120 = vperm.xlu0 %6051, %v5958_v10   ;;  %v5949_v10 = vld [vmem:[%s14410_s8 + $0x58] sm:$0xff] }
 0x5c9   : > { %16401 = vst [vmem:[#allocation20_spill] sm:$0xff] %v11960_v49 }
 0x5ca   : > { %4427 = vperm.xlu1 %6052, %v5945_v43   ;;  %v11978_v43 = vpop.permute.xlu0 %4205 }
 0x5cb   : > { %16404 = vst [vmem:[#allocation221_spill] sm:$0xff] %v11978_v43  ;;  %v5957_v43 = vld [vmem:[%s14410_s8 + $0xf8] sm:$0xff] }
 0x5cc   : > { %4607 = vperm.xlu0 %6051, %v5948_v20   ;;  %v11973_v36 = vpop.permute.xlu1 %4203  ;;  %v5953_v20 = vld [vmem:[%s14410_s8 + $0xd8] sm:$0xff] }
 0x5cd   : > { %16403 = vst [vmem:[#allocation44_spill] sm:$0xff] %v11973_v36 }
 0x5ce   : > { %5125 = vperm.xlu1 %6052, %v5959_v35   ;;  %v16405_v35 = vld [vmem:[#allocation244_spill] sm:$0xff]  ;;  %v11992_v40 = vpop.permute.xlu0 %4209 }
 0x5cf   : > { %v3882_v36 = vsel %vm1236_vm2, %v16405_v35, %v11512_v18  ;;  %16407 = vst [vmem:[#allocation12_spill] sm:$0xff] %v11992_v40  ;;  %v3874_v18 = vsel %vm1236_vm2, %v11556_v8, %v11600_v58  ;;  %v3870_v8 = vsel %vm1236_vm2, %v11600_v58, %v11644_v32 }
 0x5d0   : > { %4792 = vperm.xlu0 %6051, %v5952_v61   ;;  %v11990_v49 = vpop.permute.xlu1 %4207  ;;  %v16408_v61 = vld [vmem:[#allocation86_spill] sm:$0xff] }
 0x5d1   : > { %16406 = vst [vmem:[#allocation112_spill] sm:$0xff] %v11990_v49 }
 0x5d2   : > { %4612 = vperm.xlu1 %6052, %v5949_v10   ;;  %v11995_v10 = vmul.f32 %v3882_v36, %v16408_v61  ;;  %v16410_v36 = vld [vmem:[#allocation88_spill] sm:$0xff]  ;;  %v12022_v60 = vpop.permute.xlu0 %4213 }
 0x5d3   : > { %16414 = vst [vmem:[#allocation31_spill] sm:$0xff] %v12022_v60 }
 0x5d4   : > { %4945 = vperm.xlu0 %6051, %v5956_v27   ;;  %16409 = vst [vmem:[#allocation34_spill] sm:$0xff] %v11995_v10  ;;  %v3883_v27 = vsel %vm1236_vm2, %v11494_v30, %v11538_v59  ;;  %v12013_v40 = vpop.permute.xlu1 %4211 }
 0x5d5   : > { %16412 = vst [vmem:[#allocation190_spill] sm:$0xff] %v12013_v40  ;;  %v12016_v49 = vmul.f32 %v3883_v27, %v16408_v61 }
 0x5d6   : > { %4797 = vperm.xlu1 %6052, %v5953_v20   ;;  %v12011_v20 = vmul.f32 %v3878_v57, %v16410_v36  ;;  %v16415_v57 = vld [vmem:[#allocation94_spill] sm:$0xff] }
 0x5d7   : > { %16413 = vst [vmem:[#allocation80_spill] sm:$0xff] %v12016_v49  ;;  %v12033_v27 = vmul.f32 %v3874_v18, %v16415_v57  ;;  %v12050_v18 = vpop.permute.xlu0 %4217 }
 0x5d8   : > { %4499 = vrot.lane.b32.xlu0 %v11995_v10, %s6258_s16  ;;  %16411 = vst [vmem:[#allocation10_spill] sm:$0xff] %v12011_v20  ;;  %v12046_v60 = vpop.permute.xlu1 %4215  ;;  %16418 = vst [vmem:[#allocation179_spill] sm:$0xff] %v12050_v18 }
 0x5d9   : > { %16417 = vst [vmem:[#allocation64_spill] sm:$0xff] %v12046_v60 }
 0x5da   : > { %4950 = vperm.xlu1 %6052, %v5957_v43   ;;  %v3879_v43 = vsel %vm1236_vm2, %v11538_v59, %v11582_v4  ;;  %v3875_v59 = vsel %vm1236_vm2, %v11582_v4, %v11626_v46  ;;  %v3871_v4 = vsel %vm1236_vm2, %v11626_v46, %v11668_v47 }
 0x5db   : > { %v12036_v40 = vmul.f32 %v3879_v43, %v16410_v36  ;;  %v16419_v43 = vld [vmem:[#allocation116_spill] sm:$0xff]  ;;  %v12058_v58 = vmul.f32 %v3875_v59, %v16415_v57 }
 0x5dc   : > { %4507 = vrot.lane.b32.xlu0 %v12011_v20, %s6258_s16  ;;  %v12055_v39 = vmul.f32 %v3870_v8, %v16419_v43  ;;  %v12068_v60 = vpop.permute.xlu1 %4219  ;;  %v12071_v18 = vmul.f32 %v3871_v4, %v16419_v43  ;;  %v12073_v8 = vpop.permute.xlu0 %4221 }
 0x5dd   : > { %16416 = vst [vmem:[#allocation49_spill] sm:$0xff] %v12036_v40  ;;  %16420 = vst [vmem:[#allocation25_spill] sm:$0xff] %v12068_v60 }
 0x5de   : > { %4501 = vrot.lane.b32.xlu1 %v12016_v49, %s6258_s16  ;;  %16421 = vst [vmem:[#allocation99_spill] sm:$0xff] %v12071_v18  ;;  %16422 = vst [vmem:[#allocation46_spill] sm:$0xff] %v12073_v8 }
 0x5e0   : > { %4515 = vrot.lane.b32.xlu0 %v12033_v27, %s6258_s16  ;;  %v12081_v59 = vpop.permute.xlu1 %4223 }
 0x5e1   : > { %16424 = vst [vmem:[#allocation26_spill] sm:$0xff] %v12081_v59 }
 0x5e2   : > { %4509 = vrot.lane.b32.xlu1 %v12036_v40, %s6258_s16 }
 0x5e4   : > { %4523 = vrot.lane.b32.xlu0 %v12055_v39, %s6258_s16 }
 0x5e6   : > { %4517 = vrot.lane.b32.xlu1 %v12058_v58, %s6258_s16 }
 0x5e8   : > { %4692 = vrot.lane.b32.xlu0 %v11471_v13, %s6259_s27 }
 0x5ea   : > { %4525 = vrot.lane.b32.xlu1 %v12071_v18, %s6258_s16 }
 0x5eb   : > { %v12079_v46 = vpop.permute.xlu0 %4259 }
 0x5ec   : > { %16423 = vst [vmem:[#allocation183_spill] sm:$0xff] %v12079_v46  ;;  %4700 = vrot.lane.b32.xlu0 %v11519_v63, %s6259_s27 }
 0x5ee   : > { %4694 = vrot.lane.b32.xlu1 %v11500_v54, %s6259_s27 }
 0x5ef   : > { %v12087_v4 = vpop.permute.xlu0 %4269 }
 0x5f0   : > { %16425 = vst [vmem:[#allocation144_spill] sm:$0xff] %v12087_v4  ;;  %4708 = vrot.lane.b32.xlu0 %v11563_v29, %s6259_s27 }
 0x5f1   : > { %v12089_v60 = vpop.permute.xlu1 %4264 }
 0x5f2   : > { %16426 = vst [vmem:[#allocation114_spill] sm:$0xff] %v12089_v60  ;;  %4702 = vrot.lane.b32.xlu1 %v11544_v1, %s6259_s27 }
 0x5f3   : > { %v12095_v8 = vpop.permute.xlu0 %4314 }
 0x5f4   : > { %4716 = vrot.lane.b32.xlu0 %v11607_v44, %s6259_s27 }
 0x5f5   : > { %v12097_v13 = vpop.permute.xlu1 %4274 }
 0x5f6   : > { %16427 = vst [vmem:[#allocation184_spill] sm:$0xff] %v12097_v13  ;;  %4710 = vrot.lane.b32.xlu1 %v11588_v42, %s6259_s27 }
 0x5f7   : > { %v12103_v59 = vpop.permute.xlu0 %4318 }
 0x5f8   : > { %16428 = vst [vmem:[#allocation35_spill] sm:$0xff] %v12103_v59  ;;  %4845 = vrot.lane.b32.xlu0 %v10598_v50, %s6259_s27 }
 0x5f9   : > { %v12105_v4 = vpop.permute.xlu1 %4316 }
 0x5fa   : > { %16429 = vst [vmem:[#allocation111_spill] sm:$0xff] %v12105_v4  ;;  %4718 = vrot.lane.b32.xlu1 %v11632_v23, %s6259_s27 }
 0x5fb   : > { %v12111_v54 = vpop.permute.xlu0 %4322 }
 0x5fc   : > { %4853 = vrot.lane.b32.xlu0 %v16299_v33, %s6259_s27 }
 0x5fd   : > { %v12113_v60 = vpop.permute.xlu1 %4320 }
 0x5fe   : > { %16430 = vst [vmem:[#allocation70_spill] sm:$0xff] %v12113_v60  ;;  %4847 = vrot.lane.b32.xlu1 %v16298_v11, %s6259_s27  ;;  %v5960_v60 = vld [vmem:[%s14410_s8 + $0x110] sm:$0xff] }
 0x5ff   : > { %v12119_v44 = vpop.permute.xlu0 %4326 }
 0x600   : > { %16431 = vst [vmem:[#allocation191_spill] sm:$0xff] %v12119_v44  ;;  %4861 = vrot.lane.b32.xlu0 %v16303_v45, %s6259_s27  ;;  %v3886_v44 = vsel %vm1236_vm2, %v11793_v17, %v16405_v35  ;;  %v3887_v35 = vsel %vm1236_vm2, %v11797_v6, %v11494_v30 }
 0x601   : > { %v12121_v13 = vpop.permute.xlu1 %4324 }
 0x602   : > { %16432 = vst [vmem:[#allocation160_spill] sm:$0xff] %v12121_v13  ;;  %4855 = vrot.lane.b32.xlu1 %v16302_v9, %s6259_s27 }
 0x603   : > { %v12127_v23 = vpop.permute.xlu0 %4330 }
 0x604   : > { %4869 = vrot.lane.b32.xlu0 %v16307_v53, %s6259_s27  ;;  %v16436_v53 = vld [vmem:[#allocation142_spill] sm:$0xff] }
 0x605   : > { %v12129_v59 = vpop.permute.xlu1 %4328 }
 0x606   : > { %16433 = vst [vmem:[#allocation17_spill] sm:$0xff] %v12129_v59  ;;  %4863 = vrot.lane.b32.xlu1 %v16306_v14, %s6259_s27  ;;  %v12149_v59 = vmul.f32 %v3886_v44, %v16436_v53  ;;  %v5961_v14 = vld [vmem:[%s14410_s8 + $0x118] sm:$0xff]  ;;  %v12165_v44 = vmul.f32 %v3887_v35, %v16436_v53 }
 0x607   : > { %v12142_v11 = vpop.permute.xlu0 %4334 }
 0x608   : > { %16434 = vst [vmem:[#allocation40_spill] sm:$0xff] %v12142_v11  ;;  %5130 = vperm.xlu0 %6051, %v5960_v60   ;;  %16437 = vst [vmem:[#allocation105_spill] sm:$0xff] %v12149_v59 }
 0x609   : > { %v12144_v42 = vpop.permute.xlu1 %4332  ;;  %16440 = vst [vmem:[#allocation61_spill] sm:$0xff] %v12165_v44 }
 0x60a   : > { %16435 = vst [vmem:[#allocation169_spill] sm:$0xff] %v12144_v42  ;;  %4871 = vrot.lane.b32.xlu1 %v16309_v48, %s6259_s27  ;;  %v16443_v42 = vld [vmem:[#allocation33_spill] sm:$0xff] }
 0x60b   : > { %v12154_v50 = vpop.permute.xlu0 %4338 }
 0x60c   : > { %16438 = vst [vmem:[#allocation76_spill] sm:$0xff] %v12154_v50  ;;  %4555 = vrot.lane.b32.xlu0 %v12149_v59, %s6258_s16 }
 0x60d   : > { %v12160_v11 = vpop.permute.xlu1 %4336 }
 0x60e   : > { %16439 = vst [vmem:[#allocation168_spill] sm:$0xff] %v12160_v11  ;;  %5135 = vperm.xlu1 %6052, %v5961_v14   ;;  %v16446_v14 = vld [vmem:[#allocation242_spill] sm:$0xff] }
 0x60f   : > { %v12167_v60 = vpop.permute.xlu0 %4342 }
 0x610   : > { %16441 = vst [vmem:[#allocation56_spill] sm:$0xff] %v12167_v60  ;;  %4684 = vrot.lane.b32.xlu0 %v16443_v42, %s6259_s27 }
 0x611   : > { %v12169_v48 = vpop.permute.xlu1 %4340 }
 0x612   : > { %16442 = vst [vmem:[#allocation156_spill] sm:$0xff] %v12169_v48  ;;  %4557 = vrot.lane.b32.xlu1 %v12165_v44, %s6258_s16 }
 0x613   : > { %v12175_v30 = vpop.permute.xlu0 %4346 }
 0x614   : > { %16444 = vst [vmem:[#allocation47_spill] sm:$0xff] %v12175_v30  ;;  %4837 = vrot.lane.b32.xlu0 %v10560_v25, %s6259_s27 }
 0x615   : > { %v12177_v11 = vpop.permute.xlu1 %4344 }
 0x616   : > { %16445 = vst [vmem:[#allocation157_spill] sm:$0xff] %v12177_v11  ;;  %4686 = vrot.lane.b32.xlu1 %v16446_v14, %s6259_s27  ;;  %v16465_v14 = vld [vmem:[#allocation96_spill] sm:$0xff] }
 0x617   : > { %v12183_v35 = vpop.permute.xlu0 %4350 }
 0x618   : > { %16447 = vst [vmem:[#allocation192_spill] sm:$0xff] %v12183_v35  ;;  %5030 = vrot.lane.b32.xlu0 %v12011_v20, %s6259_s27 }
 0x619   : > { %v12185_v60 = vpop.permute.xlu1 %4348 }
 0x61a   : > { %16448 = vst [vmem:[#allocation158_spill] sm:$0xff] %v12185_v60  ;;  %4839 = vrot.lane.b32.xlu1 %v10574_v7, %s6259_s27  ;;  %v3866_v60 = vsel %vm1236_vm2, %v11644_v32, %v11702_v0  ;;  %v3867_v32 = vsel %vm1236_vm2, %v11668_v47, %v11726_v38 }
 0x61b   : > { %v12191_v44 = vpop.permute.xlu0 %4354 }
 0x61c   : > { %16449 = vst [vmem:[#allocation193_spill] sm:$0xff] %v12191_v44  ;;  %5038 = vrot.lane.b32.xlu0 %v12033_v27, %s6259_s27 }
 0x61d   : > { %v12193_v30 = vpop.permute.xlu1 %4352 }
 0x61e   : > { %16450 = vst [vmem:[#allocation87_spill] sm:$0xff] %v12193_v30  ;;  %5032 = vrot.lane.b32.xlu1 %v12036_v40, %s6259_s27  ;;  %v16453_v30 = vld [vmem:[#allocation135_spill] sm:$0xff] }
 0x61f   : > { %v12203_v35 = vpop.permute.xlu0 %4358  ;;  %v12212_v44 = vmul.f32 %v3866_v60, %v16453_v30 }
 0x620   : > { %16451 = vst [vmem:[#allocation198_spill] sm:$0xff] %v12203_v35  ;;  %5046 = vrot.lane.b32.xlu0 %v12055_v39, %s6259_s27  ;;  %v16457_v35 = vld [vmem:[#allocation91_spill] sm:$0xff] }
 0x621   : > { %v12205_v11 = vpop.permute.xlu1 %4356  ;;  %16454 = vst [vmem:[#allocation199_spill] sm:$0xff] %v12212_v44 }
 0x622   : > { %16452 = vst [vmem:[#allocation115_spill] sm:$0xff] %v12205_v11  ;;  %5040 = vrot.lane.b32.xlu1 %v12058_v58, %s6259_s27  ;;  %v16458_v11 = vld [vmem:[#allocation43_spill] sm:$0xff] }
 0x623   : > { %v12214_v59 = vpop.permute.xlu0 %4362  ;;  %v3884_v60 = vsel %vm1236_vm2, %v16458_v11, %v16457_v35 }
 0x624   : > { %16455 = vst [vmem:[#allocation110_spill] sm:$0xff] %v12214_v59  ;;  %5054 = vrot.lane.b32.xlu0 %v12212_v44, %s6259_s27  ;;  %v12231_v59 = vmul.f32 %v3867_v32, %v16453_v30  ;;  %v12242_v47 = vmul.f32 %v3884_v60, %v16408_v61 }
 0x625   : > { %v12220_v40 = vpop.permute.xlu1 %4360 }
 0x626   : > { %16456 = vst [vmem:[#allocation245_spill] sm:$0xff] %v12220_v40  ;;  %5048 = vrot.lane.b32.xlu1 %v12071_v18, %s6259_s27  ;;  %16459 = vst [vmem:[#allocation130_spill] sm:$0xff] %v12231_v59  ;;  %v16463_v40 = vld [vmem:[#allocation118_spill] sm:$0xff] }
 0x627   : > { %v12233_v20 = vpop.permute.xlu0 %4366  ;;  %16462 = vst [vmem:[#allocation30_spill] sm:$0xff] %v12242_v47  ;;  %v3880_v18 = vsel %vm1236_vm2, %v16457_v35, %v16463_v40 }
 0x628   : > { %16460 = vst [vmem:[#allocation71_spill] sm:$0xff] %v12233_v20  ;;  %5022 = vrot.lane.b32.xlu0 %v11995_v10, %s6259_s27  ;;  %v16466_v20 = vld [vmem:[#allocation175_spill] sm:$0xff]  ;;  %v12261_v60 = vmul.f32 %v3880_v18, %v16410_v36 }
 0x629   : > { %v12235_v7 = vpop.permute.xlu1 %4364 }
 0x62a   : > { %16461 = vst [vmem:[#allocation203_spill] sm:$0xff] %v12235_v7  ;;  %5056 = vrot.lane.b32.xlu1 %v12231_v59, %s6259_s27  ;;  %v3885_v7 = vsel %vm1236_vm2, %v16466_v20, %v16465_v14  ;;  %16468 = vst [vmem:[#allocation204_spill] sm:$0xff] %v12261_v60 }
 0x62b   : > { %v12248_v32 = vpop.permute.xlu0 %4370  ;;  %v12264_v35 = vmul.f32 %v3885_v7, %v16408_v61 }
 0x62c   : > { %16464 = vst [vmem:[#allocation206_spill] sm:$0xff] %v12248_v32  ;;  %4503 = vrot.lane.b32.xlu0 %v12242_v47, %s6258_s16  ;;  %v16470_v32 = vld [vmem:[#allocation177_spill] sm:$0xff] }
 0x62d   : > { %v12254_v48 = vpop.permute.xlu1 %4368  ;;  %16469 = vst [vmem:[#allocation92_spill] sm:$0xff] %v12264_v35  ;;  %v3876_v10 = vsel %vm1236_vm2, %v16463_v40, %v16470_v32  ;;  %v3872_v61 = vsel %vm1236_vm2, %v16470_v32, %v11670_v22 }
 0x62e   : > { %16467 = vst [vmem:[#allocation117_spill] sm:$0xff] %v12254_v48  ;;  %5024 = vrot.lane.b32.xlu1 %v12016_v49, %s6259_s27  ;;  %v16472_v48 = vld [vmem:[#allocation82_spill] sm:$0xff]  ;;  %v12283_v7 = vmul.f32 %v3876_v10, %v16415_v57 }
 0x62f   : > { %v12270_v42 = vpop.permute.xlu0 %4374  ;;  %v3881_v25 = vsel %vm1236_vm2, %v16465_v14, %v16472_v48  ;;  %v16477_v14 = vld [vmem:[#allocation124_spill] sm:$0xff] }
 0x630   : > { %16471 = vst [vmem:[#allocation67_spill] sm:$0xff] %v12270_v42  ;;  %4511 = vrot.lane.b32.xlu0 %v12261_v60, %s6258_s16  ;;  %16474 = vst [vmem:[#allocation103_spill] sm:$0xff] %v12283_v7  ;;  %v12286_v40 = vmul.f32 %v3881_v25, %v16410_v36  ;;  %v3877_v42 = vsel %vm1236_vm2, %v16472_v48, %v16477_v14  ;;  %v12305_v25 = vmul.f32 %v3872_v61, %v16419_v43 }
 0x631   : > { %v12276_v4 = vpop.permute.xlu1 %4372  ;;  %v12308_v10 = vmul.f32 %v3877_v42, %v16415_v57  ;;  %v3873_v48 = vsel %vm1236_vm2, %v16477_v14, %v11693_v26 }
 0x632   : > { %16473 = vst [vmem:[#allocation166_spill] sm:$0xff] %v12276_v4  ;;  %4505 = vrot.lane.b32.xlu1 %v12264_v35, %s6258_s16  ;;  %16475 = vst [vmem:[#allocation19_spill] sm:$0xff] %v12286_v40  ;;  %v12323_v61 = vmul.f32 %v3873_v48, %v16419_v43  ;;  %v16490_v43 = vld [vmem:[#allocation104_spill] sm:$0xff] }
 0x633   : > { %v12292_v18 = vpop.permute.xlu0 %4412  ;;  %16479 = vst [vmem:[#allocation136_spill] sm:$0xff] %v12305_v25  ;;  %16480 = vst [vmem:[#allocation69_spill] sm:$0xff] %v12308_v10 }
 0x634   : > { %16476 = vst [vmem:[#allocation159_spill] sm:$0xff] %v12292_v18  ;;  %4519 = vrot.lane.b32.xlu0 %v12283_v7, %s6258_s16  ;;  %16483 = vst [vmem:[#allocation209_spill] sm:$0xff] %v12323_v61 }
 0x635   : > { %v12298_v49 = vpop.permute.xlu1 %4376 }
 0x636   : > { %16478 = vst [vmem:[#allocation207_spill] sm:$0xff] %v12298_v49  ;;  %4513 = vrot.lane.b32.xlu1 %v12286_v40, %s6258_s16  ;;  %v16486_v49 = vld [vmem:[#allocation100_spill] sm:$0xff] }
 0x637   : > { %v12310_v36 = vpop.permute.xlu0 %4597 }
 0x638   : > { %16481 = vst [vmem:[#allocation108_spill] sm:$0xff] %v12310_v36  ;;  %4527 = vrot.lane.b32.xlu0 %v12305_v25, %s6258_s16 }
 0x639   : > { %v12316_v32 = vpop.permute.xlu1 %4417 }
 0x63a   : > { %16482 = vst [vmem:[#allocation208_spill] sm:$0xff] %v12316_v32  ;;  %4521 = vrot.lane.b32.xlu1 %v12308_v10, %s6258_s16  ;;  %v16489_v32 = vld [vmem:[#allocation53_spill] sm:$0xff] }
 0x63b   : > { %v12325_v42 = vpop.permute.xlu0 %4782 }
 0x63c   : > { %16484 = vst [vmem:[#allocation161_spill] sm:$0xff] %v12325_v42  ;;  %4696 = vrot.lane.b32.xlu0 %v16486_v49, %s6259_s27  ;;  %v16494_v49 = vld [vmem:[#allocation173_spill] sm:$0xff] }
 0x63d   : > { %v12327_v57 = vpop.permute.xlu1 %4602 }
 0x63e   : > { %16485 = vst [vmem:[#allocation75_spill] sm:$0xff] %v12327_v57  ;;  %4529 = vrot.lane.b32.xlu1 %v12323_v61, %s6258_s16  ;;  %v16493_v57 = vld [vmem:[#allocation106_spill] sm:$0xff] }
 0x63f   : > { %v12333_v14 = vpop.permute.xlu0 %4935 }
 0x640   : > { %16487 = vst [vmem:[#allocation73_spill] sm:$0xff] %v12333_v14  ;;  %4704 = vrot.lane.b32.xlu0 %v16489_v32, %s6259_s27  ;;  %v16498_v32 = vld [vmem:[#allocation107_spill] sm:$0xff] }
 0x641   : > { %v12335_v4 = vpop.permute.xlu1 %4787 }
 0x642   : > { %16488 = vst [vmem:[#allocation81_spill] sm:$0xff] %v12335_v4  ;;  %4698 = vrot.lane.b32.xlu1 %v16490_v43, %s6259_s27  ;;  %v16497_v4 = vld [vmem:[#allocation132_spill] sm:$0xff] }
 0x643   : > { %v12341_v48 = vpop.permute.xlu0 %4422 }
 0x644   : > { %16491 = vst [vmem:[#allocation197_spill] sm:$0xff] %v12341_v48  ;;  %4712 = vrot.lane.b32.xlu0 %v16493_v57, %s6259_s27  ;;  %v16501_v57 = vld [vmem:[#allocation154_spill] sm:$0xff] }
 0x645   : > { %v12343_v42 = vpop.permute.xlu1 %4940 }
 0x646   : > { %16492 = vst [vmem:[#allocation201_spill] sm:$0xff] %v12343_v42  ;;  %4706 = vrot.lane.b32.xlu1 %v16494_v49, %s6259_s27 }
 0x647   : > { %v12349_v13 = vpop.permute.xlu0 %5120 }
 0x648   : > { %16495 = vst [vmem:[#allocation59_spill] sm:$0xff] %v12349_v13  ;;  %4720 = vrot.lane.b32.xlu0 %v16497_v4, %s6259_s27 }
 0x649   : > { %v12351_v14 = vpop.permute.xlu1 %4427 }
 0x64a   : > { %16496 = vst [vmem:[#allocation127_spill] sm:$0xff] %v12351_v14  ;;  %4714 = vrot.lane.b32.xlu1 %v16498_v32, %s6259_s27 }
 0x64b   : > { %v12357_v43 = vpop.permute.xlu0 %4607 }
 0x64c   : > { %16499 = vst [vmem:[#allocation72_spill] sm:$0xff] %v12357_v43  ;;  %4849 = vrot.lane.b32.xlu0 %v16297_v5, %s6259_s27 }
 0x64d   : > { %v12359_v48 = vpop.permute.xlu1 %5125 }
 0x64e   : > { %16500 = vst [vmem:[#allocation211_spill] sm:$0xff] %v12359_v48  ;;  %4722 = vrot.lane.b32.xlu1 %v16501_v57, %s6259_s27  ;;  %v3888_v57 = vsel %vm1236_vm2, %v11801_v21, %v16458_v11  ;;  %v3889_v11 = vsel %vm1236_vm2, %v11811_v2, %v16466_v20  ;;  %v4245_v20 = vsel %vm1645_vm3, %v11881_v28, %v11897_v41 }
 0x64f   : > { %v12365_v49 = vpop.permute.xlu0 %4792  ;;  %v4279_v14 = vmul.f32 %v12079_v46, %v4245_v20 }
 0x650   : > { %16502 = vst [vmem:[#allocation50_spill] sm:$0xff] %v12365_v49  ;;  %4857 = vrot.lane.b32.xlu0 %v16301_v51, %s6259_s27  ;;  %v16541_v51 = vld [vmem:[#allocation195_spill] sm:$0xff] }
 0x651   : > { %v12367_v13 = vpop.permute.xlu1 %4612 }
 0x652   : > { %16503 = vst [vmem:[#allocation45_spill] sm:$0xff] %v12367_v13  ;;  %4851 = vrot.lane.b32.xlu1 %v16300_v55, %s6259_s27  ;;  %v4095_v55 = vmul.f32 %v11847_v12, %v12033_v27 }
 0x653   : > { %v12373_v4 = vpop.permute.xlu0 %4945 }
 0x654   : > { %16504 = vst [vmem:[#allocation163_spill] sm:$0xff] %v12373_v4  ;;  %4865 = vrot.lane.b32.xlu0 %v16305_v56, %s6259_s27 }
 0x655   : > { %v12375_v43 = vpop.permute.xlu1 %4797 }
 0x656   : > { %16505 = vst [vmem:[#allocation143_spill] sm:$0xff] %v12375_v43  ;;  %4859 = vrot.lane.b32.xlu1 %v16304_v37, %s6259_s27  ;;  %v12394_v43 = vmul.f32 %v3888_v57, %v16436_v53 }
 0x657   : > { %v12385_v49 = vpop.permute.xlu0 %4499 }
 0x658   : > { %16506 = vst [vmem:[#allocation216_spill] sm:$0xff] %v12385_v49  ;;  %4873 = vrot.lane.b32.xlu0 %v11056_v15, %s6259_s27  ;;  %16508 = vst [vmem:[#allocation188_spill] sm:$0xff] %v12394_v43  ;;  %v4006_v15 = vmul.f32 %v11827_v16, %v16299_v33 }
 0x659   : > { %v12387_v13 = vpop.permute.xlu1 %4950 }
 0x65a   : > { %16507 = vst [vmem:[#allocation24_spill] sm:$0xff] %v12387_v13  ;;  %4867 = vrot.lane.b32.xlu1 %v16308_v62, %s6259_s27  ;;  %v4398_v13 = vsel %vm1645_vm3, %v12111_v54, %v12127_v23  ;;  %v12420_v62 = vmul.f32 %v3889_v11, %v16436_v53  ;;  %v16511_v53 = vld [vmem:[#allocation243_spill] sm:$0xff] }
 0x65b   : > { %v12396_v4 = vpop.permute.xlu0 %4507  ;;  %v4432_v57 = vmul.f32 %v12292_v18, %v4398_v13 }
 0x65c   : > { %4559 = vrot.lane.b32.xlu0 %v12394_v43, %s6258_s16  ;;  %16510 = vst [vmem:[#allocation16_spill] sm:$0xff] %v12420_v62  ;;  %v3949_v43 = vmul.f32 %v11809_v24, %v11519_v63  ;;  %v4241_v63 = vsel %vm1645_vm3, %v11897_v41, %v11917_v31  ;;  %v16513_v41 = vld [vmem:[#allocation7_spill] sm:$0xff] }
 0x65d   : > { %v12406_v56 = vpop.permute.xlu1 %4501  ;;  %v4464_v11 = vadd.f32 %v4432_v57, %v4279_v14  ;;  %v4280_v37 = vmul.f32 %v12079_v46, %v4241_v63  ;;  %v4007_v14 = vmul.f32 %v11827_v16, %v16303_v45  ;;  %v16514_v45 = vld [vmem:[#allocation66_spill] sm:$0xff] }
 0x65e   : > { %16509 = vst [vmem:[#allocation182_spill] sm:$0xff] %v12406_v56  ;;  %4875 = vrot.lane.b32.xlu1 %v11067_v19, %s6259_s27  ;;  %v4394_v19 = vsel %vm1645_vm3, %v12127_v23, %v12154_v50  ;;  %v4038_v27 = vadd.f32 %v4006_v15, %v3949_v43  ;;  %v3950_v15 = vmul.f32 %v11809_v24, %v11563_v29 }
 0x65f   : > { %v4516_v32 = vpop.permute.xlu0 %4515  ;;  %v4433_v23 = vmul.f32 %v12292_v18, %v4394_v19 }
 0x660   : > { %v4583_v33 = vsel %vm1645_vm3, %v12396_v4, %v4516_v32  ;;  %4688 = vrot.lane.b32.xlu0 %v16511_v53, %s6259_s27  ;;  %v4127_v57 = vadd.f32 %v4095_v55, %v4038_v27  ;;  %v4096_v55 = vmul.f32 %v11847_v12, %v12055_v39  ;;  %v16542_v53 = vld [vmem:[#allocation228_spill] sm:$0xff] }
 0x661   : > { %v12427_v13 = vpop.permute.xlu1 %4509  ;;  %v4617_v20 = vmul.f32 %v12310_v36, %v4583_v33 }
 0x662   : > { %4561 = vrot.lane.b32.xlu1 %v12420_v62, %s6258_s16 }
 0x663   : > { %v4649_v50 = vadd.f32 %v4617_v20, %v4464_v11  ;;  %v12447_v5 = vpop.permute.xlu0 %4523  ;;  %v4465_v11 = vadd.f32 %v4433_v23, %v4280_v37 }
 0x664   : > { %16512 = vst [vmem:[#allocation65_spill] sm:$0xff] %v12447_v5  ;;  %v4579_v19 = vsel %vm1645_vm3, %v4516_v32, %v12447_v5  ;;  %4841 = vrot.lane.b32.xlu0 %v10577_v52, %s6259_s27  ;;  %v4039_v5 = vadd.f32 %v4007_v14, %v3950_v15  ;;  %v16519_v14 = vld [vmem:[#allocation241_spill] sm:$0xff] }
 0x665   : > { %v12451_v33 = vpop.permute.xlu1 %4517  ;;  %v5204_v43 = vmul.f32 %v4649_v50, %v16513_v41  ;;  %v4618_v20 = vmul.f32 %v12310_v36, %v4579_v19  ;;  %v16517_v50 = vld [vmem:[#allocation14_spill] sm:$0xff]  ;;  %v3868_v19 = vsel %vm1236_vm2, %v11670_v22, %v16519_v14 }
 0x666   : > { %4690 = vrot.lane.b32.xlu1 %v16514_v45, %s6259_s27  ;;  %v4128_v29 = vadd.f32 %v4096_v55, %v4039_v5 }
 0x667   : > { %v12466_v63 = vadd.f32 %v5204_v43, %v4127_v57  ;;  %v4650_v32 = vadd.f32 %v4618_v20, %v4465_v11  ;;  %v12468_v27 = vpop.permute.xlu0 %4692  ;;  %v12500_v43 = vmul.f32 %v3868_v19, %v16453_v30  ;;  %v16522_v20 = vld [vmem:[#allocation176_spill] sm:$0xff] }
 0x668   : > { %5034 = vrot.lane.b32.xlu0 %v12261_v60, %s6259_s27  ;;  %v3869_v22 = vsel %vm1236_vm2, %v11693_v26, %v16522_v20  ;;  %v16525_v26 = vld [vmem:[#allocation152_spill] sm:$0xff] }
 0x669   : > { %16515 = vst [vmem:[#allocation213_spill] sm:$0xff] %v12466_v63  ;;  %v12470_v62 = vpop.permute.xlu1 %4525  ;;  %v5205_v37 = vmul.f32 %v4650_v32, %v16517_v50  ;;  %16520 = vst [vmem:[#allocation189_spill] sm:$0xff] %v12500_v43  ;;  %v12515_v32 = vmul.f32 %v3869_v22, %v16453_v30  ;;  %v3862_v19 = vsel %vm1236_vm2, %v11702_v0, %v16525_v26  ;;  %v16526_v30 = vld [vmem:[#allocation137_spill] sm:$0xff]  ;;  %v16528_v0 = vld [vmem:[#allocation170_spill] sm:$0xff] }
 0x66a   : > { %16516 = vst [vmem:[#allocation109_spill] sm:$0xff] %v12470_v62  ;;  %4843 = vrot.lane.b32.xlu1 %v10594_v3, %s6259_s27  ;;  %v12538_v22 = vmul.f32 %v3862_v19, %v16526_v30  ;;  %v16529_v19 = vld [vmem:[#allocation141_spill] sm:$0xff] }
 0x66b   : > { %v12477_v23 = vpop.permute.xlu0 %4700  ;;  %v12479_v39 = vadd.f32 %v5205_v37, %v4128_v29  ;;  %16523 = vst [vmem:[#allocation180_spill] sm:$0xff] %v12515_v32 }
 0x66c   : > { %5042 = vrot.lane.b32.xlu0 %v12283_v7, %s6259_s27  ;;  %16527 = vst [vmem:[#allocation78_spill] sm:$0xff] %v12538_v22 }
 0x66d   : > { %16518 = vst [vmem:[#allocation22_spill] sm:$0xff] %v12479_v39  ;;  %v12481_v57 = vpop.permute.xlu1 %4694 }
 0x66e   : > { %5036 = vrot.lane.b32.xlu1 %v12286_v40, %s6259_s27  ;;  %v3858_v40 = vsel %vm1236_vm2, %v16525_v26, %v11793_v17  ;;  %v16532_v26 = vld [vmem:[#allocation79_spill] sm:$0xff] }
 0x66f   : > { %v12491_v15 = vpop.permute.xlu0 %4708 }
 0x670   : > { %5050 = vrot.lane.b32.xlu0 %v12305_v25, %s6259_s27 }
 0x671   : > { %v12493_v5 = vpop.permute.xlu1 %4702 }
 0x672   : > { %5044 = vrot.lane.b32.xlu1 %v12308_v10, %s6259_s27 }
 0x673   : > { %v12502_v11 = vpop.permute.xlu0 %4716 }
 0x674   : > { %16521 = vst [vmem:[#allocation165_spill] sm:$0xff] %v12502_v11  ;;  %5058 = vrot.lane.b32.xlu0 %v12500_v43, %s6259_s27 }
 0x675   : > { %v12508_v55 = vpop.permute.xlu1 %4710 }
 0x676   : > { %5052 = vrot.lane.b32.xlu1 %v12323_v61, %s6259_s27 }
 0x677   : > { %v12517_v37 = vpop.permute.xlu0 %4845 }
 0x678   : > { %5026 = vrot.lane.b32.xlu0 %v12242_v47, %s6259_s27  ;;  %v3863_v47 = vsel %vm1236_vm2, %v11726_v38, %v16528_v0  ;;  %v16533_v38 = vld [vmem:[#allocation101_spill] sm:$0xff] }
 0x679   : > { %v12519_v29 = vpop.permute.xlu1 %4718  ;;  %v12560_v17 = vmul.f32 %v3863_v47, %v16526_v30  ;;  %v4014_v60 = vmul.f32 %v16533_v38, %v16302_v9  ;;  %v16535_v47 = vld [vmem:[#allocation21_spill] sm:$0xff] }
 0x67a   : > { %16524 = vst [vmem:[#allocation146_spill] sm:$0xff] %v12519_v29  ;;  %5060 = vrot.lane.b32.xlu1 %v12515_v32, %s6259_s27  ;;  %v3957_v3 = vmul.f32 %v16535_v47, %v11544_v1  ;;  %v16540_v1 = vld [vmem:[#allocation32_spill] sm:$0xff] }
 0x67b   : > { %v12529_v25 = vpop.permute.xlu0 %4853  ;;  %16531 = vst [vmem:[#allocation93_spill] sm:$0xff] %v12560_v17 }
 0x67c   : > { %4531 = vrot.lane.b32.xlu0 %v12212_v44, %s6258_s16  ;;  %v12557_v44 = vmul.f32 %v3858_v40, %v16529_v19  ;;  %v4046_v31 = vadd.f32 %v4014_v60, %v3957_v3 }
 0x67d   : > { %v12531_v61 = vpop.permute.xlu1 %4847 }
 0x67e   : > { %5028 = vrot.lane.b32.xlu1 %v12264_v35, %s6259_s27  ;;  %16530 = vst [vmem:[#allocation133_spill] sm:$0xff] %v12557_v44  ;;  %v3864_v35 = vsel %vm1236_vm2, %v16519_v14, %v16532_v26  ;;  %v16536_v14 = vld [vmem:[#allocation187_spill] sm:$0xff] }
 0x67f   : > { %v12544_v10 = vpop.permute.xlu0 %4861  ;;  %v4103_v52 = vmul.f32 %v16536_v14, %v12058_v58  ;;  %v12585_v9 = vmul.f32 %v3864_v35, %v16526_v30  ;;  %v4249_v58 = vsel %vm1645_vm3, %v16540_v1, %v11881_v28  ;;  %v4250_v35 = vsel %vm1645_vm3, %v16542_v53, %v16541_v51  ;;  %v16544_v30 = vld [vmem:[#allocation196_spill] sm:$0xff]  ;;  %v16546_v28 = vld [vmem:[#allocation179_spill] sm:$0xff] }
 0x680   : > { %4539 = vrot.lane.b32.xlu0 %v12538_v22, %s6258_s16  ;;  %v4253_v32 = vsel %vm1645_vm3, %v16546_v28, %v16540_v1  ;;  %v4278_v28 = vmul.f32 %v12079_v46, %v4249_v58  ;;  %v4588_v58 = vsel %vm1645_vm3, %v12406_v56, %v12427_v13  ;;  %v16563_v22 = vld [vmem:[#allocation156_spill] sm:$0xff] }
 0x681   : > { %v12550_v45 = vpop.permute.xlu1 %4855  ;;  %16537 = vst [vmem:[#allocation83_spill] sm:$0xff] %v12585_v9 }
 0x682   : > { %4533 = vrot.lane.b32.xlu1 %v12231_v59, %s6258_s16  ;;  %v3859_v59 = vsel %vm1236_vm2, %v16528_v0, %v11797_v6  ;;  %v12591_v6 = vsel %vm1236_vm2, %v16532_v26, %v11801_v21  ;;  %v4246_v21 = vsel %vm1645_vm3, %v16541_v51, %v16544_v30  ;;  %v16549_v51 = vld [vmem:[#allocation149_spill] sm:$0xff] }
 0x683   : > { %v12568_v7 = vpop.permute.xlu0 %4869  ;;  %16538 = vst [vmem:[#allocation84_spill] sm:$0xff] %v12591_v6  ;;  %v12594_v0 = vmul.f32 %v3859_v59, %v16529_v19  ;;  %v16545_v59 = vld [vmem:[#allocation214_spill] sm:$0xff]  ;;  %v16547_v6 = vld [vmem:[#allocation25_spill] sm:$0xff]  ;;  %v12637_v19 = vadd.f32 %v4103_v52, %v4046_v31  ;;  %v4584_v52 = vsel %vm1645_vm3, %v12427_v13, %v12451_v33  ;;  %v16558_v13 = vld [vmem:[#allocation148_spill] sm:$0xff] }
 0x684   : > { %16534 = vst [vmem:[#allocation119_spill] sm:$0xff] %v12568_v7  ;;  %4547 = vrot.lane.b32.xlu0 %v12557_v44, %s6258_s16  ;;  %v4242_v26 = vsel %vm1645_vm3, %v16544_v30, %v16545_v59  ;;  %v12622_v3 = vsel %vm1645_vm3, %v16547_v6, %v16542_v53  ;;  %v4402_v30 = vsel %vm1645_vm3, %v12095_v8, %v12111_v54  ;;  %v16551_v59 = vld [vmem:[#allocation111_spill] sm:$0xff]  ;;  %v16552_v53 = vld [vmem:[#allocation169_spill] sm:$0xff]  ;;  %v16553_v6 = vld [vmem:[#allocation114_spill] sm:$0xff] }
 0x685   : > { %v12574_v40 = vpop.permute.xlu1 %4863  ;;  %16539 = vst [vmem:[#allocation85_spill] sm:$0xff] %v12594_v0  ;;  %v4587_v54 = vsel %vm1645_vm3, %v12385_v49, %v12396_v4  ;;  %v4431_v31 = vmul.f32 %v12292_v18, %v4402_v30  ;;  %v4286_v39 = vmul.f32 %v16553_v6, %v4250_v35  ;;  %v4287_v4 = vmul.f32 %v16553_v6, %v4246_v21  ;;  %v16559_v30 = vld [vmem:[#allocation120_spill] sm:$0xff]  ;;  %v16561_v21 = vld [vmem:[#allocation33_spill] sm:$0xff] }
 0x686   : > { %4541 = vrot.lane.b32.xlu1 %v12560_v17, %s6258_s16  ;;  %v4288_v63 = vmul.f32 %v16553_v6, %v4242_v26  ;;  %v16557_v17 = vld [vmem:[#allocation145_spill] sm:$0xff]  ;;  %v4005_v35 = vmul.f32 %v11827_v16, %v16559_v30  ;;  %v3947_v26 = vmul.f32 %v11809_v24, %v16561_v21 }
 0x687   : > { %v12604_v2 = vpop.permute.xlu0 %5130  ;;  %v4004_v44 = vmul.f32 %v11827_v16, %v16557_v17  ;;  %v4395_v17 = vsel %vm1645_vm3, %v16552_v53, %v16563_v22  ;;  %v16565_v16 = vld [vmem:[#allocation63_spill] sm:$0xff] }
 0x688   : > { %16543 = vst [vmem:[#allocation113_spill] sm:$0xff] %v12604_v2  ;;  %4724 = vrot.lane.b32.xlu0 %v16549_v51, %s6259_s27  ;;  %v16550_v2 = vld [vmem:[#allocation160_spill] sm:$0xff] }
 0x689   : > { %v12624_v60 = vpop.permute.xlu1 %4871  ;;  %v4403_v1 = vsel %vm1645_vm3, %v16551_v59, %v16550_v2  ;;  %v4399_v51 = vsel %vm1645_vm3, %v16550_v2, %v16552_v53  ;;  %v16554_v2 = vld [vmem:[#allocation208_spill] sm:$0xff]  ;;  %v12697_v22 = vadd.f32 %v4004_v44, %v3947_v26  ;;  %v16573_v26 = vld [vmem:[#allocation34_spill] sm:$0xff] }
 0x68a   : > { %16548 = vst [vmem:[#allocation121_spill] sm:$0xff] %v12624_v60  ;;  %4549 = vrot.lane.b32.xlu1 %v12594_v0, %s6258_s16  ;;  %v4439_v9 = vmul.f32 %v16554_v2, %v4403_v1  ;;  %v4440_v20 = vmul.f32 %v16554_v2, %v4399_v51  ;;  %v4616_v1 = vmul.f32 %v12310_v36, %v4587_v54  ;;  %v16560_v51 = vld [vmem:[#allocation75_spill] sm:$0xff] }
 0x68b   : > { %v12661_v43 = vpop.permute.xlu0 %4555  ;;  %v4624_v48 = vmul.f32 %v16560_v51, %v4588_v58  ;;  %v4625_v56 = vmul.f32 %v16560_v51, %v4584_v52  ;;  %v3948_v54 = vmul.f32 %v11809_v24, %v16565_v16  ;;  %v16566_v58 = vld [vmem:[#allocation122_spill] sm:$0xff]  ;;  %v4463_v36 = vadd.f32 %v4431_v31, %v4278_v28  ;;  %v16569_v16 = vld [vmem:[#allocation240_spill] sm:$0xff]  ;;  %v16570_v28 = vld [vmem:[#allocation123_spill] sm:$0xff] }
 0x68c   : > { %16555 = vst [vmem:[#allocation125_spill] sm:$0xff] %v12661_v43  ;;  %4732 = vrot.lane.b32.xlu0 %v16558_v13, %s6259_s27  ;;  %v16564_v13 = vld [vmem:[#allocation242_spill] sm:$0xff]  ;;  %v3956_v52 = vmul.f32 %v16535_v47, %v16566_v58  ;;  %v4471_v43 = vadd.f32 %v4439_v9, %v4286_v39  ;;  %v4472_v21 = vadd.f32 %v4440_v20, %v4287_v4  ;;  %v16572_v4 = vld [vmem:[#allocation128_spill] sm:$0xff] }
 0x68d   : > { %v12665_v0 = vpop.permute.xlu1 %5135  ;;  %v3955_v30 = vmul.f32 %v16535_v47, %v16564_v13  ;;  %v4441_v53 = vmul.f32 %v16554_v2, %v4395_v17  ;;  %v4037_v58 = vadd.f32 %v4005_v35, %v3948_v54  ;;  %v3958_v39 = vmul.f32 %v16535_v47, %v16570_v28  ;;  %v16575_v54 = vld [vmem:[#allocation58_spill] sm:$0xff] }
 0x68e   : > { %16556 = vst [vmem:[#allocation131_spill] sm:$0xff] %v12665_v0  ;;  %v16562_v0 = vld [vmem:[#allocation140_spill] sm:$0xff]  ;;  %v4648_v20 = vadd.f32 %v4616_v1, %v4463_v36  ;;  %v4656_v9 = vadd.f32 %v4624_v48, %v4471_v43  ;;  %v4657_v31 = vadd.f32 %v4625_v56, %v4472_v21  ;;  %v4013_v17 = vmul.f32 %v16533_v38, %v16572_v4  ;;  %v16576_v56 = vld [vmem:[#allocation206_spill] sm:$0xff]  ;;  %v16580_v4 = vld [vmem:[#allocation49_spill] sm:$0xff] }
 0x68f   : > { %4726 = vrot.lane.b32.xlu1 %v16562_v0, %s6259_s27  ;;  %v4580_v0 = vsel %vm1645_vm3, %v12451_v33, %v12470_v62  ;;  %v12694_v49 = vpop.permute.xlu0 %4684  ;;  %v16571_v33 = vld [vmem:[#allocation37_spill] sm:$0xff]  ;;  %v12712_v62 = vmul.f32 %v11847_v12, %v16573_v26  ;;  %v4015_v36 = vmul.f32 %v16533_v38, %v16575_v54  ;;  %v4406_v48 = vsel %vm1645_vm3, %v16576_v56, %v12095_v8  ;;  %v16577_v43 = vld [vmem:[#allocation166_spill] sm:$0xff] }
 0x690   : > { %16567 = vst [vmem:[#allocation244_spill] sm:$0xff] %v12694_v49  ;;  %4740 = vrot.lane.b32.xlu0 %v16569_v16, %s6259_s27  ;;  %v4626_v44 = vmul.f32 %v16560_v51, %v4580_v0  ;;  %v16574_v16 = vld [vmem:[#allocation60_spill] sm:$0xff]  ;;  %v4407_v0 = vsel %vm1645_vm3, %v16577_v43, %v16551_v59  ;;  %v16579_v21 = vld [vmem:[#allocation10_spill] sm:$0xff]  ;;  %v4473_v26 = vadd.f32 %v4441_v53, %v4288_v63  ;;  %v16583_v59 = vld [vmem:[#allocation11_spill] sm:$0xff] }
 0x691   : > { %v12699_v13 = vpop.permute.xlu1 %4557  ;;  %v4012_v35 = vmul.f32 %v16533_v38, %v16574_v16  ;;  %v4094_v28 = vmul.f32 %v11847_v12, %v16579_v21  ;;  %v4102_v16 = vmul.f32 %v16536_v14, %v16580_v4  ;;  %v4277_v54 = vmul.f32 %v12079_v46, %v4253_v32  ;;  %v16582_v38 = vld [vmem:[#allocation162_spill] sm:$0xff]  ;;  %v16584_v4 = vld [vmem:[#allocation167_spill] sm:$0xff] }
 0x692   : > { %16568 = vst [vmem:[#allocation86_spill] sm:$0xff] %v12699_v13  ;;  %v4438_v8 = vmul.f32 %v16554_v2, %v4407_v0  ;;  %v5203_v43 = vmul.f32 %v4648_v20, %v16583_v59  ;;  %v5211_v47 = vmul.f32 %v4656_v9, %v16583_v59  ;;  %v5212_v21 = vmul.f32 %v4657_v31, %v16513_v41  ;;  %v16588_v2 = vld [vmem:[#allocation99_spill] sm:$0xff] }
 0x693   : > { %4734 = vrot.lane.b32.xlu1 %v16571_v33, %s6259_s27  ;;  %v12726_v1 = vpop.permute.xlu0 %4837  ;;  %v4430_v33 = vmul.f32 %v12292_v18, %v4406_v48  ;;  %v4045_v63 = vadd.f32 %v4013_v17, %v3956_v52  ;;  %v4658_v32 = vadd.f32 %v4626_v44, %v4473_v26  ;;  %v4768_v53 = vsel %vm2169_vm4, %v12468_v27, %v12477_v23  ;;  %v16585_v26 = vld [vmem:[#allocation80_spill] sm:$0xff] }
 0x694   : > { %16578 = vst [vmem:[#allocation88_spill] sm:$0xff] %v12726_v1  ;;  %4877 = vrot.lane.b32.xlu0 %v16582_v38, %s6259_s27  ;;  %v12748_v48 = vadd.f32 %v4012_v35, %v3955_v30  ;;  %v4285_v0 = vmul.f32 %v16553_v6, %v12622_v3  ;;  %v4921_v20 = vsel %vm2169_vm4, %v12517_v37, %v12529_v25  ;;  %v16587_v6 = vld [vmem:[#allocation151_spill] sm:$0xff]  ;;  %v16596_v38 = vld [vmem:[#allocation216_spill] sm:$0xff] }
 0x695   : > { %v12735_v56 = vpop.permute.xlu1 %4686  ;;  %v4126_v31 = vadd.f32 %v4094_v28, %v4037_v58  ;;  %v4134_v52 = vadd.f32 %v4102_v16, %v4045_v63  ;;  %v12758_v17 = vadd.f32 %v4015_v36, %v3958_v39  ;;  %v12760_v44 = vadd.f32 %v4430_v33, %v4277_v54  ;;  %v16589_v39 = vld [vmem:[#allocation161_spill] sm:$0xff]  ;;  %v16590_v36 = vld [vmem:[#allocation98_spill] sm:$0xff] }
 0x696   : > { %16581 = vst [vmem:[#allocation94_spill] sm:$0xff] %v12735_v56  ;;  %v12764_v30 = vmul.f32 %v16536_v14, %v16585_v26  ;;  %v12766_v35 = vadd.f32 %v4438_v8, %v4285_v0  ;;  %v12774_v46 = vmul.f32 %v16536_v14, %v16588_v2  ;;  %v12777_v58 = vadd.f32 %v5212_v21, %v12637_v19  ;;  %v16591_v8 = vld [vmem:[#allocation73_spill] sm:$0xff]  ;;  %v16594_v26 = vld [vmem:[#allocation230_spill] sm:$0xff] }
 0x697   : > { %4742 = vrot.lane.b32.xlu1 %v16584_v4, %s6259_s27  ;;  %v12756_v9 = vpop.permute.xlu0 %5030  ;;  %v4801_v33 = vmul.f32 %v16589_v39, %v4768_v53  ;;  %v12782_v28 = vadd.f32 %v5203_v43, %v4126_v31  ;;  %v12784_v16 = vadd.f32 %v5211_v47, %v4134_v52  ;;  %v12787_v54 = vmul.f32 %v4658_v32, %v16517_v50  ;;  %v16593_v52 = vld [vmem:[#allocation59_spill] sm:$0xff]  ;;  %v16709_v4 = vld [vmem:[#allocation68_spill] sm:$0xff] }
 0x698   : > { %4885 = vrot.lane.b32.xlu0 %v16587_v6, %s6259_s27  ;;  %v4954_v63 = vmul.f32 %v16591_v8, %v4921_v20  ;;  %v4922_v19 = vsel %vm2169_vm4, %v12531_v61, %v12550_v45  ;;  %v4917_v2 = vsel %vm2169_vm4, %v12529_v25, %v12544_v10  ;;  %v4769_v47 = vsel %vm2169_vm4, %v12481_v57, %v12493_v5  ;;  %v16592_v20 = vld [vmem:[#allocation138_spill] sm:$0xff] }
 0x699   : > { %v12768_v3 = vpop.permute.xlu1 %4839  ;;  %v4764_v43 = vsel %vm2169_vm4, %v12477_v23, %v12491_v15  ;;  %v4765_v21 = vsel %vm2169_vm4, %v12493_v5, %v12508_v55  ;;  %v4760_v25 = vsel %vm2169_vm4, %v12491_v15, %v12502_v11  ;;  %v4761_v53 = vsel %vm2169_vm4, %v12508_v55, %v12519_v29 }
 0x69a   : > { %16586 = vst [vmem:[#allocation116_spill] sm:$0xff] %v12768_v3  ;;  %v4918_v23 = vsel %vm2169_vm4, %v12550_v45, %v12574_v40  ;;  %v4913_v5 = vsel %vm2169_vm4, %v12544_v10, %v12568_v7  ;;  %v4962_v55 = vmul.f32 %v12343_v42, %v4922_v19  ;;  %v4955_v31 = vmul.f32 %v16591_v8, %v4917_v2  ;;  %v16595_v7 = vld [vmem:[#allocation81_spill] sm:$0xff] }
 0x69b   : > { %4879 = vrot.lane.b32.xlu1 %v16590_v36, %s6259_s27  ;;  %v5039_v32 = vpop.permute.xlu0 %5038  ;;  %v4914_v45 = vsel %vm2169_vm4, %v12574_v40, %v12624_v60  ;;  %v4809_v29 = vmul.f32 %v16595_v7, %v4769_v47  ;;  %v4802_v11 = vmul.f32 %v16589_v39, %v4764_v43  ;;  %v4803_v18 = vmul.f32 %v16589_v39, %v4760_v25  ;;  %v16597_v40 = vld [vmem:[#allocation125_spill] sm:$0xff] }
 0x69c   : > { %v5106_v15 = vsel %vm2169_vm4, %v12756_v9, %v5039_v32  ;;  %4893 = vrot.lane.b32.xlu0 %v16592_v20, %s6259_s27  ;;  %v4986_v20 = vadd.f32 %v4954_v63, %v4801_v33  ;;  %v4810_v19 = vmul.f32 %v16595_v7, %v4765_v21  ;;  %v4963_v2 = vmul.f32 %v12343_v42, %v4918_v23  ;;  %v16598_v63 = vld [vmem:[#allocation78_spill] sm:$0xff] }
 0x69d   : > { %v12826_v0 = vpop.permute.xlu1 %5032  ;;  %v5139_v10 = vmul.f32 %v16593_v52, %v5106_v15  ;;  %v4956_v36 = vmul.f32 %v16591_v8, %v4913_v5  ;;  %v4591_v15 = vsel %vm1645_vm3, %v16597_v40, %v16596_v38  ;;  %v4964_v47 = vmul.f32 %v12343_v42, %v4914_v45  ;;  %v16600_v5 = vld [vmem:[#allocation108_spill] sm:$0xff]  ;;  %v16601_v45 = vld [vmem:[#allocation182_spill] sm:$0xff] }
 0x69e   : > { %v4994_v21 = vadd.f32 %v4962_v55, %v4809_v29  ;;  %v4987_v25 = vadd.f32 %v4955_v31, %v4802_v11  ;;  %v4925_v11 = vsel %vm2169_vm4, %v12726_v1, %v12517_v37  ;;  %v16602_v29 = vld [vmem:[#allocation211_spill] sm:$0xff]  ;;  %v4995_v31 = vadd.f32 %v4963_v2, %v4810_v19  ;;  %v16605_v19 = vld [vmem:[#allocation133_spill] sm:$0xff] }
 0x69f   : > { %4887 = vrot.lane.b32.xlu1 %v16594_v26, %s6259_s27  ;;  %v5047_v60 = vpop.permute.xlu0 %5046  ;;  %v4811_v26 = vmul.f32 %v16595_v7, %v4761_v53  ;;  %v5171_v43 = vadd.f32 %v5139_v10, %v4986_v20  ;;  %v16599_v53 = vld [vmem:[#allocation29_spill] sm:$0xff]  ;;  %v4615_v20 = vmul.f32 %v16600_v5, %v4591_v15  ;;  %v4988_v10 = vadd.f32 %v4956_v36, %v4803_v18  ;;  %v16661_v1 = vld [vmem:[#allocation139_spill] sm:$0xff] }
 0x6a0   : > { %v5102_v33 = vsel %vm2169_vm4, %v5039_v32, %v5047_v60  ;;  %5062 = vrot.lane.b32.xlu0 %v16598_v63, %s6259_s27  ;;  %v4592_v32 = vsel %vm1645_vm3, %v12699_v13, %v16601_v45  ;;  %v4953_v36 = vmul.f32 %v16591_v8, %v4925_v11  ;;  %v16606_v2 = vld [vmem:[#allocation93_spill] sm:$0xff]  ;;  %v16665_v8 = vld [vmem:[#allocation42_spill] sm:$0xff] }
 0x6a1   : > { %v5041_v6 = vpop.permute.xlu1 %5040  ;;  %v5140_v38 = vmul.f32 %v16593_v52, %v5102_v33  ;;  %v4772_v33 = vsel %vm2169_vm4, %v12694_v49, %v12468_v27  ;;  %v4996_v5 = vadd.f32 %v4964_v47, %v4811_v26  ;;  %v4623_v18 = vmul.f32 %v16560_v51, %v4592_v32  ;;  %v16672_v49 = vld [vmem:[#allocation44_spill] sm:$0xff]  ;;  %v16701_v51 = vld [vmem:[#allocation89_spill] sm:$0xff] }
 0x6a2   : > { %v5107_v23 = vsel %vm2169_vm4, %v12826_v0, %v5041_v6  ;;  %v4647_v47 = vadd.f32 %v4615_v20, %v12760_v44 }
 0x6a3   : > { %4895 = vrot.lane.b32.xlu1 %v16599_v53, %s6259_s27  ;;  %v5147_v55 = vmul.f32 %v16602_v29, %v5107_v23  ;;  %v5172_v15 = vadd.f32 %v5140_v38, %v4987_v25  ;;  %v12878_v40 = vpop.permute.xlu0 %5054  ;;  %v16604_v53 = vld [vmem:[#allocation232_spill] sm:$0xff]  ;;  %v4773_v25 = vsel %vm2169_vm4, %v12735_v56, %v12481_v57  ;;  %v16607_v23 = vld [vmem:[#allocation231_spill] sm:$0xff]  ;;  %v16610_v57 = vld [vmem:[#allocation105_spill] sm:$0xff] }
 0x6a4   : > { %16603 = vst [vmem:[#allocation142_spill] sm:$0xff] %v12878_v40  ;;  %v5267_v45 = vmul.f32 %v5171_v43, %v16604_v53  ;;  %v5098_v37 = vsel %vm2169_vm4, %v5047_v60, %v12878_v40  ;;  %5070 = vrot.lane.b32.xlu0 %v16605_v19, %s6259_s27  ;;  %v4800_v43 = vmul.f32 %v16589_v39, %v4772_v33  ;;  %v16657_v56 = vld [vmem:[#allocation218_spill] sm:$0xff]  ;;  %v16669_v39 = vld [vmem:[#allocation217_spill] sm:$0xff] }
 0x6a5   : > { %v5179_v13 = vadd.f32 %v5147_v55, %v4994_v21  ;;  %v5049_v63 = vpop.permute.xlu1 %5048  ;;  %v5141_v26 = vmul.f32 %v16593_v52, %v5098_v37  ;;  %v5268_v38 = vmul.f32 %v5172_v15, %v16607_v23  ;;  %v4655_v33 = vadd.f32 %v4623_v18, %v12766_v35  ;;  %v16611_v37 = vld [vmem:[#allocation85_spill] sm:$0xff] }
 0x6a6   : > { %v5103_v27 = vsel %vm2169_vm4, %v5041_v6, %v5049_v63  ;;  %v4926_v6 = vsel %vm2169_vm4, %v12768_v3, %v12531_v61  ;;  %v5299_v55 = vadd.f32 %v5267_v45, %v12782_v28  ;;  %v16612_v35 = vld [vmem:[#allocation213_spill] sm:$0xff] }
 0x6a7   : > { %5064 = vrot.lane.b32.xlu1 %v16606_v2, %s6259_s27  ;;  %v5275_v60 = vmul.f32 %v5179_v13, %v16604_v53  ;;  %v5148_v21 = vmul.f32 %v16602_v29, %v5103_v27  ;;  %v5173_v32 = vadd.f32 %v5141_v26, %v4988_v10  ;;  %v12906_v44 = vpop.permute.xlu0 %5022  ;;  %v4985_v10 = vadd.f32 %v4953_v36, %v4800_v43  ;;  %v16613_v36 = vld [vmem:[#allocation233_spill] sm:$0xff]  ;;  %v16705_v2 = vld [vmem:[#allocation171_spill] sm:$0xff] }
 0x6a8   : > { %16608 = vst [vmem:[#allocation135_spill] sm:$0xff] %v12906_v44  ;;  %v5110_v13 = vsel %vm2169_vm4, %v12906_v44, %v12756_v9  ;;  %5078 = vrot.lane.b32.xlu0 %v16610_v57, %s6259_s27  ;;  %v4961_v9 = vmul.f32 %v12343_v42, %v4926_v6  ;;  %v5300_v18 = vadd.f32 %v5268_v38, %v16612_v35  ;;  %v16624_v35 = vld [vmem:[#allocation22_spill] sm:$0xff]  ;;  %v16662_v42 = vld [vmem:[#allocation223_spill] sm:$0xff]  ;;  %v16706_v19 = vld [vmem:[#allocation17_spill] sm:$0xff] }
 0x6a9   : > { %v5180_v20 = vadd.f32 %v5148_v21, %v4995_v31  ;;  %v12908_v11 = vpop.permute.xlu1 %5056  ;;  %v5307_v61 = vadd.f32 %v5275_v60, %v12784_v16  ;;  %v5138_v15 = vmul.f32 %v16593_v52, %v5110_v13  ;;  %v4808_v16 = vmul.f32 %v16595_v7, %v4773_v25  ;;  %v16617_v25 = vld [vmem:[#allocation164_spill] sm:$0xff]  ;;  %v16655_v44 = vld [vmem:[#allocation210_spill] sm:$0xff] }
 0x6aa   : > { %16609 = vst [vmem:[#allocation91_spill] sm:$0xff] %v12908_v11  ;;  %v5099_v31 = vsel %vm2169_vm4, %v5049_v63, %v12908_v11  ;;  %v5269_v26 = vmul.f32 %v5173_v32, %v16613_v36  ;;  %v4136_v63 = vadd.f32 %v12774_v46, %v12758_v17  ;;  %v5210_v38 = vmul.f32 %v4655_v33, %v16617_v25  ;;  %v16618_v46 = vld [vmem:[#allocation61_spill] sm:$0xff]  ;;  %v16656_v11 = vld [vmem:[#allocation219_spill] sm:$0xff]  ;;  %v16658_v52 = vld [vmem:[#allocation200_spill] sm:$0xff] }
 0x6ab   : > { %5072 = vrot.lane.b32.xlu1 %v16611_v37, %s6259_s27  ;;  %v5276_v27 = vmul.f32 %v5180_v20, %v16607_v23  ;;  %v5149_v28 = vmul.f32 %v16602_v29, %v5099_v31  ;;  %v5974_v45 = vpack.c.bf16 %v5307_v61, %v5299_v55  ;;  %v12931_v43 = vpop.permute.xlu0 %4503  ;;  %v5170_v6 = vadd.f32 %v5138_v15, %v4985_v10  ;;  %v16616_v20 = vld [vmem:[#allocation189_spill] sm:$0xff]  ;;  %v16619_v31 = vld [vmem:[#allocation178_spill] sm:$0xff]  ;;  %v16667_v7 = vld [vmem:[#allocation20_spill] sm:$0xff] }
 0x6ac   : > { %16614 = vst [vmem:[#allocation43_spill] sm:$0xff] %v12931_v43  ;;  %4535 = vrot.lane.b32.xlu0 %v16616_v20, %s6258_s16  ;;  %v5202_v55 = vmul.f32 %v4647_v47, %v16617_v25  ;;  %v5245_v17 = vadd.f32 %v12787_v54, %v4136_v63  ;;  %v16620_v47 = vld [vmem:[#allocation176_spill] sm:$0xff]  ;;  %v4125_v15 = vadd.f32 %v12712_v62, %v12697_v22  ;;  %v16703_v57 = vld [vmem:[#allocation62_spill] sm:$0xff] }
 0x6ad   : > { %v5308_v60 = vadd.f32 %v5276_v27, %v12777_v58  ;;  %v5181_v21 = vadd.f32 %v5149_v28, %v4996_v5  ;;  %v12936_v13 = vpop.permute.xlu1 %5024  ;;  %5975 = vmatprep.subr.bf16.mxu0 %v5974_v45  ;;  %v4993_v58 = vadd.f32 %v4961_v9, %v4808_v16  ;;  %v3865_v33 = vsel %vm1236_vm2, %v16620_v47, %v16619_v31  ;;  %v16621_v54 = vld [vmem:[#allocation220_spill] sm:$0xff]  ;;  %v16623_v16 = vld [vmem:[#allocation83_spill] sm:$0xff]  ;;  %v16715_v25 = vld [vmem:[#allocation18_spill] sm:$0xff] }
 0x6ae   : > { %16615 = vst [vmem:[#allocation118_spill] sm:$0xff] %v12936_v13  ;;  %v5111_v32 = vsel %vm2169_vm4, %v12936_v13, %v12826_v0  ;;  %v4133_v0 = vadd.f32 %v12764_v30, %v12748_v48  ;;  %v5266_v9 = vmul.f32 %v5170_v6, %v16621_v54  ;;  %v16628_v62 = vld [vmem:[#allocation180_spill] sm:$0xff]  ;;  %v5234_v22 = vadd.f32 %v5202_v55, %v4125_v15 }
 0x6af   : > { %5080 = vrot.lane.b32.xlu1 %v16618_v46, %s6259_s27  ;;  %v5277_v5 = vmul.f32 %v5181_v21, %v16613_v36  ;;  %v5146_v61 = vmul.f32 %v16602_v29, %v5111_v32  ;;  %v5984_v10 = vpack.c.bf16 %v5308_v60, %v5300_v18  ;;  %v12959_v27 = vpop.permute.xlu0 %4511  ;;  %v5301_v18 = vadd.f32 %v5269_v26, %v16624_v35  ;;  %v16625_v60 = vld [vmem:[#allocation141_spill] sm:$0xff]  ;;  %v16626_v21 = vld [vmem:[#allocation84_spill] sm:$0xff] }
 0x6b0   : > { %4543 = vrot.lane.b32.xlu0 %v16623_v16, %s6258_s16  ;;  %v12969_v32 = vmul.f32 %v16626_v21, %v16625_v60  ;;  %v5242_v48 = vadd.f32 %v5210_v38, %v4133_v0  ;;  %v16631_v20 = vld [vmem:[#allocation224_spill] sm:$0xff]  ;;  %v13074_v3 = vsel %vm1645_vm3, %v16658_v52, %v16657_v56  ;;  %v13096_v52 = vsel %vm1645_vm3, %v16656_v11, %v16667_v7 }
 0x6b1   : > { %v5178_v28 = vadd.f32 %v5146_v61, %v4993_v58  ;;  %v12962_v45 = vpop.permute.xlu1 %4505  ;;  %v5309_v63 = vadd.f32 %v5277_v5, %v5245_v17  ;;  %v16629_v58 = vld [vmem:[#allocation137_spill] sm:$0xff]  ;;  %v3861_v26 = vsel %vm1236_vm2, %v16619_v31, %v16631_v20  ;;  %v5298_v17 = vadd.f32 %v5266_v9, %v5234_v22  ;;  %v16634_v20 = vld [vmem:[#allocation155_spill] sm:$0xff]  ;;  %16659 = vst [vmem:[#allocation32_spill] sm:$0xff] %v13074_v3 }
 0x6b2   : > { %16622 = vst [vmem:[#allocation96_spill] sm:$0xff] %v12962_v45  ;;  %16627 = vst [vmem:[#allocation175_spill] sm:$0xff] %v12969_v32  ;;  %v12975_v61 = vmul.f32 %v3865_v33, %v16629_v58  ;;  %v12990_v38 = vmul.f32 %v3861_v26, %v16625_v60  ;;  %v16637_v9 = vld [vmem:[#allocation27_spill] sm:$0xff]  ;;  %v16640_v60 = vld [vmem:[#allocation150_spill] sm:$0xff] }
 0x6b3   : > { %4537 = vrot.lane.b32.xlu1 %v16628_v62, %s6258_s16  ;;  %v5274_v30 = vmul.f32 %v5178_v28, %v16621_v54  ;;  %v5982_v6 = vpack.c.bf16 %v5309_v63, %v5301_v18  ;;  %v12977_v47 = vpop.permute.xlu0 %4519  ;;  %v16639_v63 = vld [vmem:[#allocation51_spill] sm:$0xff]  ;;  %v16647_v26 = vld [vmem:[#allocation234_spill] sm:$0xff]  ;;  %16668 = vst [vmem:[#allocation160_spill] sm:$0xff] %v13096_v52  ;;  %v16676_v52 = vld [vmem:[#allocation112_spill] sm:$0xff] }
 0x6b4   : > { %16630 = vst [vmem:[#allocation177_spill] sm:$0xff] %v12975_v61  ;;  %4551 = vrot.lane.b32.xlu0 %v12969_v32, %s6258_s16  ;;  %16632 = vst [vmem:[#allocation82_spill] sm:$0xff] %v12990_v38  ;;  %v16713_v54 = vld [vmem:[#allocation185_spill] sm:$0xff] }
 0x6b5   : > { %v5306_v5 = vadd.f32 %v5274_v30, %v5242_v48  ;;  %v12983_v35 = vpop.permute.xlu1 %4513  ;;  %5983 = vmatprep.subr.bf16.mxu1 %v5982_v6  ;;  %v16643_v48 = vld [vmem:[#allocation227_spill] sm:$0xff]  ;;  %v16644_v30 = vld [vmem:[#allocation174_spill] sm:$0xff] }
 0x6b6   : > { %5985 = vmatpush1.bf16.msra.mxu1 %v5984_v10  ;;  %v16636_v10 = vld [vmem:[#allocation172_spill] sm:$0xff] }
 0x6b7   : > { %4545 = vrot.lane.b32.xlu1 %v12975_v61, %s6258_s16  ;;  %v5976_v55 = vpack.c.bf16 %v5306_v5, %v5298_v17  ;;  %v12992_v33 = vpop.permute.xlu0 %4527  ;;  %v16648_v17 = vld [vmem:[#allocation229_spill] sm:$0xff]  ;;  %v16649_v5 = vld [vmem:[#allocation48_spill] sm:$0xff] }
 0x6b8   : > { %16633 = vst [vmem:[#allocation124_spill] sm:$0xff] %v12992_v33  ;;  %4728 = vrot.lane.b32.xlu0 %v16634_v20, %s6259_s27  ;;  %v16708_v20 = vld [vmem:[#allocation90_spill] sm:$0xff] }
 0x6b9   : > { %v12994_v15 = vpop.permute.xlu1 %4521  ;;  %5977 = vmatpush1.bf16.msra.mxu0 %v5976_v55  ;;  %v16650_v55 = vld [vmem:[#allocation194_spill] sm:$0xff] }
 0x6bb   : > { %4553 = vrot.lane.b32.xlu1 %v12990_v38, %s6258_s16  ;;  %v13000_v31 = vpop.permute.xlu0 %4696  ;;  %s14305_s16 = scalar_lea.vmem [#allocation3], %s5873_s4 }
 0x6bc   : > { %4736 = vrot.lane.b32.xlu0 %v16636_v10, %s6259_s27  ;;  %s5786_s1 = sshll.u32 %s14305_s16, 4  ;;  %s14358_s1 = int_to_ptr.vmem [resolvable:$true] %s5786_s1 }
 0x6bd   : > { %v13002_v0 = vpop.permute.xlu1 %4529  ;;  %s6190_s18 = scalar_lea.vmem %s14358_s1, 1024 }
 0x6be   : > { %16635 = vst [vmem:[#allocation7_spill] sm:$0xff] %v13002_v0  ;;  %p6191_p11 = scmp.ne.s32.totalorder %s14358_s1, %s6190_s18 }
 0x6bf   : > { %4730 = vrot.lane.b32.xlu1 %v16637_v9, %s6259_s27  ;;  %v13008_v28 = vpop.permute.xlu0 %4704  ;;  %v16651_v9 = vld [vmem:[#allocation202_spill] sm:$0xff] }
 0x6c0   : > { %4744 = vrot.lane.b32.xlu0 %v16639_v63, %s6259_s27  ;;  %v13036_v63 = vsel %vm1645_vm3, %v16650_v55, %v16649_v5  ;;  %p6192_p12 = pnand %p6191_p11, %p6367_p5 }
 0x6c1   : > { %v13010_v18 = vpop.permute.xlu1 %4698 }
 0x6c2   : > { %16638 = vst [vmem:[#allocation14_spill] sm:$0xff] %v13010_v18  ;;  %v16722_v18 = vld [vmem:[#allocation107_spill] sm:$0xff]  ;;  %p6193_p13 = pneg %p6192_p12 }
 0x6c3   : > { %4738 = vrot.lane.b32.xlu1 %v16640_v60, %s6259_s27  ;;  %v13016_v21 = vpop.permute.xlu0 %4712  ;;  %v16653_v60 = vld [vmem:[#allocation205_spill] sm:$0xff] }
 0x6c4   : > { %16641 = vst [vmem:[#allocation241_spill] sm:$0xff] %v13016_v21  ;;  %4881 = vrot.lane.b32.xlu0 %v16643_v48, %s6259_s27  ;;  %v16652_v48 = vld [vmem:[#allocation28_spill] sm:$0xff]  ;;  %v13048_v62 = vsel %vm1645_vm3, %v16649_v5, %v16653_v60  ;;  %v13062_v29 = vsel %vm1645_vm3, %v16653_v60, %v16655_v44  ;;  %v16663_v60 = vld [vmem:[#allocation214_spill] sm:$0xff] }
 0x6c5   : > { %v13018_v22 = vpop.permute.xlu1 %4706  ;;  %v13084_v40 = vsel %vm1645_vm3, %v16663_v60, %v16662_v42  ;;  %v16671_v60 = vld [vmem:[#allocation237_spill] sm:$0xff] }
 0x6c6   : > { %16642 = vst [vmem:[#allocation152_spill] sm:$0xff] %v13018_v22  ;;  %16664 = vst [vmem:[#allocation228_spill] sm:$0xff] %v13084_v40  ;;  %v16702_v40 = vld [vmem:[#allocation186_spill] sm:$0xff] }
 0x6c7   : > { %4746 = vrot.lane.b32.xlu1 %v16644_v30, %s6259_s27  ;;  %v13024_v6 = vpop.permute.xlu0 %4720  ;;  %v13042_v30 = vsel %vm1645_vm3, %v16652_v48, %v16651_v9  ;;  %v4022_v46 = vmul.f32 %v16702_v40, %v16701_v51  ;;  %v4021_v37 = vmul.f32 %v16702_v40, %v16705_v2  ;;  %v16710_v51 = vld [vmem:[#allocation129_spill] sm:$0xff] }
 0x6c8   : > { %16645 = vst [vmem:[#allocation170_spill] sm:$0xff] %v13024_v6  ;;  %4889 = vrot.lane.b32.xlu0 %v16647_v26, %s6259_s27  ;;  %v4028_v10 = vmul.f32 %v16709_v4, %v16710_v51  ;;  %v16714_v2 = vld [vmem:[#allocation173_spill] sm:$0xff]  ;;  %v16719_v6 = vld [vmem:[#allocation40_spill] sm:$0xff] }
 0x6c9   : > { %v13026_v58 = vpop.permute.xlu1 %4714  ;;  %v3973_v36 = vmul.f32 %v16715_v25, %v16714_v2 }
 0x6ca   : > { %16646 = vst [vmem:[#allocation79_spill] sm:$0xff] %v13026_v58  ;;  %v16721_v58 = vld [vmem:[#allocation104_spill] sm:$0xff] }
 0x6cb   : > { %4883 = vrot.lane.b32.xlu1 %v16648_v17, %s6259_s27  ;;  %v13050_v26 = vpop.permute.xlu0 %4849  ;;  %v16654_v17 = vld [vmem:[#allocation74_spill] sm:$0xff] }
 0x6cc   : > { %v13056_v13 = vsel %vm1645_vm3, %v16651_v9, %v16654_v17  ;;  %v13068_v5 = vsel %vm1645_vm3, %v16654_v17, %v16656_v11  ;;  %4897 = vrot.lane.b32.xlu0 %v16661_v1, %s6259_s27  ;;  %v13090_v17 = vsel %vm1645_vm3, %v16655_v44, %v16665_v8  ;;  %v13102_v1 = vsel %vm1645_vm3, %v16657_v56, %v16669_v39 }
 0x6cd   : > { %v13076_v9 = vpop.permute.xlu1 %4722  ;;  %16666 = vst [vmem:[#allocation196_spill] sm:$0xff] %v13090_v17  ;;  %16670 = vst [vmem:[#allocation111_spill] sm:$0xff] %v13102_v1  ;;  %v13110_v44 = vsel %vm1645_vm3, %v16662_v42, %v16672_v49  ;;  %v16674_v17 = vld [vmem:[#allocation221_spill] sm:$0xff]  ;;  %v13122_v56 = vsel %vm1645_vm3, %v16667_v7, %v16676_v52  ;;  %v16678_v1 = vld [vmem:[#allocation12_spill] sm:$0xff] }
 0x6ce   : > { %16660 = vst [vmem:[#allocation195_spill] sm:$0xff] %v13076_v9  ;;  %16673 = vst [vmem:[#allocation169_spill] sm:$0xff] %v13110_v44  ;;  %v13116_v11 = vsel %vm1645_vm3, %v16665_v8, %v16674_v17  ;;  %v16680_v42 = vld [vmem:[#allocation190_spill] sm:$0xff]  ;;  %v16682_v8 = vld [vmem:[#allocation31_spill] sm:$0xff] }
 0x6cf   : > { %4891 = vrot.lane.b32.xlu1 %v16671_v60, %s6259_s27  ;;  %16675 = vst [vmem:[#allocation145_spill] sm:$0xff] %v13116_v11  ;;  %16677 = vst [vmem:[#allocation120_spill] sm:$0xff] %v13122_v56  ;;  %v13128_v60 = vsel %vm1645_vm3, %v16669_v39, %v16678_v1  ;;  %v13134_v44 = vsel %vm1645_vm3, %v16672_v49, %v16680_v42  ;;  %v13140_v11 = vsel %vm1645_vm3, %v16674_v17, %v16682_v8  ;;  %v16684_v7 = vld [vmem:[#allocation64_spill] sm:$0xff]  ;;  %v16686_v39 = vld [vmem:[#allocation179_spill] sm:$0xff]  ;;  %v13154_v49 = vpop.permute.xlu0 %4857 }
 0x6d0   : > { %16679 = vst [vmem:[#allocation33_spill] sm:$0xff] %v13128_v60  ;;  %16681 = vst [vmem:[#allocation242_spill] sm:$0xff] %v13134_v44  ;;  %v13146_v56 = vsel %vm1645_vm3, %v16676_v52, %v16684_v7  ;;  %v13152_v60 = vsel %vm1645_vm3, %v16678_v1, %v16686_v39  ;;  %v16688_v44 = vld [vmem:[#allocation25_spill] sm:$0xff]  ;;  %v16692_v39 = vld [vmem:[#allocation26_spill] sm:$0xff]  ;;  %5066 = vrot.lane.b32.xlu0 %v16623_v16, %s6259_s27 }
 0x6d1   : > { %16683 = vst [vmem:[#allocation63_spill] sm:$0xff] %v13140_v11  ;;  %16685 = vst [vmem:[#allocation122_spill] sm:$0xff] %v13146_v56  ;;  %v13160_v17 = vsel %vm1645_vm3, %v16680_v42, %v16688_v44  ;;  %v16690_v11 = vld [vmem:[#allocation46_spill] sm:$0xff]  ;;  %v13178_v56 = vsel %vm1645_vm3, %v16684_v7, %v16692_v39  ;;  %v13180_v44 = vpop.permute.xlu1 %4851  ;;  %v13188_v42 = vsel %vm1645_vm3, %v16692_v39, %v16652_v48  ;;  %v16704_v39 = vld [vmem:[#allocation100_spill] sm:$0xff] }
 0x6d2   : > { %16687 = vst [vmem:[#allocation123_spill] sm:$0xff] %v13152_v60  ;;  %16689 = vst [vmem:[#allocation128_spill] sm:$0xff] %v13160_v17  ;;  %v13166_v52 = vsel %vm1645_vm3, %v16682_v8, %v16690_v11  ;;  %v13172_v1 = vsel %vm1645_vm3, %v16690_v11, %v16650_v55  ;;  %v16695_v8 = vld [vmem:[#allocation191_spill] sm:$0xff]  ;;  %v4020_v48 = vmul.f32 %v16702_v40, %v16703_v57  ;;  %v16711_v57 = vld [vmem:[#allocation77_spill] sm:$0xff] }
 0x6d3   : > { %16691 = vst [vmem:[#allocation34_spill] sm:$0xff] %v13166_v52  ;;  %16693 = vst [vmem:[#allocation60_spill] sm:$0xff] %v13178_v56  ;;  %v16696_v55 = vld [vmem:[#allocation35_spill] sm:$0xff]  ;;  %v16697_v52 = vld [vmem:[#allocation53_spill] sm:$0xff]  ;;  %v13214_v14 = vpop.permute.xlu0 %4865  ;;  %v4029_v12 = vmul.f32 %v16709_v4, %v16711_v57  ;;  %v4400_v57 = vsel %vm1645_vm3, %v16695_v8, %v16719_v6 }
 0x6d4   : > { %16694 = vst [vmem:[#allocation58_spill] sm:$0xff] %v13180_v44  ;;  %v4404_v11 = vsel %vm1645_vm3, %v16696_v55, %v16695_v8  ;;  %v16698_v17 = vld [vmem:[#allocation215_spill] sm:$0xff]  ;;  %5074 = vrot.lane.b32.xlu0 %v12969_v32, %s6259_s27  ;;  %v16718_v9 = vld [vmem:[#allocation106_spill] sm:$0xff]  ;;  %v3972_v32 = vmul.f32 %v16715_v25, %v16721_v58 }
 0x6d5   : > { %v3965_v7 = vmul.f32 %v16698_v17, %v16697_v52  ;;  %v16699_v56 = vld [vmem:[#allocation23_spill] sm:$0xff]  ;;  %v3964_v3 = vmul.f32 %v16698_v17, %v16704_v39  ;;  %v16707_v52 = vld [vmem:[#allocation70_spill] sm:$0xff]  ;;  %v13224_v23 = vpop.permute.xlu1 %4859  ;;  %v13232_v51 = vmul.f32 %v16698_v17, %v16718_v9  ;;  %v16723_v9 = vld [vmem:[#allocation168_spill] sm:$0xff] }
 0x6d6   : > { %4899 = vrot.lane.b32.xlu1 %v16699_v56, %s6259_s27  ;;  %v16700_v60 = vld [vmem:[#allocation243_spill] sm:$0xff]  ;;  %v4405_v56 = vsel %vm1645_vm3, %v16707_v52, %v16706_v19  ;;  %16716 = vst [vmem:[#allocation10_spill] sm:$0xff] %v13224_v23 }
 0x6d7   : > { %v3963_v16 = vmul.f32 %v16698_v17, %v16700_v60  ;;  %v4030_v60 = vmul.f32 %v16709_v4, %v16708_v20  ;;  %v16712_v39 = vld [vmem:[#allocation103_spill] sm:$0xff]  ;;  %v16717_v20 = vld [vmem:[#allocation204_spill] sm:$0xff]  ;;  %v4401_v17 = vsel %vm1645_vm3, %v16706_v19, %v16723_v9  ;;  %v4054_v22 = vadd.f32 %v4022_v46, %v3965_v7  ;;  %v13258_v58 = vpop.permute.xlu0 %4873 }
 0x6d8   : > { %v4111_v24 = vmul.f32 %v16713_v54, %v16712_v39  ;;  %v4110_v53 = vmul.f32 %v16713_v54, %v16717_v20  ;;  %v16720_v39 = vld [vmem:[#allocation66_spill] sm:$0xff]  ;;  %v13246_v20 = vmul.f32 %v16715_v25, %v16722_v18  ;;  %v4053_v44 = vadd.f32 %v4021_v37, %v3964_v3  ;;  %16726 = vst [vmem:[#allocation11_spill] sm:$0xff] %v13258_v58  ;;  %v16730_v3 = vld [vmem:[#allocation188_spill] sm:$0xff] }
 0x6d9   : > { %v3971_v2 = vmul.f32 %v16715_v25, %v16720_v39  ;;  %v13252_v8 = vadd.f32 %v4020_v48, %v3963_v16  ;;  %v4062_v23 = vadd.f32 %v4030_v60, %v3973_v36  ;;  %v4061_v18 = vadd.f32 %v4029_v12, %v3972_v32  ;;  %v16728_v25 = vld [vmem:[#allocation157_spill] sm:$0xff]  ;;  %v13268_v16 = vpop.permute.xlu1 %4867  ;;  %5082 = vrot.lane.b32.xlu0 %v16730_v3, %s6259_s27  ;;  %v16731_v37 = vld [vmem:[#allocation30_spill] sm:$0xff] }
 0x6da   : > { %5068 = vrot.lane.b32.xlu1 %v12975_v61, %s6259_s27  ;;  %v16725_v61 = vld [vmem:[#allocation56_spill] sm:$0xff]  ;;  %v4397_v19 = vsel %vm1645_vm3, %v16723_v9, %v16728_v25  ;;  %v13266_v46 = vadd.f32 %v4111_v24, %v4054_v22  ;;  %16729 = vst [vmem:[#allocation99_spill] sm:$0xff] %v13268_v16  ;;  %v13274_v36 = vmul.f32 %v16713_v54, %v16731_v37  ;;  %v16733_v32 = vld [vmem:[#allocation69_spill] sm:$0xff]  ;;  %v16738_v37 = vld [vmem:[#allocation127_spill] sm:$0xff] }
 0x6db   : > { %16724 = vst [vmem:[#allocation49_spill] sm:$0xff] %v13252_v8  ;;  %v4396_v39 = vsel %vm1645_vm3, %v16719_v6, %v16725_v61  ;;  %v13260_v21 = vadd.f32 %v4028_v10, %v3971_v2  ;;  %v13276_v6 = vadd.f32 %v4110_v53, %v4053_v44  ;;  %v4589_v12 = vsel %vm1645_vm3, %v12931_v43, %v12959_v27  ;;  %v16734_v10 = vld [vmem:[#allocation153_spill] sm:$0xff]  ;;  %v5331_v53 = vld [vmem:[%s14412_s10] sm:$0xff]  ;;  %v16735_v44 = vld [vmem:[#allocation92_spill] sm:$0xff] }
 0x6dc   : > { %16732 = vst [vmem:[#allocation216_spill] sm:$0xff] %v13274_v36  ;;  %v4585_v24 = vsel %vm1645_vm3, %v12959_v27, %v12977_v47  ;;  %v4119_v22 = vmul.f32 %v16734_v10, %v16733_v32  ;;  %v13295_v7 = vmul.f32 %v16734_v10, %v16735_v44  ;;  %v16737_v48 = vld [vmem:[#allocation197_spill] sm:$0xff]  ;;  %v4590_v27 = vsel %vm1645_vm3, %v12962_v45, %v12983_v35  ;;  %v13309_v44 = vpop.permute.xlu0 %4559  ;;  %v16741_v25 = vld [vmem:[#allocation95_spill] sm:$0xff] }
 0x6dd   : > { %16727 = vst [vmem:[#allocation80_spill] sm:$0xff] %v13260_v21  ;;  %v4447_v60 = vmul.f32 %v16737_v48, %v4404_v11  ;;  %v4448_v2 = vmul.f32 %v16737_v48, %v4400_v57  ;;  %v4586_v9 = vsel %vm1645_vm3, %v12983_v35, %v12994_v15  ;;  %v4455_v32 = vmul.f32 %v16738_v37, %v4405_v56  ;;  %v16743_v21 = vld [vmem:[#allocation72_spill] sm:$0xff]  ;;  %v13321_v8 = vpop.permute.xlu1 %4875 }
 0x6de   : > { %5076 = vrot.lane.b32.xlu1 %v12990_v38, %s6259_s27  ;;  %16736 = vst [vmem:[#allocation182_spill] sm:$0xff] %v13295_v7  ;;  %v4456_v3 = vmul.f32 %v16738_v37, %v4401_v17  ;;  %16739 = vst [vmem:[#allocation213_spill] sm:$0xff] %v13309_v44  ;;  %v16740_v38 = vld [vmem:[#allocation19_spill] sm:$0xff]  ;;  %v4023_v61 = vmul.f32 %v16702_v40, %v16741_v25  ;;  %v16742_v7 = vld [vmem:[#allocation144_spill] sm:$0xff]  ;;  %v4632_v36 = vmul.f32 %v16743_v21, %v4589_v12 }
 0x6df   : > { %v4118_v11 = vmul.f32 %v16734_v10, %v16740_v38  ;;  %v4294_v57 = vmul.f32 %v16742_v7, %v13036_v63  ;;  %v4295_v35 = vmul.f32 %v16742_v7, %v13048_v62  ;;  %v4633_v56 = vmul.f32 %v16743_v21, %v4585_v24  ;;  %16744 = vst [vmem:[#allocation178_spill] sm:$0xff] %v13321_v8  ;;  %v16745_v17 = vld [vmem:[#allocation184_spill] sm:$0xff]  ;;  %v16746_v38 = vld [vmem:[#allocation45_spill] sm:$0xff] }
 0x6e0   : > { %5334 = vperm.xlu0 %6051, %v5331_v53   ;;  %v4302_v45 = vmul.f32 %v16745_v17, %v13042_v30  ;;  %v4640_v44 = vmul.f32 %v16746_v38, %v4590_v27  ;;  %v4303_v25 = vmul.f32 %v16745_v17, %v13056_v13  ;;  %v4641_v63 = vmul.f32 %v16746_v38, %v4586_v9  ;;  %v16747_v12 = vld [vmem:[#allocation16_spill] sm:$0xff]  ;;  %v16748_v53 = vld [vmem:[#allocation225_spill] sm:$0xff]  ;;  %v13338_v13 = vpop.permute.xlu0 %4688 }
 0x6e1   : > { %v4479_v40 = vadd.f32 %v4447_v60, %v4294_v57  ;;  %v4480_v62 = vadd.f32 %v4448_v2, %v4295_v35  ;;  %v4581_v24 = vsel %vm1645_vm3, %v12977_v47, %v12992_v33  ;;  %v4031_v30 = vmul.f32 %v16709_v4, %v16748_v53  ;;  %16749 = vst [vmem:[#allocation176_spill] sm:$0xff] %v13338_v13  ;;  %v16750_v9 = vld [vmem:[#allocation136_spill] sm:$0xff]  ;;  %v13342_v57 = vpop.permute.xlu1 %4561 }
 0x6e2   : > { %5084 = vrot.lane.b32.xlu1 %v16747_v12, %s6259_s27  ;;  %v4487_v8 = vadd.f32 %v4455_v32, %v4302_v45  ;;  %v4488_v27 = vadd.f32 %v4456_v3, %v4303_v25  ;;  %v4449_v43 = vmul.f32 %v16737_v48, %v4396_v39  ;;  %v4112_v16 = vmul.f32 %v16713_v54, %v16750_v9  ;;  %v16752_v39 = vld [vmem:[#allocation67_spill] sm:$0xff] }
 0x6e3   : > { %v4664_v12 = vadd.f32 %v4632_v36, %v4479_v40  ;;  %v4665_v60 = vadd.f32 %v4633_v56, %v4480_v62  ;;  %v4151_v2 = vadd.f32 %v4119_v22, %v4062_v23  ;;  %16751 = vst [vmem:[#allocation22_spill] sm:$0xff] %v13342_v57  ;;  %v4150_v35 = vadd.f32 %v4118_v11, %v4061_v18  ;;  %v16753_v32 = vld [vmem:[#allocation207_spill] sm:$0xff] }
 0x6e4   : > { %v4672_v58 = vadd.f32 %v4640_v44, %v4487_v8  ;;  %v4673_v47 = vadd.f32 %v4641_v63, %v4488_v27  ;;  %v4296_v53 = vmul.f32 %v16742_v7, %v13062_v29  ;;  %v4634_v45 = vmul.f32 %v16743_v21, %v4581_v24  ;;  %v13364_v22 = vpop.permute.xlu0 %4841  ;;  %v16756_v63 = vld [vmem:[#allocation209_spill] sm:$0xff] }
 0x6e5   : > { %v4408_v3 = vsel %vm1645_vm3, %v16752_v39, %v16696_v55  ;;  %v4409_v40 = vsel %vm1645_vm3, %v16753_v32, %v16707_v52  ;;  %v4304_v23 = vmul.f32 %v16745_v17, %v13068_v5  ;;  %v4055_v8 = vadd.f32 %v4023_v61, %v13232_v51  ;;  %16754 = vst [vmem:[#allocation141_spill] sm:$0xff] %v13364_v22  ;;  %v13371_v61 = vpop.permute.xlu1 %4690 }
 0x6e6   : > { %v4481_v18 = vadd.f32 %v4449_v43, %v4296_v53  ;;  %v4457_v29 = vmul.f32 %v16738_v37, %v4397_v19  ;;  %v4582_v36 = vsel %vm1645_vm3, %v12994_v15, %v13002_v0  ;;  %v4446_v55 = vmul.f32 %v16737_v48, %v4408_v3  ;;  %16755 = vst [vmem:[#allocation84_spill] sm:$0xff] %v13371_v61  ;;  %v16759_v3 = vld [vmem:[#allocation50_spill] sm:$0xff] }
 0x6e7   : > { %v5219_v44 = vmul.f32 %v4664_v12, %v16583_v59  ;;  %v5220_v52 = vmul.f32 %v4665_v60, %v16513_v41  ;;  %v4293_v5 = vmul.f32 %v16742_v7, %v13172_v1  ;;  %v4454_v43 = vmul.f32 %v16738_v37, %v4409_v40  ;;  %v16775_v7 = vld [vmem:[#allocation178_spill] sm:$0xff]  ;;  %v16854_v37 = vld [vmem:[#allocation228_spill] sm:$0xff] }
 0x6e8   : > { %v5227_v51 = vmul.f32 %v4672_v58, %v16583_v59  ;;  %v5228_v19 = vmul.f32 %v4673_v47, %v16513_v41  ;;  %v4666_v15 = vadd.f32 %v4634_v45, %v4481_v18  ;;  %v4923_v11 = vsel %vm2169_vm4, %v13050_v26, %v13154_v49  ;;  %v13393_v62 = vpop.permute.xlu0 %5034 }
 0x6e9   : > { %v4642_v56 = vmul.f32 %v16746_v38, %v4582_v36  ;;  %v4301_v25 = vmul.f32 %v16745_v17, %v13188_v42  ;;  %v13383_v1 = vadd.f32 %v4031_v30, %v13246_v20  ;;  %v13387_v12 = vmul.f32 %v16734_v10, %v16756_v63  ;;  %v16757_v20 = vld [vmem:[#allocation163_spill] sm:$0xff]  ;;  %v13403_v9 = vpop.permute.xlu1 %4843  ;;  %v16764_v36 = vld [vmem:[#allocation14_spill] sm:$0xff]  ;;  %v16769_v63 = vld [vmem:[#allocation24_spill] sm:$0xff] }
 0x6ea   : > { %v4489_v59 = vadd.f32 %v4457_v29, %v4304_v23  ;;  %v4770_v41 = vsel %vm2169_vm4, %v13000_v31, %v13008_v28  ;;  %v4478_v58 = vadd.f32 %v4446_v55, %v4293_v5  ;;  %v13395_v24 = vadd.f32 %v4112_v16, %v4055_v8  ;;  %16758 = vst [vmem:[#allocation137_spill] sm:$0xff] %v13403_v9  ;;  %v16760_v23 = vld [vmem:[#allocation241_spill] sm:$0xff]  ;;  %v16762_v8 = vld [vmem:[#allocation58_spill] sm:$0xff]  ;;  %v16763_v29 = vld [vmem:[#allocation152_spill] sm:$0xff] }
 0x6eb   : > { %v13398_v42 = vadd.f32 %v5220_v52, %v13266_v46  ;;  %v4970_v30 = vmul.f32 %v16757_v20, %v4923_v11  ;;  %v13401_v27 = vadd.f32 %v4454_v43, %v4301_v25  ;;  %v13406_v60 = vadd.f32 %v5219_v44, %v13276_v6  ;;  %v16766_v44 = vld [vmem:[#allocation170_spill] sm:$0xff]  ;;  %v16767_v52 = vld [vmem:[#allocation195_spill] sm:$0xff] }
 0x6ec   : > { %v13408_v47 = vadd.f32 %v5228_v19, %v4151_v2  ;;  %v13411_v53 = vmul.f32 %v4666_v15, %v16517_v50  ;;  %v4919_v46 = vsel %vm2169_vm4, %v13154_v49, %v13214_v14  ;;  %v13417_v16 = vadd.f32 %v5227_v51, %v4150_v35  ;;  %v16761_v2 = vld [vmem:[#allocation10_spill] sm:$0xff]  ;;  %v16765_v35 = vld [vmem:[#allocation79_spill] sm:$0xff]  ;;  %v5043_v43 = vpop.permute.xlu0 %5042 }
 0x6ed   : > { %v4674_v45 = vadd.f32 %v4642_v56, %v4489_v59  ;;  %v4817_v40 = vmul.f32 %v16759_v3, %v4770_v41  ;;  %v4766_v6 = vsel %vm2169_vm4, %v13008_v28, %v16760_v23  ;;  %v4924_v18 = vsel %vm2169_vm4, %v16762_v8, %v16761_v2  ;;  %v16768_v15 = vld [vmem:[#allocation11_spill] sm:$0xff]  ;;  %v13449_v56 = vpop.permute.xlu1 %5036 }
 0x6ee   : > { %v4771_v49 = vsel %vm2169_vm4, %v16764_v36, %v16763_v29  ;;  %v4767_v55 = vsel %vm2169_vm4, %v16763_v29, %v16765_v35  ;;  %v4762_v28 = vsel %vm2169_vm4, %v16760_v23, %v16766_v44  ;;  %v4763_v5 = vsel %vm2169_vm4, %v16765_v35, %v16767_v52  ;;  %v16770_v41 = vld [vmem:[#allocation99_spill] sm:$0xff]  ;;  %v16773_v29 = vld [vmem:[#allocation113_spill] sm:$0xff] }
 0x6ef   : > { %v5002_v51 = vadd.f32 %v4970_v30, %v4817_v40  ;;  %v4971_v19 = vmul.f32 %v16757_v20, %v4919_v46  ;;  %v4915_v11 = vsel %vm2169_vm4, %v13214_v14, %v16768_v15  ;;  %v5108_v25 = vsel %vm2169_vm4, %v13393_v62, %v5043_v43  ;;  %v16771_v40 = vld [vmem:[#allocation43_spill] sm:$0xff]  ;;  %v16772_v46 = vld [vmem:[#allocation213_spill] sm:$0xff] }
 0x6f0   : > { %v4978_v59 = vmul.f32 %v16769_v63, %v4924_v18  ;;  %v4920_v30 = vsel %vm2169_vm4, %v16761_v2, %v16770_v41  ;;  %v4593_v23 = vsel %vm1645_vm3, %v16772_v46, %v16771_v40  ;;  %v5155_v14 = vmul.f32 %v16773_v29, %v5108_v25  ;;  %v16774_v15 = vld [vmem:[#allocation143_spill] sm:$0xff]  ;;  %v5051_v25 = vpop.permute.xlu0 %5050 }
 0x6f1   : > { %v13465_v35 = vmul.f32 %v4674_v45, %v16517_v50  ;;  %v4825_v52 = vmul.f32 %v16774_v15, %v4771_v49  ;;  %v4818_v44 = vmul.f32 %v16759_v3, %v4766_v6  ;;  %v4819_v18 = vmul.f32 %v16759_v3, %v4762_v28  ;;  %v5045_v6 = vpop.permute.xlu1 %5044  ;;  %v16845_v17 = vld [vmem:[#allocation115_spill] sm:$0xff] }
 0x6f2   : > { %v4826_v32 = vmul.f32 %v16774_v15, %v4767_v55  ;;  %v4972_v2 = vmul.f32 %v16757_v20, %v4915_v11  ;;  %v4916_v40 = vsel %vm2169_vm4, %v16770_v41, %v16775_v7  ;;  %v5187_v46 = vadd.f32 %v5155_v14, %v5002_v51  ;;  %v16776_v14 = vld [vmem:[#allocation96_spill] sm:$0xff] }
 0x6f3   : > { %v4827_v50 = vmul.f32 %v16774_v15, %v4763_v5  ;;  %v4979_v45 = vmul.f32 %v16769_v63, %v4920_v30  ;;  %v4631_v49 = vmul.f32 %v16743_v21, %v4593_v23  ;;  %v5104_v28 = vsel %vm2169_vm4, %v5043_v43, %v5051_v25  ;;  %v16778_v30 = vld [vmem:[#allocation232_spill] sm:$0xff] }
 0x6f4   : > { %v5010_v55 = vadd.f32 %v4978_v59, %v4825_v52  ;;  %v5003_v33 = vadd.f32 %v4971_v19, %v4818_v44  ;;  %v5109_v11 = vsel %vm2169_vm4, %v13449_v56, %v5045_v6  ;;  %v5156_v41 = vmul.f32 %v16773_v29, %v5104_v28  ;;  %v16777_v52 = vld [vmem:[#allocation131_spill] sm:$0xff]  ;;  %v13500_v28 = vpop.permute.xlu0 %5058 }
 0x6f5   : > { %v4980_v51 = vmul.f32 %v16769_v63, %v4916_v40  ;;  %v4594_v5 = vsel %vm1645_vm3, %v13342_v57, %v16776_v14  ;;  %v4927_v43 = vsel %vm2169_vm4, %v13364_v22, %v13050_v26  ;;  %v5163_v44 = vmul.f32 %v16777_v52, %v5109_v11  ;;  %16779 = vst [vmem:[#allocation224_spill] sm:$0xff] %v13500_v28  ;;  %v5053_v21 = vpop.permute.xlu1 %5052  ;;  %v16833_v22 = vld [vmem:[#allocation78_spill] sm:$0xff] }
 0x6f6   : > { %v5004_v19 = vadd.f32 %v4972_v2, %v4819_v18  ;;  %v4774_v59 = vsel %vm2169_vm4, %v13338_v13, %v13000_v31  ;;  %v5283_v23 = vmul.f32 %v5187_v46, %v16778_v30  ;;  %v5188_v40 = vadd.f32 %v5156_v41, %v5003_v33 }
 0x6f7   : > { %v5011_v7 = vadd.f32 %v4979_v45, %v4826_v32  ;;  %v4663_v14 = vadd.f32 %v4631_v49, %v4478_v58  ;;  %v5195_v57 = vadd.f32 %v5163_v44, %v5010_v55  ;;  %v5100_v26 = vsel %vm2169_vm4, %v5051_v25, %v13500_v28  ;;  %v16780_v49 = vld [vmem:[#allocation231_spill] sm:$0xff] }
 0x6f8   : > { %v4639_v18 = vmul.f32 %v16746_v38, %v4594_v5  ;;  %v4969_v2 = vmul.f32 %v16757_v20, %v4927_v43  ;;  %v5105_v31 = vsel %vm2169_vm4, %v5045_v6, %v5053_v21  ;;  %v5157_v46 = vmul.f32 %v16773_v29, %v5100_v26  ;;  %v13522_v55 = vpop.permute.xlu0 %5026  ;;  %v16783_v26 = vld [vmem:[#allocation233_spill] sm:$0xff] }
 0x6f9   : > { %v5012_v33 = vadd.f32 %v4980_v51, %v4827_v50  ;;  %v4816_v11 = vmul.f32 %v16759_v3, %v4774_v59  ;;  %v5291_v32 = vmul.f32 %v5195_v57, %v16778_v30  ;;  %v5164_v58 = vmul.f32 %v16777_v52, %v5105_v31  ;;  %16781 = vst [vmem:[#allocation48_spill] sm:$0xff] %v13522_v55  ;;  %v13525_v51 = vpop.permute.xlu1 %5060  ;;  %v16840_v20 = vld [vmem:[#allocation65_spill] sm:$0xff]  ;;  %v16841_v3 = vld [vmem:[#allocation138_spill] sm:$0xff] }
 0x6fa   : > { %v4775_v25 = vsel %vm2169_vm4, %v13371_v61, %v16764_v36  ;;  %v4928_v45 = vsel %vm2169_vm4, %v13403_v9, %v16762_v8  ;;  %v5284_v6 = vmul.f32 %v5188_v40, %v16780_v49  ;;  %v5315_v50 = vadd.f32 %v5283_v23, %v13406_v60  ;;  %16782 = vst [vmem:[#allocation194_spill] sm:$0xff] %v13525_v51  ;;  %v16829_v9 = vld [vmem:[#allocation133_spill] sm:$0xff] }
 0x6fb   : > { %v5196_v41 = vadd.f32 %v5164_v58, %v5011_v7  ;;  %v5189_v57 = vadd.f32 %v5157_v46, %v5004_v19  ;;  %v5112_v36 = vsel %vm2169_vm4, %v13522_v55, %v13393_v62  ;;  %v5323_v5 = vadd.f32 %v5291_v32, %v13417_v16  ;;  %v16786_v58 = vld [vmem:[#allocation49_spill] sm:$0xff]  ;;  %v16824_v55 = vld [vmem:[#allocation56_spill] sm:$0xff] }
 0x6fc   : > { %v4671_v43 = vadd.f32 %v4639_v18, %v13401_v27  ;;  %v5001_v8 = vadd.f32 %v4969_v2, %v4816_v11  ;;  %v5101_v44 = vsel %vm2169_vm4, %v5053_v21, %v13525_v51  ;;  %v5154_v60 = vmul.f32 %v16773_v29, %v5112_v36  ;;  %v13542_v23 = vpop.permute.xlu0 %4531  ;;  %v16785_v11 = vld [vmem:[#allocation164_spill] sm:$0xff]  ;;  %v16832_v29 = vld [vmem:[#allocation193_spill] sm:$0xff] }
 0x6fd   : > { %v4977_v7 = vmul.f32 %v16769_v63, %v4928_v45  ;;  %v5292_v19 = vmul.f32 %v5196_v41, %v16780_v49  ;;  %v5165_v59 = vmul.f32 %v16777_v52, %v5101_v44  ;;  %v5978_v30 = vpack.c.bf16 %v5323_v5, %v5315_v50  ;;  %v13550_v46 = vpop.permute.xlu1 %5028  ;;  %v16788_v49 = vld [vmem:[#allocation80_spill] sm:$0xff]  ;;  %v16790_v50 = vld [vmem:[#allocation147_spill] sm:$0xff]  ;;  %v16791_v41 = vld [vmem:[#allocation222_spill] sm:$0xff] }
 0x6fe   : > { %v4824_v62 = vmul.f32 %v16774_v15, %v4775_v25  ;;  %v5316_v16 = vadd.f32 %v5284_v6, %v13398_v42  ;;  %v4152_v27 = vadd.f32 %v13387_v12, %v13383_v1  ;;  %v5253_v21 = vadd.f32 %v13411_v53, %v13395_v24  ;;  %16784 = vst [vmem:[#allocation202_spill] sm:$0xff] %v13550_v46  ;;  %v16787_v25 = vld [vmem:[#allocation216_spill] sm:$0xff]  ;;  %v16836_v63 = vld [vmem:[#allocation157_spill] sm:$0xff] }
 0x6ff   : > { %v5324_v40 = vadd.f32 %v5292_v19, %v13408_v47  ;;  %v5285_v18 = vmul.f32 %v5189_v57, %v16783_v26  ;;  %v5197_v2 = vadd.f32 %v5165_v59, %v5012_v33  ;;  %v5186_v31 = vadd.f32 %v5154_v60, %v5001_v8  ;;  %5979 = vmatprep.subr.bf16.mxu0 %v5978_v30  ;;  %v16793_v5 = vld [vmem:[#allocation220_spill] sm:$0xff]  ;;  %v16794_v19 = vld [vmem:[#allocation97_spill] sm:$0xff] }
 0x700   : > { %v5218_v32 = vmul.f32 %v4663_v14, %v16785_v11  ;;  %v5226_v42 = vmul.f32 %v4671_v43, %v16785_v11  ;;  %v5113_v1 = vsel %vm2169_vm4, %v13550_v46, %v13449_v56  ;;  %v5261_v12 = vadd.f32 %v13465_v35, %v4152_v27  ;;  %v16789_v14 = vld [vmem:[#allocation182_spill] sm:$0xff]  ;;  %v13567_v36 = vpop.permute.xlu0 %4539  ;;  %v16792_v56 = vld [vmem:[#allocation148_spill] sm:$0xff] }
 0x701   : > { %v5009_v24 = vadd.f32 %v4977_v7, %v4824_v62  ;;  %v5293_v47 = vmul.f32 %v5197_v2, %v16783_v26  ;;  %v5162_v53 = vmul.f32 %v16777_v52, %v5113_v1  ;;  %v5988_v33 = vpack.c.bf16 %v5324_v40, %v5316_v16  ;;  %v13572_v44 = vpop.permute.xlu1 %4533  ;;  %v16795_v59 = vld [vmem:[#allocation212_spill] sm:$0xff]  ;;  %v16796_v62 = vld [vmem:[#allocation134_spill] sm:$0xff]  ;;  %v16797_v16 = vld [vmem:[#allocation21_spill] sm:$0xff] }
 0x702   : > { %v4141_v45 = vadd.f32 %v16787_v25, %v16786_v58  ;;  %v4149_v6 = vadd.f32 %v16789_v14, %v16788_v49  ;;  %v3951_v57 = vmul.f32 %v16791_v41, %v16790_v50  ;;  %v3953_v35 = vmul.f32 %v16791_v41, %v16792_v56  ;;  %v16798_v40 = vld [vmem:[#allocation149_spill] sm:$0xff]  ;;  %v16799_v2 = vld [vmem:[#allocation240_spill] sm:$0xff] }
 0x703   : > { %v5282_v43 = vmul.f32 %v5186_v31, %v16793_v5  ;;  %v5194_v8 = vadd.f32 %v5162_v53, %v5009_v24  ;;  %v5317_v60 = vadd.f32 %v5285_v18, %v5253_v21  ;;  %v5325_v7 = vadd.f32 %v5293_v47, %v5261_v12  ;;  %v16800_v21 = vld [vmem:[#allocation199_spill] sm:$0xff]  ;;  %v16801_v18 = vld [vmem:[#allocation181_spill] sm:$0xff]  ;;  %v16802_v47 = vld [vmem:[#allocation226_spill] sm:$0xff] }
 0x704   : > { %v4008_v30 = vmul.f32 %v16795_v59, %v16794_v19  ;;  %v3959_v27 = vmul.f32 %v16797_v16, %v16796_v62  ;;  %v3952_v26 = vmul.f32 %v16791_v41, %v16798_v40  ;;  %v13582_v11 = vmul.f32 %v16791_v41, %v16799_v2  ;;  %v16803_v58 = vld [vmem:[#allocation101_spill] sm:$0xff]  ;;  %v13589_v49 = vpop.permute.xlu0 %4547  ;;  %v16805_v56 = vld [vmem:[#allocation132_spill] sm:$0xff]  ;;  %v16806_v19 = vld [vmem:[#allocation215_spill] sm:$0xff] }
 0x705   : > { %v5250_v1 = vadd.f32 %v5218_v32, %v4141_v45  ;;  %v5258_v31 = vadd.f32 %v5226_v42, %v4149_v6  ;;  %v5290_v24 = vmul.f32 %v5194_v8, %v16793_v5  ;;  %v5986_v53 = vpack.c.bf16 %v5325_v7, %v5317_v60  ;;  %v16804_v14 = vld [vmem:[#allocation37_spill] sm:$0xff]  ;;  %v13597_v45 = vpop.permute.xlu1 %4541  ;;  %v16807_v6 = vld [vmem:[#allocation140_spill] sm:$0xff]  ;;  %v16810_v62 = vld [vmem:[#allocation130_spill] sm:$0xff] }
 0x706   : > { %v4097_v12 = vmul.f32 %v16801_v18, %v16800_v21  ;;  %v4016_v25 = vmul.f32 %v16803_v58, %v16802_v47  ;;  %v3961_v50 = vmul.f32 %v16797_v16, %v16804_v14  ;;  %v13595_v41 = vmul.f32 %v16806_v19, %v16805_v56  ;;  %v16808_v8 = vld [vmem:[#allocation172_spill] sm:$0xff]  ;;  %v16811_v40 = vld [vmem:[#allocation187_spill] sm:$0xff]  ;;  %v16815_v47 = vld [vmem:[#allocation154_spill] sm:$0xff] }
 0x707   : > { %v5314_v32 = vadd.f32 %v5282_v43, %v5250_v1  ;;  %v5322_v42 = vadd.f32 %v5290_v24, %v5258_v31  ;;  %5987 = vmatprep.subr.bf16.mxu1 %v5986_v53  ;;  %v3960_v5 = vmul.f32 %v16797_v16, %v16807_v6  ;;  %v13603_v60 = vmul.f32 %v16806_v19, %v16808_v8  ;;  %v13610_v43 = vld [vmem:[%s14411_s9] sm:$0xff]  ;;  %v16813_v1 = vld [vmem:[#allocation167_spill] sm:$0xff]  ;;  %v16830_v52 = vld [vmem:[#allocation85_spill] sm:$0xff] }
 0x708   : > { %v4040_v7 = vadd.f32 %v4008_v30, %v3951_v57  ;;  %v4105_v2 = vmul.f32 %v16811_v40, %v16810_v62  ;;  %5989 = vmatpush1.bf16.msra.mxu1 %v5988_v33  ;;  %16812 = vst [vmem:[#allocation205_spill] sm:$0xff] %v13610_v43  ;;  %v3962_v31 = vmul.f32 %v16797_v16, %v16813_v1  ;;  %v16814_v24 = vld [vmem:[#allocation151_spill] sm:$0xff]  ;;  %v16816_v14 = vld [vmem:[#allocation18_spill] sm:$0xff]  ;;  %v13628_v46 = vpop.permute.xlu0 %4724 }
 0x709   : > { %16809 = vst [vmem:[#allocation28_spill] sm:$0xff] %v13603_v60  ;;  %v4010_v53 = vmul.f32 %v16795_v59, %v16814_v24  ;;  %v5980_v21 = vpack.c.bf16 %v5322_v42, %v5314_v32  ;;  %v13618_v57 = vmul.f32 %v16816_v14, %v16815_v47  ;;  %v16817_v30 = vld [vmem:[#allocation155_spill] sm:$0xff]  ;;  %v4048_v6 = vadd.f32 %v4016_v25, %v3959_v27  ;;  %v16819_v8 = vld [vmem:[#allocation230_spill] sm:$0xff]  ;;  %v16822_v42 = vld [vmem:[#allocation76_spill] sm:$0xff]  ;;  %v13642_v27 = vpop.permute.xlu1 %4549 }
 0x70a   : > { %v13622_v33 = vmul.f32 %v16806_v19, %v16817_v30  ;;  %v13624_v56 = vadd.f32 %v4097_v12, %v4040_v7  ;;  %v4018_v62 = vmul.f32 %v16803_v58, %v16819_v8  ;;  %v16820_v16 = vld [vmem:[#allocation162_spill] sm:$0xff]  ;;  %v16821_v32 = vld [vmem:[#allocation47_spill] sm:$0xff]  ;;  %v16823_v47 = vld [vmem:[#allocation192_spill] sm:$0xff]  ;;  %v4107_v51 = vmul.f32 %v16811_v40, %v16830_v52 }
 0x70b   : > { %v4009_v1 = vmul.f32 %v16795_v59, %v16820_v16  ;;  %v4390_v24 = vsel %vm1645_vm3, %v16822_v42, %v16821_v32  ;;  %v13640_v12 = vsel %vm1645_vm3, %v16824_v55, %v16823_v47  ;;  %5981 = vmatpush1.bf16.msra.mxu0 %v5980_v21  ;;  %5963 = vmatmul.mubr.msk.f32.vlgmr.msra.gmra.mrb[16].mxu1 %vm5337_vm1, %v13610_v43  ;;  %v16826_v25 = vld [vmem:[#allocation98_spill] sm:$0xff]  ;;  %v16828_v8 = vld [vmem:[#allocation156_spill] sm:$0xff]  ;;  %v16831_v21 = vmov 0.0  }
 0x70c   : > { %16818 = vst [vmem:[#allocation74_spill] sm:$0xff] %v13622_v33  ;;  %16825 = vst [vmem:[#allocation210_spill] sm:$0xff] %v13640_v12  ;;  %v4017_v7 = vmul.f32 %v16803_v58, %v16826_v25  ;;  %v16827_v30 = vld [vmem:[#allocation158_spill] sm:$0xff]  ;;  %v13652_v42 = vadd.f32 %v4105_v2, %v4048_v6  ;;  %v4099_v55 = vmul.f32 %v16801_v18, %v16829_v9  ;;  %5618 = vmatprep.mubr.f32.mxu1 %v16831_v21  ;;  %v16835_v6 = vld [vmem:[#allocation87_spill] sm:$0xff]  ;;  %v13675_v15 = vpop.permute.xlu0 %4732 }
 0x70d   : > { %v4391_v16 = vsel %vm1645_vm3, %v16828_v8, %v16827_v30  ;;  %v4386_v25 = vsel %vm1645_vm3, %v16821_v32, %v16832_v29  ;;  %v4042_v61 = vadd.f32 %v4010_v53, %v3953_v35  ;;  %v4098_v28 = vmul.f32 %v16801_v18, %v16833_v22  ;;  %v16834_v8 = vld [vmem:[#allocation93_spill] sm:$0xff]  ;;  %v16838_v32 = vld [vmem:[#allocation126_spill] sm:$0xff]  ;;  %v13685_v13 = vpop.permute.xlu1 %4726  ;;  %v16843_v12 = vld [vmem:[#allocation159_spill] sm:$0xff] }
 0x70e   : > { %v4106_v2 = vmul.f32 %v16811_v40, %v16834_v8  ;;  %v13671_v9 = vsel %vm1645_vm3, %v16836_v63, %v16835_v6  ;;  %v4050_v52 = vadd.f32 %v4018_v62, %v3961_v50  ;;  %5962 = vmatmul.mubr.msk.f32.vlgmr.msra.gmra.mrb[16].mxu0 %vm5337_vm1, %v13610_v43  ;;  %v16839_v35 = vld [vmem:[#allocation186_spill] sm:$0xff]  ;;  %v4041_v22 = vadd.f32 %v4009_v1, %v3952_v26  ;;  %v16842_v62 = vld [vmem:[#allocation29_spill] sm:$0xff]  ;;  %v16857_v33 = vld [vmem:[#allocation203_spill] sm:$0xff] }
 0x70f   : > { %16837 = vst [vmem:[#allocation219_spill] sm:$0xff] %v13671_v9  ;;  %v13679_v53 = vmul.f32 %v16839_v35, %v16838_v32  ;;  %v4575_v8 = vsel %vm1645_vm3, %v16840_v20, %v13542_v23  ;;  %v4049_v63 = vadd.f32 %v4017_v7, %v3960_v5  ;;  %v4011_v50 = vmul.f32 %v16795_v59, %v16841_v3  ;;  %v16844_v1 = vld [vmem:[#allocation102_spill] sm:$0xff]  ;;  %v16846_v59 = vld [vmem:[#allocation109_spill] sm:$0xff]  ;;  %v16848_v7 = vld [vmem:[#allocation32_spill] sm:$0xff] }
 0x710   : > { %v4019_v43 = vmul.f32 %v16803_v58, %v16842_v62  ;;  %5547 = vmatprep.mubr.f32.mxu0 %v16831_v21  ;;  %v4434_v32 = vmul.f32 %v16843_v12, %v4390_v24  ;;  %v13693_v38 = vadd.f32 %v4099_v55, %v4042_v61  ;;  %v13695_v26 = vadd.f32 %v4107_v51, %v4050_v52  ;;  %v16847_v51 = vld [vmem:[#allocation110_spill] sm:$0xff]  ;;  %v16849_v55 = vld [vmem:[#allocation183_spill] sm:$0xff]  ;;  %v16850_v52 = vld [vmem:[#allocation108_spill] sm:$0xff]  ;;  %v13721_v39 = vpop.permute.xlu0 %4740 }
 0x711   : > { %v13699_v20 = vmul.f32 %v16709_v4, %v16844_v1  ;;  %v4387_v3 = vsel %vm1645_vm3, %v16827_v30, %v16845_v17  ;;  %v4576_v58 = vsel %vm1645_vm3, %v16846_v59, %v13572_v44  ;;  %v13709_v5 = vadd.f32 %v4098_v28, %v4041_v22  ;;  %v16851_v30 = vld [vmem:[#allocation208_spill] sm:$0xff]  ;;  %v13723_v48 = vpop.permute.xlu1 %4734  ;;  %v16852_v22 = vld [vmem:[#allocation105_spill] sm:$0xff] }
 0x712   : > { %v13711_v61 = vadd.f32 %v4106_v2, %v4049_v63  ;;  %v4382_v24 = vsel %vm1645_vm3, %v16832_v29, %v16847_v51  ;;  %v4281_v21 = vmul.f32 %v16849_v55, %v16848_v7  ;;  %v4619_v62 = vmul.f32 %v16850_v52, %v4575_v8  ;;  %v16853_v59 = vld [vmem:[#allocation61_spill] sm:$0xff]  ;;  %v16855_v7 = vld [vmem:[#allocation114_spill] sm:$0xff]  ;;  %v16856_v8 = vld [vmem:[#allocation75_spill] sm:$0xff] }
 0x713   : > { %v4442_v1 = vmul.f32 %v16851_v30, %v4391_v16  ;;  %v4043_v28 = vadd.f32 %v4011_v50, %v13582_v11  ;;  %v4051_v2 = vadd.f32 %v4019_v43, %v3962_v31  ;;  %v4100_v63 = vmul.f32 %v16801_v18, %v16852_v22  ;;  %v16858_v18 = vld [vmem:[#allocation206_spill] sm:$0xff] }
 0x714   : > { %v4108_v29 = vmul.f32 %v16811_v40, %v16853_v59  ;;  %v4466_v0 = vadd.f32 %v4434_v32, %v4281_v21  ;;  %v4289_v9 = vmul.f32 %v16855_v7, %v16854_v37  ;;  %v4627_v19 = vmul.f32 %v16856_v8, %v4576_v58  ;;  %v16859_v43 = vld [vmem:[#allocation166_spill] sm:$0xff]  ;;  %v4878_v21 = vpop.permute.xlu0 %4877  ;;  %v16861_v59 = vld [vmem:[#allocation33_spill] sm:$0xff] }
 0x715   : > { %v4571_v16 = vsel %vm1645_vm3, %v13542_v23, %v13567_v36  ;;  %v4383_v11 = vsel %vm1645_vm3, %v16845_v17, %v16857_v33  ;;  %v4378_v40 = vsel %vm1645_vm3, %v16847_v51, %v16858_v18  ;;  %v4379_v37 = vsel %vm1645_vm3, %v16857_v33, %v16859_v43  ;;  %v16860_v23 = vld [vmem:[#allocation111_spill] sm:$0xff] }
 0x716   : > { %v4435_v31 = vmul.f32 %v16843_v12, %v4386_v25  ;;  %v4651_v50 = vadd.f32 %v4619_v62, %v4466_v0  ;;  %v4474_v32 = vadd.f32 %v4442_v1, %v4289_v9  ;;  %v4282_v58 = vmul.f32 %v16849_v55, %v16860_v23  ;;  %v16862_v18 = vld [vmem:[#allocation123_spill] sm:$0xff]  ;;  %v13762_v25 = vpop.permute.xlu1 %4742  ;;  %v16863_v62 = vld [vmem:[#allocation169_spill] sm:$0xff] }
 0x717   : > { %v4572_v17 = vsel %vm1645_vm3, %v13572_v44, %v13597_v45  ;;  %v4620_v51 = vmul.f32 %v16850_v52, %v4571_v16  ;;  %v4443_v22 = vmul.f32 %v16851_v30, %v4387_v3  ;;  %v4283_v33 = vmul.f32 %v16849_v55, %v16861_v59  ;;  %v16864_v16 = vld [vmem:[#allocation242_spill] sm:$0xff] }
 0x718   : > { %v4284_v0 = vmul.f32 %v16849_v55, %v16862_v18  ;;  %v4659_v9 = vadd.f32 %v4627_v19, %v4474_v32  ;;  %v4290_v1 = vmul.f32 %v16855_v7, %v16863_v62  ;;  %v4567_v44 = vsel %vm1645_vm3, %v13567_v36, %v13589_v49  ;;  %v16865_v55 = vld [vmem:[#allocation125_spill] sm:$0xff]  ;;  %v16866_v32 = vld [vmem:[#allocation36_spill] sm:$0xff]  ;;  %v4886_v60 = vpop.permute.xlu0 %4885 }
 0x719   : > { %v4291_v3 = vmul.f32 %v16855_v7, %v16864_v16  ;;  %v4467_v43 = vadd.f32 %v4435_v31, %v4282_v58  ;;  %v4628_v23 = vmul.f32 %v16856_v8, %v4572_v17  ;;  %v4436_v59 = vmul.f32 %v16843_v12, %v4382_v24  ;;  %v16867_v17 = vld [vmem:[#allocation128_spill] sm:$0xff] }
 0x71a   : > { %v4563_v19 = vsel %vm1645_vm3, %v13589_v49, %v16865_v55  ;;  %v5206_v18 = vmul.f32 %v4651_v50, %v16866_v32  ;;  %v4437_v62 = vmul.f32 %v16843_v12, %v4378_v40  ;;  %v4444_v6 = vmul.f32 %v16851_v30, %v4383_v11  ;;  %v4880_v47 = vpop.permute.xlu1 %4879  ;;  %v16868_v50 = vld [vmem:[#allocation86_spill] sm:$0xff] }
 0x71b   : > { %v4445_v36 = vmul.f32 %v16851_v30, %v4379_v37  ;;  %v4652_v16 = vadd.f32 %v4620_v51, %v4467_v43  ;;  %v4475_v31 = vadd.f32 %v4443_v22, %v4290_v1  ;;  %v4621_v58 = vmul.f32 %v16850_v52, %v4567_v44  ;;  %v16869_v44 = vld [vmem:[#allocation52_spill] sm:$0xff] }
 0x71c   : > { %v4292_v24 = vmul.f32 %v16855_v7, %v16867_v17  ;;  %v5214_v14 = vmul.f32 %v4659_v9, %v16866_v32  ;;  %v4622_v49 = vmul.f32 %v16850_v52, %v4563_v19  ;;  %v4564_v12 = vsel %vm1645_vm3, %v13642_v27, %v16868_v50  ;;  %v4894_v1 = vpop.permute.xlu0 %4893  ;;  %v16874_v19 = vld [vmem:[#allocation121_spill] sm:$0xff] }
 0x71d   : > { %v4568_v30 = vsel %vm1645_vm3, %v13597_v45, %v13642_v27  ;;  %v4660_v11 = vadd.f32 %v4628_v23, %v4475_v31  ;;  %v4468_v40 = vadd.f32 %v4436_v59, %v4283_v33  ;;  %v13795_v37 = vadd.f32 %v4100_v63, %v4043_v28  ;;  %v16873_v23 = vld [vmem:[#allocation244_spill] sm:$0xff]  ;;  %v16875_v31 = vld [vmem:[#allocation161_spill] sm:$0xff] }
 0x71e   : > { %v13797_v7 = vadd.f32 %v4108_v29, %v4051_v2  ;;  %v13800_v51 = vadd.f32 %v5206_v18, %v13624_v56  ;;  %v4469_v52 = vadd.f32 %v4437_v62, %v4284_v0  ;;  %v4476_v22 = vadd.f32 %v4444_v6, %v4291_v3  ;;  %v4888_v28 = vpop.permute.xlu1 %4887  ;;  %v16870_v56 = vld [vmem:[#allocation165_spill] sm:$0xff]  ;;  %v16872_v0 = vld [vmem:[#allocation119_spill] sm:$0xff] }
 0x71f   : > { %v4477_v9 = vadd.f32 %v4445_v36, %v4292_v24  ;;  %v13803_v43 = vmul.f32 %v4652_v16, %v16869_v44  ;;  %v13805_v55 = vadd.f32 %v4621_v58, %v4468_v40  ;;  %v4629_v45 = vmul.f32 %v16856_v8, %v4568_v30  ;;  %v16876_v24 = vld [vmem:[#allocation81_spill] sm:$0xff]  ;;  %v16878_v30 = vld [vmem:[#allocation142_spill] sm:$0xff] }
 0x720   : > { %v4630_v27 = vmul.f32 %v16856_v8, %v4564_v12  ;;  %v13810_v2 = vadd.f32 %v5214_v14, %v13652_v42  ;;  %v13812_v63 = vadd.f32 %v4622_v49, %v4469_v52  ;;  %v4756_v6 = vsel %vm2169_vm4, %v16870_v56, %v13628_v46  ;;  %v16871_v8 = vld [vmem:[#allocation146_spill] sm:$0xff]  ;;  %v5063_v62 = vpop.permute.xlu0 %5062  ;;  %v16877_v50 = vld [vmem:[#allocation73_spill] sm:$0xff] }
 0x721   : > { %v4752_v29 = vsel %vm2169_vm4, %v13628_v46, %v13675_v15  ;;  %v13823_v33 = vmul.f32 %v4660_v11, %v16869_v44  ;;  %v4757_v14 = vsel %vm2169_vm4, %v16871_v8, %v13685_v13  ;;  %v4748_v42 = vsel %vm2169_vm4, %v13675_v15, %v13721_v39  ;;  %v16879_v52 = vld [vmem:[#allocation201_spill] sm:$0xff] }
 0x722   : > { %v4909_v3 = vsel %vm2169_vm4, %v16872_v0, %v4878_v21  ;;  %v4753_v46 = vsel %vm2169_vm4, %v13685_v13, %v13723_v48  ;;  %v4776_v59 = vsel %vm2169_vm4, %v13721_v39, %v16873_v23  ;;  %v4910_v18 = vsel %vm2169_vm4, %v16874_v19, %v4880_v47  ;;  %v4896_v17 = vpop.permute.xlu1 %4895  ;;  %v16883_v23 = vld [vmem:[#allocation94_spill] sm:$0xff] }
 0x723   : > { %v4905_v15 = vsel %vm2169_vm4, %v4878_v21, %v4886_v60  ;;  %v4661_v36 = vadd.f32 %v4629_v45, %v4476_v22  ;;  %v13849_v16 = vadd.f32 %v4630_v27, %v4477_v9  ;;  %v4804_v58 = vmul.f32 %v16875_v31, %v4756_v6  ;;  %v16880_v6 = vld [vmem:[#allocation88_spill] sm:$0xff] }
 0x724   : > { %v4805_v13 = vmul.f32 %v16875_v31, %v4752_v29  ;;  %v4812_v49 = vmul.f32 %v16876_v24, %v4757_v14  ;;  %v4806_v39 = vmul.f32 %v16875_v31, %v4748_v42  ;;  %v4957_v12 = vmul.f32 %v16877_v50, %v4909_v3  ;;  %v5071_v8 = vpop.permute.xlu0 %5070  ;;  %v16881_v42 = vld [vmem:[#allocation116_spill] sm:$0xff]  ;;  %v16882_v3 = vld [vmem:[#allocation59_spill] sm:$0xff] }
 0x725   : > { %v5094_v11 = vsel %vm2169_vm4, %v16878_v30, %v5063_v62  ;;  %v4813_v21 = vmul.f32 %v16876_v24, %v4753_v46  ;;  %v4807_v40 = vmul.f32 %v16875_v31, %v4776_v59  ;;  %v4965_v22 = vmul.f32 %v16879_v52, %v4910_v18  ;;  %v16884_v59 = vld [vmem:[#allocation91_spill] sm:$0xff] }
 0x726   : > { %v4958_v9 = vmul.f32 %v16877_v50, %v4905_v15  ;;  %v4749_v45 = vsel %vm2169_vm4, %v13723_v48, %v13762_v25  ;;  %v4906_v27 = vsel %vm2169_vm4, %v4880_v47, %v4888_v28  ;;  %v4901_v56 = vsel %vm2169_vm4, %v4886_v60, %v4894_v1  ;;  %v5065_v46 = vpop.permute.xlu1 %5064 }
 0x727   : > { %v4929_v29 = vsel %vm2169_vm4, %v4894_v1, %v16880_v6  ;;  %v4902_v14 = vsel %vm2169_vm4, %v4888_v28, %v4896_v17  ;;  %v4930_v0 = vsel %vm2169_vm4, %v4896_v17, %v16881_v42  ;;  %v5142_v48 = vmul.f32 %v16882_v3, %v5094_v11  ;;  %v16885_v17 = vld [vmem:[#allocation211_spill] sm:$0xff] }
 0x728   : > { %v5090_v47 = vsel %vm2169_vm4, %v5063_v62, %v5071_v8  ;;  %v4777_v60 = vsel %vm2169_vm4, %v13762_v25, %v16883_v23  ;;  %v4989_v1 = vadd.f32 %v4957_v12, %v4804_v58  ;;  %v5095_v28 = vsel %vm2169_vm4, %v16884_v59, %v5065_v46  ;;  %v5079_v58 = vpop.permute.xlu0 %5078 }
 0x729   : > { %v5143_v19 = vmul.f32 %v16882_v3, %v5090_v47  ;;  %v4997_v18 = vadd.f32 %v4965_v22, %v4812_v49  ;;  %v4990_v15 = vadd.f32 %v4958_v9, %v4805_v13  ;;  %v4966_v31 = vmul.f32 %v16879_v52, %v4906_v27  ;;  %v16886_v13 = vld [vmem:[#allocation135_spill] sm:$0xff] }
 0x72a   : > { %v5150_v30 = vmul.f32 %v16885_v17, %v5095_v28  ;;  %v4959_v62 = vmul.f32 %v16877_v50, %v4901_v56  ;;  %v4960_v11 = vmul.f32 %v16877_v50, %v4929_v29  ;;  %v4967_v6 = vmul.f32 %v16879_v52, %v4902_v14  ;;  %v5073_v23 = vpop.permute.xlu1 %5072 }
 0x72b   : > { %v4968_v25 = vmul.f32 %v16879_v52, %v4930_v0  ;;  %v5174_v12 = vadd.f32 %v5142_v48, %v4989_v1  ;;  %v5086_v49 = vsel %vm2169_vm4, %v5071_v8, %v5079_v58  ;;  %v5114_v22 = vsel %vm2169_vm4, %v5079_v58, %v16886_v13  ;;  %v16887_v8 = vld [vmem:[#allocation39_spill] sm:$0xff] }
 0x72c   : > { %v5182_v42 = vadd.f32 %v5150_v30, %v4997_v18  ;;  %v4814_v9 = vmul.f32 %v16876_v24, %v4749_v45  ;;  %v5175_v27 = vadd.f32 %v5143_v19, %v4990_v15  ;;  %v5091_v50 = vsel %vm2169_vm4, %v5065_v46, %v5073_v23  ;;  %v13909_v28 = vpop.permute.xlu0 %4535  ;;  %v16888_v19 = vld [vmem:[#allocation235_spill] sm:$0xff] }
 0x72d   : > { %v5144_v56 = vmul.f32 %v16882_v3, %v5086_v49  ;;  %v4815_v52 = vmul.f32 %v16876_v24, %v4777_v60  ;;  %v4998_v29 = vadd.f32 %v4966_v31, %v4813_v21  ;;  %v5151_v14 = vmul.f32 %v16885_v17, %v5091_v50  ;;  %v16889_v24 = vld [vmem:[#allocation238_spill] sm:$0xff] }
 0x72e   : > { %v5145_v0 = vmul.f32 %v16882_v3, %v5114_v22  ;;  %v5216_v48 = vmul.f32 %v4661_v36, %v16887_v8  ;;  %v4991_v47 = vadd.f32 %v4959_v62, %v4806_v39  ;;  %v4992_v1 = vadd.f32 %v4960_v11, %v4807_v40  ;;  %v5081_v30 = vpop.permute.xlu1 %5080  ;;  %v16890_v31 = vld [vmem:[#allocation118_spill] sm:$0xff] }
 0x72f   : > { %v4999_v59 = vadd.f32 %v4967_v6, %v4814_v9  ;;  %v5000_v45 = vadd.f32 %v4968_v25, %v4815_v52  ;;  %v5270_v18 = vmul.f32 %v5174_v12, %v16888_v19  ;;  %v5278_v46 = vmul.f32 %v5182_v42, %v16888_v19  ;;  %v16891_v25 = vld [vmem:[#allocation55_spill] sm:$0xff] }
 0x730   : > { %v5183_v15 = vadd.f32 %v5151_v14, %v4998_v29  ;;  %v5271_v21 = vmul.f32 %v5175_v27, %v16889_v24  ;;  %v5176_v60 = vadd.f32 %v5144_v56, %v4991_v47  ;;  %v5087_v3 = vsel %vm2169_vm4, %v5073_v23, %v5081_v30  ;;  %v13926_v12 = vpop.permute.xlu0 %4543 }
 0x731   : > { %v5115_v36 = vsel %vm2169_vm4, %v5081_v30, %v16890_v31  ;;  %v5177_v40 = vadd.f32 %v5145_v0, %v4992_v1  ;;  %v5152_v62 = vmul.f32 %v16885_v17, %v5087_v3  ;;  %v5208_v6 = vmul.f32 %v13805_v55, %v16887_v8  ;;  %v16895_v0 = vld [vmem:[#allocation234_spill] sm:$0xff]  ;;  %v16897_v30 = vld [vmem:[#allocation237_spill] sm:$0xff]  ;;  %v16898_v3 = vld [vmem:[#allocation175_spill] sm:$0xff] }
 0x732   : > { %v5279_v39 = vmul.f32 %v5183_v15, %v16889_v24  ;;  %v5153_v11 = vmul.f32 %v16885_v17, %v5115_v36  ;;  %v5209_v58 = vmul.f32 %v13812_v63, %v16891_v25  ;;  %v5239_v42 = vadd.f32 %v13803_v43, %v13709_v5  ;;  %v13935_v9 = vpop.permute.xlu1 %4537  ;;  %v16892_v63 = vld [vmem:[#allocation236_spill] sm:$0xff]  ;;  %v16893_v43 = vld [vmem:[#allocation239_spill] sm:$0xff]  ;;  %v16899_v36 = vld [vmem:[#allocation150_spill] sm:$0xff] }
 0x733   : > { %v5247_v23 = vadd.f32 %v13823_v33, %v13711_v61  ;;  %v5217_v49 = vmul.f32 %v13849_v16, %v16891_v25  ;;  %v5310_v13 = vadd.f32 %v5278_v46, %v13810_v2  ;;  %v5184_v17 = vadd.f32 %v5152_v62, %v4999_v59  ;;  %v16894_v16 = vld [vmem:[#allocation189_spill] sm:$0xff]  ;;  %v16896_v46 = vld [vmem:[#allocation180_spill] sm:$0xff] }
 0x734   : > { %v5185_v22 = vadd.f32 %v5153_v11, %v5000_v45  ;;  %v5248_v55 = vadd.f32 %v5216_v48, %v13695_v26  ;;  %v5272_v27 = vmul.f32 %v5176_v60, %v16892_v63  ;;  %v5303_v50 = vadd.f32 %v5271_v21, %v5239_v42  ;;  %v13948_v48 = vpop.permute.xlu0 %4551  ;;  %v16903_v42 = vld [vmem:[#allocation198_spill] sm:$0xff] }
 0x735   : > { %v5311_v56 = vadd.f32 %v5279_v39, %v5247_v23  ;;  %v5302_v5 = vadd.f32 %v5270_v18, %v13800_v51  ;;  %v5273_v52 = vmul.f32 %v5177_v40, %v16893_v43  ;;  %v5280_v61 = vmul.f32 %v5184_v17, %v16892_v63  ;;  %v16900_v39 = vld [vmem:[#allocation18_spill] sm:$0xff]  ;;  %v16905_v23 = vld [vmem:[#allocation28_spill] sm:$0xff] }
 0x736   : > { %v5281_v33 = vmul.f32 %v5185_v22, %v16893_v43  ;;  %v5240_v2 = vadd.f32 %v5208_v6, %v13693_v38  ;;  %v4113_v29 = vmul.f32 %v16713_v54, %v16894_v16  ;;  %v4026_v26 = vmul.f32 %v16839_v35, %v16895_v0  ;;  %v13950_v1 = vpop.permute.xlu1 %4545  ;;  %v16902_v6 = vld [vmem:[#allocation227_spill] sm:$0xff]  ;;  %v16906_v22 = vld [vmem:[#allocation229_spill] sm:$0xff] }
 0x737   : > { %v5990_v14 = vpack.c.bf16 %v5311_v56, %v5303_v50  ;;  %v5312_v47 = vadd.f32 %v5280_v61, %v5248_v55  ;;  %v5992_v51 = vpack.c.bf16 %v5310_v13, %v5302_v5  ;;  %v5241_v59 = vadd.f32 %v5209_v58, %v13795_v37  ;;  %v16907_v5 = vld [vmem:[#allocation83_spill] sm:$0xff]  ;;  %v16908_v61 = vld [vmem:[#allocation245_spill] sm:$0xff] }
 0x738   : > { %v5249_v45 = vadd.f32 %v5217_v49, %v13797_v7  ;;  %v5304_v18 = vadd.f32 %v5272_v27, %v5240_v2  ;;  %v4056_v38 = vadd.f32 %v13679_v53, %v13595_v41  ;;  %v4121_v15 = vmul.f32 %v16734_v10, %v16896_v46  ;;  %v16901_v41 = vld [vmem:[#allocation82_spill] sm:$0xff]  ;;  %v13968_v62 = vpop.permute.xlu0 %4728  ;;  %v16914_v46 = vld [vmem:[#allocation23_spill] sm:$0xff] }
 0x739   : > { %5991 = vmatprep.subr.bf16.mxu0 %v5990_v14  ;;  %v4034_v21 = vmul.f32 %v16709_v4, %v16897_v30  ;;  %v4064_v60 = vadd.f32 %v13699_v20, %v13618_v57  ;;  %v4115_v31 = vmul.f32 %v16713_v54, %v16898_v3  ;;  %v5305_v37 = vadd.f32 %v5273_v52, %v5241_v59  ;;  %v16904_v57 = vld [vmem:[#allocation192_spill] sm:$0xff]  ;;  %v16910_v14 = vld [vmem:[#allocation27_spill] sm:$0xff]  ;;  %v16912_v59 = vld [vmem:[#allocation74_spill] sm:$0xff] }
 0x73a   : > { %5993 = vmatpush1.bf16.msra.mxu0 %v5992_v51  ;;  %v5313_v7 = vadd.f32 %v5281_v33, %v5249_v45  ;;  %v3977_v40 = vmul.f32 %v16900_v39, %v16899_v36  ;;  %v4123_v53 = vmul.f32 %v16734_v10, %v16901_v41  ;;  %v6000_v11 = vpack.c.bf16 %v5312_v47, %v5304_v18  ;;  %v13977_v13 = vpop.permute.xlu1 %4553  ;;  %v16909_v33 = vld [vmem:[#allocation87_spill] sm:$0xff]  ;;  %v16913_v18 = vld [vmem:[#allocation177_spill] sm:$0xff] }
 0x73b   : > { %v4025_v58 = vmul.f32 %v16839_v35, %v16902_v6  ;;  %v4388_v20 = vsel %vm1645_vm3, %v16904_v57, %v16903_v42  ;;  %v4058_v49 = vadd.f32 %v4026_v26, %v16905_v23  ;;  %v4033_v55 = vmul.f32 %v16709_v4, %v16906_v22  ;;  %v16911_v26 = vld [vmem:[#allocation139_spill] sm:$0xff] }
 0x73c   : > { %v5998_v17 = vpack.c.bf16 %v5313_v7, %v5305_v37  ;;  %v13981_v27 = vadd.f32 %v4113_v29, %v4056_v38  ;;  %v13983_v50 = vadd.f32 %v4121_v15, %v4064_v60  ;;  %v4066_v56 = vadd.f32 %v4034_v21, %v3977_v40  ;;  %v13999_v51 = vpop.permute.xlu0 %4736  ;;  %v16915_v30 = vld [vmem:[#allocation71_spill] sm:$0xff]  ;;  %v16918_v7 = vld [vmem:[#allocation174_spill] sm:$0xff] }
 0x73d   : > { %v4114_v52 = vmul.f32 %v16713_v54, %v16907_v5  ;;  %v4389_v2 = vsel %vm1645_vm3, %v16909_v33, %v16908_v61  ;;  %v13991_v16 = vadd.f32 %v4115_v31, %v4058_v49  ;;  %v3976_v0 = vmul.f32 %v16900_v39, %v16910_v14  ;;  %v16916_v3 = vld [vmem:[#allocation51_spill] sm:$0xff]  ;;  %v16923_v49 = vld [vmem:[#allocation188_spill] sm:$0xff] }
 0x73e   : > { %5999 = vmatprep.subr.bf16.mxu1 %v5998_v17  ;;  %v4027_v29 = vmul.f32 %v16839_v35, %v16911_v26  ;;  %v13997_v47 = vadd.f32 %v4123_v53, %v4066_v56  ;;  %v4057_v45 = vadd.f32 %v4025_v58, %v16912_v59  ;;  %v14004_v38 = vmul.f32 %v16734_v10, %v16913_v18  ;;  %v14012_v35 = vpop.permute.xlu1 %4730  ;;  %v16917_v31 = vld [vmem:[#allocation215_spill] sm:$0xff]  ;;  %v16924_v17 = vld [vmem:[#allocation16_spill] sm:$0xff] }
 0x73f   : > { %6001 = vmatpush1.bf16.msra.mxu1 %v6000_v11  ;;  %v4035_v15 = vmul.f32 %v16709_v4, %v16914_v46  ;;  %v4384_v21 = vsel %vm1645_vm3, %v16903_v42, %v16915_v30  ;;  %v4065_v60 = vadd.f32 %v4033_v55, %v3976_v0  ;;  %v3970_v37 = vmul.f32 %v16917_v31, %v16916_v3  ;;  %v16919_v40 = vld [vmem:[#allocation219_spill] sm:$0xff]  ;;  %v16922_v42 = vld [vmem:[#allocation197_spill] sm:$0xff]  ;;  %v16927_v33 = vld [vmem:[#allocation160_spill] sm:$0xff] }
 0x740   : > { %v3978_v36 = vmul.f32 %v16900_v39, %v16918_v7  ;;  %v16920_v41 = vld [vmem:[#allocation127_spill] sm:$0xff]  ;;  %v4573_v6 = vsel %vm1645_vm3, %v13909_v28, %v13926_v12  ;;  %v14028_v58 = vadd.f32 %v4114_v52, %v4057_v45  ;;  %v4451_v57 = vmul.f32 %v16922_v42, %v4388_v20  ;;  %v16925_v55 = vld [vmem:[#allocation117_spill] sm:$0xff]  ;;  %v16928_v14 = vld [vmem:[#allocation184_spill] sm:$0xff]  ;;  %v14045_v0 = vpop.permute.xlu0 %4744 }
 0x741   : > { %v4458_v53 = vmul.f32 %v16920_v41, %v16919_v40  ;;  %v16921_v11 = vld [vmem:[#allocation7_spill] sm:$0xff]  ;;  %v4059_v23 = vadd.f32 %v4027_v29, %v3970_v37  ;;  %v4116_v39 = vmul.f32 %v16713_v54, %v16923_v49  ;;  %v4124_v22 = vmul.f32 %v16734_v10, %v16924_v17  ;;  %v16929_v54 = vld [vmem:[#allocation124_spill] sm:$0xff]  ;;  %v16930_v29 = vld [vmem:[#allocation45_spill] sm:$0xff] }
 0x742   : > { %v4578_v4 = vsel %vm1645_vm3, %v16921_v11, %v13935_v9  ;;  %v4385_v56 = vsel %vm1645_vm3, %v16908_v61, %v16925_v55  ;;  %v16926_v5 = vld [vmem:[#allocation67_spill] sm:$0xff]  ;;  %v4305_v20 = vmul.f32 %v16928_v14, %v16927_v33  ;;  %v4067_v26 = vadd.f32 %v4035_v15, %v3978_v36  ;;  %v16931_v45 = vld [vmem:[#allocation145_spill] sm:$0xff]  ;;  %v16932_v61 = vld [vmem:[#allocation144_spill] sm:$0xff]  ;;  %v14055_v31 = vpop.permute.xlu1 %4738 }
 0x743   : > { %v4380_v52 = vsel %vm1645_vm3, %v16915_v30, %v16926_v5  ;;  %v4577_v10 = vsel %vm1645_vm3, %v16929_v54, %v13909_v28  ;;  %v4643_v59 = vmul.f32 %v16930_v29, %v4578_v4  ;;  %v4298_v18 = vmul.f32 %v16932_v61, %v16931_v45  ;;  %v16933_v46 = vld [vmem:[#allocation72_spill] sm:$0xff]  ;;  %v16935_v7 = vld [vmem:[#allocation210_spill] sm:$0xff]  ;;  %v16936_v40 = vld [vmem:[#allocation213_spill] sm:$0xff] }
 0x744   : > { %v4636_v3 = vmul.f32 %v16933_v46, %v4573_v6  ;;  %v16934_v30 = vld [vmem:[#allocation196_spill] sm:$0xff]  ;;  %v4450_v15 = vmul.f32 %v16922_v42, %v16935_v7  ;;  %v4490_v36 = vadd.f32 %v4458_v53, %v4305_v20  ;;  %v4565_v28 = vsel %vm1645_vm3, %v13948_v48, %v16936_v40  ;;  %v16937_v5 = vld [vmem:[#allocation34_spill] sm:$0xff]  ;;  %v16940_v7 = vld [vmem:[#allocation63_spill] sm:$0xff] }
 0x745   : > { %v4297_v37 = vmul.f32 %v16932_v61, %v16934_v30  ;;  %v4483_v11 = vadd.f32 %v4451_v57, %v4298_v18  ;;  %v4459_v4 = vmul.f32 %v16920_v41, %v4389_v2  ;;  %v4574_v6 = vsel %vm1645_vm3, %v13935_v9, %v13950_v1  ;;  %v4882_v2 = vpop.permute.xlu0 %4881  ;;  %v16938_v45 = vld [vmem:[#allocation120_spill] sm:$0xff] }
 0x746   : > { %v4453_v49 = vmul.f32 %v16922_v42, %v4380_v52  ;;  %v4635_v17 = vmul.f32 %v16933_v46, %v4577_v10  ;;  %v4300_v53 = vmul.f32 %v16932_v61, %v16937_v5  ;;  %v4452_v33 = vmul.f32 %v16922_v42, %v4384_v21  ;;  %v14082_v18 = vpop.permute.xlu1 %4746  ;;  %v16939_v10 = vld [vmem:[#allocation207_spill] sm:$0xff] }
 0x747   : > { %v4569_v57 = vsel %vm1645_vm3, %v13926_v12, %v13948_v48  ;;  %v4675_v20 = vadd.f32 %v4643_v59, %v4490_v36  ;;  %v4668_v54 = vadd.f32 %v4636_v3, %v4483_v11  ;;  %v4306_v9 = vmul.f32 %v16928_v14, %v16938_v45 }
 0x748   : > { %v4638_v52 = vmul.f32 %v16933_v46, %v4565_v28  ;;  %v4381_v21 = vsel %vm1645_vm3, %v16925_v55, %v16939_v10  ;;  %v4482_v42 = vadd.f32 %v4450_v15, %v4297_v37  ;;  %v4644_v30 = vmul.f32 %v16930_v29, %v4574_v6  ;;  %v16941_v6 = vld [vmem:[#allocation22_spill] sm:$0xff] }
 0x749   : > { %v4299_v12 = vmul.f32 %v16932_v61, %v16940_v7  ;;  %v4491_v48 = vadd.f32 %v4459_v4, %v4306_v9  ;;  %v4485_v59 = vadd.f32 %v4453_v49, %v4300_v53  ;;  %v4637_v3 = vmul.f32 %v16933_v46, %v4569_v57  ;;  %v4890_v37 = vpop.permute.xlu0 %4889  ;;  %v16943_v53 = vld [vmem:[#allocation60_spill] sm:$0xff]  ;;  %v16946_v7 = vld [vmem:[#allocation195_spill] sm:$0xff] }
 0x74a   : > { %v4570_v36 = vsel %vm1645_vm3, %v13950_v1, %v13977_v13  ;;  %v4667_v40 = vadd.f32 %v4635_v17, %v4482_v42  ;;  %v4460_v11 = vmul.f32 %v16920_v41, %v4385_v56  ;;  %v4461_v55 = vmul.f32 %v16920_v41, %v4381_v21  ;;  %v4884_v49 = vpop.permute.xlu1 %4883  ;;  %v16942_v1 = vld [vmem:[#allocation122_spill] sm:$0xff] }
 0x74b   : > { %v4484_v28 = vadd.f32 %v4452_v33, %v4299_v12  ;;  %v5230_v15 = vmul.f32 %v4675_v20, %v16866_v32  ;;  %v5223_v61 = vmul.f32 %v4668_v54, %v16869_v44  ;;  %v4670_v4 = vadd.f32 %v4638_v52, %v4485_v59  ;;  %v16944_v52 = vld [vmem:[#allocation170_spill] sm:$0xff] }
 0x74c   : > { %v4566_v46 = vsel %vm1645_vm3, %v13977_v13, %v16941_v6  ;;  %v4676_v5 = vadd.f32 %v4644_v30, %v4491_v48  ;;  %v4307_v17 = vmul.f32 %v16928_v14, %v16942_v1  ;;  %v4308_v56 = vmul.f32 %v16928_v14, %v16943_v53  ;;  %v16947_v48 = vld [vmem:[#allocation176_spill] sm:$0xff] }
 0x74d   : > { %v4645_v41 = vmul.f32 %v16930_v29, %v4570_v36  ;;  %v4669_v33 = vadd.f32 %v4637_v3, %v4484_v28  ;;  %v4154_v57 = vadd.f32 %v14004_v38, %v4065_v60  ;;  %v14110_v20 = vadd.f32 %v4116_v39, %v4059_v23  ;;  %v4898_v21 = vpop.permute.xlu0 %4897  ;;  %v16948_v3 = vld [vmem:[#allocation178_spill] sm:$0xff] }
 0x74e   : > { %v14112_v54 = vadd.f32 %v4124_v22, %v4067_v26  ;;  %v4492_v45 = vadd.f32 %v4460_v11, %v4307_v17  ;;  %v4493_v9 = vadd.f32 %v4461_v55, %v4308_v56  ;;  %v4646_v13 = vmul.f32 %v16930_v29, %v4566_v46  ;;  %v4892_v60 = vpop.permute.xlu1 %4891  ;;  %v16945_v29 = vld [vmem:[#allocation50_spill] sm:$0xff]  ;;  %v16949_v11 = vld [vmem:[#allocation11_spill] sm:$0xff]  ;;  %v16953_v56 = vld [vmem:[#allocation224_spill] sm:$0xff] }
 0x74f   : > { %v4758_v10 = vsel %vm2169_vm4, %v16944_v52, %v13968_v62  ;;  %v14120_v14 = vmul.f32 %v4667_v40, %v16866_v32  ;;  %v14123_v42 = vadd.f32 %v5230_v15, %v13983_v50  ;;  %v14126_v38 = vmul.f32 %v4670_v4, %v16891_v25  ;;  %v16950_v55 = vld [vmem:[#allocation163_spill] sm:$0xff]  ;;  %v16955_v52 = vld [vmem:[#allocation84_spill] sm:$0xff] }
 0x750   : > { %v14129_v23 = vadd.f32 %v5223_v61, %v14028_v58  ;;  %v5231_v39 = vmul.f32 %v4676_v5, %v16869_v44  ;;  %v4677_v22 = vadd.f32 %v4645_v41, %v4492_v45  ;;  %v4754_v26 = vsel %vm2169_vm4, %v13968_v62, %v13999_v51 }
 0x751   : > { %v4907_v32 = vsel %vm2169_vm4, %v4882_v2, %v4890_v37  ;;  %v14139_v50 = vmul.f32 %v4669_v33, %v16887_v8  ;;  %v4820_v30 = vmul.f32 %v16945_v29, %v4758_v10  ;;  %v4759_v58 = vsel %vm2169_vm4, %v16946_v7, %v14012_v35  ;;  %v5067_v40 = vpop.permute.xlu0 %5066  ;;  %v16954_v33 = vld [vmem:[#allocation141_spill] sm:$0xff] }
 0x752   : > { %v4750_v44 = vsel %vm2169_vm4, %v13999_v51, %v14045_v0  ;;  %v4678_v12 = vadd.f32 %v4646_v13, %v4493_v9  ;;  %v4755_v62 = vsel %vm2169_vm4, %v14012_v35, %v14055_v31  ;;  %v4778_v59 = vsel %vm2169_vm4, %v14045_v0, %v16947_v48  ;;  %v4900_v61 = vpop.permute.xlu1 %4899  ;;  %v16951_v0 = vld [vmem:[#allocation143_spill] sm:$0xff] }
 0x753   : > { %v4912_v36 = vsel %vm2169_vm4, %v16948_v3, %v4884_v49  ;;  %v4821_v28 = vmul.f32 %v16945_v29, %v4754_v26  ;;  %v4911_v51 = vsel %vm2169_vm4, %v16949_v11, %v4882_v2  ;;  %v4974_v15 = vmul.f32 %v16950_v55, %v4907_v32  ;;  %v16952_v2 = vld [vmem:[#allocation24_spill] sm:$0xff]  ;;  %v16956_v26 = vld [vmem:[#allocation113_spill] sm:$0xff] }
 0x754   : > { %v4903_v35 = vsel %vm2169_vm4, %v4890_v37, %v4898_v21  ;;  %v14169_v4 = vmul.f32 %v4677_v22, %v16887_v8  ;;  %v4828_v6 = vmul.f32 %v16951_v0, %v4759_v58  ;;  %v4822_v46 = vmul.f32 %v16945_v29, %v4750_v44 }
 0x755   : > { %v14173_v5 = vadd.f32 %v5231_v39, %v4154_v57  ;;  %v4829_v1 = vmul.f32 %v16951_v0, %v4755_v62  ;;  %v4823_v17 = vmul.f32 %v16945_v29, %v4778_v59  ;;  %v4981_v53 = vmul.f32 %v16952_v2, %v4912_v36  ;;  %v5075_v9 = vpop.permute.xlu0 %5074  ;;  %v16957_v29 = vld [vmem:[#allocation194_spill] sm:$0xff]  ;;  %v16958_v62 = vld [vmem:[#allocation131_spill] sm:$0xff]  ;;  %v16959_v36 = vld [vmem:[#allocation137_spill] sm:$0xff] }
 0x756   : > { %v5096_v37 = vsel %vm2169_vm4, %v16953_v56, %v5067_v40  ;;  %v4973_v41 = vmul.f32 %v16950_v55, %v4911_v51  ;;  %v4908_v8 = vsel %vm2169_vm4, %v4884_v49, %v4892_v60  ;;  %v4931_v57 = vsel %vm2169_vm4, %v4898_v21, %v16954_v33  ;;  %v5069_v22 = vpop.permute.xlu1 %5068 }
 0x757   : > { %v4975_v45 = vmul.f32 %v16950_v55, %v4903_v35  ;;  %v4751_v13 = vsel %vm2169_vm4, %v14055_v31, %v14082_v18  ;;  %v4779_v10 = vsel %vm2169_vm4, %v14082_v18, %v16955_v52  ;;  %v5006_v39 = vadd.f32 %v4974_v15, %v4821_v28 }
 0x758   : > { %v5092_v49 = vsel %vm2169_vm4, %v5067_v40, %v5075_v9  ;;  %v4904_v21 = vsel %vm2169_vm4, %v4892_v60, %v4900_v61  ;;  %v5158_v32 = vmul.f32 %v16956_v26, %v5096_v37  ;;  %v5097_v7 = vsel %vm2169_vm4, %v16957_v29, %v5069_v22 }
 0x759   : > { %v5159_v31 = vmul.f32 %v16956_v26, %v5092_v49  ;;  %v5013_v58 = vadd.f32 %v4981_v53, %v4828_v6  ;;  %v4982_v44 = vmul.f32 %v16952_v2, %v4908_v8  ;;  %v4976_v18 = vmul.f32 %v16950_v55, %v4931_v57  ;;  %v5083_v28 = vpop.permute.xlu0 %5082  ;;  %v16960_v6 = vld [vmem:[#allocation48_spill] sm:$0xff] }
 0x75a   : > { %v5166_v48 = vmul.f32 %v16958_v62, %v5097_v7  ;;  %v5005_v59 = vadd.f32 %v4973_v41, %v4820_v30  ;;  %v5007_v3 = vadd.f32 %v4975_v45, %v4822_v46  ;;  %v4932_v60 = vsel %vm2169_vm4, %v4900_v61, %v16959_v36  ;;  %v5077_v15 = vpop.permute.xlu1 %5076  ;;  %v16962_v36 = vld [vmem:[#allocation205_spill] sm:$0xff] }
 0x75b   : > { %v5191_v40 = vadd.f32 %v5159_v31, %v5006_v39  ;;  %v4983_v11 = vmul.f32 %v16952_v2, %v4904_v21  ;;  %v5088_v35 = vsel %vm2169_vm4, %v5075_v9, %v5083_v28  ;;  %v5116_v55 = vsel %vm2169_vm4, %v5083_v28, %v16960_v6 }
 0x75c   : > { %v5198_v51 = vadd.f32 %v5166_v48, %v5013_v58  ;;  %v5190_v53 = vadd.f32 %v5158_v32, %v5005_v59  ;;  %v5093_v30 = vsel %vm2169_vm4, %v5069_v22, %v5077_v15  ;;  %v5160_v46 = vmul.f32 %v16956_v26, %v5088_v35 }
 0x75d   : > { %v5161_v61 = vmul.f32 %v16956_v26, %v5116_v55  ;;  %v5014_v56 = vadd.f32 %v4982_v44, %v4829_v1  ;;  %v5008_v37 = vadd.f32 %v4976_v18, %v4823_v17  ;;  %v4984_v41 = vmul.f32 %v16952_v2, %v4932_v60  ;;  %v16961_v26 = vld [vmem:[#allocation202_spill] sm:$0xff] }
 0x75e   : > { %v5167_v8 = vmul.f32 %v16958_v62, %v5093_v30  ;;  %v4830_v33 = vmul.f32 %v16951_v0, %v4751_v13  ;;  %v5294_v57 = vmul.f32 %v5198_v51, %v16888_v19  ;;  %v5287_v45 = vmul.f32 %v5191_v40, %v16889_v24  ;;  %v5085_v21 = vpop.permute.xlu1 %5084  ;;  %v6182_v40 = vld [vmem:[%s6395_s29 + $0x10] sm:$0xff]  ;;  %v14279_v30 = vld [vmem:[%s14262_s22] sm:$0xff] }
 0x75f   : > { %v5192_v9 = vadd.f32 %v5160_v46, %v5007_v3  ;;  %v5233_v52 = vmul.f32 %v4678_v12, %v16891_v25  ;;  %v4831_v39 = vmul.f32 %v16951_v0, %v4779_v10  ;;  %v5193_v49 = vadd.f32 %v5161_v61, %v5008_v37 }
 0x760   : > { %v5199_v22 = vadd.f32 %v5167_v8, %v5014_v56  ;;  %v5015_v1 = vadd.f32 %v4983_v11, %v4830_v33  ;;  %v5286_v17 = vmul.f32 %v5190_v53, %v16888_v19  ;;  %v5089_v2 = vsel %vm2169_vm4, %v5077_v15, %v5085_v21  ;;  %v14273_v11 = vld [vmem:[%s14262_s22 + $0x18] sm:$0xff]  ;;  %v6184_v56 = vld [vmem:[%s6395_s29] sm:$0xff]  ;;  %v6185_v33 = vld [vmem:[%s6395_s29 + $0x8] sm:$0xff] }
 0x761   : > { %v5117_v13 = vsel %vm2169_vm4, %v5085_v21, %v16961_v26  ;;  %v5016_v32 = vadd.f32 %v4984_v41, %v4831_v39  ;;  %v5168_v25 = vmul.f32 %v16958_v62, %v5089_v2  ;;  %v5254_v0 = vadd.f32 %v14120_v14, %v13981_v27  ;;  %v6183_v15 = vld [vmem:[%s6395_s29 + $0x18] sm:$0xff]  ;;  %v451_v41 = vld [vmem:[%s14262_s22 + $0x8] sm:$0xff] }
 0x762   : > { %v5295_v29 = vmul.f32 %v5199_v22, %v16889_v24  ;;  %v5169_v12 = vmul.f32 %v16958_v62, %v5117_v13  ;;  %v5326_v10 = vadd.f32 %v5294_v57, %v14123_v42  ;;  %v5288_v19 = vmul.f32 %v5192_v9, %v16892_v63 }
 0x763   : > { %v5319_v7 = vadd.f32 %v5287_v45, %v14129_v23  ;;  %v5289_v31 = vmul.f32 %v5193_v49, %v16893_v43  ;;  %v5200_v34 = vadd.f32 %v5168_v25, %v5015_v1  ;;  %v5256_v24 = vadd.f32 %v14139_v50, %v13991_v16 }
 0x764   : > { %v5201_v58 = vadd.f32 %v5169_v12, %v5016_v32  ;;  %v5327_v44 = vadd.f32 %v5295_v29, %v14173_v5  ;;  %v5264_v18 = vadd.f32 %v14169_v4, %v13997_v47  ;;  %v5318_v62 = vadd.f32 %v5286_v17, %v5254_v0 }
 0x765   : > { %v5257_v27 = vadd.f32 %v14126_v38, %v14110_v20  ;;  %v5296_v14 = vmul.f32 %v5200_v34, %v16892_v63  ;;  %v5265_v48 = vadd.f32 %v5233_v52, %v14112_v54  ;;  %v5320_v5 = vadd.f32 %v5288_v19, %v5256_v24  ;;  %v14264_v63 = vpop.permute.xlu0 %5334  ;;  %v14268_v38 = vld [vmem:[%s14262_s22 + $0x10] sm:$0xff] }
 0x766   : > { %v5297_v42 = vmul.f32 %v5201_v58, %v16893_v43  ;;  %v5994_v23 = vpack.c.bf16 %v5327_v44, %v5319_v7  ;;  %v5996_v59 = vpack.c.bf16 %v5326_v10, %v5318_v62  ;;  %v16964_v62 = vld [vmem:[#allocation9_spill] sm:$0xff] }
 0x767   : > { %v5328_v3 = vadd.f32 %v5296_v14, %v5264_v18  ;;  %v5321_v16 = vadd.f32 %v5289_v31, %v5257_v27 }
 0x768   : > { %5995 = vmatprep.subr.bf16.mxu0 %v5994_v23  ;;  %v5329_v50 = vadd.f32 %v5297_v42, %v5265_v48  ;;  %v16965_v42 = vld [vmem:[#allocation15_spill] sm:$0xff] }
 0x769   : > { %5997 = vmatpush1.bf16.msra.mxu0 %v5996_v59  ;;  %v6004_v4 = vpack.c.bf16 %v5328_v3, %v5320_v5  ;;  %v16966_v59 = vld [vmem:[#allocation6_spill] sm:$0xff] }
 0x76a   : > { %v6002_v47 = vpack.c.bf16 %v5329_v50, %v5321_v16  ;;  %v14291_v16 = vstv %s5705_s20 }
 0x76c   : > { %5964 = vmatmul.mubr.msk.f32.vlgmr.msra.gmra.mrb[18].mxu0 %vm5337_vm1, %v16962_v36  ;;  %6003 = vmatprep.subr.bf16.mxu1 %v6002_v47  ;;  %v16967_v47 = vld [vmem:[#allocation8_spill] sm:$0xff] }
 0x76d   : > { %6005 = vmatpush1.bf16.msra.mxu1 %v6004_v4 }
 0x770   : > { %5965 = vmatmul.mubr.msk.f32.vlgmr.msra.gmra.mrb[18].mxu1 %vm5337_vm1, %v16962_v36 }
 0x7de   : > { %v5478_v43 = vpop.f32.mrb[16].mxu1 }
 0x7df   : > { %v5479_v20 = vadd.f32 %v5478_v43, %v14264_v63  ;;  %v5480_v54 = vpop.f32.mrb[17].mxu1  ;;  %v16968_v43 = vld [vmem:[#allocation13_spill] sm:$0xff] }
 0x7e0   : > { %v5481_v60 = vadd.f32 %v5480_v54, %v14264_v63 }
 0x7e1   : > { %v5627_v28 = vadd.f32 %v6182_v40, %v5479_v20  ;;  %v5407_v51 = vpop.f32.mrb[16].mxu0 }
 0x7e2   : > { %v5628_v35 = vadd.f32 %v6183_v15, %v5481_v60  ;;  %v5408_v6 = vadd.f32 %v5407_v51, %v14264_v63  ;;  %v5409_v55 = vpop.f32.mrb[17].mxu0 }
 0x7e3   : > { %v5635_v53 = vmul.f32 %v5627_v28, %v14268_v38  ;;  %v5410_v46 = vadd.f32 %v5409_v55, %v14264_v63 }
 0x7e4   : > { %v5636_v61 = vmul.f32 %v5628_v35, %v14273_v11  ;;  %v5625_v37 = vadd.f32 %v6184_v56, %v5408_v6 }
 0x7e5   : > { %v5653_v8 = vrot.slane %v5635_v53, 4  ;;  %v5626_v57 = vadd.f32 %v6185_v33, %v5410_v46 }
 0x7e6   : > { %v5659_v45 = vrot.slane %v5636_v61, 4  ;;  %v5633_v9 = vmul.f32 %v5625_v37, %v14279_v30 }
 0x7e7   : > { %v5654_v52 = vadd.f32 %v5653_v8, %v5635_v53  ;;  %v5634_v39 = vmul.f32 %v5626_v57, %v451_v41  ;;  %v14315_v8 = vld [vmem:[%s14262_s22 + $0x20] sm:$0xff] }
 0x7e8   : > { %v5660_v22 = vadd.f32 %v5659_v45, %v5636_v61  ;;  %v5641_v49 = vrot.slane %v5633_v9, 4 }
 0x7e9   : > { %v5655_v21 = vrot.slane %v5654_v52, 2  ;;  %v5647_v1 = vrot.slane %v5634_v39, 4 }
 0x7ea   : > { %v5661_v17 = vrot.slane %v5660_v22, 2  ;;  %v5642_v2 = vadd.f32 %v5641_v49, %v5633_v9  ;;  %v14320_v9 = vld [vmem:[%s14262_s22 + $0x28] sm:$0xff] }
 0x7eb   : > { %v5656_v26 = vadd.f32 %v5655_v21, %v5654_v52  ;;  %v5648_v13 = vadd.f32 %v5647_v1, %v5634_v39  ;;  %v14327_v1 = vld [vmem:[%s14262_s22 + $0x30] sm:$0xff] }
 0x7ec   : > { %v5662_v32 = vadd.f32 %v5661_v17, %v5660_v22  ;;  %v5643_v29 = vrot.slane %v5642_v2, 2 }
 0x7ed   : > { %v5657_v25 = vrot.slane %v5656_v26, 1  ;;  %v5649_v12 = vrot.slane %v5648_v13, 2 }
 0x7ee   : > { %v5663_v0 = vrot.slane %v5662_v32, 1  ;;  %v5644_v10 = vadd.f32 %v5643_v29, %v5642_v2 }
 0x7ef   : > { %v5658_v19 = vadd.f32 %v5657_v25, %v5656_v26  ;;  %v5650_v7 = vadd.f32 %v5649_v12, %v5648_v13  ;;  %v6188_v26 = vld [vmem:[%s6395_s29 + $0x30] sm:$0xff]  ;;  %v6189_v25 = vld [vmem:[%s6395_s29 + $0x38] sm:$0xff] }
 0x7f0   : > { %v5664_v31 = vadd.f32 %v5663_v0, %v5662_v32  ;;  %v5645_v34 = vrot.slane %v5644_v10, 1  ;;  %v457_v32 = vld [vmem:[%s14262_s22 + $0x38] sm:$0xff]  ;;  %s6194_s22 = sshll.u32 %s6260_s19, 4  ;;  %s6195_s22 = int_to_ptr.vmem [resolvable:$false] %s6194_s22 }
 0x7f1   : > { %v5691_v58 = vmul.f32 0.25, %v5658_v19  ;;  %v5651_v44 = vrot.slane %v5650_v7, 1  ;;  %s6196_s20 = scalar_lea.vmem %s6195_s22, 2048  ;;  %p6197_p0 = scmp.lt.s32.totalorder %s14358_s1, %s6195_s22 }
 0x7f2   : > { %v5692_v24 = vmul.f32 0.25, %v5664_v31  ;;  %v5646_v18 = vadd.f32 %v5645_v34, %v5644_v10  ;;  %p6198_p1 = scmp.lt.s32.totalorder %s6196_s20, %s6190_s18 }
 0x7f3   : > { %v5699_v27 = vsub.f32 %v5691_v58, %v16964_v62  ;;  %v5652_v14 = vadd.f32 %v5651_v44, %v5650_v7 }
 0x7f4   : > { %v5700_v23 = vsub.f32 %v5692_v24, %v16965_v42  ;;  %v5689_v48 = vmul.f32 0.25, %v5646_v18  ;;  %p6199_p2 = por %p6198_p1, %p6197_p0 }
 0x7f5   : > { %v5717_v5 = vrot.slane %v5699_v27, %v16966_v59  ;;  %v5690_v3 = vmul.f32 0.25, %v5652_v14 }
 0x7f6   : > { %v5721_v50 = vrot.slane %v5700_v23, %v16966_v59  ;;  %v5697_v4 = vsub.f32 %v5689_v48, %v16967_v47  ;;  %p6200_p3 = pnand %p6199_p2, %p6193_p13 }
 0x7f7   : > { %v5740_v36 = vmul.f32 %v5717_v5, %v5627_v28  ;;  %v5698_v20 = vsub.f32 %v5690_v3, %v16968_v43 }
 0x7f8   : > { %v5741_v54 = vmul.f32 %v5721_v50, %v5628_v35  ;;  %v5709_v60 = vrot.slane %v5697_v4, %v16966_v59 }
 0x7f9   : > { %v5749_v40 = vmul.f32 %v14291_v16, %v5740_v36  ;;  %v5713_v51 = vrot.slane %v5698_v20, %v16966_v59  ;;  %v16969_v20 = vld [vmem:[#allocation38_spill] sm:$0xff] }
 0x7fa   : > { %v5750_v15 = vmul.f32 %v14291_v16, %v5741_v54  ;;  %v5738_v6 = vmul.f32 %v5709_v60, %v5625_v37 }
 0x7fb   : > { %v5757_v55 = vsub.f32 %v14268_v38, %v5749_v40  ;;  %v5739_v53 = vmul.f32 %v5713_v51, %v5626_v57  ;;  %v6186_v57 = vld [vmem:[%s6395_s29 + $0x20] sm:$0xff] }
 0x7fc   : > { %v5758_v46 = vsub.f32 %v14273_v11, %v5750_v15  ;;  %v5747_v28 = vmul.f32 %v14291_v16, %v5738_v6  ;;  %v16970_v40 = vld [vmem:[#allocation54_spill] sm:$0xff] }
 0x7fd   : > { %5765 = vst [vmem:[%s14305_s16 + $0x10] sm:$0xff] %v5757_v55  ;;  %v5748_v35 = vmul.f32 %v14291_v16, %v5739_v53 }
 0x7fe   : > { %5766 = vst [vmem:[%s14305_s16 + $0x18] sm:$0xff] %v5758_v46  ;;  %v5755_v38 = vsub.f32 %v14279_v30, %v5747_v28  ;;  %v6187_v30 = vld [vmem:[%s6395_s29 + $0x28] sm:$0xff]  ;;  %s5973_s29 = sshll.u32 %s6350_s11, 10  ;;  %s5772_s11 = scalar_lea.sflag [#allocation4], %s433_s21 }
 0x7ff   : > { %v5756_v61 = vsub.f32 %v451_v41, %v5748_v35  ;;  %v16971_v35 = vld [vmem:[#allocation41_spill] sm:$0xff]  ;;  %s14356_s17 = scalar_lea.hbm %s14414_s12, %s5973_s29 }
 0x800   : > { %5763 = vst [vmem:[%s14305_s16] sm:$0xff] %v5755_v38 }
 0x801   : > { %5764 = vst [vmem:[%s14305_s16 + $0x8] sm:$0xff] %v5756_v61 }
 0x83f   : > { %v5549_v11 = vpop.f32.mrb[18].mxu0 }
 0x840   : > { %v5550_v56 = vadd.f32 %v5549_v11, %v14264_v63  ;;  %v5551_v37 = vpop.f32.mrb[19].mxu0  ;;  %v16972_v11 = vld [vmem:[#allocation57_spill] sm:$0xff] }
 0x841   : > { %v5552_v33 = vadd.f32 %v5551_v37, %v14264_v63 }
 0x842   : > { %v5629_v45 = vadd.f32 %v6186_v57, %v5550_v56 }
 0x843   : > { %v5630_v41 = vadd.f32 %v6187_v30, %v5552_v33  ;;  %v5620_v52 = vpop.f32.mrb[18].mxu1 }
 0x844   : > { %v5637_v39 = vmul.f32 %v5629_v45, %v14315_v8  ;;  %v5621_v22 = vadd.f32 %v5620_v52, %v14264_v63  ;;  %v5622_v49 = vpop.f32.mrb[19].mxu1 }
 0x845   : > { %v5638_v21 = vmul.f32 %v5630_v41, %v14320_v9  ;;  %v5623_v17 = vadd.f32 %v5622_v49, %v14264_v63 }
 0x846   : > { %v5665_v2 = vrot.slane %v5637_v39, 4  ;;  %v5631_v13 = vadd.f32 %v6188_v26, %v5621_v22 }
 0x847   : > { %v5671_v29 = vrot.slane %v5638_v21, 4  ;;  %v5632_v12 = vadd.f32 %v6189_v25, %v5623_v17 }
 0x848   : > { %v5666_v0 = vadd.f32 %v5665_v2, %v5637_v39  ;;  %v5639_v10 = vmul.f32 %v5631_v13, %v14327_v1 }
 0x849   : > { %v5672_v19 = vadd.f32 %v5671_v29, %v5638_v21  ;;  %v5640_v7 = vmul.f32 %v5632_v12, %v457_v32 }
 0x84a   : > { %v5667_v31 = vrot.slane %v5666_v0, 2  ;;  %v5677_v34 = vrot.slane %v5639_v10, 4 }
 0x84b   : > { %v5673_v58 = vrot.slane %v5672_v19, 2  ;;  %v5683_v44 = vrot.slane %v5640_v7, 4 }
 0x84c   : > { %v5668_v24 = vadd.f32 %v5667_v31, %v5666_v0  ;;  %v5678_v18 = vadd.f32 %v5677_v34, %v5639_v10 }
 0x84d   : > { %v5674_v62 = vadd.f32 %v5673_v58, %v5672_v19  ;;  %v5684_v63 = vadd.f32 %v5683_v44, %v5640_v7 }
 0x84e   : > { %v5669_v27 = vrot.slane %v5668_v24, 1  ;;  %v5679_v14 = vrot.slane %v5678_v18, 2 }
 0x84f   : > { %v5675_v42 = vrot.slane %v5674_v62, 1  ;;  %v5685_v23 = vrot.slane %v5684_v63, 2 }
 0x850   : > { %v5670_v48 = vadd.f32 %v5669_v27, %v5668_v24  ;;  %v5680_v5 = vadd.f32 %v5679_v14, %v5678_v18 }
 0x851   : > { %v5676_v3 = vadd.f32 %v5675_v42, %v5674_v62  ;;  %v5686_v50 = vadd.f32 %v5685_v23, %v5684_v63 }
 0x852   : > { %v5693_v47 = vmul.f32 0.25, %v5670_v48  ;;  %v5681_v4 = vrot.slane %v5680_v5, 1 }
 0x853   : > { %v5694_v36 = vmul.f32 0.25, %v5676_v3  ;;  %v5687_v43 = vrot.slane %v5686_v50, 1 }
 0x854   : > { %v5701_v54 = vsub.f32 %v5693_v47, %v16969_v20  ;;  %v5682_v60 = vadd.f32 %v5681_v4, %v5680_v5 }
 0x855   : > { %v5702_v51 = vsub.f32 %v5694_v36, %v16970_v40  ;;  %v5688_v15 = vadd.f32 %v5687_v43, %v5686_v50 }
 0x856   : > { %v5725_v6 = vrot.slane %v5701_v54, %v16966_v59  ;;  %v5695_v55 = vmul.f32 0.25, %v5682_v60 }
 0x857   : > { %v5729_v53 = vrot.slane %v5702_v51, %v16966_v59  ;;  %v5696_v46 = vmul.f32 0.25, %v5688_v15 }
 0x858   : > { %v5742_v28 = vmul.f32 %v5725_v6, %v5629_v45  ;;  %v5703_v38 = vsub.f32 %v5695_v55, %v16971_v35 }
 0x859   : > { %v5743_v61 = vmul.f32 %v5729_v53, %v5630_v41  ;;  %v5704_v56 = vsub.f32 %v5696_v46, %v16972_v11 }
 0x85a   : > { %v5751_v37 = vmul.f32 %v14291_v16, %v5742_v28  ;;  %v5733_v33 = vrot.slane %v5703_v38, %v16966_v59 }
 0x85b   : > { %v5752_v57 = vmul.f32 %v14291_v16, %v5743_v61  ;;  %v5737_v30 = vrot.slane %v5704_v56, %v16966_v59 }
 0x85c   : > { %v5759_v52 = vsub.f32 %v14315_v8, %v5751_v37  ;;  %v5744_v45 = vmul.f32 %v5733_v33, %v5631_v13 }
 0x85d   : > { %v5760_v39 = vsub.f32 %v14320_v9, %v5752_v57  ;;  %v5745_v22 = vmul.f32 %v5737_v30, %v5632_v12 }
 0x85e   : > { %5767 = vst [vmem:[%s14305_s16 + $0x20] sm:$0xff] %v5759_v52  ;;  %v5753_v41 = vmul.f32 %v14291_v16, %v5744_v45 }
 0x85f   : > { %5768 = vst [vmem:[%s14305_s16 + $0x28] sm:$0xff] %v5760_v39  ;;  %v5754_v49 = vmul.f32 %v14291_v16, %v5745_v22 }
 0x860   : > { %v5761_v21 = vsub.f32 %v14327_v1, %v5753_v41 }
 0x861   : > { %v5762_v59 = vsub.f32 %v457_v32, %v5754_v49 }
 0x862   : > { %5769 = vst [vmem:[%s14305_s16 + $0x30] sm:$0xff] %v5761_v21 }
 0x863   : > { %5770 = vst [vmem:[%s14305_s16 + $0x38] sm:$0xff] %v5762_v59 }
 0x864   : > { %6203 = shalt.err (!%p6200_p3)
}
 0x865   : > { %s6204_s21 = scalar_lea.hbm %s14356_s17, 1024  ;;  %s6208_s29 = scalar_lea.hbm %s14414_s12, 2048 }
 0x866   : > { %p6205_p4 = scmp.ne.s32.totalorder %s14356_s17, %s6204_s21  ;;  %p6209_p9 = scmp.lt.u32.totalorder %s14356_s17, %s14414_s12 }
 0x867   : > { %p6210_p10 = scmp.lt.u32.totalorder %s6208_s29, %s6204_s21  ;;  %p6212_p12 = scmp.lt.u32.totalorder %s6204_s21, %s14356_s17 }
 0x868   : > { %p6206_p7 = pnand %p6205_p4, %p6367_p5 }
 0x869   : > { %p6211_p11 = por %p6210_p10, %p6209_p9 }
 0x86a   : > { %p6207_p8 = pneg %p6206_p7 }
 0x86b   : > { %p6213_p13 = por %p6212_p12, %p6211_p11 }
 0x86d   : > { %p6214_p0 = pnand %p6213_p13, %p6207_p8 }
 0x86f   : > { %6217 = shalt.err (!%p6214_p0)
}
 0x870   : > { %6006 = dma.vmem_to_hbm [thread:$0]  (%p6367_p5), %s14358_s1, 1024, %s14356_s17, %s5772_s11  }
 0x871 PF: > { %p6012_p1 = scmp.ge.s32.totalorder %s6252_s26, 2  ;;  %s5798_s18 = sand.u32 1, %s6240_s23  }
 0x872   : > { %s5799_s19 = scalar_lea.sflag [#allocation4], %s5798_s18 }
 0x873   : > { %p6009_p2 = pnand %p6012_p1, %p6371_p6 }
 0x875   : > { %6235 = dma.done.wait (!%p6009_p2), %s5799_s19, 1024  }
 0x876   : > { %6237 = vsyncadd (!%p6009_p2), %s5799_s19, 4294966272  ;;  %p23_p3 = scmp.ge.s32.totalorder %s6354_s28, 4   ;;  %s16973_s23 = smov %s6244_s24 }
 0x877   : > { %s16974_s24 = smov %s6248_s25  ;;  %s16975_s25 = smov %s6365_s13 }
 0x878   : > { %s16976_s26 = smov %s6354_s28  ;;  %25 = sbr.rel (!%p23_p3) target bundleno = 7 (0x7), region = 128 }
 0x87f   :  { %5804 = vsyncpa [#allocation4], 1 }
 0x880   :  { %5806 = vsyncpa [#allocation4 + $0x1], 1 }

</bundles_post_ra>
